<compile_context>
chip_gen: v7x
topology: tpu7x:2x2x1
jax: 0.10.0
libtpu: 0.0.40
codegen_flags: <defaults>
</compile_context>

<pallas_src>
import math
import numpy as np
import jax
import jax.numpy as jnp
from jax.experimental import pallas as pl
from jax.experimental.pallas import tpu as pltpu

# ------------------------- small DiT configuration -------------------------
INPUT_SIZE = 16
PATCH = 2
IN_CH = 4
HIDDEN = 32
DEPTH = 2
HEADS = 4
HEAD_DIM = HIDDEN // HEADS
MLP_HIDDEN = int(HIDDEN * 4.0)           # = 128 (lane-dense fc1 output)
NUM_CLASSES = 10
LEARN_SIGMA = True
OUT_CH = IN_CH * 2 if LEARN_SIGMA else IN_CH
FREQ_DIM = 256
BATCH = 2
GRID_N = INPUT_SIZE // PATCH
NUM_PATCHES = GRID_N * GRID_N            # T = 64
PATCH_DIM = IN_CH * PATCH * PATCH        # 16
OUT_PATCH_DIM = PATCH * PATCH * OUT_CH   # 32
LN_EPS = 1e-6


# ------------------------------ kernel helpers ------------------------------
def _layernorm(x):
    mu = jnp.mean(x, axis=-1, keepdims=True)
    var = jnp.mean((x - mu) ** 2, axis=-1, keepdims=True)
    return (x - mu) * jax.lax.rsqrt(var + LN_EPS)


def _gelu_tanh(x):
    # nn.GELU(approximate="tanh")
    return 0.5 * x * (1.0 + jnp.tanh(0.7978845608028654 * (x + 0.044715 * x * x * x)))


def _silu(x):
    return x * jax.nn.sigmoid(x)


# ------------------------------ the fused kernel ------------------------------
def dit_fused_kernel(patches_ref, freq_ref, yemb_ref,
                     pw_ref, pb_ref, pos_ref,
                     tw1_ref, tb1_ref, tw2_ref, tb2_ref,
                     wada_ref, bada_ref,
                     wq_ref, bq_ref, wk_ref, bk_ref, wv_ref, bv_ref,
                     wproj_ref, bproj_ref,
                     wfc1_ref, bfc1_ref, wfc2_ref, bfc2_ref,
                     fwada_ref, fbada_ref, fwlin_ref, fblin_ref,
                     out_ref):
    # One grid step == one batch element (leading dim squeezed by BlockSpec).
    H = HEADS
    dh = HEAD_DIM
    inv_sqrt_dh = 1.0 / math.sqrt(dh)

    # ---- patch embedding + positional embedding ----
    x = jnp.dot(patches_ref[...].astype(jnp.bfloat16), pw_ref[...],
                preferred_element_type=jnp.float32)
    x = x + pb_ref[...] + pos_ref[...]                       # (T, D) f32

    # ---- timestep embedder MLP + label embedding -> conditioning c ----
    th = jnp.dot(freq_ref[...].astype(jnp.bfloat16), tw1_ref[...],
                 preferred_element_type=jnp.float32) + tb1_ref[...]
    th = _silu(th)
    t_emb = jnp.dot(th.astype(jnp.bfloat16), tw2_ref[...],
                    preferred_element_type=jnp.float32) + tb2_ref[...]
    c = t_emb + yemb_ref[...]                                # (1, D) f32
    silu_c = _silu(c).astype(jnp.bfloat16)                   # hoisted across blocks

    # ---- DiT blocks (DEPTH is a small static constant -> Python unroll) ----
    for l in range(DEPTH):
        def mod_chunk(i, _l=l):
            # pre-split adaLN weights: no lane-axis slicing of the 6*D output
            return (jnp.dot(silu_c, wada_ref[_l, i],
                            preferred_element_type=jnp.float32)
                    + bada_ref[_l, i][None, :])              # (1, D)

        shift_msa, scale_msa, gate_msa = mod_chunk(0), mod_chunk(1), mod_chunk(2)
        shift_mlp, scale_mlp, gate_mlp = mod_chunk(3), mod_chunk(4), mod_chunk(5)

        # ---- attention branch ----
        xm = (_layernorm(x) * (1.0 + scale_msa) + shift_msa).astype(jnp.bfloat16)
        q = jnp.dot(xm, wq_ref[l], preferred_element_type=jnp.float32) + bq_ref[l][None, :]
        k = jnp.dot(xm, wk_ref[l], preferred_element_type=jnp.float32) + bk_ref[l][None, :]
        v = jnp.dot(xm, wv_ref[l], preferred_element_type=jnp.float32) + bv_ref[l][None, :]

        # head-major layout (H, T, dh): heads batched in a single einsum each
        qh = jnp.stack([q[:, h_ * dh:(h_ + 1) * dh] for h_ in range(H)],
                       axis=0).astype(jnp.bfloat16)
        kh = jnp.stack([k[:, h_ * dh:(h_ + 1) * dh] for h_ in range(H)],
                       axis=0).astype(jnp.bfloat16)
        vh = jnp.stack([v[:, h_ * dh:(h_ + 1) * dh] for h_ in range(H)],
                       axis=0).astype(jnp.bfloat16)

        s = jnp.einsum('htd,hsd->hts', qh, kh,
                       preferred_element_type=jnp.float32) * inv_sqrt_dh
        s = s - jnp.max(s, axis=-1, keepdims=True)
        p = jnp.exp(s)
        p = p * pl.reciprocal(jnp.sum(p, axis=-1, keepdims=True), approx=True)
        o = jnp.einsum('hts,hsd->htd', p.astype(jnp.bfloat16), vh,
                       preferred_element_type=jnp.float32)   # (H, T, dh)

        # output projection: sum_h o[h] @ Wproj_rows[h]  (avoids head concat)
        attn = jnp.dot(o[0].astype(jnp.bfloat16), wproj_ref[l, 0],
                       preferred_element_type=jnp.float32)
        for h_ in range(1, H):
            attn = attn + jnp.dot(o[h_].astype(jnp.bfloat16), wproj_ref[l, h_],
                                  preferred_element_type=jnp.float32)
        attn = attn + bproj_ref[l][None, :]
        x = x + gate_msa * attn

        # ---- MLP branch ----
        xm2 = (_layernorm(x) * (1.0 + scale_mlp) + shift_mlp).astype(jnp.bfloat16)
        h1 = jnp.dot(xm2, wfc1_ref[l],
                     preferred_element_type=jnp.float32) + bfc1_ref[l][None, :]
        h1 = _gelu_tanh(h1)
        h2 = jnp.dot(h1.astype(jnp.bfloat16), wfc2_ref[l],
                     preferred_element_type=jnp.float32) + bfc2_ref[l][None, :]
        x = x + gate_mlp * h2

    # ---- final layer: adaLN (shift, scale) + linear ----
    shift_f = (jnp.dot(silu_c, fwada_ref[0], preferred_element_type=jnp.float32)
               + fbada_ref[0][None, :])
    scale_f = (jnp.dot(silu_c, fwada_ref[1], preferred_element_type=jnp.float32)
               + fbada_ref[1][None, :])
    xf = (_layernorm(x) * (1.0 + scale_f) + shift_f).astype(jnp.bfloat16)
    out_ref[...] = (jnp.dot(xf, fwlin_ref[...], preferred_element_type=jnp.float32)
                    + fblin_ref[...])


# ------------------------------- pallas wrapper -------------------------------
def _full_spec(arr):
    nd = arr.ndim
    shape = arr.shape

    def idx(b):
        return (0,) * nd

    return pl.BlockSpec(shape, idx)


@jax.jit
def dit_forward(params, x, t, y):
    B = x.shape[0]
    x = x.astype(jnp.float32)

    # patchify NCHW -> (B, T, C*p*p), matching Conv2d(k=p, s=p) + flatten order
    xb = x.reshape(B, IN_CH, GRID_N, PATCH, GRID_N, PATCH)
    patches = jnp.transpose(xb, (0, 2, 4, 1, 3, 5)).reshape(B, NUM_PATCHES, PATCH_DIM)

    freq = timestep_embedding(t, FREQ_DIM).reshape(B, 1, FREQ_DIM)
    # LabelEmbedder at inference (training=False): plain table lookup, no dropout
    y_emb = jnp.take(params['y_table'], y, axis=0).reshape(B, 1, HIDDEN)

    weight_args = (
        params['patch_w_t'], params['patch_b'], params['pos_embed'],
        params['t_w1_t'], params['t_b1'], params['t_w2_t'], params['t_b2'],
        params['w_ada'], params['b_ada'],
        params['w_q'], params['b_q'], params['w_k'], params['b_k'],
        params['w_v'], params['b_v'],
        params['w_proj'], params['b_proj'],
        params['w_fc1'], params['b_fc1'], params['w_fc2'], params['b_fc2'],
        params['final_w_ada'], params['final_b_ada'],
        params['final_w_lin'], params['final_b_lin'],
    )

    in_specs = [
        pl.BlockSpec((None, NUM_PATCHES, PATCH_DIM), lambda b: (b, 0, 0)),
        pl.BlockSpec((None, 1, FREQ_DIM), lambda b: (b, 0, 0)),
        pl.BlockSpec((None, 1, HIDDEN), lambda b: (b, 0, 0)),
    ] + [_full_spec(w) for w in weight_args]

    # TODO(synk): at real DiT scale (D=1152, T>=256) re-tile with a grid over
    # sequence/K and double-buffered BlockSpecs instead of whole-model-in-VMEM
    # (v7x VMEM is 64 MiB); at toy size everything fits trivially.
    out = pl.pallas_call(
        dit_fused_kernel,
        out_shape=jax.ShapeDtypeStruct((B, NUM_PATCHES, OUT_PATCH_DIM), jnp.float32),
        grid=(B,),
        in_specs=in_specs,
        out_specs=pl.BlockSpec((None, NUM_PATCHES, OUT_PATCH_DIM), lambda b: (b, 0, 0)),
        compiler_params=pltpu.CompilerParams(
            dimension_semantics=("parallel",)),   # 2 TCs on v7x take one batch each
    )(patches, freq, y_emb, *weight_args)

    return unpatchify(out).astype(jnp.float32)


# ------------------------------- glue (plain JAX) ----------------------------
def get_1d_sincos_pos_embed_from_grid(embed_dim, pos):
    omega = np.arange(embed_dim // 2, dtype=np.float64) / (embed_dim / 2.0)
    omega = 1.0 / 10000 ** omega
    pos = pos.reshape(-1)
    out = np.einsum("m,d->md", pos, omega)
    return np.concatenate([np.sin(out), np.cos(out)], axis=1)


def get_2d_sincos_pos_embed(embed_dim, grid_size):
    grid_h = np.arange(grid_size, dtype=np.float32)
    grid_w = np.arange(grid_size, dtype=np.float32)
    grid = np.meshgrid(grid_w, grid_h)
    grid = np.stack(grid, axis=0).reshape([2, 1, grid_size, grid_size])
    emb_h = get_1d_sincos_pos_embed_from_grid(embed_dim // 2, grid[0])
    emb_w = get_1d_sincos_pos_embed_from_grid(embed_dim // 2, grid[1])
    return np.concatenate([emb_h, emb_w], axis=1)  # (T, D)


def timestep_embedding(t, dim, max_period=10000):
    half = dim // 2
    freqs = jnp.exp(-math.log(max_period) * jnp.arange(half, dtype=jnp.float32) / half)
    args = t.astype(jnp.float32)[:, None] * freqs[None]
    return jnp.concatenate([jnp.cos(args), jnp.sin(args)], axis=-1)


def unpatchify(x):
    # x: (N, T, p*p*C) -> (N, C, H, W), same einsum as the PyTorch module
    c = OUT_CH
    p = PATCH
    h = w = int(math.isqrt(x.shape[1]))
    x = x.reshape(x.shape[0], h, w, p, p, c)
    x = jnp.einsum('nhwpqc->nchpwq', x)
    return x.reshape(x.shape[0], c, h * p, w * p)


# ------------------------------ parameter setup ------------------------------
def _linear(key, out_dim, in_dim):
    kw, kb = jax.random.split(key)
    w = (1.0 / math.sqrt(in_dim)) * jax.random.normal(kw, (out_dim, in_dim), jnp.float32)
    b = 0.01 * jax.random.normal(kb, (out_dim,), jnp.float32)
    return w, b


def make_params(key):
    ks = iter(jax.random.split(key, 32))
    D = HIDDEN
    dh = HEAD_DIM
    bf = jnp.bfloat16
    p = {}

    # x_embedder: Conv2d(IN_CH, HIDDEN, k=p, s=p) == linear over flattened (C,p,p)
    w_patch, b_patch = _linear(next(ks), D, PATCH_DIM)
    p['patch_w_t'] = w_patch.T.astype(bf)                       # (C*p*p, D)
    p['patch_b'] = b_patch.reshape(1, D)
    p['pos_embed'] = jnp.asarray(get_2d_sincos_pos_embed(D, GRID_N), jnp.float32)

    # t_embedder MLP
    w1, b1 = _linear(next(ks), D, FREQ_DIM)
    w2, b2 = _linear(next(ks), D, D)
    p['t_w1_t'], p['t_b1'] = w1.T.astype(bf), b1.reshape(1, D)
    p['t_w2_t'], p['t_b2'] = w2.T.astype(bf), b2.reshape(1, D)

    # y_embedder (LabelEmbedder): table (num_classes + 1, D) since dropout_prob > 0
    p['y_table'] = 0.02 * jax.random.normal(next(ks), (NUM_CLASSES + 1, D), jnp.float32)

    # DiT blocks (weights stacked over DEPTH; chunk/head splits done here, free)
    wada_l, bada_l = [], []
    wq_l, bq_l, wk_l, bk_l, wv_l, bv_l = [], [], [], [], [], []
    wproj_l, bproj_l = [], []
    wfc1_l, bfc1_l, wfc2_l, bfc2_l = [], [], [], []
    for _ in range(DEPTH):
        w_ada, b_ada = _linear(next(ks), 6 * D, D)
        wada_l.append(jnp.stack([w_ada[i * D:(i + 1) * D, :].T for i in range(6)], axis=0))
        bada_l.append(b_ada.reshape(6, D))

        w_qkv, b_qkv = _linear(next(ks), 3 * D, D)
        wq_l.append(w_qkv[0 * D:1 * D].T); bq_l.append(b_qkv[0 * D:1 * D])
        wk_l.append(w_qkv[1 * D:2 * D].T); bk_l.append(b_qkv[1 * D:2 * D])
        wv_l.append(w_qkv[2 * D:3 * D].T); bv_l.append(b_qkv[2 * D:3 * D])

        w_proj, b_proj = _linear(next(ks), D, D)
        wpt = w_proj.T                                          # (D_in, D_out)
        wproj_l.append(jnp.stack(
            [wpt[h * dh:(h + 1) * dh, :] for h in range(HEADS)], axis=0))  # (H, dh, D)
        bproj_l.append(b_proj)

        w_fc1, b_fc1 = _linear(next(ks), MLP_HIDDEN, D)
        w_fc2, b_fc2 = _linear(next(ks), D, MLP_HIDDEN)
        wfc1_l.append(w_fc1.T); bfc1_l.append(b_fc1)
        wfc2_l.append(w_fc2.T); bfc2_l.append(b_fc2)

    p['w_ada'] = jnp.stack(wada_l).astype(bf)                   # (DEPTH, 6, D, D)
    p['b_ada'] = jnp.stack(bada_l)                              # (DEPTH, 6, D)
    p['w_q'] = jnp.stack(wq_l).astype(bf); p['b_q'] = jnp.stack(bq_l)
    p['w_k'] = jnp.stack(wk_l).astype(bf); p['b_k'] = jnp.stack(bk_l)
    p['w_v'] = jnp.stack(wv_l).astype(bf); p['b_v'] = jnp.stack(bv_l)
    p['w_proj'] = jnp.stack(wproj_l).astype(bf)                 # (DEPTH, H, dh, D)
    p['b_proj'] = jnp.stack(bproj_l)                            # (DEPTH, D)
    p['w_fc1'] = jnp.stack(wfc1_l).astype(bf)                   # (DEPTH, D, MLP)
    p['b_fc1'] = jnp.stack(bfc1_l)                              # (DEPTH, MLP)
    p['w_fc2'] = jnp.stack(wfc2_l).astype(bf)                   # (DEPTH, MLP, D)
    p['b_fc2'] = jnp.stack(bfc2_l)                              # (DEPTH, D)

    # final layer
    w_fada, b_fada = _linear(next(ks), 2 * D, D)
    p['final_w_ada'] = jnp.stack([w_fada[0:D].T, w_fada[D:2 * D].T], axis=0).astype(bf)
    p['final_b_ada'] = b_fada.reshape(2, D)
    w_flin, b_flin = _linear(next(ks), OUT_PATCH_DIM, D)
    p['final_w_lin'] = w_flin.T.astype(bf)                      # (D, OUTD)
    p['final_b_lin'] = b_flin.reshape(1, OUT_PATCH_DIM)
    return p


# ----------------------------------- main -------------------------------------
if __name__ == "__main__":
    # TODO(synk): sequence-parallel chunk/gather, gradient checkpointing and the
    # use_video / class-dropout (training) paths are distributed/training-only
    # and are not translated.
    root = jax.random.PRNGKey(0)
    k_params, k_x, k_t, k_y = jax.random.split(root, 4)

    params = make_params(k_params)
    x = jax.random.normal(k_x, (BATCH, IN_CH, INPUT_SIZE, INPUT_SIZE), jnp.float32)
    t = jax.random.randint(k_t, (BATCH,), 0, 1000).astype(jnp.float32)
    y = jax.random.randint(k_y, (BATCH,), 0, NUM_CLASSES)

    out = dit_forward(params, x, t, y)
    jax.block_until_ready(out)
    assert out.shape == (BATCH, OUT_CH, INPUT_SIZE, INPUT_SIZE)
    assert out.dtype == jnp.float32
    assert bool(jnp.all(jnp.isfinite(out)))
    print("KERNEL_OK")
</pallas_src>

<mosaic_0001>
module attributes {stable_mosaic.version = 11 : i64} {
  func.func @dit_fused_kernel(%arg0: i32, %arg1: memref<1x64x16xf32, #tpu.memory_space<vmem>>, %arg2: memref<1x1x256xf32, #tpu.memory_space<vmem>>, %arg3: memref<1x1x32xf32, #tpu.memory_space<vmem>>, %arg4: memref<16x32xbf16, #tpu.memory_space<vmem>>, %arg5: memref<1x32xf32, #tpu.memory_space<vmem>>, %arg6: memref<64x32xf32, #tpu.memory_space<vmem>>, %arg7: memref<256x32xbf16, #tpu.memory_space<vmem>>, %arg8: memref<1x32xf32, #tpu.memory_space<vmem>>, %arg9: memref<32x32xbf16, #tpu.memory_space<vmem>>, %arg10: memref<1x32xf32, #tpu.memory_space<vmem>>, %arg11: memref<2x6x32x32xbf16, #tpu.memory_space<vmem>>, %arg12: memref<2x6x32xf32, #tpu.memory_space<vmem>>, %arg13: memref<2x32x32xbf16, #tpu.memory_space<vmem>>, %arg14: memref<2x32xf32, #tpu.memory_space<vmem>>, %arg15: memref<2x32x32xbf16, #tpu.memory_space<vmem>>, %arg16: memref<2x32xf32, #tpu.memory_space<vmem>>, %arg17: memref<2x32x32xbf16, #tpu.memory_space<vmem>>, %arg18: memref<2x32xf32, #tpu.memory_space<vmem>>, %arg19: memref<2x4x8x32xbf16, #tpu.memory_space<vmem>>, %arg20: memref<2x32xf32, #tpu.memory_space<vmem>>, %arg21: memref<2x32x128xbf16, #tpu.memory_space<vmem>>, %arg22: memref<2x128xf32, #tpu.memory_space<vmem>>, %arg23: memref<2x128x32xbf16, #tpu.memory_space<vmem>>, %arg24: memref<2x32xf32, #tpu.memory_space<vmem>>, %arg25: memref<2x32x32xbf16, #tpu.memory_space<vmem>>, %arg26: memref<2x32xf32, #tpu.memory_space<vmem>>, %arg27: memref<32x32xbf16, #tpu.memory_space<vmem>>, %arg28: memref<1x32xf32, #tpu.memory_space<vmem>>, %arg29: memref<1x64x32xf32, #tpu.memory_space<vmem>>) attributes {dimension_semantics = [#tpu.dimension_semantics<parallel>], iteration_bounds = array<i64: 2>, scalar_prefetch = 0 : i64, scratch_operands = 0 : i64, tpu.core_type = #tpu.core_type<tc>, window_params = [{transform_indices = @transform_0, window_bounds = array<i64: 1, 64, 16>}, {transform_indices = @transform_1, window_bounds = array<i64: 1, 1, 256>}, {transform_indices = @transform_2, window_bounds = array<i64: 1, 1, 32>}, {pipeline_mode = #tpu.pipeline_mode<synchronous>, transform_indices = @transform_3, window_bounds = array<i64: 16, 32>}, {pipeline_mode = #tpu.pipeline_mode<synchronous>, transform_indices = @transform_4, window_bounds = array<i64: 1, 32>}, {pipeline_mode = #tpu.pipeline_mode<synchronous>, transform_indices = @transform_5, window_bounds = array<i64: 64, 32>}, {pipeline_mode = #tpu.pipeline_mode<synchronous>, transform_indices = @transform_6, window_bounds = array<i64: 256, 32>}, {pipeline_mode = #tpu.pipeline_mode<synchronous>, transform_indices = @transform_7, window_bounds = array<i64: 1, 32>}, {pipeline_mode = #tpu.pipeline_mode<synchronous>, transform_indices = @transform_8, window_bounds = array<i64: 32, 32>}, {pipeline_mode = #tpu.pipeline_mode<synchronous>, transform_indices = @transform_9, window_bounds = array<i64: 1, 32>}, {pipeline_mode = #tpu.pipeline_mode<synchronous>, transform_indices = @transform_10, window_bounds = array<i64: 2, 6, 32, 32>}, {pipeline_mode = #tpu.pipeline_mode<synchronous>, transform_indices = @transform_11, window_bounds = array<i64: 2, 6, 32>}, {pipeline_mode = #tpu.pipeline_mode<synchronous>, transform_indices = @transform_12, window_bounds = array<i64: 2, 32, 32>}, {pipeline_mode = #tpu.pipeline_mode<synchronous>, transform_indices = @transform_13, window_bounds = array<i64: 2, 32>}, {pipeline_mode = #tpu.pipeline_mode<synchronous>, transform_indices = @transform_14, window_bounds = array<i64: 2, 32, 32>}, {pipeline_mode = #tpu.pipeline_mode<synchronous>, transform_indices = @transform_15, window_bounds = array<i64: 2, 32>}, {pipeline_mode = #tpu.pipeline_mode<synchronous>, transform_indices = @transform_16, window_bounds = array<i64: 2, 32, 32>}, {pipeline_mode = #tpu.pipeline_mode<synchronous>, transform_indices = @transform_17, window_bounds = array<i64: 2, 32>}, {pipeline_mode = #tpu.pipeline_mode<synchronous>, transform_indices = @transform_18, window_bounds = array<i64: 2, 4, 8, 32>}, {pipeline_mode = #tpu.pipeline_mode<synchronous>, transform_indices = @transform_19, window_bounds = array<i64: 2, 32>}, {pipeline_mode = #tpu.pipeline_mode<synchronous>, transform_indices = @transform_20, window_bounds = array<i64: 2, 32, 128>}, {pipeline_mode = #tpu.pipeline_mode<synchronous>, transform_indices = @transform_21, window_bounds = array<i64: 2, 128>}, {pipeline_mode = #tpu.pipeline_mode<synchronous>, transform_indices = @transform_22, window_bounds = array<i64: 2, 128, 32>}, {pipeline_mode = #tpu.pipeline_mode<synchronous>, transform_indices = @transform_23, window_bounds = array<i64: 2, 32>}, {pipeline_mode = #tpu.pipeline_mode<synchronous>, transform_indices = @transform_24, window_bounds = array<i64: 2, 32, 32>}, {pipeline_mode = #tpu.pipeline_mode<synchronous>, transform_indices = @transform_25, window_bounds = array<i64: 2, 32>}, {pipeline_mode = #tpu.pipeline_mode<synchronous>, transform_indices = @transform_26, window_bounds = array<i64: 32, 32>}, {pipeline_mode = #tpu.pipeline_mode<synchronous>, transform_indices = @transform_27, window_bounds = array<i64: 1, 32>}, {transform_indices = @transform_28, window_bounds = array<i64: 1, 64, 32>}]} {
    %c0 = arith.constant 0 : index
    %c0_0 = arith.constant 0 : index
    %c0_1 = arith.constant 0 : index
    %0 = vector.load %arg1[%c0, %c0_0, %c0_1] : memref<1x64x16xf32, #tpu.memory_space<vmem>>, vector<1x64x16xf32>
    %1 = vector.shape_cast %0 : vector<1x64x16xf32> to vector<64x16xf32>
    %2 = arith.truncf %1 : vector<64x16xf32> to vector<64x16xbf16>
    %c0_2 = arith.constant 0 : index
    %c0_3 = arith.constant 0 : index
    %3 = vector.load %arg4[%c0_2, %c0_3] : memref<16x32xbf16, #tpu.memory_space<vmem>>, vector<16x32xbf16>
    %cst = arith.constant dense<0.000000e+00> : vector<64x32xf32>
    %4 = tpu.matmul %2, %3, %cst {dimension_numbers = #tpu.dot_dimension_numbers<[1], [0], [0], [1], [0, 0, 1, 1], [], []>} : vector<64x16xbf16>, vector<16x32xbf16>, vector<64x32xf32> -> vector<64x32xf32>
    %c0_4 = arith.constant 0 : index
    %c0_5 = arith.constant 0 : index
    %5 = vector.load %arg5[%c0_4, %c0_5] : memref<1x32xf32, #tpu.memory_space<vmem>>, vector<1x32xf32>
    %6 = vector.broadcast %5 : vector<1x32xf32> to vector<64x32xf32>
    %7 = arith.addf %4, %6 : vector<64x32xf32>
    %c0_6 = arith.constant 0 : index
    %c0_7 = arith.constant 0 : index
    %8 = vector.load %arg6[%c0_6, %c0_7] : memref<64x32xf32, #tpu.memory_space<vmem>>, vector<64x32xf32>
    %9 = arith.addf %7, %8 : vector<64x32xf32>
    %c0_8 = arith.constant 0 : index
    %c0_9 = arith.constant 0 : index
    %c0_10 = arith.constant 0 : index
    %10 = vector.load %arg2[%c0_8, %c0_9, %c0_10] : memref<1x1x256xf32, #tpu.memory_space<vmem>>, vector<1x1x256xf32>
    %11 = vector.shape_cast %10 : vector<1x1x256xf32> to vector<1x256xf32>
    %12 = arith.truncf %11 : vector<1x256xf32> to vector<1x256xbf16>
    %c0_11 = arith.constant 0 : index
    %c0_12 = arith.constant 0 : index
    %13 = vector.load %arg7[%c0_11, %c0_12] : memref<256x32xbf16, #tpu.memory_space<vmem>>, vector<256x32xbf16>
    %cst_13 = arith.constant dense<0.000000e+00> : vector<1x32xf32>
    %14 = tpu.matmul %12, %13, %cst_13 {dimension_numbers = #tpu.dot_dimension_numbers<[1], [0], [0], [1], [0, 0, 1, 1], [], []>} : vector<1x256xbf16>, vector<256x32xbf16>, vector<1x32xf32> -> vector<1x32xf32>
    %c0_14 = arith.constant 0 : index
    %c0_15 = arith.constant 0 : index
    %15 = vector.load %arg8[%c0_14, %c0_15] : memref<1x32xf32, #tpu.memory_space<vmem>>, vector<1x32xf32>
    %16 = arith.addf %14, %15 : vector<1x32xf32>
    %17 = arith.negf %16 : vector<1x32xf32>
    %18 = math.exp %17 : vector<1x32xf32>
    %cst_16 = arith.constant 1.000000e+00 : f32
    %19 = vector.broadcast %cst_16 : f32 to vector<1x32xf32>
    %20 = arith.addf %19, %18 : vector<1x32xf32>
    %21 = arith.divf %19, %20 : vector<1x32xf32>
    %22 = arith.mulf %16, %21 : vector<1x32xf32>
    %23 = arith.truncf %22 : vector<1x32xf32> to vector<1x32xbf16>
    %c0_17 = arith.constant 0 : index
    %c0_18 = arith.constant 0 : index
    %24 = vector.load %arg9[%c0_17, %c0_18] : memref<32x32xbf16, #tpu.memory_space<vmem>>, vector<32x32xbf16>
    %cst_19 = arith.constant dense<0.000000e+00> : vector<1x32xf32>
    %25 = tpu.matmul %23, %24, %cst_19 {dimension_numbers = #tpu.dot_dimension_numbers<[1], [0], [0], [1], [0, 0, 1, 1], [], []>} : vector<1x32xbf16>, vector<32x32xbf16>, vector<1x32xf32> -> vector<1x32xf32>
    %c0_20 = arith.constant 0 : index
    %c0_21 = arith.constant 0 : index
    %26 = vector.load %arg10[%c0_20, %c0_21] : memref<1x32xf32, #tpu.memory_space<vmem>>, vector<1x32xf32>
    %27 = arith.addf %25, %26 : vector<1x32xf32>
    %c0_22 = arith.constant 0 : index
    %c0_23 = arith.constant 0 : index
    %c0_24 = arith.constant 0 : index
    %28 = vector.load %arg3[%c0_22, %c0_23, %c0_24] : memref<1x1x32xf32, #tpu.memory_space<vmem>>, vector<1x1x32xf32>
    %29 = vector.shape_cast %28 : vector<1x1x32xf32> to vector<1x32xf32>
    %30 = arith.addf %27, %29 : vector<1x32xf32>
    %31 = arith.negf %30 : vector<1x32xf32>
    %32 = math.exp %31 : vector<1x32xf32>
    %cst_25 = arith.constant 1.000000e+00 : f32
    %33 = vector.broadcast %cst_25 : f32 to vector<1x32xf32>
    %34 = arith.addf %33, %32 : vector<1x32xf32>
    %35 = arith.divf %33, %34 : vector<1x32xf32>
    %36 = arith.mulf %30, %35 : vector<1x32xf32>
    %37 = arith.truncf %36 : vector<1x32xf32> to vector<1x32xbf16>
    %c0_26 = arith.constant 0 : index
    %c0_27 = arith.constant 0 : index
    %c0_28 = arith.constant 0 : index
    %c0_29 = arith.constant 0 : index
    %38 = vector.load %arg11[%c0_26, %c0_27, %c0_28, %c0_29] : memref<2x6x32x32xbf16, #tpu.memory_space<vmem>>, vector<1x1x32x32xbf16>
    %39 = vector.shape_cast %38 : vector<1x1x32x32xbf16> to vector<32x32xbf16>
    %cst_30 = arith.constant dense<0.000000e+00> : vector<1x32xf32>
    %40 = tpu.matmul %37, %39, %cst_30 {dimension_numbers = #tpu.dot_dimension_numbers<[1], [0], [0], [1], [0, 0, 1, 1], [], []>} : vector<1x32xbf16>, vector<32x32xbf16>, vector<1x32xf32> -> vector<1x32xf32>
    %c0_31 = arith.constant 0 : index
    %c0_32 = arith.constant 0 : index
    %c0_33 = arith.constant 0 : index
    %41 = vector.load %arg12[%c0_31, %c0_32, %c0_33] : memref<2x6x32xf32, #tpu.memory_space<vmem>>, vector<1x1x32xf32>
    %42 = vector.shape_cast %41 : vector<1x1x32xf32> to vector<32xf32>
    %43 = vector.shape_cast %42 : vector<32xf32> to vector<1x32xf32>
    %44 = arith.addf %40, %43 : vector<1x32xf32>
    %c0_34 = arith.constant 0 : index
    %c1 = arith.constant 1 : index
    %c0_35 = arith.constant 0 : index
    %c0_36 = arith.constant 0 : index
    %45 = vector.load %arg11[%c0_34, %c1, %c0_35, %c0_36] : memref<2x6x32x32xbf16, #tpu.memory_space<vmem>>, vector<1x1x32x32xbf16>
    %46 = vector.shape_cast %45 : vector<1x1x32x32xbf16> to vector<32x32xbf16>
    %cst_37 = arith.constant dense<0.000000e+00> : vector<1x32xf32>
    %47 = tpu.matmul %37, %46, %cst_37 {dimension_numbers = #tpu.dot_dimension_numbers<[1], [0], [0], [1], [0, 0, 1, 1], [], []>} : vector<1x32xbf16>, vector<32x32xbf16>, vector<1x32xf32> -> vector<1x32xf32>
    %c0_38 = arith.constant 0 : index
    %c1_39 = arith.constant 1 : index
    %c0_40 = arith.constant 0 : index
    %48 = vector.load %arg12[%c0_38, %c1_39, %c0_40] : memref<2x6x32xf32, #tpu.memory_space<vmem>>, vector<1x1x32xf32>
    %49 = vector.shape_cast %48 : vector<1x1x32xf32> to vector<32xf32>
    %50 = vector.shape_cast %49 : vector<32xf32> to vector<1x32xf32>
    %51 = arith.addf %47, %50 : vector<1x32xf32>
    %c0_41 = arith.constant 0 : index
    %c2 = arith.constant 2 : index
    %c0_42 = arith.constant 0 : index
    %c0_43 = arith.constant 0 : index
    %52 = vector.load %arg11[%c0_41, %c2, %c0_42, %c0_43] : memref<2x6x32x32xbf16, #tpu.memory_space<vmem>>, vector<1x1x32x32xbf16>
    %53 = vector.shape_cast %52 : vector<1x1x32x32xbf16> to vector<32x32xbf16>
    %cst_44 = arith.constant dense<0.000000e+00> : vector<1x32xf32>
    %54 = tpu.matmul %37, %53, %cst_44 {dimension_numbers = #tpu.dot_dimension_numbers<[1], [0], [0], [1], [0, 0, 1, 1], [], []>} : vector<1x32xbf16>, vector<32x32xbf16>, vector<1x32xf32> -> vector<1x32xf32>
    %c0_45 = arith.constant 0 : index
    %c2_46 = arith.constant 2 : index
    %c0_47 = arith.constant 0 : index
    %55 = vector.load %arg12[%c0_45, %c2_46, %c0_47] : memref<2x6x32xf32, #tpu.memory_space<vmem>>, vector<1x1x32xf32>
    %56 = vector.shape_cast %55 : vector<1x1x32xf32> to vector<32xf32>
    %57 = vector.shape_cast %56 : vector<32xf32> to vector<1x32xf32>
    %58 = arith.addf %54, %57 : vector<1x32xf32>
    %c0_48 = arith.constant 0 : index
    %c3 = arith.constant 3 : index
    %c0_49 = arith.constant 0 : index
    %c0_50 = arith.constant 0 : index
    %59 = vector.load %arg11[%c0_48, %c3, %c0_49, %c0_50] : memref<2x6x32x32xbf16, #tpu.memory_space<vmem>>, vector<1x1x32x32xbf16>
    %60 = vector.shape_cast %59 : vector<1x1x32x32xbf16> to vector<32x32xbf16>
    %cst_51 = arith.constant dense<0.000000e+00> : vector<1x32xf32>
    %61 = tpu.matmul %37, %60, %cst_51 {dimension_numbers = #tpu.dot_dimension_numbers<[1], [0], [0], [1], [0, 0, 1, 1], [], []>} : vector<1x32xbf16>, vector<32x32xbf16>, vector<1x32xf32> -> vector<1x32xf32>
    %c0_52 = arith.constant 0 : index
    %c3_53 = arith.constant 3 : index
    %c0_54 = arith.constant 0 : index
    %62 = vector.load %arg12[%c0_52, %c3_53, %c0_54] : memref<2x6x32xf32, #tpu.memory_space<vmem>>, vector<1x1x32xf32>
    %63 = vector.shape_cast %62 : vector<1x1x32xf32> to vector<32xf32>
    %64 = vector.shape_cast %63 : vector<32xf32> to vector<1x32xf32>
    %65 = arith.addf %61, %64 : vector<1x32xf32>
    %c0_55 = arith.constant 0 : index
    %c4 = arith.constant 4 : index
    %c0_56 = arith.constant 0 : index
    %c0_57 = arith.constant 0 : index
    %66 = vector.load %arg11[%c0_55, %c4, %c0_56, %c0_57] : memref<2x6x32x32xbf16, #tpu.memory_space<vmem>>, vector<1x1x32x32xbf16>
    %67 = vector.shape_cast %66 : vector<1x1x32x32xbf16> to vector<32x32xbf16>
    %cst_58 = arith.constant dense<0.000000e+00> : vector<1x32xf32>
    %68 = tpu.matmul %37, %67, %cst_58 {dimension_numbers = #tpu.dot_dimension_numbers<[1], [0], [0], [1], [0, 0, 1, 1], [], []>} : vector<1x32xbf16>, vector<32x32xbf16>, vector<1x32xf32> -> vector<1x32xf32>
    %c0_59 = arith.constant 0 : index
    %c4_60 = arith.constant 4 : index
    %c0_61 = arith.constant 0 : index
    %69 = vector.load %arg12[%c0_59, %c4_60, %c0_61] : memref<2x6x32xf32, #tpu.memory_space<vmem>>, vector<1x1x32xf32>
    %70 = vector.shape_cast %69 : vector<1x1x32xf32> to vector<32xf32>
    %71 = vector.shape_cast %70 : vector<32xf32> to vector<1x32xf32>
    %72 = arith.addf %68, %71 : vector<1x32xf32>
    %c0_62 = arith.constant 0 : index
    %c5 = arith.constant 5 : index
    %c0_63 = arith.constant 0 : index
    %c0_64 = arith.constant 0 : index
    %73 = vector.load %arg11[%c0_62, %c5, %c0_63, %c0_64] : memref<2x6x32x32xbf16, #tpu.memory_space<vmem>>, vector<1x1x32x32xbf16>
    %74 = vector.shape_cast %73 : vector<1x1x32x32xbf16> to vector<32x32xbf16>
    %cst_65 = arith.constant dense<0.000000e+00> : vector<1x32xf32>
    %75 = tpu.matmul %37, %74, %cst_65 {dimension_numbers = #tpu.dot_dimension_numbers<[1], [0], [0], [1], [0, 0, 1, 1], [], []>} : vector<1x32xbf16>, vector<32x32xbf16>, vector<1x32xf32> -> vector<1x32xf32>
    %c0_66 = arith.constant 0 : index
    %c5_67 = arith.constant 5 : index
    %c0_68 = arith.constant 0 : index
    %76 = vector.load %arg12[%c0_66, %c5_67, %c0_68] : memref<2x6x32xf32, #tpu.memory_space<vmem>>, vector<1x1x32xf32>
    %77 = vector.shape_cast %76 : vector<1x1x32xf32> to vector<32xf32>
    %78 = vector.shape_cast %77 : vector<32xf32> to vector<1x32xf32>
    %79 = arith.addf %75, %78 : vector<1x32xf32>
    %cst_69 = arith.constant dense<0.000000e+00> : vector<64xf32>
    %80 = vector.multi_reduction <add>, %9, %cst_69 [1] : vector<64x32xf32> to vector<64xf32>
    %81 = vector.shape_cast %80 : vector<64xf32> to vector<64x1xf32>
    %cst_70 = arith.constant 3.200000e+01 : f32
    %82 = vector.broadcast %cst_70 : f32 to vector<64x1xf32>
    %83 = arith.divf %81, %82 : vector<64x1xf32>
    %84 = vector.broadcast %83 : vector<64x1xf32> to vector<64x32xf32>
    %85 = arith.subf %9, %84 : vector<64x32xf32>
    %86 = arith.mulf %85, %85 : vector<64x32xf32>
    %cst_71 = arith.constant dense<0.000000e+00> : vector<64xf32>
    %87 = vector.multi_reduction <add>, %86, %cst_71 [1] : vector<64x32xf32> to vector<64xf32>
    %88 = vector.shape_cast %87 : vector<64xf32> to vector<64x1xf32>
    %cst_72 = arith.constant 3.200000e+01 : f32
    %89 = vector.broadcast %cst_72 : f32 to vector<64x1xf32>
    %90 = arith.divf %88, %89 : vector<64x1xf32>
    %91 = vector.broadcast %83 : vector<64x1xf32> to vector<64x32xf32>
    %92 = arith.subf %9, %91 : vector<64x32xf32>
    %cst_73 = arith.constant 9.99999997E-7 : f32
    %93 = vector.broadcast %cst_73 : f32 to vector<64x1xf32>
    %94 = arith.addf %90, %93 : vector<64x1xf32>
    %95 = math.rsqrt %94 : vector<64x1xf32>
    %96 = vector.broadcast %95 : vector<64x1xf32> to vector<64x32xf32>
    %97 = arith.mulf %92, %96 : vector<64x32xf32>
    %cst_74 = arith.constant 1.000000e+00 : f32
    %98 = vector.broadcast %cst_74 : f32 to vector<1x32xf32>
    %99 = arith.addf %98, %51 : vector<1x32xf32>
    %100 = vector.broadcast %99 : vector<1x32xf32> to vector<64x32xf32>
    %101 = arith.mulf %97, %100 : vector<64x32xf32>
    %102 = vector.broadcast %44 : vector<1x32xf32> to vector<64x32xf32>
    %103 = arith.addf %101, %102 : vector<64x32xf32>
    %104 = arith.truncf %103 : vector<64x32xf32> to vector<64x32xbf16>
    %c0_75 = arith.constant 0 : index
    %c0_76 = arith.constant 0 : index
    %c0_77 = arith.constant 0 : index
    %105 = vector.load %arg13[%c0_75, %c0_76, %c0_77] : memref<2x32x32xbf16, #tpu.memory_space<vmem>>, vector<1x32x32xbf16>
    %106 = vector.shape_cast %105 : vector<1x32x32xbf16> to vector<32x32xbf16>
    %cst_78 = arith.constant dense<0.000000e+00> : vector<64x32xf32>
    %107 = tpu.matmul %104, %106, %cst_78 {dimension_numbers = #tpu.dot_dimension_numbers<[1], [0], [0], [1], [0, 0, 1, 1], [], []>} : vector<64x32xbf16>, vector<32x32xbf16>, vector<64x32xf32> -> vector<64x32xf32>
    %c0_79 = arith.constant 0 : index
    %c0_80 = arith.constant 0 : index
    %108 = vector.load %arg14[%c0_79, %c0_80] : memref<2x32xf32, #tpu.memory_space<vmem>>, vector<1x32xf32>
    %109 = vector.shape_cast %108 : vector<1x32xf32> to vector<32xf32>
    %110 = vector.shape_cast %109 : vector<32xf32> to vector<1x32xf32>
    %111 = vector.broadcast %110 : vector<1x32xf32> to vector<64x32xf32>
    %112 = arith.addf %107, %111 : vector<64x32xf32>
    %c0_81 = arith.constant 0 : index
    %c0_82 = arith.constant 0 : index
    %c0_83 = arith.constant 0 : index
    %113 = vector.load %arg15[%c0_81, %c0_82, %c0_83] : memref<2x32x32xbf16, #tpu.memory_space<vmem>>, vector<1x32x32xbf16>
    %114 = vector.shape_cast %113 : vector<1x32x32xbf16> to vector<32x32xbf16>
    %cst_84 = arith.constant dense<0.000000e+00> : vector<64x32xf32>
    %115 = tpu.matmul %104, %114, %cst_84 {dimension_numbers = #tpu.dot_dimension_numbers<[1], [0], [0], [1], [0, 0, 1, 1], [], []>} : vector<64x32xbf16>, vector<32x32xbf16>, vector<64x32xf32> -> vector<64x32xf32>
    %c0_85 = arith.constant 0 : index
    %c0_86 = arith.constant 0 : index
    %116 = vector.load %arg16[%c0_85, %c0_86] : memref<2x32xf32, #tpu.memory_space<vmem>>, vector<1x32xf32>
    %117 = vector.shape_cast %116 : vector<1x32xf32> to vector<32xf32>
    %118 = vector.shape_cast %117 : vector<32xf32> to vector<1x32xf32>
    %119 = vector.broadcast %118 : vector<1x32xf32> to vector<64x32xf32>
    %120 = arith.addf %115, %119 : vector<64x32xf32>
    %c0_87 = arith.constant 0 : index
    %c0_88 = arith.constant 0 : index
    %c0_89 = arith.constant 0 : index
    %121 = vector.load %arg17[%c0_87, %c0_88, %c0_89] : memref<2x32x32xbf16, #tpu.memory_space<vmem>>, vector<1x32x32xbf16>
    %122 = vector.shape_cast %121 : vector<1x32x32xbf16> to vector<32x32xbf16>
    %cst_90 = arith.constant dense<0.000000e+00> : vector<64x32xf32>
    %123 = tpu.matmul %104, %122, %cst_90 {dimension_numbers = #tpu.dot_dimension_numbers<[1], [0], [0], [1], [0, 0, 1, 1], [], []>} : vector<64x32xbf16>, vector<32x32xbf16>, vector<64x32xf32> -> vector<64x32xf32>
    %c0_91 = arith.constant 0 : index
    %c0_92 = arith.constant 0 : index
    %124 = vector.load %arg18[%c0_91, %c0_92] : memref<2x32xf32, #tpu.memory_space<vmem>>, vector<1x32xf32>
    %125 = vector.shape_cast %124 : vector<1x32xf32> to vector<32xf32>
    %126 = vector.shape_cast %125 : vector<32xf32> to vector<1x32xf32>
    %127 = vector.broadcast %126 : vector<1x32xf32> to vector<64x32xf32>
    %128 = arith.addf %123, %127 : vector<64x32xf32>
    %129 = vector.extract_strided_slice %112 {offsets = [0, 0], sizes = [64, 8], strides = [1, 1]} : vector<64x32xf32> to vector<64x8xf32>
    %130 = vector.extract_strided_slice %112 {offsets = [0, 8], sizes = [64, 8], strides = [1, 1]} : vector<64x32xf32> to vector<64x8xf32>
    %131 = vector.extract_strided_slice %112 {offsets = [0, 16], sizes = [64, 8], strides = [1, 1]} : vector<64x32xf32> to vector<64x8xf32>
    %132 = vector.extract_strided_slice %112 {offsets = [0, 24], sizes = [64, 8], strides = [1, 1]} : vector<64x32xf32> to vector<64x8xf32>
    %133 = vector.shape_cast %129 : vector<64x8xf32> to vector<1x64x8xf32>
    %134 = vector.shape_cast %130 : vector<64x8xf32> to vector<1x64x8xf32>
    %135 = vector.shape_cast %131 : vector<64x8xf32> to vector<1x64x8xf32>
    %136 = vector.shape_cast %132 : vector<64x8xf32> to vector<1x64x8xf32>
    %137 = tpu.concatenate %133, %134, %135, %136 in 0 : vector<1x64x8xf32>, vector<1x64x8xf32>, vector<1x64x8xf32>, vector<1x64x8xf32> -> vector<4x64x8xf32>
    %138 = arith.truncf %137 : vector<4x64x8xf32> to vector<4x64x8xbf16>
    %139 = vector.extract_strided_slice %120 {offsets = [0, 0], sizes = [64, 8], strides = [1, 1]} : vector<64x32xf32> to vector<64x8xf32>
    %140 = vector.extract_strided_slice %120 {offsets = [0, 8], sizes = [64, 8], strides = [1, 1]} : vector<64x32xf32> to vector<64x8xf32>
    %141 = vector.extract_strided_slice %120 {offsets = [0, 16], sizes = [64, 8], strides = [1, 1]} : vector<64x32xf32> to vector<64x8xf32>
    %142 = vector.extract_strided_slice %120 {offsets = [0, 24], sizes = [64, 8], strides = [1, 1]} : vector<64x32xf32> to vector<64x8xf32>
    %143 = vector.shape_cast %139 : vector<64x8xf32> to vector<1x64x8xf32>
    %144 = vector.shape_cast %140 : vector<64x8xf32> to vector<1x64x8xf32>
    %145 = vector.shape_cast %141 : vector<64x8xf32> to vector<1x64x8xf32>
    %146 = vector.shape_cast %142 : vector<64x8xf32> to vector<1x64x8xf32>
    %147 = tpu.concatenate %143, %144, %145, %146 in 0 : vector<1x64x8xf32>, vector<1x64x8xf32>, vector<1x64x8xf32>, vector<1x64x8xf32> -> vector<4x64x8xf32>
    %148 = arith.truncf %147 : vector<4x64x8xf32> to vector<4x64x8xbf16>
    %149 = vector.extract_strided_slice %128 {offsets = [0, 0], sizes = [64, 8], strides = [1, 1]} : vector<64x32xf32> to vector<64x8xf32>
    %150 = vector.extract_strided_slice %128 {offsets = [0, 8], sizes = [64, 8], strides = [1, 1]} : vector<64x32xf32> to vector<64x8xf32>
    %151 = vector.extract_strided_slice %128 {offsets = [0, 16], sizes = [64, 8], strides = [1, 1]} : vector<64x32xf32> to vector<64x8xf32>
    %152 = vector.extract_strided_slice %128 {offsets = [0, 24], sizes = [64, 8], strides = [1, 1]} : vector<64x32xf32> to vector<64x8xf32>
    %153 = vector.shape_cast %149 : vector<64x8xf32> to vector<1x64x8xf32>
    %154 = vector.shape_cast %150 : vector<64x8xf32> to vector<1x64x8xf32>
    %155 = vector.shape_cast %151 : vector<64x8xf32> to vector<1x64x8xf32>
    %156 = vector.shape_cast %152 : vector<64x8xf32> to vector<1x64x8xf32>
    %157 = tpu.concatenate %153, %154, %155, %156 in 0 : vector<1x64x8xf32>, vector<1x64x8xf32>, vector<1x64x8xf32>, vector<1x64x8xf32> -> vector<4x64x8xf32>
    %158 = arith.truncf %157 : vector<4x64x8xf32> to vector<4x64x8xbf16>
    "tpu.trace_start"() <{level = 10 : i32, message = "htd,hsd->hts"}> : () -> ()
    %cst_93 = arith.constant dense<0.000000e+00> : vector<4x64x64xf32>
    %159 = tpu.matmul %138, %148, %cst_93 {dimension_numbers = #tpu.dot_dimension_numbers<[2], [2], [1], [1], [0, 0, 0, 1, 1, 1], [0], [0]>} : vector<4x64x8xbf16>, vector<4x64x8xbf16>, vector<4x64x64xf32> -> vector<4x64x64xf32>
    "tpu.trace_stop"() : () -> ()
    %cst_94 = arith.constant 0.353553385 : f32
    %160 = vector.broadcast %cst_94 : f32 to vector<4x64x64xf32>
    %161 = arith.mulf %159, %160 : vector<4x64x64xf32>
    %cst_95 = arith.constant dense<0xFF800000> : vector<4x64xf32>
    %162 = vector.multi_reduction <maximumf>, %161, %cst_95 [2] : vector<4x64x64xf32> to vector<4x64xf32>
    %163 = vector.shape_cast %162 : vector<4x64xf32> to vector<4x64x1xf32>
    %164 = vector.broadcast %163 : vector<4x64x1xf32> to vector<4x64x64xf32>
    %165 = arith.subf %161, %164 : vector<4x64x64xf32>
    %166 = math.exp %165 : vector<4x64x64xf32>
    %cst_96 = arith.constant dense<0.000000e+00> : vector<4x64xf32>
    %167 = vector.multi_reduction <add>, %166, %cst_96 [2] : vector<4x64x64xf32> to vector<4x64xf32>
    %168 = vector.shape_cast %167 : vector<4x64xf32> to vector<4x64x1xf32>
    %169 = tpu.reciprocal %168 {approx = true} : vector<4x64x1xf32> -> vector<4x64x1xf32>
    %170 = vector.broadcast %169 : vector<4x64x1xf32> to vector<4x64x64xf32>
    %171 = arith.mulf %166, %170 : vector<4x64x64xf32>
    %172 = arith.truncf %171 : vector<4x64x64xf32> to vector<4x64x64xbf16>
    "tpu.trace_start"() <{level = 10 : i32, message = "hts,hsd->htd"}> : () -> ()
    %cst_97 = arith.constant dense<0.000000e+00> : vector<4x64x8xf32>
    %173 = tpu.matmul %172, %158, %cst_97 {dimension_numbers = #tpu.dot_dimension_numbers<[2], [1], [1], [2], [0, 0, 0, 1, 1, 2], [0], [0]>} : vector<4x64x64xbf16>, vector<4x64x8xbf16>, vector<4x64x8xf32> -> vector<4x64x8xf32>
    "tpu.trace_stop"() : () -> ()
    %174 = vector.extract_strided_slice %173 {offsets = [0, 0, 0], sizes = [1, 64, 8], strides = [1, 1, 1]} : vector<4x64x8xf32> to vector<1x64x8xf32>
    %175 = vector.shape_cast %174 : vector<1x64x8xf32> to vector<64x8xf32>
    %176 = arith.truncf %175 : vector<64x8xf32> to vector<64x8xbf16>
    %c0_98 = arith.constant 0 : index
    %c0_99 = arith.constant 0 : index
    %c0_100 = arith.constant 0 : index
    %c0_101 = arith.constant 0 : index
    %177 = vector.load %arg19[%c0_98, %c0_99, %c0_100, %c0_101] : memref<2x4x8x32xbf16, #tpu.memory_space<vmem>>, vector<1x1x8x32xbf16>
    %178 = vector.shape_cast %177 : vector<1x1x8x32xbf16> to vector<8x32xbf16>
    %cst_102 = arith.constant dense<0.000000e+00> : vector<64x32xf32>
    %179 = tpu.matmul %176, %178, %cst_102 {dimension_numbers = #tpu.dot_dimension_numbers<[1], [0], [0], [1], [0, 0, 1, 1], [], []>} : vector<64x8xbf16>, vector<8x32xbf16>, vector<64x32xf32> -> vector<64x32xf32>
    %180 = vector.extract_strided_slice %173 {offsets = [1, 0, 0], sizes = [1, 64, 8], strides = [1, 1, 1]} : vector<4x64x8xf32> to vector<1x64x8xf32>
    %181 = vector.shape_cast %180 : vector<1x64x8xf32> to vector<64x8xf32>
    %182 = arith.truncf %181 : vector<64x8xf32> to vector<64x8xbf16>
    %c0_103 = arith.constant 0 : index
    %c1_104 = arith.constant 1 : index
    %c0_105 = arith.constant 0 : index
    %c0_106 = arith.constant 0 : index
    %183 = vector.load %arg19[%c0_103, %c1_104, %c0_105, %c0_106] : memref<2x4x8x32xbf16, #tpu.memory_space<vmem>>, vector<1x1x8x32xbf16>
    %184 = vector.shape_cast %183 : vector<1x1x8x32xbf16> to vector<8x32xbf16>
    %cst_107 = arith.constant dense<0.000000e+00> : vector<64x32xf32>
    %185 = tpu.matmul %182, %184, %cst_107 {dimension_numbers = #tpu.dot_dimension_numbers<[1], [0], [0], [1], [0, 0, 1, 1], [], []>} : vector<64x8xbf16>, vector<8x32xbf16>, vector<64x32xf32> -> vector<64x32xf32>
    %186 = arith.addf %179, %185 : vector<64x32xf32>
    %187 = vector.extract_strided_slice %173 {offsets = [2, 0, 0], sizes = [1, 64, 8], strides = [1, 1, 1]} : vector<4x64x8xf32> to vector<1x64x8xf32>
    %188 = vector.shape_cast %187 : vector<1x64x8xf32> to vector<64x8xf32>
    %189 = arith.truncf %188 : vector<64x8xf32> to vector<64x8xbf16>
    %c0_108 = arith.constant 0 : index
    %c2_109 = arith.constant 2 : index
    %c0_110 = arith.constant 0 : index
    %c0_111 = arith.constant 0 : index
    %190 = vector.load %arg19[%c0_108, %c2_109, %c0_110, %c0_111] : memref<2x4x8x32xbf16, #tpu.memory_space<vmem>>, vector<1x1x8x32xbf16>
    %191 = vector.shape_cast %190 : vector<1x1x8x32xbf16> to vector<8x32xbf16>
    %cst_112 = arith.constant dense<0.000000e+00> : vector<64x32xf32>
    %192 = tpu.matmul %189, %191, %cst_112 {dimension_numbers = #tpu.dot_dimension_numbers<[1], [0], [0], [1], [0, 0, 1, 1], [], []>} : vector<64x8xbf16>, vector<8x32xbf16>, vector<64x32xf32> -> vector<64x32xf32>
    %193 = arith.addf %186, %192 : vector<64x32xf32>
    %194 = vector.extract_strided_slice %173 {offsets = [3, 0, 0], sizes = [1, 64, 8], strides = [1, 1, 1]} : vector<4x64x8xf32> to vector<1x64x8xf32>
    %195 = vector.shape_cast %194 : vector<1x64x8xf32> to vector<64x8xf32>
    %196 = arith.truncf %195 : vector<64x8xf32> to vector<64x8xbf16>
    %c0_113 = arith.constant 0 : index
    %c3_114 = arith.constant 3 : index
    %c0_115 = arith.constant 0 : index
    %c0_116 = arith.constant 0 : index
    %197 = vector.load %arg19[%c0_113, %c3_114, %c0_115, %c0_116] : memref<2x4x8x32xbf16, #tpu.memory_space<vmem>>, vector<1x1x8x32xbf16>
    %198 = vector.shape_cast %197 : vector<1x1x8x32xbf16> to vector<8x32xbf16>
    %cst_117 = arith.constant dense<0.000000e+00> : vector<64x32xf32>
    %199 = tpu.matmul %196, %198, %cst_117 {dimension_numbers = #tpu.dot_dimension_numbers<[1], [0], [0], [1], [0, 0, 1, 1], [], []>} : vector<64x8xbf16>, vector<8x32xbf16>, vector<64x32xf32> -> vector<64x32xf32>
    %200 = arith.addf %193, %199 : vector<64x32xf32>
    %c0_118 = arith.constant 0 : index
    %c0_119 = arith.constant 0 : index
    %201 = vector.load %arg20[%c0_118, %c0_119] : memref<2x32xf32, #tpu.memory_space<vmem>>, vector<1x32xf32>
    %202 = vector.shape_cast %201 : vector<1x32xf32> to vector<32xf32>
    %203 = vector.shape_cast %202 : vector<32xf32> to vector<1x32xf32>
    %204 = vector.broadcast %203 : vector<1x32xf32> to vector<64x32xf32>
    %205 = arith.addf %200, %204 : vector<64x32xf32>
    %206 = vector.broadcast %58 : vector<1x32xf32> to vector<64x32xf32>
    %207 = arith.mulf %206, %205 : vector<64x32xf32>
    %208 = arith.addf %9, %207 : vector<64x32xf32>
    %cst_120 = arith.constant dense<0.000000e+00> : vector<64xf32>
    %209 = vector.multi_reduction <add>, %208, %cst_120 [1] : vector<64x32xf32> to vector<64xf32>
    %210 = vector.shape_cast %209 : vector<64xf32> to vector<64x1xf32>
    %cst_121 = arith.constant 3.200000e+01 : f32
    %211 = vector.broadcast %cst_121 : f32 to vector<64x1xf32>
    %212 = arith.divf %210, %211 : vector<64x1xf32>
    %213 = vector.broadcast %212 : vector<64x1xf32> to vector<64x32xf32>
    %214 = arith.subf %208, %213 : vector<64x32xf32>
    %215 = arith.mulf %214, %214 : vector<64x32xf32>
    %cst_122 = arith.constant dense<0.000000e+00> : vector<64xf32>
    %216 = vector.multi_reduction <add>, %215, %cst_122 [1] : vector<64x32xf32> to vector<64xf32>
    %217 = vector.shape_cast %216 : vector<64xf32> to vector<64x1xf32>
    %cst_123 = arith.constant 3.200000e+01 : f32
    %218 = vector.broadcast %cst_123 : f32 to vector<64x1xf32>
    %219 = arith.divf %217, %218 : vector<64x1xf32>
    %220 = vector.broadcast %212 : vector<64x1xf32> to vector<64x32xf32>
    %221 = arith.subf %208, %220 : vector<64x32xf32>
    %cst_124 = arith.constant 9.99999997E-7 : f32
    %222 = vector.broadcast %cst_124 : f32 to vector<64x1xf32>
    %223 = arith.addf %219, %222 : vector<64x1xf32>
    %224 = math.rsqrt %223 : vector<64x1xf32>
    %225 = vector.broadcast %224 : vector<64x1xf32> to vector<64x32xf32>
    %226 = arith.mulf %221, %225 : vector<64x32xf32>
    %cst_125 = arith.constant 1.000000e+00 : f32
    %227 = vector.broadcast %cst_125 : f32 to vector<1x32xf32>
    %228 = arith.addf %227, %72 : vector<1x32xf32>
    %229 = vector.broadcast %228 : vector<1x32xf32> to vector<64x32xf32>
    %230 = arith.mulf %226, %229 : vector<64x32xf32>
    %231 = vector.broadcast %65 : vector<1x32xf32> to vector<64x32xf32>
    %232 = arith.addf %230, %231 : vector<64x32xf32>
    %233 = arith.truncf %232 : vector<64x32xf32> to vector<64x32xbf16>
    %c0_126 = arith.constant 0 : index
    %c0_127 = arith.constant 0 : index
    %c0_128 = arith.constant 0 : index
    %234 = vector.load %arg21[%c0_126, %c0_127, %c0_128] : memref<2x32x128xbf16, #tpu.memory_space<vmem>>, vector<1x32x128xbf16>
    %235 = vector.shape_cast %234 : vector<1x32x128xbf16> to vector<32x128xbf16>
    %cst_129 = arith.constant dense<0.000000e+00> : vector<64x128xf32>
    %236 = tpu.matmul %233, %235, %cst_129 {dimension_numbers = #tpu.dot_dimension_numbers<[1], [0], [0], [1], [0, 0, 1, 1], [], []>} : vector<64x32xbf16>, vector<32x128xbf16>, vector<64x128xf32> -> vector<64x128xf32>
    %c0_130 = arith.constant 0 : index
    %c0_131 = arith.constant 0 : index
    %237 = vector.load %arg22[%c0_130, %c0_131] : memref<2x128xf32, #tpu.memory_space<vmem>>, vector<1x128xf32>
    %238 = vector.shape_cast %237 : vector<1x128xf32> to vector<128xf32>
    %239 = vector.shape_cast %238 : vector<128xf32> to vector<1x128xf32>
    %240 = vector.broadcast %239 : vector<1x128xf32> to vector<64x128xf32>
    %241 = arith.addf %236, %240 : vector<64x128xf32>
    %cst_132 = arith.constant 5.000000e-01 : f32
    %242 = vector.broadcast %cst_132 : f32 to vector<64x128xf32>
    %243 = arith.mulf %242, %241 : vector<64x128xf32>
    %cst_133 = arith.constant 4.471500e-02 : f32
    %244 = vector.broadcast %cst_133 : f32 to vector<64x128xf32>
    %245 = arith.mulf %244, %241 : vector<64x128xf32>
    %246 = arith.mulf %245, %241 : vector<64x128xf32>
    %247 = arith.mulf %246, %241 : vector<64x128xf32>
    %248 = arith.addf %241, %247 : vector<64x128xf32>
    %cst_134 = arith.constant 0.797884583 : f32
    %249 = vector.broadcast %cst_134 : f32 to vector<64x128xf32>
    %250 = arith.mulf %249, %248 : vector<64x128xf32>
    %251 = math.tanh %250 : vector<64x128xf32>
    %cst_135 = arith.constant 1.000000e+00 : f32
    %252 = vector.broadcast %cst_135 : f32 to vector<64x128xf32>
    %253 = arith.addf %252, %251 : vector<64x128xf32>
    %254 = arith.mulf %243, %253 : vector<64x128xf32>
    %255 = arith.truncf %254 : vector<64x128xf32> to vector<64x128xbf16>
    %c0_136 = arith.constant 0 : index
    %c0_137 = arith.constant 0 : index
    %c0_138 = arith.constant 0 : index
    %256 = vector.load %arg23[%c0_136, %c0_137, %c0_138] : memref<2x128x32xbf16, #tpu.memory_space<vmem>>, vector<1x128x32xbf16>
    %257 = vector.shape_cast %256 : vector<1x128x32xbf16> to vector<128x32xbf16>
    %cst_139 = arith.constant dense<0.000000e+00> : vector<64x32xf32>
    %258 = tpu.matmul %255, %257, %cst_139 {dimension_numbers = #tpu.dot_dimension_numbers<[1], [0], [0], [1], [0, 0, 1, 1], [], []>} : vector<64x128xbf16>, vector<128x32xbf16>, vector<64x32xf32> -> vector<64x32xf32>
    %c0_140 = arith.constant 0 : index
    %c0_141 = arith.constant 0 : index
    %259 = vector.load %arg24[%c0_140, %c0_141] : memref<2x32xf32, #tpu.memory_space<vmem>>, vector<1x32xf32>
    %260 = vector.shape_cast %259 : vector<1x32xf32> to vector<32xf32>
    %261 = vector.shape_cast %260 : vector<32xf32> to vector<1x32xf32>
    %262 = vector.broadcast %261 : vector<1x32xf32> to vector<64x32xf32>
    %263 = arith.addf %258, %262 : vector<64x32xf32>
    %264 = vector.broadcast %79 : vector<1x32xf32> to vector<64x32xf32>
    %265 = arith.mulf %264, %263 : vector<64x32xf32>
    %266 = arith.addf %208, %265 : vector<64x32xf32>
    %c1_142 = arith.constant 1 : index
    %c0_143 = arith.constant 0 : index
    %c0_144 = arith.constant 0 : index
    %c0_145 = arith.constant 0 : index
    %267 = vector.load %arg11[%c1_142, %c0_143, %c0_144, %c0_145] : memref<2x6x32x32xbf16, #tpu.memory_space<vmem>>, vector<1x1x32x32xbf16>
    %268 = vector.shape_cast %267 : vector<1x1x32x32xbf16> to vector<32x32xbf16>
    %cst_146 = arith.constant dense<0.000000e+00> : vector<1x32xf32>
    %269 = tpu.matmul %37, %268, %cst_146 {dimension_numbers = #tpu.dot_dimension_numbers<[1], [0], [0], [1], [0, 0, 1, 1], [], []>} : vector<1x32xbf16>, vector<32x32xbf16>, vector<1x32xf32> -> vector<1x32xf32>
    %c1_147 = arith.constant 1 : index
    %c0_148 = arith.constant 0 : index
    %c0_149 = arith.constant 0 : index
    %270 = vector.load %arg12[%c1_147, %c0_148, %c0_149] : memref<2x6x32xf32, #tpu.memory_space<vmem>>, vector<1x1x32xf32>
    %271 = vector.shape_cast %270 : vector<1x1x32xf32> to vector<32xf32>
    %272 = vector.shape_cast %271 : vector<32xf32> to vector<1x32xf32>
    %273 = arith.addf %269, %272 : vector<1x32xf32>
    %c1_150 = arith.constant 1 : index
    %c1_151 = arith.constant 1 : index
    %c0_152 = arith.constant 0 : index
    %c0_153 = arith.constant 0 : index
    %274 = vector.load %arg11[%c1_150, %c1_151, %c0_152, %c0_153] : memref<2x6x32x32xbf16, #tpu.memory_space<vmem>>, vector<1x1x32x32xbf16>
    %275 = vector.shape_cast %274 : vector<1x1x32x32xbf16> to vector<32x32xbf16>
    %cst_154 = arith.constant dense<0.000000e+00> : vector<1x32xf32>
    %276 = tpu.matmul %37, %275, %cst_154 {dimension_numbers = #tpu.dot_dimension_numbers<[1], [0], [0], [1], [0, 0, 1, 1], [], []>} : vector<1x32xbf16>, vector<32x32xbf16>, vector<1x32xf32> -> vector<1x32xf32>
    %c1_155 = arith.constant 1 : index
    %c1_156 = arith.constant 1 : index
    %c0_157 = arith.constant 0 : index
    %277 = vector.load %arg12[%c1_155, %c1_156, %c0_157] : memref<2x6x32xf32, #tpu.memory_space<vmem>>, vector<1x1x32xf32>
    %278 = vector.shape_cast %277 : vector<1x1x32xf32> to vector<32xf32>
    %279 = vector.shape_cast %278 : vector<32xf32> to vector<1x32xf32>
    %280 = arith.addf %276, %279 : vector<1x32xf32>
    %c1_158 = arith.constant 1 : index
    %c2_159 = arith.constant 2 : index
    %c0_160 = arith.constant 0 : index
    %c0_161 = arith.constant 0 : index
    %281 = vector.load %arg11[%c1_158, %c2_159, %c0_160, %c0_161] : memref<2x6x32x32xbf16, #tpu.memory_space<vmem>>, vector<1x1x32x32xbf16>
    %282 = vector.shape_cast %281 : vector<1x1x32x32xbf16> to vector<32x32xbf16>
    %cst_162 = arith.constant dense<0.000000e+00> : vector<1x32xf32>
    %283 = tpu.matmul %37, %282, %cst_162 {dimension_numbers = #tpu.dot_dimension_numbers<[1], [0], [0], [1], [0, 0, 1, 1], [], []>} : vector<1x32xbf16>, vector<32x32xbf16>, vector<1x32xf32> -> vector<1x32xf32>
    %c1_163 = arith.constant 1 : index
    %c2_164 = arith.constant 2 : index
    %c0_165 = arith.constant 0 : index
    %284 = vector.load %arg12[%c1_163, %c2_164, %c0_165] : memref<2x6x32xf32, #tpu.memory_space<vmem>>, vector<1x1x32xf32>
    %285 = vector.shape_cast %284 : vector<1x1x32xf32> to vector<32xf32>
    %286 = vector.shape_cast %285 : vector<32xf32> to vector<1x32xf32>
    %287 = arith.addf %283, %286 : vector<1x32xf32>
    %c1_166 = arith.constant 1 : index
    %c3_167 = arith.constant 3 : index
    %c0_168 = arith.constant 0 : index
    %c0_169 = arith.constant 0 : index
    %288 = vector.load %arg11[%c1_166, %c3_167, %c0_168, %c0_169] : memref<2x6x32x32xbf16, #tpu.memory_space<vmem>>, vector<1x1x32x32xbf16>
    %289 = vector.shape_cast %288 : vector<1x1x32x32xbf16> to vector<32x32xbf16>
    %cst_170 = arith.constant dense<0.000000e+00> : vector<1x32xf32>
    %290 = tpu.matmul %37, %289, %cst_170 {dimension_numbers = #tpu.dot_dimension_numbers<[1], [0], [0], [1], [0, 0, 1, 1], [], []>} : vector<1x32xbf16>, vector<32x32xbf16>, vector<1x32xf32> -> vector<1x32xf32>
    %c1_171 = arith.constant 1 : index
    %c3_172 = arith.constant 3 : index
    %c0_173 = arith.constant 0 : index
    %291 = vector.load %arg12[%c1_171, %c3_172, %c0_173] : memref<2x6x32xf32, #tpu.memory_space<vmem>>, vector<1x1x32xf32>
    %292 = vector.shape_cast %291 : vector<1x1x32xf32> to vector<32xf32>
    %293 = vector.shape_cast %292 : vector<32xf32> to vector<1x32xf32>
    %294 = arith.addf %290, %293 : vector<1x32xf32>
    %c1_174 = arith.constant 1 : index
    %c4_175 = arith.constant 4 : index
    %c0_176 = arith.constant 0 : index
    %c0_177 = arith.constant 0 : index
    %295 = vector.load %arg11[%c1_174, %c4_175, %c0_176, %c0_177] : memref<2x6x32x32xbf16, #tpu.memory_space<vmem>>, vector<1x1x32x32xbf16>
    %296 = vector.shape_cast %295 : vector<1x1x32x32xbf16> to vector<32x32xbf16>
    %cst_178 = arith.constant dense<0.000000e+00> : vector<1x32xf32>
    %297 = tpu.matmul %37, %296, %cst_178 {dimension_numbers = #tpu.dot_dimension_numbers<[1], [0], [0], [1], [0, 0, 1, 1], [], []>} : vector<1x32xbf16>, vector<32x32xbf16>, vector<1x32xf32> -> vector<1x32xf32>
    %c1_179 = arith.constant 1 : index
    %c4_180 = arith.constant 4 : index
    %c0_181 = arith.constant 0 : index
    %298 = vector.load %arg12[%c1_179, %c4_180, %c0_181] : memref<2x6x32xf32, #tpu.memory_space<vmem>>, vector<1x1x32xf32>
    %299 = vector.shape_cast %298 : vector<1x1x32xf32> to vector<32xf32>
    %300 = vector.shape_cast %299 : vector<32xf32> to vector<1x32xf32>
    %301 = arith.addf %297, %300 : vector<1x32xf32>
    %c1_182 = arith.constant 1 : index
    %c5_183 = arith.constant 5 : index
    %c0_184 = arith.constant 0 : index
    %c0_185 = arith.constant 0 : index
    %302 = vector.load %arg11[%c1_182, %c5_183, %c0_184, %c0_185] : memref<2x6x32x32xbf16, #tpu.memory_space<vmem>>, vector<1x1x32x32xbf16>
    %303 = vector.shape_cast %302 : vector<1x1x32x32xbf16> to vector<32x32xbf16>
    %cst_186 = arith.constant dense<0.000000e+00> : vector<1x32xf32>
    %304 = tpu.matmul %37, %303, %cst_186 {dimension_numbers = #tpu.dot_dimension_numbers<[1], [0], [0], [1], [0, 0, 1, 1], [], []>} : vector<1x32xbf16>, vector<32x32xbf16>, vector<1x32xf32> -> vector<1x32xf32>
    %c1_187 = arith.constant 1 : index
    %c5_188 = arith.constant 5 : index
    %c0_189 = arith.constant 0 : index
    %305 = vector.load %arg12[%c1_187, %c5_188, %c0_189] : memref<2x6x32xf32, #tpu.memory_space<vmem>>, vector<1x1x32xf32>
    %306 = vector.shape_cast %305 : vector<1x1x32xf32> to vector<32xf32>
    %307 = vector.shape_cast %306 : vector<32xf32> to vector<1x32xf32>
    %308 = arith.addf %304, %307 : vector<1x32xf32>
    %cst_190 = arith.constant dense<0.000000e+00> : vector<64xf32>
    %309 = vector.multi_reduction <add>, %266, %cst_190 [1] : vector<64x32xf32> to vector<64xf32>
    %310 = vector.shape_cast %309 : vector<64xf32> to vector<64x1xf32>
    %cst_191 = arith.constant 3.200000e+01 : f32
    %311 = vector.broadcast %cst_191 : f32 to vector<64x1xf32>
    %312 = arith.divf %310, %311 : vector<64x1xf32>
    %313 = vector.broadcast %312 : vector<64x1xf32> to vector<64x32xf32>
    %314 = arith.subf %266, %313 : vector<64x32xf32>
    %315 = arith.mulf %314, %314 : vector<64x32xf32>
    %cst_192 = arith.constant dense<0.000000e+00> : vector<64xf32>
    %316 = vector.multi_reduction <add>, %315, %cst_192 [1] : vector<64x32xf32> to vector<64xf32>
    %317 = vector.shape_cast %316 : vector<64xf32> to vector<64x1xf32>
    %cst_193 = arith.constant 3.200000e+01 : f32
    %318 = vector.broadcast %cst_193 : f32 to vector<64x1xf32>
    %319 = arith.divf %317, %318 : vector<64x1xf32>
    %320 = vector.broadcast %312 : vector<64x1xf32> to vector<64x32xf32>
    %321 = arith.subf %266, %320 : vector<64x32xf32>
    %cst_194 = arith.constant 9.99999997E-7 : f32
    %322 = vector.broadcast %cst_194 : f32 to vector<64x1xf32>
    %323 = arith.addf %319, %322 : vector<64x1xf32>
    %324 = math.rsqrt %323 : vector<64x1xf32>
    %325 = vector.broadcast %324 : vector<64x1xf32> to vector<64x32xf32>
    %326 = arith.mulf %321, %325 : vector<64x32xf32>
    %cst_195 = arith.constant 1.000000e+00 : f32
    %327 = vector.broadcast %cst_195 : f32 to vector<1x32xf32>
    %328 = arith.addf %327, %280 : vector<1x32xf32>
    %329 = vector.broadcast %328 : vector<1x32xf32> to vector<64x32xf32>
    %330 = arith.mulf %326, %329 : vector<64x32xf32>
    %331 = vector.broadcast %273 : vector<1x32xf32> to vector<64x32xf32>
    %332 = arith.addf %330, %331 : vector<64x32xf32>
    %333 = arith.truncf %332 : vector<64x32xf32> to vector<64x32xbf16>
    %c1_196 = arith.constant 1 : index
    %c0_197 = arith.constant 0 : index
    %c0_198 = arith.constant 0 : index
    %334 = vector.load %arg13[%c1_196, %c0_197, %c0_198] : memref<2x32x32xbf16, #tpu.memory_space<vmem>>, vector<1x32x32xbf16>
    %335 = vector.shape_cast %334 : vector<1x32x32xbf16> to vector<32x32xbf16>
    %cst_199 = arith.constant dense<0.000000e+00> : vector<64x32xf32>
    %336 = tpu.matmul %333, %335, %cst_199 {dimension_numbers = #tpu.dot_dimension_numbers<[1], [0], [0], [1], [0, 0, 1, 1], [], []>} : vector<64x32xbf16>, vector<32x32xbf16>, vector<64x32xf32> -> vector<64x32xf32>
    %c1_200 = arith.constant 1 : index
    %c0_201 = arith.constant 0 : index
    %337 = vector.load %arg14[%c1_200, %c0_201] : memref<2x32xf32, #tpu.memory_space<vmem>>, vector<1x32xf32>
    %338 = vector.shape_cast %337 : vector<1x32xf32> to vector<32xf32>
    %339 = vector.shape_cast %338 : vector<32xf32> to vector<1x32xf32>
    %340 = vector.broadcast %339 : vector<1x32xf32> to vector<64x32xf32>
    %341 = arith.addf %336, %340 : vector<64x32xf32>
    %c1_202 = arith.constant 1 : index
    %c0_203 = arith.constant 0 : index
    %c0_204 = arith.constant 0 : index
    %342 = vector.load %arg15[%c1_202, %c0_203, %c0_204] : memref<2x32x32xbf16, #tpu.memory_space<vmem>>, vector<1x32x32xbf16>
    %343 = vector.shape_cast %342 : vector<1x32x32xbf16> to vector<32x32xbf16>
    %cst_205 = arith.constant dense<0.000000e+00> : vector<64x32xf32>
    %344 = tpu.matmul %333, %343, %cst_205 {dimension_numbers = #tpu.dot_dimension_numbers<[1], [0], [0], [1], [0, 0, 1, 1], [], []>} : vector<64x32xbf16>, vector<32x32xbf16>, vector<64x32xf32> -> vector<64x32xf32>
    %c1_206 = arith.constant 1 : index
    %c0_207 = arith.constant 0 : index
    %345 = vector.load %arg16[%c1_206, %c0_207] : memref<2x32xf32, #tpu.memory_space<vmem>>, vector<1x32xf32>
    %346 = vector.shape_cast %345 : vector<1x32xf32> to vector<32xf32>
    %347 = vector.shape_cast %346 : vector<32xf32> to vector<1x32xf32>
    %348 = vector.broadcast %347 : vector<1x32xf32> to vector<64x32xf32>
    %349 = arith.addf %344, %348 : vector<64x32xf32>
    %c1_208 = arith.constant 1 : index
    %c0_209 = arith.constant 0 : index
    %c0_210 = arith.constant 0 : index
    %350 = vector.load %arg17[%c1_208, %c0_209, %c0_210] : memref<2x32x32xbf16, #tpu.memory_space<vmem>>, vector<1x32x32xbf16>
    %351 = vector.shape_cast %350 : vector<1x32x32xbf16> to vector<32x32xbf16>
    %cst_211 = arith.constant dense<0.000000e+00> : vector<64x32xf32>
    %352 = tpu.matmul %333, %351, %cst_211 {dimension_numbers = #tpu.dot_dimension_numbers<[1], [0], [0], [1], [0, 0, 1, 1], [], []>} : vector<64x32xbf16>, vector<32x32xbf16>, vector<64x32xf32> -> vector<64x32xf32>
    %c1_212 = arith.constant 1 : index
    %c0_213 = arith.constant 0 : index
    %353 = vector.load %arg18[%c1_212, %c0_213] : memref<2x32xf32, #tpu.memory_space<vmem>>, vector<1x32xf32>
    %354 = vector.shape_cast %353 : vector<1x32xf32> to vector<32xf32>
    %355 = vector.shape_cast %354 : vector<32xf32> to vector<1x32xf32>
    %356 = vector.broadcast %355 : vector<1x32xf32> to vector<64x32xf32>
    %357 = arith.addf %352, %356 : vector<64x32xf32>
    %358 = vector.extract_strided_slice %341 {offsets = [0, 0], sizes = [64, 8], strides = [1, 1]} : vector<64x32xf32> to vector<64x8xf32>
    %359 = vector.extract_strided_slice %341 {offsets = [0, 8], sizes = [64, 8], strides = [1, 1]} : vector<64x32xf32> to vector<64x8xf32>
    %360 = vector.extract_strided_slice %341 {offsets = [0, 16], sizes = [64, 8], strides = [1, 1]} : vector<64x32xf32> to vector<64x8xf32>
    %361 = vector.extract_strided_slice %341 {offsets = [0, 24], sizes = [64, 8], strides = [1, 1]} : vector<64x32xf32> to vector<64x8xf32>
    %362 = vector.shape_cast %358 : vector<64x8xf32> to vector<1x64x8xf32>
    %363 = vector.shape_cast %359 : vector<64x8xf32> to vector<1x64x8xf32>
    %364 = vector.shape_cast %360 : vector<64x8xf32> to vector<1x64x8xf32>
    %365 = vector.shape_cast %361 : vector<64x8xf32> to vector<1x64x8xf32>
    %366 = tpu.concatenate %362, %363, %364, %365 in 0 : vector<1x64x8xf32>, vector<1x64x8xf32>, vector<1x64x8xf32>, vector<1x64x8xf32> -> vector<4x64x8xf32>
    %367 = arith.truncf %366 : vector<4x64x8xf32> to vector<4x64x8xbf16>
    %368 = vector.extract_strided_slice %349 {offsets = [0, 0], sizes = [64, 8], strides = [1, 1]} : vector<64x32xf32> to vector<64x8xf32>
    %369 = vector.extract_strided_slice %349 {offsets = [0, 8], sizes = [64, 8], strides = [1, 1]} : vector<64x32xf32> to vector<64x8xf32>
    %370 = vector.extract_strided_slice %349 {offsets = [0, 16], sizes = [64, 8], strides = [1, 1]} : vector<64x32xf32> to vector<64x8xf32>
    %371 = vector.extract_strided_slice %349 {offsets = [0, 24], sizes = [64, 8], strides = [1, 1]} : vector<64x32xf32> to vector<64x8xf32>
    %372 = vector.shape_cast %368 : vector<64x8xf32> to vector<1x64x8xf32>
    %373 = vector.shape_cast %369 : vector<64x8xf32> to vector<1x64x8xf32>
    %374 = vector.shape_cast %370 : vector<64x8xf32> to vector<1x64x8xf32>
    %375 = vector.shape_cast %371 : vector<64x8xf32> to vector<1x64x8xf32>
    %376 = tpu.concatenate %372, %373, %374, %375 in 0 : vector<1x64x8xf32>, vector<1x64x8xf32>, vector<1x64x8xf32>, vector<1x64x8xf32> -> vector<4x64x8xf32>
    %377 = arith.truncf %376 : vector<4x64x8xf32> to vector<4x64x8xbf16>
    %378 = vector.extract_strided_slice %357 {offsets = [0, 0], sizes = [64, 8], strides = [1, 1]} : vector<64x32xf32> to vector<64x8xf32>
    %379 = vector.extract_strided_slice %357 {offsets = [0, 8], sizes = [64, 8], strides = [1, 1]} : vector<64x32xf32> to vector<64x8xf32>
    %380 = vector.extract_strided_slice %357 {offsets = [0, 16], sizes = [64, 8], strides = [1, 1]} : vector<64x32xf32> to vector<64x8xf32>
    %381 = vector.extract_strided_slice %357 {offsets = [0, 24], sizes = [64, 8], strides = [1, 1]} : vector<64x32xf32> to vector<64x8xf32>
    %382 = vector.shape_cast %378 : vector<64x8xf32> to vector<1x64x8xf32>
    %383 = vector.shape_cast %379 : vector<64x8xf32> to vector<1x64x8xf32>
    %384 = vector.shape_cast %380 : vector<64x8xf32> to vector<1x64x8xf32>
    %385 = vector.shape_cast %381 : vector<64x8xf32> to vector<1x64x8xf32>
    %386 = tpu.concatenate %382, %383, %384, %385 in 0 : vector<1x64x8xf32>, vector<1x64x8xf32>, vector<1x64x8xf32>, vector<1x64x8xf32> -> vector<4x64x8xf32>
    %387 = arith.truncf %386 : vector<4x64x8xf32> to vector<4x64x8xbf16>
    "tpu.trace_start"() <{level = 10 : i32, message = "htd,hsd->hts"}> : () -> ()
    %cst_214 = arith.constant dense<0.000000e+00> : vector<4x64x64xf32>
    %388 = tpu.matmul %367, %377, %cst_214 {dimension_numbers = #tpu.dot_dimension_numbers<[2], [2], [1], [1], [0, 0, 0, 1, 1, 1], [0], [0]>} : vector<4x64x8xbf16>, vector<4x64x8xbf16>, vector<4x64x64xf32> -> vector<4x64x64xf32>
    "tpu.trace_stop"() : () -> ()
    %cst_215 = arith.constant 0.353553385 : f32
    %389 = vector.broadcast %cst_215 : f32 to vector<4x64x64xf32>
    %390 = arith.mulf %388, %389 : vector<4x64x64xf32>
    %cst_216 = arith.constant dense<0xFF800000> : vector<4x64xf32>
    %391 = vector.multi_reduction <maximumf>, %390, %cst_216 [2] : vector<4x64x64xf32> to vector<4x64xf32>
    %392 = vector.shape_cast %391 : vector<4x64xf32> to vector<4x64x1xf32>
    %393 = vector.broadcast %392 : vector<4x64x1xf32> to vector<4x64x64xf32>
    %394 = arith.subf %390, %393 : vector<4x64x64xf32>
    %395 = math.exp %394 : vector<4x64x64xf32>
    %cst_217 = arith.constant dense<0.000000e+00> : vector<4x64xf32>
    %396 = vector.multi_reduction <add>, %395, %cst_217 [2] : vector<4x64x64xf32> to vector<4x64xf32>
    %397 = vector.shape_cast %396 : vector<4x64xf32> to vector<4x64x1xf32>
    %398 = tpu.reciprocal %397 {approx = true} : vector<4x64x1xf32> -> vector<4x64x1xf32>
    %399 = vector.broadcast %398 : vector<4x64x1xf32> to vector<4x64x64xf32>
    %400 = arith.mulf %395, %399 : vector<4x64x64xf32>
    %401 = arith.truncf %400 : vector<4x64x64xf32> to vector<4x64x64xbf16>
    "tpu.trace_start"() <{level = 10 : i32, message = "hts,hsd->htd"}> : () -> ()
    %cst_218 = arith.constant dense<0.000000e+00> : vector<4x64x8xf32>
    %402 = tpu.matmul %401, %387, %cst_218 {dimension_numbers = #tpu.dot_dimension_numbers<[2], [1], [1], [2], [0, 0, 0, 1, 1, 2], [0], [0]>} : vector<4x64x64xbf16>, vector<4x64x8xbf16>, vector<4x64x8xf32> -> vector<4x64x8xf32>
    "tpu.trace_stop"() : () -> ()
    %403 = vector.extract_strided_slice %402 {offsets = [0, 0, 0], sizes = [1, 64, 8], strides = [1, 1, 1]} : vector<4x64x8xf32> to vector<1x64x8xf32>
    %404 = vector.shape_cast %403 : vector<1x64x8xf32> to vector<64x8xf32>
    %405 = arith.truncf %404 : vector<64x8xf32> to vector<64x8xbf16>
    %c1_219 = arith.constant 1 : index
    %c0_220 = arith.constant 0 : index
    %c0_221 = arith.constant 0 : index
    %c0_222 = arith.constant 0 : index
    %406 = vector.load %arg19[%c1_219, %c0_220, %c0_221, %c0_222] : memref<2x4x8x32xbf16, #tpu.memory_space<vmem>>, vector<1x1x8x32xbf16>
    %407 = vector.shape_cast %406 : vector<1x1x8x32xbf16> to vector<8x32xbf16>
    %cst_223 = arith.constant dense<0.000000e+00> : vector<64x32xf32>
    %408 = tpu.matmul %405, %407, %cst_223 {dimension_numbers = #tpu.dot_dimension_numbers<[1], [0], [0], [1], [0, 0, 1, 1], [], []>} : vector<64x8xbf16>, vector<8x32xbf16>, vector<64x32xf32> -> vector<64x32xf32>
    %409 = vector.extract_strided_slice %402 {offsets = [1, 0, 0], sizes = [1, 64, 8], strides = [1, 1, 1]} : vector<4x64x8xf32> to vector<1x64x8xf32>
    %410 = vector.shape_cast %409 : vector<1x64x8xf32> to vector<64x8xf32>
    %411 = arith.truncf %410 : vector<64x8xf32> to vector<64x8xbf16>
    %c1_224 = arith.constant 1 : index
    %c1_225 = arith.constant 1 : index
    %c0_226 = arith.constant 0 : index
    %c0_227 = arith.constant 0 : index
    %412 = vector.load %arg19[%c1_224, %c1_225, %c0_226, %c0_227] : memref<2x4x8x32xbf16, #tpu.memory_space<vmem>>, vector<1x1x8x32xbf16>
    %413 = vector.shape_cast %412 : vector<1x1x8x32xbf16> to vector<8x32xbf16>
    %cst_228 = arith.constant dense<0.000000e+00> : vector<64x32xf32>
    %414 = tpu.matmul %411, %413, %cst_228 {dimension_numbers = #tpu.dot_dimension_numbers<[1], [0], [0], [1], [0, 0, 1, 1], [], []>} : vector<64x8xbf16>, vector<8x32xbf16>, vector<64x32xf32> -> vector<64x32xf32>
    %415 = arith.addf %408, %414 : vector<64x32xf32>
    %416 = vector.extract_strided_slice %402 {offsets = [2, 0, 0], sizes = [1, 64, 8], strides = [1, 1, 1]} : vector<4x64x8xf32> to vector<1x64x8xf32>
    %417 = vector.shape_cast %416 : vector<1x64x8xf32> to vector<64x8xf32>
    %418 = arith.truncf %417 : vector<64x8xf32> to vector<64x8xbf16>
    %c1_229 = arith.constant 1 : index
    %c2_230 = arith.constant 2 : index
    %c0_231 = arith.constant 0 : index
    %c0_232 = arith.constant 0 : index
    %419 = vector.load %arg19[%c1_229, %c2_230, %c0_231, %c0_232] : memref<2x4x8x32xbf16, #tpu.memory_space<vmem>>, vector<1x1x8x32xbf16>
    %420 = vector.shape_cast %419 : vector<1x1x8x32xbf16> to vector<8x32xbf16>
    %cst_233 = arith.constant dense<0.000000e+00> : vector<64x32xf32>
    %421 = tpu.matmul %418, %420, %cst_233 {dimension_numbers = #tpu.dot_dimension_numbers<[1], [0], [0], [1], [0, 0, 1, 1], [], []>} : vector<64x8xbf16>, vector<8x32xbf16>, vector<64x32xf32> -> vector<64x32xf32>
    %422 = arith.addf %415, %421 : vector<64x32xf32>
    %423 = vector.extract_strided_slice %402 {offsets = [3, 0, 0], sizes = [1, 64, 8], strides = [1, 1, 1]} : vector<4x64x8xf32> to vector<1x64x8xf32>
    %424 = vector.shape_cast %423 : vector<1x64x8xf32> to vector<64x8xf32>
    %425 = arith.truncf %424 : vector<64x8xf32> to vector<64x8xbf16>
    %c1_234 = arith.constant 1 : index
    %c3_235 = arith.constant 3 : index
    %c0_236 = arith.constant 0 : index
    %c0_237 = arith.constant 0 : index
    %426 = vector.load %arg19[%c1_234, %c3_235, %c0_236, %c0_237] : memref<2x4x8x32xbf16, #tpu.memory_space<vmem>>, vector<1x1x8x32xbf16>
    %427 = vector.shape_cast %426 : vector<1x1x8x32xbf16> to vector<8x32xbf16>
    %cst_238 = arith.constant dense<0.000000e+00> : vector<64x32xf32>
    %428 = tpu.matmul %425, %427, %cst_238 {dimension_numbers = #tpu.dot_dimension_numbers<[1], [0], [0], [1], [0, 0, 1, 1], [], []>} : vector<64x8xbf16>, vector<8x32xbf16>, vector<64x32xf32> -> vector<64x32xf32>
    %429 = arith.addf %422, %428 : vector<64x32xf32>
    %c1_239 = arith.constant 1 : index
    %c0_240 = arith.constant 0 : index
    %430 = vector.load %arg20[%c1_239, %c0_240] : memref<2x32xf32, #tpu.memory_space<vmem>>, vector<1x32xf32>
    %431 = vector.shape_cast %430 : vector<1x32xf32> to vector<32xf32>
    %432 = vector.shape_cast %431 : vector<32xf32> to vector<1x32xf32>
    %433 = vector.broadcast %432 : vector<1x32xf32> to vector<64x32xf32>
    %434 = arith.addf %429, %433 : vector<64x32xf32>
    %435 = vector.broadcast %287 : vector<1x32xf32> to vector<64x32xf32>
    %436 = arith.mulf %435, %434 : vector<64x32xf32>
    %437 = arith.addf %266, %436 : vector<64x32xf32>
    %cst_241 = arith.constant dense<0.000000e+00> : vector<64xf32>
    %438 = vector.multi_reduction <add>, %437, %cst_241 [1] : vector<64x32xf32> to vector<64xf32>
    %439 = vector.shape_cast %438 : vector<64xf32> to vector<64x1xf32>
    %cst_242 = arith.constant 3.200000e+01 : f32
    %440 = vector.broadcast %cst_242 : f32 to vector<64x1xf32>
    %441 = arith.divf %439, %440 : vector<64x1xf32>
    %442 = vector.broadcast %441 : vector<64x1xf32> to vector<64x32xf32>
    %443 = arith.subf %437, %442 : vector<64x32xf32>
    %444 = arith.mulf %443, %443 : vector<64x32xf32>
    %cst_243 = arith.constant dense<0.000000e+00> : vector<64xf32>
    %445 = vector.multi_reduction <add>, %444, %cst_243 [1] : vector<64x32xf32> to vector<64xf32>
    %446 = vector.shape_cast %445 : vector<64xf32> to vector<64x1xf32>
    %cst_244 = arith.constant 3.200000e+01 : f32
    %447 = vector.broadcast %cst_244 : f32 to vector<64x1xf32>
    %448 = arith.divf %446, %447 : vector<64x1xf32>
    %449 = vector.broadcast %441 : vector<64x1xf32> to vector<64x32xf32>
    %450 = arith.subf %437, %449 : vector<64x32xf32>
    %cst_245 = arith.constant 9.99999997E-7 : f32
    %451 = vector.broadcast %cst_245 : f32 to vector<64x1xf32>
    %452 = arith.addf %448, %451 : vector<64x1xf32>
    %453 = math.rsqrt %452 : vector<64x1xf32>
    %454 = vector.broadcast %453 : vector<64x1xf32> to vector<64x32xf32>
    %455 = arith.mulf %450, %454 : vector<64x32xf32>
    %cst_246 = arith.constant 1.000000e+00 : f32
    %456 = vector.broadcast %cst_246 : f32 to vector<1x32xf32>
    %457 = arith.addf %456, %301 : vector<1x32xf32>
    %458 = vector.broadcast %457 : vector<1x32xf32> to vector<64x32xf32>
    %459 = arith.mulf %455, %458 : vector<64x32xf32>
    %460 = vector.broadcast %294 : vector<1x32xf32> to vector<64x32xf32>
    %461 = arith.addf %459, %460 : vector<64x32xf32>
    %462 = arith.truncf %461 : vector<64x32xf32> to vector<64x32xbf16>
    %c1_247 = arith.constant 1 : index
    %c0_248 = arith.constant 0 : index
    %c0_249 = arith.constant 0 : index
    %463 = vector.load %arg21[%c1_247, %c0_248, %c0_249] : memref<2x32x128xbf16, #tpu.memory_space<vmem>>, vector<1x32x128xbf16>
    %464 = vector.shape_cast %463 : vector<1x32x128xbf16> to vector<32x128xbf16>
    %cst_250 = arith.constant dense<0.000000e+00> : vector<64x128xf32>
    %465 = tpu.matmul %462, %464, %cst_250 {dimension_numbers = #tpu.dot_dimension_numbers<[1], [0], [0], [1], [0, 0, 1, 1], [], []>} : vector<64x32xbf16>, vector<32x128xbf16>, vector<64x128xf32> -> vector<64x128xf32>
    %c1_251 = arith.constant 1 : index
    %c0_252 = arith.constant 0 : index
    %466 = vector.load %arg22[%c1_251, %c0_252] : memref<2x128xf32, #tpu.memory_space<vmem>>, vector<1x128xf32>
    %467 = vector.shape_cast %466 : vector<1x128xf32> to vector<128xf32>
    %468 = vector.shape_cast %467 : vector<128xf32> to vector<1x128xf32>
    %469 = vector.broadcast %468 : vector<1x128xf32> to vector<64x128xf32>
    %470 = arith.addf %465, %469 : vector<64x128xf32>
    %cst_253 = arith.constant 5.000000e-01 : f32
    %471 = vector.broadcast %cst_253 : f32 to vector<64x128xf32>
    %472 = arith.mulf %471, %470 : vector<64x128xf32>
    %cst_254 = arith.constant 4.471500e-02 : f32
    %473 = vector.broadcast %cst_254 : f32 to vector<64x128xf32>
    %474 = arith.mulf %473, %470 : vector<64x128xf32>
    %475 = arith.mulf %474, %470 : vector<64x128xf32>
    %476 = arith.mulf %475, %470 : vector<64x128xf32>
    %477 = arith.addf %470, %476 : vector<64x128xf32>
    %cst_255 = arith.constant 0.797884583 : f32
    %478 = vector.broadcast %cst_255 : f32 to vector<64x128xf32>
    %479 = arith.mulf %478, %477 : vector<64x128xf32>
    %480 = math.tanh %479 : vector<64x128xf32>
    %cst_256 = arith.constant 1.000000e+00 : f32
    %481 = vector.broadcast %cst_256 : f32 to vector<64x128xf32>
    %482 = arith.addf %481, %480 : vector<64x128xf32>
    %483 = arith.mulf %472, %482 : vector<64x128xf32>
    %484 = arith.truncf %483 : vector<64x128xf32> to vector<64x128xbf16>
    %c1_257 = arith.constant 1 : index
    %c0_258 = arith.constant 0 : index
    %c0_259 = arith.constant 0 : index
    %485 = vector.load %arg23[%c1_257, %c0_258, %c0_259] : memref<2x128x32xbf16, #tpu.memory_space<vmem>>, vector<1x128x32xbf16>
    %486 = vector.shape_cast %485 : vector<1x128x32xbf16> to vector<128x32xbf16>
    %cst_260 = arith.constant dense<0.000000e+00> : vector<64x32xf32>
    %487 = tpu.matmul %484, %486, %cst_260 {dimension_numbers = #tpu.dot_dimension_numbers<[1], [0], [0], [1], [0, 0, 1, 1], [], []>} : vector<64x128xbf16>, vector<128x32xbf16>, vector<64x32xf32> -> vector<64x32xf32>
    %c1_261 = arith.constant 1 : index
    %c0_262 = arith.constant 0 : index
    %488 = vector.load %arg24[%c1_261, %c0_262] : memref<2x32xf32, #tpu.memory_space<vmem>>, vector<1x32xf32>
    %489 = vector.shape_cast %488 : vector<1x32xf32> to vector<32xf32>
    %490 = vector.shape_cast %489 : vector<32xf32> to vector<1x32xf32>
    %491 = vector.broadcast %490 : vector<1x32xf32> to vector<64x32xf32>
    %492 = arith.addf %487, %491 : vector<64x32xf32>
    %493 = vector.broadcast %308 : vector<1x32xf32> to vector<64x32xf32>
    %494 = arith.mulf %493, %492 : vector<64x32xf32>
    %495 = arith.addf %437, %494 : vector<64x32xf32>
    %c0_263 = arith.constant 0 : index
    %c0_264 = arith.constant 0 : index
    %c0_265 = arith.constant 0 : index
    %496 = vector.load %arg25[%c0_263, %c0_264, %c0_265] : memref<2x32x32xbf16, #tpu.memory_space<vmem>>, vector<1x32x32xbf16>
    %497 = vector.shape_cast %496 : vector<1x32x32xbf16> to vector<32x32xbf16>
    %cst_266 = arith.constant dense<0.000000e+00> : vector<1x32xf32>
    %498 = tpu.matmul %37, %497, %cst_266 {dimension_numbers = #tpu.dot_dimension_numbers<[1], [0], [0], [1], [0, 0, 1, 1], [], []>} : vector<1x32xbf16>, vector<32x32xbf16>, vector<1x32xf32> -> vector<1x32xf32>
    %c0_267 = arith.constant 0 : index
    %c0_268 = arith.constant 0 : index
    %499 = vector.load %arg26[%c0_267, %c0_268] : memref<2x32xf32, #tpu.memory_space<vmem>>, vector<1x32xf32>
    %500 = vector.shape_cast %499 : vector<1x32xf32> to vector<32xf32>
    %501 = vector.shape_cast %500 : vector<32xf32> to vector<1x32xf32>
    %502 = arith.addf %498, %501 : vector<1x32xf32>
    %c1_269 = arith.constant 1 : index
    %c0_270 = arith.constant 0 : index
    %c0_271 = arith.constant 0 : index
    %503 = vector.load %arg25[%c1_269, %c0_270, %c0_271] : memref<2x32x32xbf16, #tpu.memory_space<vmem>>, vector<1x32x32xbf16>
    %504 = vector.shape_cast %503 : vector<1x32x32xbf16> to vector<32x32xbf16>
    %cst_272 = arith.constant dense<0.000000e+00> : vector<1x32xf32>
    %505 = tpu.matmul %37, %504, %cst_272 {dimension_numbers = #tpu.dot_dimension_numbers<[1], [0], [0], [1], [0, 0, 1, 1], [], []>} : vector<1x32xbf16>, vector<32x32xbf16>, vector<1x32xf32> -> vector<1x32xf32>
    %c1_273 = arith.constant 1 : index
    %c0_274 = arith.constant 0 : index
    %506 = vector.load %arg26[%c1_273, %c0_274] : memref<2x32xf32, #tpu.memory_space<vmem>>, vector<1x32xf32>
    %507 = vector.shape_cast %506 : vector<1x32xf32> to vector<32xf32>
    %508 = vector.shape_cast %507 : vector<32xf32> to vector<1x32xf32>
    %509 = arith.addf %505, %508 : vector<1x32xf32>
    %cst_275 = arith.constant dense<0.000000e+00> : vector<64xf32>
    %510 = vector.multi_reduction <add>, %495, %cst_275 [1] : vector<64x32xf32> to vector<64xf32>
    %511 = vector.shape_cast %510 : vector<64xf32> to vector<64x1xf32>
    %cst_276 = arith.constant 3.200000e+01 : f32
    %512 = vector.broadcast %cst_276 : f32 to vector<64x1xf32>
    %513 = arith.divf %511, %512 : vector<64x1xf32>
    %514 = vector.broadcast %513 : vector<64x1xf32> to vector<64x32xf32>
    %515 = arith.subf %495, %514 : vector<64x32xf32>
    %516 = arith.mulf %515, %515 : vector<64x32xf32>
    %cst_277 = arith.constant dense<0.000000e+00> : vector<64xf32>
    %517 = vector.multi_reduction <add>, %516, %cst_277 [1] : vector<64x32xf32> to vector<64xf32>
    %518 = vector.shape_cast %517 : vector<64xf32> to vector<64x1xf32>
    %cst_278 = arith.constant 3.200000e+01 : f32
    %519 = vector.broadcast %cst_278 : f32 to vector<64x1xf32>
    %520 = arith.divf %518, %519 : vector<64x1xf32>
    %521 = vector.broadcast %513 : vector<64x1xf32> to vector<64x32xf32>
    %522 = arith.subf %495, %521 : vector<64x32xf32>
    %cst_279 = arith.constant 9.99999997E-7 : f32
    %523 = vector.broadcast %cst_279 : f32 to vector<64x1xf32>
    %524 = arith.addf %520, %523 : vector<64x1xf32>
    %525 = math.rsqrt %524 : vector<64x1xf32>
    %526 = vector.broadcast %525 : vector<64x1xf32> to vector<64x32xf32>
    %527 = arith.mulf %522, %526 : vector<64x32xf32>
    %cst_280 = arith.constant 1.000000e+00 : f32
    %528 = vector.broadcast %cst_280 : f32 to vector<1x32xf32>
    %529 = arith.addf %528, %509 : vector<1x32xf32>
    %530 = vector.broadcast %529 : vector<1x32xf32> to vector<64x32xf32>
    %531 = arith.mulf %527, %530 : vector<64x32xf32>
    %532 = vector.broadcast %502 : vector<1x32xf32> to vector<64x32xf32>
    %533 = arith.addf %531, %532 : vector<64x32xf32>
    %534 = arith.truncf %533 : vector<64x32xf32> to vector<64x32xbf16>
    %c0_281 = arith.constant 0 : index
    %c0_282 = arith.constant 0 : index
    %535 = vector.load %arg27[%c0_281, %c0_282] : memref<32x32xbf16, #tpu.memory_space<vmem>>, vector<32x32xbf16>
    %cst_283 = arith.constant dense<0.000000e+00> : vector<64x32xf32>
    %536 = tpu.matmul %534, %535, %cst_283 {dimension_numbers = #tpu.dot_dimension_numbers<[1], [0], [0], [1], [0, 0, 1, 1], [], []>} : vector<64x32xbf16>, vector<32x32xbf16>, vector<64x32xf32> -> vector<64x32xf32>
    %c0_284 = arith.constant 0 : index
    %c0_285 = arith.constant 0 : index
    %537 = vector.load %arg28[%c0_284, %c0_285] : memref<1x32xf32, #tpu.memory_space<vmem>>, vector<1x32xf32>
    %538 = vector.broadcast %537 : vector<1x32xf32> to vector<64x32xf32>
    %539 = arith.addf %536, %538 : vector<64x32xf32>
    %c0_286 = arith.constant 0 : index
    %c0_287 = arith.constant 0 : index
    %c0_288 = arith.constant 0 : index
    %540 = vector.load %arg29[%c0_286, %c0_287, %c0_288] : memref<1x64x32xf32, #tpu.memory_space<vmem>>, vector<1x64x32xf32>
    %541 = vector.shape_cast %540 : vector<1x64x32xf32> to vector<64x32xf32>
    %542 = vector.shape_cast %539 : vector<64x32xf32> to vector<1x64x32xf32>
    tpu.vector_store %arg29[%c0_286, %c0_287, %c0_288], %542 {strides = array<i32>} : memref<1x64x32xf32, #tpu.memory_space<vmem>>, vector<1x64x32xf32>,
    return
  }
  func.func @transform_0(%arg0: i32) -> (i32, i32, i32) {
    %c0_i32 = arith.constant 0 : i32
    %c0_i32_0 = arith.constant 0 : i32
    %c0_i32_1 = arith.constant 0 : i32
    return %arg0, %c0_i32, %c0_i32_0 : i32, i32, i32
  }
  func.func @transform_1(%arg0: i32) -> (i32, i32, i32) {
    %c0_i32 = arith.constant 0 : i32
    %c0_i32_0 = arith.constant 0 : i32
    %c0_i32_1 = arith.constant 0 : i32
    return %arg0, %c0_i32, %c0_i32_0 : i32, i32, i32
  }
  func.func @transform_2(%arg0: i32) -> (i32, i32, i32) {
    %c0_i32 = arith.constant 0 : i32
    %c0_i32_0 = arith.constant 0 : i32
    %c0_i32_1 = arith.constant 0 : i32
    return %arg0, %c0_i32, %c0_i32_0 : i32, i32, i32
  }
  func.func @transform_3(%arg0: i32) -> (i32, i32) {
    %c0_i32 = arith.constant 0 : i32
    %c0_i32_0 = arith.constant 0 : i32
    %c0_i32_1 = arith.constant 0 : i32
    return %c0_i32, %c0_i32_0 : i32, i32
  }
  func.func @transform_4(%arg0: i32) -> (i32, i32) {
    %c0_i32 = arith.constant 0 : i32
    %c0_i32_0 = arith.constant 0 : i32
    %c0_i32_1 = arith.constant 0 : i32
    return %c0_i32, %c0_i32_0 : i32, i32
  }
  func.func @transform_5(%arg0: i32) -> (i32, i32) {
    %c0_i32 = arith.constant 0 : i32
    %c0_i32_0 = arith.constant 0 : i32
    %c0_i32_1 = arith.constant 0 : i32
    return %c0_i32, %c0_i32_0 : i32, i32
  }
  func.func @transform_6(%arg0: i32) -> (i32, i32) {
    %c0_i32 = arith.constant 0 : i32
    %c0_i32_0 = arith.constant 0 : i32
    %c0_i32_1 = arith.constant 0 : i32
    return %c0_i32, %c0_i32_0 : i32, i32
  }
  func.func @transform_7(%arg0: i32) -> (i32, i32) {
    %c0_i32 = arith.constant 0 : i32
    %c0_i32_0 = arith.constant 0 : i32
    %c0_i32_1 = arith.constant 0 : i32
    return %c0_i32, %c0_i32_0 : i32, i32
  }
  func.func @transform_8(%arg0: i32) -> (i32, i32) {
    %c0_i32 = arith.constant 0 : i32
    %c0_i32_0 = arith.constant 0 : i32
    %c0_i32_1 = arith.constant 0 : i32
    return %c0_i32, %c0_i32_0 : i32, i32
  }
  func.func @transform_9(%arg0: i32) -> (i32, i32) {
    %c0_i32 = arith.constant 0 : i32
    %c0_i32_0 = arith.constant 0 : i32
    %c0_i32_1 = arith.constant 0 : i32
    return %c0_i32, %c0_i32_0 : i32, i32
  }
  func.func @transform_10(%arg0: i32) -> (i32, i32, i32, i32) {
    %c0_i32 = arith.constant 0 : i32
    %c0_i32_0 = arith.constant 0 : i32
    %c0_i32_1 = arith.constant 0 : i32
    %c0_i32_2 = arith.constant 0 : i32
    %c0_i32_3 = arith.constant 0 : i32
    return %c0_i32, %c0_i32_0, %c0_i32_1, %c0_i32_2 : i32, i32, i32, i32
  }
  func.func @transform_11(%arg0: i32) -> (i32, i32, i32) {
    %c0_i32 = arith.constant 0 : i32
    %c0_i32_0 = arith.constant 0 : i32
    %c0_i32_1 = arith.constant 0 : i32
    %c0_i32_2 = arith.constant 0 : i32
    return %c0_i32, %c0_i32_0, %c0_i32_1 : i32, i32, i32
  }
  func.func @transform_12(%arg0: i32) -> (i32, i32, i32) {
    %c0_i32 = arith.constant 0 : i32
    %c0_i32_0 = arith.constant 0 : i32
    %c0_i32_1 = arith.constant 0 : i32
    %c0_i32_2 = arith.constant 0 : i32
    return %c0_i32, %c0_i32_0, %c0_i32_1 : i32, i32, i32
  }
  func.func @transform_13(%arg0: i32) -> (i32, i32) {
    %c0_i32 = arith.constant 0 : i32
    %c0_i32_0 = arith.constant 0 : i32
    %c0_i32_1 = arith.constant 0 : i32
    return %c0_i32, %c0_i32_0 : i32, i32
  }
  func.func @transform_14(%arg0: i32) -> (i32, i32, i32) {
    %c0_i32 = arith.constant 0 : i32
    %c0_i32_0 = arith.constant 0 : i32
    %c0_i32_1 = arith.constant 0 : i32
    %c0_i32_2 = arith.constant 0 : i32
    return %c0_i32, %c0_i32_0, %c0_i32_1 : i32, i32, i32
  }
  func.func @transform_15(%arg0: i32) -> (i32, i32) {
    %c0_i32 = arith.constant 0 : i32
    %c0_i32_0 = arith.constant 0 : i32
    %c0_i32_1 = arith.constant 0 : i32
    return %c0_i32, %c0_i32_0 : i32, i32
  }
  func.func @transform_16(%arg0: i32) -> (i32, i32, i32) {
    %c0_i32 = arith.constant 0 : i32
    %c0_i32_0 = arith.constant 0 : i32
    %c0_i32_1 = arith.constant 0 : i32
    %c0_i32_2 = arith.constant 0 : i32
    return %c0_i32, %c0_i32_0, %c0_i32_1 : i32, i32, i32
  }
  func.func @transform_17(%arg0: i32) -> (i32, i32) {
    %c0_i32 = arith.constant 0 : i32
    %c0_i32_0 = arith.constant 0 : i32
    %c0_i32_1 = arith.constant 0 : i32
    return %c0_i32, %c0_i32_0 : i32, i32
  }
  func.func @transform_18(%arg0: i32) -> (i32, i32, i32, i32) {
    %c0_i32 = arith.constant 0 : i32
    %c0_i32_0 = arith.constant 0 : i32
    %c0_i32_1 = arith.constant 0 : i32
    %c0_i32_2 = arith.constant 0 : i32
    %c0_i32_3 = arith.constant 0 : i32
    return %c0_i32, %c0_i32_0, %c0_i32_1, %c0_i32_2 : i32, i32, i32, i32
  }
  func.func @transform_19(%arg0: i32) -> (i32, i32) {
    %c0_i32 = arith.constant 0 : i32
    %c0_i32_0 = arith.constant 0 : i32
    %c0_i32_1 = arith.constant 0 : i32
    return %c0_i32, %c0_i32_0 : i32, i32
  }
  func.func @transform_20(%arg0: i32) -> (i32, i32, i32) {
    %c0_i32 = arith.constant 0 : i32
    %c0_i32_0 = arith.constant 0 : i32
    %c0_i32_1 = arith.constant 0 : i32
    %c0_i32_2 = arith.constant 0 : i32
    return %c0_i32, %c0_i32_0, %c0_i32_1 : i32, i32, i32
  }
  func.func @transform_21(%arg0: i32) -> (i32, i32) {
    %c0_i32 = arith.constant 0 : i32
    %c0_i32_0 = arith.constant 0 : i32
    %c0_i32_1 = arith.constant 0 : i32
    return %c0_i32, %c0_i32_0 : i32, i32
  }
  func.func @transform_22(%arg0: i32) -> (i32, i32, i32) {
    %c0_i32 = arith.constant 0 : i32
    %c0_i32_0 = arith.constant 0 : i32
    %c0_i32_1 = arith.constant 0 : i32
    %c0_i32_2 = arith.constant 0 : i32
    return %c0_i32, %c0_i32_0, %c0_i32_1 : i32, i32, i32
  }
  func.func @transform_23(%arg0: i32) -> (i32, i32) {
    %c0_i32 = arith.constant 0 : i32
    %c0_i32_0 = arith.constant 0 : i32
    %c0_i32_1 = arith.constant 0 : i32
    return %c0_i32, %c0_i32_0 : i32, i32
  }
  func.func @transform_24(%arg0: i32) -> (i32, i32, i32) {
    %c0_i32 = arith.constant 0 : i32
    %c0_i32_0 = arith.constant 0 : i32
    %c0_i32_1 = arith.constant 0 : i32
    %c0_i32_2 = arith.constant 0 : i32
    return %c0_i32, %c0_i32_0, %c0_i32_1 : i32, i32, i32
  }
  func.func @transform_25(%arg0: i32) -> (i32, i32) {
    %c0_i32 = arith.constant 0 : i32
    %c0_i32_0 = arith.constant 0 : i32
    %c0_i32_1 = arith.constant 0 : i32
    return %c0_i32, %c0_i32_0 : i32, i32
  }
  func.func @transform_26(%arg0: i32) -> (i32, i32) {
    %c0_i32 = arith.constant 0 : i32
    %c0_i32_0 = arith.constant 0 : i32
    %c0_i32_1 = arith.constant 0 : i32
    return %c0_i32, %c0_i32_0 : i32, i32
  }
  func.func @transform_27(%arg0: i32) -> (i32, i32) {
    %c0_i32 = arith.constant 0 : i32
    %c0_i32_0 = arith.constant 0 : i32
    %c0_i32_1 = arith.constant 0 : i32
    return %c0_i32, %c0_i32_0 : i32, i32
  }
  func.func @transform_28(%arg0: i32) -> (i32, i32, i32) {
    %c0_i32 = arith.constant 0 : i32
    %c0_i32_0 = arith.constant 0 : i32
    %c0_i32_1 = arith.constant 0 : i32
    return %arg0, %c0_i32, %c0_i32_0 : i32, i32, i32
  }
}

</mosaic_0001>

<bundles_post_ra>
// kernel: dit_forward.1
= control target key start
LH: loop header
LB: loop body
LE: loop exit
PB: predicated region body
PF: predicated region fallthrough
CT: control target
= control target key end

     0   :  { %s12341_s0 = inlined_call_operand.vmem [shape: f32[2,64,16], index: 0, kind: input, shape index: {}]   ;;  %s12342_s1 = inlined_call_operand.vmem [shape: f32[2,1,256], index: 1, kind: input, shape index: {}]   ;;  %s12343_s2 = inlined_call_operand.vmem [shape: f32[2,1,32], index: 2, kind: input, shape index: {}]   ;;  %s12344_s3 = inlined_call_operand.vmem [shape: bf16[16,32], index: 3, kind: input, shape index: {}]   ;;  %s12345_s4 = inlined_call_operand.vmem [shape: f32[1,32], index: 4, kind: input, shape index: {}]   ;;  %s12346_s5 = inlined_call_operand.vmem [shape: f32[64,32], index: 5, kind: input, shape index: {}]   ;;  %s12347_s6 = inlined_call_operand.vmem [shape: bf16[256,32], index: 6, kind: input, shape index: {}]   ;;  %s12348_s7 = inlined_call_operand.vmem [shape: f32[1,32], index: 7, kind: input, shape index: {}]   ;;  %s12349_s8 = inlined_call_operand.vmem [shape: bf16[32,32], index: 8, kind: input, shape index: {}]   ;;  %s12350_s9 = inlined_call_operand.vmem [shape: f32[1,32], index: 9, kind: input, shape index: {}]   ;;  %s12351_s10 = inlined_call_operand.vmem [shape: bf16[2,6,32,32], index: 10, kind: input, shape index: {}]   ;;  %s12352_s11 = inlined_call_operand.vmem [shape: f32[2,6,32], index: 11, kind: input, shape index: {}]   ;;  %s12353_s12 = inlined_call_operand.vmem [shape: bf16[2,32,32], index: 12, kind: input, shape index: {}]   ;;  %s12354_s13 = inlined_call_operand.vmem [shape: f32[2,32], index: 13, kind: input, shape index: {}]   ;;  %s12355_s14 = inlined_call_operand.vmem [shape: bf16[2,32,32], index: 14, kind: input, shape index: {}]   ;;  %s12356_s15 = inlined_call_operand.vmem [shape: f32[2,32], index: 15, kind: input, shape index: {}]   ;;  %s12357_s16 = inlined_call_operand.vmem [shape: bf16[2,32,32], index: 16, kind: input, shape index: {}]   ;;  %s12358_s17 = inlined_call_operand.vmem [shape: f32[2,32], index: 17, kind: input, shape index: {}]   ;;  %s12359_s18 = inlined_call_operand.vmem [shape: bf16[2,4,8,32], index: 18, kind: input, shape index: {}]   ;;  %s12360_s19 = inlined_call_operand.vmem [shape: f32[2,32], index: 19, kind: input, shape index: {}]   ;;  %s12361_s20 = inlined_call_operand.vmem [shape: bf16[2,32,128], index: 20, kind: input, shape index: {}]   ;;  %s12362_s21 = inlined_call_operand.vmem [shape: f32[2,128], index: 21, kind: input, shape index: {}]   ;;  %s12363_s22 = inlined_call_operand.vmem [shape: bf16[2,128,32], index: 22, kind: input, shape index: {}]   ;;  %s12364_s23 = inlined_call_operand.vmem [shape: f32[2,32], index: 23, kind: input, shape index: {}]   ;;  %s12365_s24 = inlined_call_operand.vmem [shape: bf16[2,32,32], index: 24, kind: input, shape index: {}]   ;;  %s12366_s25 = inlined_call_operand.vmem [shape: f32[2,32], index: 25, kind: input, shape index: {}]   ;;  %s12367_s26 = inlined_call_operand.vmem [shape: bf16[32,32], index: 26, kind: input, shape index: {}]   ;;  %s12368_s27 = inlined_call_operand.vmem [shape: f32[1,32], index: 27, kind: input, shape index: {}]   ;;  %s12369_s28 = inlined_call_operand.vmem [shape: f32[2,64,32], index: 28, kind: output, shape index: {}]  }
   0x1   :  { %12409 = sst [smem:[#allocation17_spill]] %s12341_s0 }
   0x2   :  { %12410 = sst [smem:[#allocation18_spill]] %s12342_s1 }
   0x3   :  { %12411 = sst [smem:[#allocation19_spill]] %s12343_s2 }
   0x4   :  { %12412 = sst [smem:[#allocation20_spill]] %s12344_s3 }
   0x5   :  { %12413 = sst [smem:[#allocation21_spill]] %s12345_s4 }
   0x6   :  { %12414 = sst [smem:[#allocation22_spill]] %s12346_s5 }
   0x7   :  { %12415 = sst [smem:[#allocation23_spill]] %s12347_s6 }
   0x8   :  { %12416 = sst [smem:[#allocation24_spill]] %s12348_s7 }
   0x9   :  { %12417 = sst [smem:[#allocation25_spill]] %s12349_s8  ;;  %s9989_s8 = smov 0  }
   0xa   :  { %12418 = sst [smem:[#allocation26_spill]] %s12350_s9 }
   0xb   :  { %12419 = sst [smem:[#allocation27_spill]] %s12351_s10 }
   0xc   :  { %12420 = sst [smem:[#allocation28_spill]] %s12352_s11 }
   0xd   :  { %12421 = sst [smem:[#allocation29_spill]] %s12353_s12 }
   0xe LB: > { %s7618_s5 = sadd.s32 4294967295, %s9837_s8   ;;  %p7622_p0 = scmp.ge.s32.totalorder %s9837_s8, 1  ;;  %s9837_s8 = sphi %s9989_s8, %s38_s8  }
   0xf   : > { %p779_p1 = scmp.lt.s32.totalorder %s9837_s8, 3 }
  0x11   : > { %p780_p2 = pnand %p7622_p0, %p779_p1 }
  0x13   : > { %783 = sbr.rel (%p780_p2) target bundleno = 6218 (0x184a), region = 132 }
  0x1a   : > { %s12422_s3 = sld [smem:[#allocation23_spill]]  ;;  %p860_p3 = scmp.lt.s32.totalorder %s7618_s5, 1  ;;  %vm905_vm0 = vcmask 130048   ;;  %v1001_v13 = vlaneseq  ;;  %v12379_v39 = vmov 0.0   ;;  %vm9840_vm1 = vmmov 0  }
  0x1b   : > { %s12423_s29 = sld [smem:[#allocation20_spill]]  ;;  %s12424_s6 = sld [smem:[#allocation17_spill]]  ;;  %vm1207_vm2 = vcmask 261120   ;;  %vm2303_vm3 = vcmask 64512   ;;  %vm2692_vm4 = vcmask 523264   ;;  %vm3392_vm5 = vcmask 1043456  }
  0x1c   : > { %s12497_s5 = smov (!%p860_p3, %s7618_s5), 1  ;;  %v1002_v22 = vshrl.u32 %v1001_v13, 7  ;;  %s12425_s1 = sld [smem:[#allocation18_spill]] }
  0x1d   : > { %s12376_s4 = sshll.u32 %s12497_s5, 6  ;;  %s7625_s0 = sshll.u32 %s12497_s5, 1 }
  0x1e   : > { %v1007_v26 = vsub.s32 1, %v1002_v22  ;;  %v10055_v30 = vsub.s32 0, %v1002_v22  ;;  %s12428_s2 = sld [smem:[#allocation21_spill]]  ;;  %s12439_s7 = sld [smem:[#allocation27_spill]] }
  0x1f   : > { %s12393_s30 = smov 104   ;;  %s12477_s11 = smov 104  }
  0x20   : > { %v9374_v0 = vld [vmem:[%s12422_s3 + $0x40] sm:$0xff]   ;;  %v9377_v3 = vld [vmem:[%s12422_s3 + $0x48] sm:$0xff]   ;;  %v9379_v5 = vld [vmem:[%s12422_s3 + $0x50] sm:$0xff]   ;;  %12426 = vst [vmem:[#allocation2_spill] sm:$0xff] %v10055_v30 }
  0x21   : > { %v9375_v1 = vld [vmem:[%s12422_s3] sm:$0xff]   ;;  %7978 = vmatprep.subr.bf16.mxu1 %v9374_v0  ;;  %v9378_v4 = vld [vmem:[%s12422_s3 + $0x8] sm:$0xff]   ;;  %s864_s10 = scalar_lea.vmem %s12424_s6, %s12376_s4  ;;  %v9380_v12 = vld [vmem:[%s12422_s3 + $0x10] sm:$0xff]  }
  0x22   : > { %v9376_v2 = vld [vmem:[%s12423_s29] sm:$0xff]   ;;  %7979 = vmatpush3.bf16.msra.mxu1 %v9375_v1  ;;  %v879_v7 = vld [vmem:[%s864_s10 + $0x8] sm:$0xff]  ;;  %v880_v8 = vld [vmem:[%s864_s10 + $0x10] sm:$0xff]  ;;  %s868_s9 = scalar_lea.vmem %s12425_s1, %s7625_s0  ;;  %s12438_s29 = sld [smem:[#allocation24_spill]] }
  0x23   : > { %8291 = vmatprep.subr.bf16.mxu0 %v9376_v2  ;;  %7980 = vmatprep.subr.bf16.mxu1 %v9377_v3  ;;  %v878_v6 = vld [vmem:[%s864_s10] sm:$0xff]  ;;  %v881_v10 = vld [vmem:[%s864_s10 + $0x18] sm:$0xff]  ;;  %v883_v17 = vld [vmem:[%s864_s10 + $0x28] sm:$0xff]  ;;  %s12440_s0 = sld [smem:[#allocation19_spill]] }
  0x24   : > { %8292 = vmatpush3.bf16.msra.mxu0 %v9376_v2  ;;  %v886_v9 = vpack.c.bf16 %v879_v7, %v878_v6  ;;  %v887_v11 = vpack.c.bf16 %v881_v10, %v880_v8  ;;  %v9381_v14 = vld [vmem:[%s12422_s3 + $0x58] sm:$0xff]   ;;  %v882_v16 = vld [vmem:[%s864_s10 + $0x20] sm:$0xff]  ;;  %v884_v19 = vld [vmem:[%s864_s10 + $0x30] sm:$0xff] }
  0x25   : > { %v9382_v15 = vld [vmem:[%s12422_s3 + $0x18] sm:$0xff]   ;;  %v888_v18 = vpack.c.bf16 %v883_v17, %v882_v16  ;;  %v9383_v21 = vld [vmem:[%s12422_s3 + $0x60] sm:$0xff]   ;;  %v9385_v25 = vld [vmem:[%s12422_s3 + $0x68] sm:$0xff]   ;;  %8301 = vmatprep.subr.bf16.mxu0 %v12379_v39 }
  0x26   : > { %7981 = vmatpush3.bf16.msra.mxu1 %v9378_v4  ;;  %8293 = vmatprep.mubr.msk.bf16.mxu0 %vm905_vm0, %v886_v9  ;;  %v885_v20 = vld [vmem:[%s864_s10 + $0x38] sm:$0xff]  ;;  %v9384_v24 = vld [vmem:[%s12422_s3 + $0x20] sm:$0xff]   ;;  %v9386_v27 = vld [vmem:[%s12422_s3 + $0x28] sm:$0xff]   ;;  %s12429_s10 = sld [smem:[#allocation22_spill]] }
  0x27   : > { %7982 = vmatprep.subr.bf16.mxu1 %v9379_v5  ;;  %8294 = vmatmul.mubr.msk.bf16.vlgmr.msra.gmra.mrb[0].mxu0 %vm905_vm0, %v887_v11  ;;  %v889_v23 = vpack.c.bf16 %v885_v20, %v884_v19  ;;  %v9387_v28 = vld [vmem:[%s12422_s3 + $0x70] sm:$0xff]   ;;  %v999_v29 = vld [vmem:[%s868_s9] sm:$0x3]  ;;  %v9389_v33 = vld [vmem:[%s12422_s3 + $0x78] sm:$0xff]   ;;  %s12427_s9 = sld [smem:[#allocation25_spill]] }
  0x28   : > { %8297 = vmatprep.mubr.msk.bf16.mxu0 %vm905_vm0, %v888_v18  ;;  %v1008_v31 = vrot.slane %v999_v29, %v1007_v26  ;;  %v9388_v32 = vld [vmem:[%s12422_s3 + $0x30] sm:$0xff]   ;;  %v9390_v35 = vld [vmem:[%s12422_s3 + $0x38] sm:$0xff]   ;;  %v1004_v36 = vrot.slane %v999_v29, %v10055_v30  ;;  %v7628_v41 = vld [vmem:[%s12428_s2] ss:$0 sm:$0xff]  ;;  %s12443_s2 = sld [smem:[#allocation29_spill]] }
  0x29   : > { %v1045_v19 = vld [vmem:[%s12438_s29] sm:$0x1]  ;;  %s871_s4 = scalar_lea.vmem %s12440_s0, %s12497_s5  ;;  %s12445_s0 = sld [smem:[#allocation28_spill]] }
  0x2a   : > { %7983 = vmatpush3.bf16.msra.mxu1 %v9380_v12  ;;  %v1012_v34 = vpack.c.bf16 %v1008_v31, %v1008_v31  ;;  %v1011_v37 = vpack.c.bf16 %v1004_v36, %v1004_v36  ;;  %s9841_s29 = smov 120  }
  0x2b   : > { %7984 = vmatprep.subr.bf16.mxu1 %v9381_v14 }
  0x2c   : > { %1174 = vmatprep.mubr.bf16.mxu1 %v1012_v34  ;;  %v985_v43 = vld [vmem:[%s12429_s10 + $0x10] sm:$0xff]  ;;  %v983_v46 = vld [vmem:[%s12429_s10] sm:$0xff]  ;;  %v986_v49 = vld [vmem:[%s12429_s10 + $0x18] sm:$0xff] }
  0x2d   : > { %v9391_v38 = vld [vmem:[%s12427_s9] sm:$0xff]   ;;  %v9392_v40 = vld [vmem:[%s12427_s9 + $0x8] sm:$0xff]   ;;  %v989_v0 = vld [vmem:[%s12429_s10 + $0x30] sm:$0xff]  ;;  %s12441_s9 = sld [smem:[#allocation26_spill]] }
  0x2e   : > { %7985 = vmatpush3.bf16.msra.mxu1 %v9382_v15  ;;  %8302 = vmatpush3.bf16.msra.mxu0 %v9391_v38  ;;  %v984_v53 = vld [vmem:[%s12429_s10 + $0x8] sm:$0xff]  ;;  %v987_v2 = vld [vmem:[%s12429_s10 + $0x20] sm:$0xff]  ;;  %v990_v6 = vld [vmem:[%s12429_s10 + $0x38] sm:$0xff] }
  0x2f   : > { %7986 = vmatprep.subr.bf16.mxu1 %v9383_v21  ;;  %8298 = vmatmul.mubr.msk.bf16.gmra.mrb[4].mxu0 %vm905_vm0, %v889_v23  ;;  %v988_v8 = vld [vmem:[%s12429_s10 + $0x28] sm:$0xff] }
  0x30   : > { %8303 = vmatprep.subr.bf16.mxu0 %v12379_v39  ;;  %8305 = vmatprep.mubr.msk.bf16.mxu0 %vm9840_vm1, %v12379_v39 }
  0x32   : > { %7987 = vmatpush3.bf16.msra.mxu1 %v9384_v24  ;;  %8304 = vmatpush3.bf16.msra.mxu0 %v9392_v40 }
  0x33   : > { %7988 = vmatprep.subr.bf16.mxu1 %v9385_v25  ;;  %8309 = vmatprep.subr.bf16.mxu0 %v12379_v39 }
  0x36   : > { %7989 = vmatpush3.bf16.msra.mxu1 %v9386_v27 }
  0x37   : > { %7990 = vmatprep.subr.bf16.mxu1 %v9387_v28 }
  0x3a   : > { %7991 = vmatpush3.bf16.msra.mxu1 %v9388_v32 }
  0x3b   : > { %7992 = vmatprep.subr.bf16.mxu1 %v9389_v33 }
  0x3e   : > { %7993 = vmatpush3.bf16.msra.mxu1 %v9390_v35 }
  0x3f   : > { %8341 = vmatprep.subr.bf16.mxu1 %v12379_v39 }
  0x41   : > { %1175 = vmatmul.mubr.bf16.vlgmr.msra.gmra.mrb[0].mxu1 %v1011_v37 }
  0x42   : > { %8345 = vmatprep.mubr.msk.bf16.mxu1 %vm9840_vm1, %v12379_v39 }
  0xfa   : > { %v8295_v42 = vpop.f32.mrb[0].mxu0 }
  0xfb   : > { %v961_v44 = vadd.f32 %v8295_v42, %v7628_v41  ;;  %v952_v45 = vpop.f32.mrb[1].mxu0 }
  0xfc   : > { %v953_v47 = vadd.f32 %v7628_v41, %v952_v45  ;;  %v8296_v48 = vpop.f32.mrb[2].mxu0 }
  0xfd   : > { %v10093_v50 = vadd.f32 %v985_v43, %v961_v44  ;;  %v964_v51 = vadd.f32 %v8296_v48, %v7628_v41  ;;  %v955_v52 = vpop.f32.mrb[3].mxu0 }
  0xfe   : > { %v10098_v54 = vadd.f32 %v983_v46, %v953_v47  ;;  %v956_v55 = vadd.f32 %v7628_v41, %v955_v52 }
  0xff   : > { %12430 = vst [vmem:[#allocation3_spill] sm:$0xff] %v10093_v50  ;;  %v10100_v56 = vadd.f32 %v986_v49, %v964_v51  ;;  %v1617_v57 = vsel %vm1207_vm2, %v10093_v50, 0.0 }
 0x100   : > { %12431 = vst [vmem:[#allocation4_spill] sm:$0xff] %v10098_v54  ;;  %v10104_v58 = vadd.f32 %v984_v53, %v956_v55  ;;  %v1611_v59 = vsel %vm1207_vm2, %v10098_v54, 0.0  ;;  %1618 = vadd.xlane.f32.xlu1 %v1617_v57 }
 0x101   : > { %12432 = vst [vmem:[#allocation5_spill] sm:$0xff] %v10100_v56  ;;  %1612 = vadd.xlane.f32.xlu0 %v1611_v59  ;;  %v1620_v60 = vsel %vm1207_vm2, %v10100_v56, 0.0 }
 0x102   : > { %12433 = vst [vmem:[#allocation6_spill] sm:$0xff] %v10104_v58  ;;  %v8299_v61 = vpop.f32.mrb[4].mxu0  ;;  %v1614_v62 = vsel %vm1207_vm2, %v10104_v58, 0.0 }
 0x103   : > { %v977_v63 = vadd.f32 %v8299_v61, %v7628_v41  ;;  %v968_v1 = vpop.f32.mrb[5].mxu0 }
 0x104   : > { %v969_v3 = vadd.f32 %v7628_v41, %v968_v1  ;;  %v8300_v4 = vpop.f32.mrb[6].mxu0  ;;  %1621 = vadd.xlane.f32.xlu1 %v1620_v60 }
 0x105   : > { %1615 = vadd.xlane.f32.xlu0 %v1614_v62  ;;  %v980_v5 = vadd.f32 %v8300_v4, %v7628_v41  ;;  %v971_v7 = vpop.f32.mrb[7].mxu0  ;;  %v10124_v9 = vadd.f32 %v989_v0, %v977_v63 }
 0x106   : > { %v10126_v10 = vadd.f32 %v987_v2, %v969_v3  ;;  %v972_v11 = vadd.f32 %v7628_v41, %v971_v7 }
 0x107   : > { %12434 = vst [vmem:[#allocation7_spill] sm:$0xff] %v10124_v9  ;;  %v10128_v12 = vadd.f32 %v990_v6, %v980_v5  ;;  %v1629_v16 = vsel %vm1207_vm2, %v10124_v9, 0.0 }
 0x108   : > { %12435 = vst [vmem:[#allocation8_spill] sm:$0xff] %v10126_v10  ;;  %v10130_v13 = vadd.f32 %v988_v8, %v972_v11  ;;  %v1623_v14 = vsel %vm1207_vm2, %v10126_v10, 0.0 }
 0x109   : > { %12436 = vst [vmem:[#allocation9_spill] sm:$0xff] %v10128_v12  ;;  %1624 = vadd.xlane.f32.xlu0 %v1623_v14  ;;  %v1632_v17 = vsel %vm1207_vm2, %v10128_v12, 0.0 }
 0x10a   : > { %12437 = vst [vmem:[#allocation10_spill] sm:$0xff] %v10130_v13  ;;  %v1626_v15 = vsel %vm1207_vm2, %v10130_v13, 0.0 }
 0x10b   : > { %1627 = vadd.xlane.f32.xlu1 %v1626_v15 }
 0x10d   : > { %1630 = vadd.xlane.f32.xlu0 %v1629_v16 }
 0x10f   : > { %1633 = vadd.xlane.f32.xlu1 %v1632_v17  ;;  %v9393_v17 = vld [vmem:[%s12439_s7] sm:$0xff]  }
 0x114   : > { %v7994_v18 = vpop.f32.mrb[0].mxu1 }
 0x115   : > { %v7995_v20 = vpop.f32.mrb[1].mxu1 }
 0x116   : > { %v7996_v21 = vadd.f32 %v7995_v20, %v7994_v18  ;;  %v7997_v22 = vpop.f32.mrb[2].mxu1  ;;  %v9394_v18 = vld [vmem:[%s12439_s7 + $0x40] sm:$0xff]   ;;  %v9396_v20 = vld [vmem:[%s12439_s7 + $0x48] sm:$0xff]  }
 0x117   : > { %v7998_v23 = vpop.f32.mrb[3].mxu1  ;;  %8342 = vmatpush3.bf16.msra.mxu1 %v9394_v18 }
 0x118   : > { %v1177_v24 = vadd.f32 %v7996_v21, %v1045_v19  ;;  %8343 = vmatprep.subr.bf16.mxu1 %v12379_v39  ;;  %v9395_v19 = vld [vmem:[%s12439_s7 + $0x8] sm:$0xff]   ;;  %v1194_v21 = vld [vmem:[%s12441_s9] sm:$0x1] }
 0x119   : > { %v1251_v23 = vld [vmem:[%s871_s4] sm:$0x1]  ;;  %s12395_s4 = smov 112  }
 0x11a   : > { %v7650_v25 = vmul.f32 -1.442695, %v1177_v24 }
 0x11b   : > { %8344 = vmatpush3.bf16.msra.mxu1 %v9396_v20 }
 0x11c   : > { %9455 = vpow2.f32 %v7650_v25 }
 0x126   : > { %v9456_v26 = vpop.eup %9455 }
 0x127   : > { %v1185_v27 = vadd.f32 1.0, %v9456_v26 }
 0x129   : > { %9457 = vrcp.f32 %v1185_v27 }
 0x133   : > { %v9458_v28 = vpop.eup %9457 }
 0x134   : > { %v1188_v29 = vmul.f32 %v9458_v28, %v1177_v24 }
 0x136   : > { %v1189_v31 = vpack.c.bf16 %v1188_v29, %v1188_v29 }
 0x138   : > { %8306 = vmatmul.mubr.msk.bf16.vlgmr.msra.gmra.mrb[8].mxu0 %vm1207_vm2, %v1189_v31 }
 0x139   : > { %8313 = vmatprep.mubr.msk.bf16.mxu0 %vm9840_vm1, %v12379_v39  ;;  %8310 = vmatpush3.bf16.msra.mxu0 %v9393_v17 }
 0x13a   : > { %8311 = vmatprep.subr.bf16.mxu0 %v12379_v39 }
 0x13d   : > { %8312 = vmatpush3.bf16.msra.mxu0 %v9395_v19 }
 0x13e   : > { %8317 = vmatprep.subr.bf16.mxu0 %v12379_v39 }
 0x18d   : > { %v1619_v32 = vpop.xlane.xlu1 %1618 }
 0x18e   : > { %v1613_v33 = vpop.xlane.xlu0 %1612  ;;  %v1638_v34 = vmul.f32 0.03125, %v1619_v32 }
 0x18f   : > { %v1636_v35 = vmul.f32 0.03125, %v1613_v33 }
 0x190   : > { %v10147_v36 = vsub.f32 %v10093_v50, %v1638_v34 }
 0x191   : > { %v10150_v37 = vsub.f32 %v10098_v54, %v1636_v35  ;;  %v1622_v38 = vpop.xlane.xlu1 %1621  ;;  %v9397_v35 = vld [vmem:[%s12439_s7 + $0x10] sm:$0xff]  }
 0x192   : > { %v1616_v40 = vpop.xlane.xlu0 %1615  ;;  %v1639_v41 = vmul.f32 0.03125, %v1622_v38  ;;  %v1654_v44 = vmul.f32 %v10147_v36, %v10147_v36 }
 0x193   : > { %v1637_v42 = vmul.f32 0.03125, %v1616_v40  ;;  %v1652_v43 = vmul.f32 %v10150_v37, %v10150_v37  ;;  %v9398_v40 = vld [vmem:[%s12439_s7 + $0x18] sm:$0xff]  }
 0x194   : > { %v10157_v45 = vsub.f32 %v10100_v56, %v1639_v41  ;;  %v1666_v51 = vsel %vm1207_vm2, %v1654_v44, 0.0  ;;  %v9399_v41 = vld [vmem:[%s12439_s7 + $0x20] sm:$0xff]   ;;  %v9402_v44 = vld [vmem:[%s12439_s7 + $0x38] sm:$0xff]  }
 0x195   : > { %v10160_v46 = vsub.f32 %v10104_v58, %v1637_v42  ;;  %v1660_v47 = vsel %vm1207_vm2, %v1652_v43, 0.0  ;;  %v9400_v42 = vld [vmem:[%s12439_s7 + $0x28] sm:$0xff]   ;;  %v9401_v43 = vld [vmem:[%s12439_s7 + $0x30] sm:$0xff]  }
 0x196   : > { %1661 = vadd.xlane.f32.xlu0 %v1660_v47  ;;  %v1625_v48 = vpop.xlane.xlu0 %1624  ;;  %v1655_v53 = vmul.f32 %v10157_v45, %v10157_v45  ;;  %v9403_v47 = vld [vmem:[%s12439_s7 + $0x50] sm:$0xff]  }
 0x197   : > { %v1640_v49 = vmul.f32 0.03125, %v1625_v48  ;;  %v1653_v52 = vmul.f32 %v10160_v46, %v10160_v46  ;;  %v9404_v48 = vld [vmem:[%s12439_s7 + $0x58] sm:$0xff]  }
 0x198   : > { %v1628_v55 = vpop.xlane.xlu1 %1627  ;;  %v1669_v0 = vsel %vm1207_vm2, %v1655_v53, 0.0  ;;  %v9408_v53 = vld [vmem:[%s12355_s14 + $0x8] sm:$0xff]  }
 0x199   : > { %v10169_v57 = vsub.f32 %v10126_v10, %v1640_v49  ;;  %v1641_v59 = vmul.f32 0.03125, %v1628_v55  ;;  %v1663_v60 = vsel %vm1207_vm2, %v1653_v52, 0.0  ;;  %v9405_v49 = vld [vmem:[%s12443_s2] sm:$0xff]   ;;  %v9407_v52 = vld [vmem:[%s12443_s2 + $0x8] sm:$0xff]  }
 0x19a   : > { %1667 = vadd.xlane.f32.xlu0 %v1666_v51  ;;  %1664 = vadd.xlane.f32.xlu1 %v1663_v60  ;;  %v1631_v61 = vpop.xlane.xlu0 %1630  ;;  %v9406_v51 = vld [vmem:[%s12355_s14] sm:$0xff]  }
 0x19b   : > { %v10173_v62 = vsub.f32 %v10130_v13, %v1641_v59  ;;  %v1642_v63 = vmul.f32 0.03125, %v1631_v61  ;;  %v1656_v1 = vmul.f32 %v10169_v57, %v10169_v57  ;;  %8357 = vmatprep.subr.bf16.mxu1 %v9405_v49  ;;  %v10284_v55 = vld [vmem:[%s12357_s16] sm:$0xff]  }
 0x19c   : > { %v1634_v2 = vpop.xlane.xlu1 %1633 }
 0x19d   : > { %v10179_v3 = vsub.f32 %v10124_v9, %v1642_v63  ;;  %v1643_v4 = vmul.f32 0.03125, %v1634_v2  ;;  %v1672_v5 = vsel %vm1207_vm2, %v1656_v1, 0.0  ;;  %v1657_v6 = vmul.f32 %v10173_v62, %v10173_v62 }
 0x19e   : > { %1670 = vadd.xlane.f32.xlu1 %v1669_v0  ;;  %1673 = vadd.xlane.f32.xlu0 %v1672_v5 }
 0x19f   : > { %v10185_v7 = vsub.f32 %v10128_v12, %v1643_v4  ;;  %v1675_v8 = vsel %vm1207_vm2, %v1657_v6, 0.0  ;;  %v1658_v11 = vmul.f32 %v10179_v3, %v10179_v3 }
 0x1a1   : > { %v1678_v14 = vsel %vm1207_vm2, %v1658_v11, 0.0  ;;  %v1659_v15 = vmul.f32 %v10185_v7, %v10185_v7 }
 0x1a2   : > { %1676 = vadd.xlane.f32.xlu1 %v1675_v8  ;;  %1679 = vadd.xlane.f32.xlu0 %v1678_v14 }
 0x1a3   : > { %v1681_v16 = vsel %vm1207_vm2, %v1659_v15, 0.0 }
 0x1a6   : > { %1682 = vadd.xlane.f32.xlu1 %v1681_v16 }
 0x20b   : > { %v1245_v22 = vpop.f32.mrb[8].mxu0 }
 0x20c   : > { %v1246_v24 = vadd.f32 %v1245_v22, %v1194_v21  ;;  %v8307_v25 = vpop.f32.mrb[9].mxu0 }
 0x20d   : > { %v1248_v26 = vpop.f32.mrb[10].mxu0 }
 0x20e   : > { %v1252_v27 = vadd.f32 %v1251_v23, %v1246_v24  ;;  %v8308_v28 = vpop.f32.mrb[11].mxu0 }
 0x210   : > { %v7654_v29 = vmul.f32 -1.442695, %v1252_v27 }
 0x212   : > { %9459 = vpow2.f32 %v7654_v29 }
 0x21c   : > { %v9460_v31 = vpop.eup %9459 }
 0x21d   : > { %v1256_v32 = vadd.f32 1.0, %v9460_v31 }
 0x21f   : > { %9461 = vrcp.f32 %v1256_v32 }
 0x223   : > { %v1662_v59 = vpop.xlane.xlu0 %1661 }
 0x224   : > { %v1684_v2 = vmul.f32 0.03125, %v1662_v59 }
 0x226   : > { %v1692_v11 = vadd.f32 1e-06, %v1684_v2 }
 0x227   : > { %v1665_v60 = vpop.xlane.xlu1 %1664  ;;  %v1668_v61 = vpop.xlane.xlu0 %1667 }
 0x228   : > { %v1685_v4 = vmul.f32 0.03125, %v1665_v60  ;;  %v1686_v5 = vmul.f32 0.03125, %v1668_v61  ;;  %9463 = vrsqrt.f32 %v1692_v11 }
 0x229   : > { %v9462_v33 = vpop.eup %9461 }
 0x22a   : > { %v1259_v34 = vmul.f32 %v9462_v33, %v1252_v27  ;;  %v1693_v16 = vadd.f32 1e-06, %v1685_v4  ;;  %v1694_v18 = vadd.f32 1e-06, %v1686_v5 }
 0x22b   : > { %v1671_v63 = vpop.xlane.xlu1 %1670  ;;  %v1674_v0 = vpop.xlane.xlu0 %1673 }
 0x22c   : > { %v10219_v38 = vpack.c.bf16 %v1259_v34, %v1259_v34  ;;  %v1687_v6 = vmul.f32 0.03125, %v1671_v63  ;;  %v1688_v14 = vmul.f32 0.03125, %v1674_v0  ;;  %9465 = vrsqrt.f32 %v1693_v16 }
 0x22d   : > { %9467 = vrsqrt.f32 %v1694_v18 }
 0x22e   : > { %12442 = vst [vmem:[#allocation11_spill] sm:$0xff] %v10219_v38  ;;  %8314 = vmatmul.mubr.msk.bf16.vlgmr.msra.gmra.mrb[12].mxu0 %vm1207_vm2, %v10219_v38  ;;  %8346 = vmatmul.mubr.msk.bf16.vlgmr.msra.gmra.mrb[4].mxu1 %vm1207_vm2, %v10219_v38  ;;  %v1695_v20 = vadd.f32 1e-06, %v1687_v6  ;;  %v1696_v22 = vadd.f32 1e-06, %v1688_v14 }
 0x22f   : > { %8318 = vmatpush3.bf16.msra.mxu0 %v9397_v35  ;;  %8321 = vmatprep.mubr.msk.bf16.mxu0 %vm9840_vm1, %v12379_v39  ;;  %v1677_v1 = vpop.xlane.xlu1 %1676  ;;  %v1680_v8 = vpop.xlane.xlu0 %1679 }
 0x230   : > { %8319 = vmatprep.subr.bf16.mxu0 %v12379_v39  ;;  %8358 = vmatpush3.bf16.msra.mxu1 %v9405_v49  ;;  %v1689_v17 = vmul.f32 0.03125, %v1677_v1  ;;  %v1690_v19 = vmul.f32 0.03125, %v1680_v8  ;;  %9469 = vrsqrt.f32 %v1695_v20 }
 0x231   : > { %8359 = vmatprep.subr.bf16.mxu1 %v9407_v52  ;;  %9471 = vrsqrt.f32 %v1696_v22 }
 0x232   : > { %v1697_v23 = vadd.f32 1e-06, %v1689_v17  ;;  %v1698_v24 = vadd.f32 1e-06, %v1690_v19  ;;  %v9464_v35 = vpop.eup %9463 }
 0x233   : > { %8320 = vmatpush3.bf16.msra.mxu0 %v9398_v40  ;;  %v1683_v15 = vpop.xlane.xlu1 %1682  ;;  %v1708_v1 = vmul.f32 %v9464_v35, %v10150_v37  ;;  %v9410_v35 = vld [vmem:[%s12357_s16 + $0x8] sm:$0xff]  }
 0x234   : > { %8325 = vmatprep.subr.bf16.mxu0 %v12379_v39  ;;  %8360 = vmatpush3.bf16.msra.mxu1 %v9407_v52  ;;  %v1691_v21 = vmul.f32 0.03125, %v1683_v15  ;;  %9473 = vrsqrt.f32 %v1697_v23 }
 0x235   : > { %8381 = vmatprep.subr.bf16.mxu1 %v10284_v55  ;;  %9475 = vrsqrt.f32 %v1698_v24 }
 0x236   : > { %8322 = vmatmul.mubr.msk.bf16.vlgmr.msra.gmra.mrb[16].mxu0 %vm1207_vm2, %v10219_v38  ;;  %v1699_v25 = vadd.f32 1e-06, %v1691_v21  ;;  %v9466_v40 = vpop.eup %9465 }
 0x237   : > { %8326 = vmatpush3.bf16.msra.mxu0 %v9399_v41  ;;  %8329 = vmatprep.mubr.msk.bf16.mxu0 %vm9840_vm1, %v12379_v39  ;;  %v9468_v41 = vpop.eup %9467  ;;  %v1709_v2 = vmul.f32 %v9466_v40, %v10160_v46 }
 0x238   : > { %8327 = vmatprep.subr.bf16.mxu0 %v12379_v39  ;;  %9477 = vrsqrt.f32 %v1699_v25  ;;  %v1710_v4 = vmul.f32 %v9468_v41, %v10147_v36 }
 0x23b   : > { %8328 = vmatpush3.bf16.msra.mxu0 %v9400_v42  ;;  %v1326_v42 = vld [vmem:[%s12445_s0 + $0x1] sm:$0x1] }
 0x23c   : > { %8333 = vmatprep.subr.bf16.mxu0 %v12379_v39 }
 0x23e   : > { %8330 = vmatmul.mubr.msk.bf16.vlgmr.msra.gmra.mrb[20].mxu0 %vm1207_vm2, %v10219_v38 }
 0x23f   : > { %8334 = vmatpush3.bf16.msra.mxu0 %v9401_v43  ;;  %8337 = vmatprep.mubr.msk.bf16.mxu0 %vm9840_vm1, %v12379_v39  ;;  %v9470_v43 = vpop.eup %9469 }
 0x240   : > { %8335 = vmatprep.subr.bf16.mxu0 %v12379_v39  ;;  %v1711_v5 = vmul.f32 %v9470_v43, %v10157_v45 }
 0x243   : > { %8336 = vmatpush3.bf16.msra.mxu0 %v9402_v44  ;;  %v1265_v44 = vld [vmem:[%s12445_s0] sm:$0x1] }
 0x244   : > { %8349 = vmatprep.subr.bf16.mxu0 %v12379_v39 }
 0x246   : > { %8338 = vmatmul.mubr.msk.bf16.vlgmr.msra.gmra.mrb[24].mxu0 %vm1207_vm2, %v10219_v38 }
 0x247   : > { %8350 = vmatpush3.bf16.msra.mxu0 %v9403_v47  ;;  %8353 = vmatprep.mubr.msk.bf16.mxu0 %vm9840_vm1, %v12379_v39  ;;  %v9472_v47 = vpop.eup %9471 }
 0x248   : > { %8351 = vmatprep.subr.bf16.mxu0 %v12379_v39  ;;  %v9474_v49 = vpop.eup %9473  ;;  %v1712_v8 = vmul.f32 %v9472_v47, %v10169_v57 }
 0x249   : > { %v1713_v14 = vmul.f32 %v9474_v49, %v10173_v62 }
 0x24b   : > { %8352 = vmatpush3.bf16.msra.mxu0 %v9404_v48 }
 0x24c   : > { %8369 = vmatprep.subr.bf16.mxu0 %v9406_v51 }
 0x24e   : > { %8354 = vmatmul.mubr.msk.bf16.vlgmr.msra.gmra.mrb[28].mxu0 %vm1207_vm2, %v10219_v38 }
 0x24f   : > { %8370 = vmatpush3.bf16.msra.mxu0 %v9406_v51 }
 0x250   : > { %8371 = vmatprep.subr.bf16.mxu0 %v9408_v53 }
 0x253   : > { %8372 = vmatpush3.bf16.msra.mxu0 %v9408_v53  ;;  %v9476_v53 = vpop.eup %9475 }
 0x254   : > { %v9478_v61 = vpop.eup %9477  ;;  %v1714_v15 = vmul.f32 %v9476_v53, %v10179_v3  ;;  %v7700_v53 = vld [vmem:[%s12356_s15] ss:$0 sm:$0xff] }
 0x255   : > { %v1715_v16 = vmul.f32 %v9478_v61, %v10185_v7 }
 0x301   : > { %v1315_v26 = vpop.f32.mrb[12].mxu0  ;;  %v10287_v27 = vpop.f32.mrb[4].mxu1 }
 0x302   : > { %12444 = vst [vmem:[#allocation12_spill] sm:$0xff] %v10287_v27  ;;  %v8315_v28 = vpop.f32.mrb[13].mxu0  ;;  %v8347_v29 = vpop.f32.mrb[5].mxu1  ;;  %v1316_v59 = vadd.f32 %v1315_v26, %v1265_v44 }
 0x303   : > { %v1318_v31 = vpop.f32.mrb[14].mxu0  ;;  %v1550_v32 = vpop.f32.mrb[6].mxu1 }
 0x304   : > { %v8316_v33 = vpop.f32.mrb[15].mxu0  ;;  %v8348_v34 = vpop.f32.mrb[7].mxu1  ;;  %v1732_v11 = vrot.slane %v1316_v59, %v10055_v30 }
 0x309   : > { %v1373_v48 = vpop.f32.mrb[16].mxu0 }
 0x30a   : > { %v1374_v51 = vadd.f32 %v1373_v48, %v1326_v42  ;;  %v8323_v52 = vpop.f32.mrb[17].mxu0 }
 0x30b   : > { %v1376_v60 = vpop.f32.mrb[18].mxu0 }
 0x30c   : > { %v1716_v63 = vadd.f32 1.0, %v1374_v51  ;;  %v8324_v0 = vpop.f32.mrb[19].mxu0  ;;  %v7693_v51 = vld [vmem:[%s12354_s13] ss:$0 sm:$0xff] }
 0x30e   : > { %v1720_v6 = vrot.slane %v1716_v63, %v10055_v30 }
 0x310   : > { %v1721_v17 = vmul.f32 %v1720_v6, %v1708_v1  ;;  %v1722_v37 = vmul.f32 %v1720_v6, %v1709_v2  ;;  %v1723_v18 = vmul.f32 %v1720_v6, %v1710_v4  ;;  %v1724_v46 = vmul.f32 %v1720_v6, %v1711_v5 }
 0x311   : > { %v10305_v19 = vpop.f32.mrb[20].mxu0  ;;  %v1725_v36 = vmul.f32 %v1720_v6, %v1712_v8  ;;  %v1726_v45 = vmul.f32 %v1720_v6, %v1713_v14  ;;  %v1727_v20 = vmul.f32 %v1720_v6, %v1714_v15  ;;  %v1728_v21 = vmul.f32 %v1720_v6, %v1715_v16 }
 0x312   : > { %12446 = vst [vmem:[#allocation13_spill] sm:$0xff] %v10305_v19  ;;  %v8331_v22 = vpop.f32.mrb[21].mxu0  ;;  %v1733_v57 = vadd.f32 %v1732_v11, %v1721_v17  ;;  %v1734_v23 = vadd.f32 %v1732_v11, %v1722_v37  ;;  %v1735_v24 = vadd.f32 %v1732_v11, %v1723_v18  ;;  %v1736_v62 = vadd.f32 %v1732_v11, %v1724_v46 }
 0x313   : > { %v1434_v25 = vpop.f32.mrb[22].mxu0  ;;  %v1737_v26 = vadd.f32 %v1732_v11, %v1725_v36  ;;  %v1738_v3 = vadd.f32 %v1732_v11, %v1726_v45  ;;  %v1739_v28 = vadd.f32 %v1732_v11, %v1727_v20  ;;  %v1740_v31 = vadd.f32 %v1732_v11, %v1728_v21 }
 0x314   : > { %v8332_v7 = vpop.f32.mrb[23].mxu0  ;;  %v1741_v29 = vpack.c.bf16 %v1734_v23, %v1733_v57  ;;  %v1742_v32 = vpack.c.bf16 %v1736_v62, %v1735_v24 }
 0x315   : > { %v1743_v33 = vpack.c.bf16 %v1738_v3, %v1737_v26  ;;  %v1744_v34 = vpack.c.bf16 %v1740_v31, %v1739_v28 }
 0x316   : > { %8361 = vmatprep.mubr.msk.bf16.mxu1 %vm1207_vm2, %v1741_v29  ;;  %8373 = vmatprep.mubr.msk.bf16.mxu0 %vm1207_vm2, %v1741_v29 }
 0x317   : > { %8362 = vmatmul.mubr.msk.bf16.vlgmr.msra.gmra.mrb[8].mxu1 %vm1207_vm2, %v1742_v32  ;;  %8374 = vmatmul.mubr.msk.bf16.vlgmr.msra.gmra.mrb[32].mxu0 %vm1207_vm2, %v1742_v32 }
 0x318   : > { %8365 = vmatprep.mubr.msk.bf16.mxu1 %vm1207_vm2, %v1743_v33  ;;  %8377 = vmatprep.mubr.msk.bf16.mxu0 %vm1207_vm2, %v1743_v33 }
 0x319   : > { %v10316_v40 = vpop.f32.mrb[24].mxu0  ;;  %8382 = vmatpush3.bf16.msra.mxu1 %v10284_v55 }
 0x31a   : > { %12447 = vst [vmem:[#allocation14_spill] sm:$0xff] %v10316_v40  ;;  %v8339_v41 = vpop.f32.mrb[25].mxu0  ;;  %8383 = vmatprep.subr.bf16.mxu1 %v9410_v35 }
 0x31b   : > { %v1492_v42 = vpop.f32.mrb[26].mxu0 }
 0x31c   : > { %v8340_v43 = vpop.f32.mrb[27].mxu0 }
 0x31d   : > { %8384 = vmatpush3.bf16.msra.mxu1 %v9410_v35 }
 0x31f   : > { %8366 = vmatmul.mubr.msk.bf16.gmra.mrb[12].mxu1 %vm1207_vm2, %v1744_v34  ;;  %8378 = vmatmul.mubr.msk.bf16.gmra.mrb[36].mxu0 %vm1207_vm2, %v1744_v34 }
 0x320   : > { %8385 = vmatprep.mubr.msk.bf16.mxu1 %vm1207_vm2, %v1741_v29 }
 0x321   : > { %v10322_v44 = vpop.f32.mrb[28].mxu0 }
 0x322   : > { %12448 = vst [vmem:[#allocation15_spill] sm:$0xff] %v10322_v44  ;;  %v8355_v47 = vpop.f32.mrb[29].mxu0 }
 0x323   : > { %v1608_v48 = vpop.f32.mrb[30].mxu0 }
 0x324   : > { %v8356_v49 = vpop.f32.mrb[31].mxu0 }
 0x327   : > { %8386 = vmatmul.mubr.msk.bf16.vlgmr.msra.gmra.mrb[16].mxu1 %vm1207_vm2, %v1742_v32 }
 0x328   : > { %8389 = vmatprep.mubr.msk.bf16.mxu1 %vm1207_vm2, %v1743_v33 }
 0x32f   : > { %8390 = vmatmul.mubr.msk.bf16.gmra.mrb[20].mxu1 %vm1207_vm2, %v1744_v34 }
 0x3ea   : > { %v8363_v55 = vpop.f32.mrb[8].mxu1  ;;  %v8375_v52 = vpop.f32.mrb[32].mxu0 }
 0x3eb   : > { %v1812_v59 = vpop.f32.mrb[9].mxu1  ;;  %v1898_v60 = vpop.f32.mrb[33].mxu0  ;;  %v10333_v0 = vadd.f32 %v8363_v55, %v7693_v51  ;;  %v1907_v1 = vadd.f32 %v8375_v52, %v7700_v53  ;;  %v7707_v52 = vld [vmem:[%s12358_s17] ss:$0 sm:$0xff] }
 0x3ec   : > { %v8364_v61 = vpop.f32.mrb[10].mxu1  ;;  %v8376_v63 = vpop.f32.mrb[34].mxu0  ;;  %v1813_v8 = vadd.f32 %v7693_v51, %v1812_v59  ;;  %v1899_v11 = vadd.f32 %v7700_v53, %v1898_v60 }
 0x3ed   : > { %v10335_v2 = vadd.f32 %v8364_v61, %v7693_v51  ;;  %v1910_v4 = vadd.f32 %v8376_v63, %v7700_v53  ;;  %v1815_v5 = vpop.f32.mrb[11].mxu1  ;;  %v1901_v6 = vpop.f32.mrb[35].mxu0 }
 0x3ee   : > { %v1816_v14 = vadd.f32 %v7693_v51, %v1815_v5  ;;  %v1902_v15 = vadd.f32 %v7700_v53, %v1901_v6 }
 0x3ef   : > { %v2096_v16 = vpack.c.bf16 %v10335_v2, %v10333_v0  ;;  %v10339_v17 = vpack.i.bf16 %v1910_v4, %v1907_v1  ;;  %v2192_v37 = vpack.c.bf16 %v1910_v4, %v1907_v1  ;;  %v10343_v18 = vpack.i.bf16 %v10335_v2, %v10333_v0 }
 0x3f0   : > { %v10345_v46 = vpack.i.bf16 %v1902_v15, %v1899_v11  ;;  %v2191_v36 = vpack.c.bf16 %v1902_v15, %v1899_v11  ;;  %v2095_v45 = vpack.c.bf16 %v1816_v14, %v1813_v8  ;;  %v10347_v20 = vpack.i.bf16 %v1816_v14, %v1813_v8 }
 0x3f1   : > { %9020 = vrot.lane.b32.xlu1 %v10339_v17, %s9841_s29 }
 0x3f2   : > { %9015 = vrot.lane.b32.xlu0 %v10345_v46, %s9841_s29  ;;  %v8367_v21 = vpop.f32.mrb[12].mxu1  ;;  %v8379_v22 = vpop.f32.mrb[36].mxu0  ;;  %8961 = vmatprep.subr.msk.bf16.mxu0 %vm2303_vm3, %v2191_v36  ;;  %v2317_v57 = vsel %vm2303_vm3, %v2191_v36, 0 }
 0x3f3   : > { %8401 = vmatprep.mubr.msk.bf16.mxu0 %vm2303_vm3, %v2095_v45  ;;  %v1828_v23 = vpop.f32.mrb[13].mxu1  ;;  %v1914_v24 = vpop.f32.mrb[37].mxu0  ;;  %8394 = vmatpush3.bf16.xpose.msra.mxu0 %v2317_v57  ;;  %v10357_v26 = vadd.f32 %v8367_v21, %v7693_v51  ;;  %v1923_v3 = vadd.f32 %v8379_v22, %v7700_v53 }
 0x3f4   : > { %v8368_v25 = vpop.f32.mrb[14].mxu1  ;;  %v8380_v62 = vpop.f32.mrb[38].mxu0  ;;  %8962 = vmatprep.subr.msk.bf16.mxu0 %vm2303_vm3, %v2192_v37  ;;  %v10361_v32 = vadd.f32 %v7693_v51, %v1828_v23  ;;  %v1915_v33 = vadd.f32 %v7700_v53, %v1914_v24 }
 0x3f5   : > { %v10359_v28 = vadd.f32 %v8368_v25, %v7693_v51  ;;  %v1926_v7 = vadd.f32 %v8380_v62, %v7700_v53  ;;  %v1831_v29 = vpop.f32.mrb[15].mxu1  ;;  %v1917_v31 = vpop.f32.mrb[39].mxu0 }
 0x3f6   : > { %v1832_v34 = vadd.f32 %v7693_v51, %v1831_v29  ;;  %v1918_v35 = vadd.f32 %v7700_v53, %v1917_v31  ;;  %9035 = vrot.lane.b32.xlu0 %v10347_v20, %s9841_s29  ;;  %v2320_v53 = vsel %vm2303_vm3, %v2192_v37, 0 }
 0x3f7   : > { %v10365_v41 = vpack.i.bf16 %v1926_v7, %v1923_v3  ;;  %v10369_v42 = vpack.i.bf16 %v10359_v28, %v10357_v26  ;;  %v2194_v43 = vpack.c.bf16 %v1926_v7, %v1923_v3  ;;  %v2098_v59 = vpack.c.bf16 %v10359_v28, %v10357_v26 }
 0x3f8   : > { %v9024_v47 = vpack.i.bf16 %v1918_v35, %v1915_v33  ;;  %v2193_v48 = vpack.c.bf16 %v1918_v35, %v1915_v33  ;;  %v9054_v49 = vpack.i.bf16 %v1832_v34, %v10361_v32  ;;  %v2097_v55 = vpack.c.bf16 %v1832_v34, %v10361_v32 }
 0x3f9   : > { %v2326_v7 = vsel %vm2303_vm3, %v2194_v43, 0 }
 0x3fa   : > { %9045 = vrot.lane.b32.xlu0 %v10345_v46, %s12395_s4  ;;  %9025 = vrot.lane.b32.xlu1 %v9024_v47, %s9841_s29  ;;  %v8387_v51 = vpop.f32.mrb[16].mxu1  ;;  %v2323_v36 = vsel %vm2303_vm3, %v2193_v48, 0 }
 0x3fb   : > { %v1984_v60 = vpop.f32.mrb[17].mxu1  ;;  %8396 = vmatpush3.bf16.xpose.msra.mxu0 %v2320_v53  ;;  %v1993_v63 = vadd.f32 %v8387_v51, %v7707_v52 }
 0x3fc   : > { %v8388_v61 = vpop.f32.mrb[18].mxu1  ;;  %8963 = vmatprep.subr.msk.bf16.mxu0 %vm2303_vm3, %v2193_v48  ;;  %v1985_v5 = vadd.f32 %v7707_v52, %v1984_v60 }
 0x3fd   : > { %v1996_v1 = vadd.f32 %v8388_v61, %v7707_v52  ;;  %v1987_v4 = vpop.f32.mrb[19].mxu1 }
 0x3fe   : > { %v1988_v6 = vadd.f32 %v7707_v52, %v1987_v4  ;;  %9030 = vrot.lane.b32.xlu1 %v10365_v41, %s9841_s29  ;;  %9050 = vrot.lane.b32.xlu0 %v10369_v42, %s9841_s29 }
 0x3ff   : > { %v10387_v8 = vpack.i.bf16 %v1996_v1, %v1993_v63  ;;  %v10389_v11 = vpack.c.bf16 %v1996_v1, %v1993_v63 }
 0x400   : > { %v10391_v14 = vpack.i.bf16 %v1988_v6, %v1985_v5  ;;  %v10393_v15 = vpack.c.bf16 %v1988_v6, %v1985_v5 }
 0x402   : > { %9040 = vrot.lane.b32.xlu1 %v10343_v18, %s9841_s29  ;;  %9065 = vrot.lane.b32.xlu0 %v9024_v47, %s12395_s4  ;;  %v8391_v37 = vpop.f32.mrb[20].mxu1 }
 0x403   : > { %v2000_v45 = vpop.f32.mrb[21].mxu1  ;;  %8398 = vmatpush3.bf16.xpose.msra.mxu0 %v2323_v36  ;;  %v2009_v22 = vadd.f32 %v8391_v37, %v7707_v52 }
 0x404   : > { %v8392_v21 = vpop.f32.mrb[22].mxu1  ;;  %8964 = vmatprep.subr.msk.bf16.mxu0 %vm2303_vm3, %v2194_v43  ;;  %v2001_v24 = vadd.f32 %v7707_v52, %v2000_v45 }
 0x405   : > { %v2012_v57 = vadd.f32 %v8392_v21, %v7707_v52  ;;  %v2003_v23 = vpop.f32.mrb[23].mxu1 }
 0x406   : > { %v2004_v25 = vadd.f32 %v7707_v52, %v2003_v23  ;;  %9075 = vrot.lane.b32.xlu0 %v10365_v41, %s12395_s4  ;;  %9055 = vrot.lane.b32.xlu1 %v9054_v49, %s9841_s29 }
 0x407   : > { %v10403_v62 = vpack.i.bf16 %v2012_v57, %v2009_v22  ;;  %v10405_v26 = vpack.c.bf16 %v2012_v57, %v2009_v22 }
 0x408   : > { %v10407_v3 = vpack.i.bf16 %v2004_v25, %v2001_v24  ;;  %v10409_v28 = vpack.c.bf16 %v2004_v25, %v2001_v24 }
 0x40a   : > { %9085 = vrot.lane.b32.xlu0 %v10347_v20, %s12395_s4  ;;  %9060 = vrot.lane.b32.xlu1 %v10339_v17, %s12395_s4 }
 0x40b   : > { %8400 = vmatpush3.bf16.xpose.msra.mxu0 %v2326_v7 }
 0x40e   : > { %9095 = vrot.lane.b32.xlu0 %v9024_v47, %s12393_s30  ;;  %9070 = vrot.lane.b32.xlu1 %v10345_v46, %s12393_s30 }
 0x412   : > { %8402 = vmatmul.mubr.msk.bf16.vlgmr.msra.gmra.mrb[40].mxu0 %vm2303_vm3, %v2096_v16  ;;  %9100 = vrot.lane.b32.xlu0 %v10369_v42, %s12395_s4 }
 0x413   : > { %9080 = vrot.lane.b32.xlu1 %v10339_v17, %s12393_s30  ;;  %8405 = vmatprep.mubr.msk.bf16.mxu0 %vm2303_vm3, %v2097_v55 }
 0x416   : > { %9115 = vrot.lane.b32.xlu0 %v10347_v20, %s12393_s30 }
 0x417   : > { %9090 = vrot.lane.b32.xlu1 %v10343_v18, %s12395_s4 }
 0x41a   : > { %9125 = vrot.lane.b32.xlu0 %v9054_v49, %s12393_s30  ;;  %8406 = vmatmul.mubr.msk.bf16.gmra.mrb[44].mxu0 %vm2303_vm3, %v2098_v59 }
 0x41b   : > { %9105 = vrot.lane.b32.xlu1 %v9054_v49, %s12395_s4 }
 0x41e   : > { %9145 = vrot.lane.b32.xlu0 %v10391_v14, %s9841_s29 }
 0x41f   : > { %9110 = vrot.lane.b32.xlu1 %v10365_v41, %s12393_s30 }
 0x422   : > { %9150 = vrot.lane.b32.xlu0 %v10391_v14, %s12395_s4 }
 0x423   : > { %9120 = vrot.lane.b32.xlu1 %v10343_v18, %s12393_s30 }
 0x426   : > { %9160 = vrot.lane.b32.xlu0 %v10407_v3, %s9841_s29 }
 0x427   : > { %9130 = vrot.lane.b32.xlu1 %v10369_v42, %s12393_s30 }
 0x42b   : > { %9135 = vrot.lane.b32.xlu1 %v10387_v8, %s9841_s29 }
 0x42f   : > { %9140 = vrot.lane.b32.xlu1 %v10387_v8, %s12395_s4 }
 0x433   : > { %9155 = vrot.lane.b32.xlu1 %v10403_v62, %s9841_s29 }
 0x463   : > { %v9021_v0 = vpop.permute.xlu1 %9020 }
 0x464   : > { %v9016_v2 = vpop.permute.xlu0 %9015  ;;  %v9023_v16 = vunpack.i.h.bf16 %v9021_v0  ;;  %v9022_v17 = vunpack.i.l.bf16 %v9021_v0 }
 0x465   : > { %v9018_v18 = vunpack.i.h.bf16 %v9016_v2  ;;  %v9017_v46 = vunpack.i.l.bf16 %v9016_v2 }
 0x466   : > { %v2196_v31 = vpack.c.bf16 %v9023_v16, %v9022_v17 }
 0x467   : > { %v2195_v20 = vpack.c.bf16 %v9018_v18, %v9017_v46 }
 0x468   : > { %v9036_v29 = vpop.permute.xlu0 %9035  ;;  %v2409_v59 = vsel %vm2303_vm3, %v2196_v31, 0 }
 0x469   : > { %v9038_v32 = vunpack.i.h.bf16 %v9036_v29  ;;  %v9037_v33 = vunpack.i.l.bf16 %v9036_v29  ;;  %8965 = vmatprep.subr.msk.bf16.mxu1 %vm2303_vm3, %v2195_v20  ;;  %v2406_v34 = vsel %vm2303_vm3, %v2195_v20, 0 }
 0x46a   : > { %8410 = vmatpush3.bf16.xpose.msra.mxu1 %v2406_v34 }
 0x46b   : > { %v2099_v35 = vpack.c.bf16 %v9038_v32, %v9037_v33  ;;  %8966 = vmatprep.subr.msk.bf16.mxu1 %vm2303_vm3, %v2196_v31 }
 0x46c   : > { %v9026_v41 = vpop.permute.xlu1 %9025  ;;  %v9046_v42 = vpop.permute.xlu0 %9045 }
 0x46d   : > { %v9028_v43 = vunpack.i.h.bf16 %v9026_v41  ;;  %v9027_v47 = vunpack.i.l.bf16 %v9026_v41  ;;  %v9048_v48 = vunpack.i.h.bf16 %v9046_v42  ;;  %v9047_v49 = vunpack.i.l.bf16 %v9046_v42  ;;  %8417 = vmatprep.mubr.msk.bf16.mxu1 %vm2303_vm3, %v2099_v35 }
 0x46f   : > { %v2199_v55 = vpack.c.bf16 %v9048_v48, %v9047_v49  ;;  %v2197_v53 = vpack.c.bf16 %v9028_v43, %v9027_v47 }
 0x470   : > { %v9031_v51 = vpop.permute.xlu1 %9030  ;;  %v10457_v52 = vpop.permute.xlu0 %9050 }
 0x471   : > { %8969 = vmatprep.subr.msk.bf16.mxu0 %vm2303_vm3, %v2199_v55  ;;  %v2495_v60 = vsel %vm2303_vm3, %v2199_v55, 0  ;;  %v9033_v1 = vunpack.i.h.bf16 %v9031_v51  ;;  %v9032_v4 = vunpack.i.l.bf16 %v9031_v51  ;;  %v2412_v36 = vsel %vm2303_vm3, %v2197_v53, 0 }
 0x472   : > { %8412 = vmatpush3.bf16.xpose.msra.mxu1 %v2409_v59  ;;  %8426 = vmatpush3.bf16.xpose.msra.mxu0 %v2495_v60 }
 0x473   : > { %8967 = vmatprep.subr.msk.bf16.mxu1 %vm2303_vm3, %v2197_v53  ;;  %v2198_v37 = vpack.c.bf16 %v9033_v1, %v9032_v4 }
 0x474   : > { %v9041_v61 = vpop.permute.xlu1 %9040  ;;  %v9066_v63 = vpop.permute.xlu0 %9065 }
 0x475   : > { %v9068_v25 = vunpack.i.h.bf16 %v9066_v63  ;;  %v9067_v7 = vunpack.i.l.bf16 %v9066_v63  ;;  %v2415_v20 = vsel %vm2303_vm3, %v2198_v37, 0  ;;  %v9043_v32 = vunpack.i.h.bf16 %v9041_v61 }
 0x476   : > { %v9042_v33 = vunpack.i.l.bf16 %v9041_v61 }
 0x477   : > { %v2201_v29 = vpack.c.bf16 %v9068_v25, %v9067_v7 }
 0x478   : > { %v9056_v5 = vpop.permute.xlu1 %9055  ;;  %v9076_v6 = vpop.permute.xlu0 %9075  ;;  %v2100_v51 = vpack.c.bf16 %v9043_v32, %v9042_v33 }
 0x479   : > { %v9058_v35 = vunpack.i.h.bf16 %v9056_v5  ;;  %v9057_v41 = vunpack.i.l.bf16 %v9056_v5  ;;  %v9078_v47 = vunpack.i.h.bf16 %v9076_v6  ;;  %v9077_v48 = vunpack.i.l.bf16 %v9076_v6 }
 0x47a   : > { %8414 = vmatpush3.bf16.xpose.msra.mxu1 %v2412_v36  ;;  %v2501_v4 = vsel %vm2303_vm3, %v2201_v29, 0  ;;  %v9053_v5 = vunpack.i.h.bf16 %v10457_v52  ;;  %v9052_v6 = vunpack.i.l.bf16 %v10457_v52 }
 0x47b   : > { %8968 = vmatprep.subr.msk.bf16.mxu1 %vm2303_vm3, %v2198_v37  ;;  %v2101_v53 = vpack.c.bf16 %v9058_v35, %v9057_v41  ;;  %v2202_v1 = vpack.c.bf16 %v9078_v47, %v9077_v48 }
 0x47c   : > { %v9061_v45 = vpop.permute.xlu1 %9060  ;;  %v9086_v21 = vpop.permute.xlu0 %9085 }
 0x47d   : > { %v9063_v22 = vunpack.i.h.bf16 %v9061_v45  ;;  %v9062_v57 = vunpack.i.l.bf16 %v9061_v45  ;;  %v9088_v23 = vunpack.i.h.bf16 %v9086_v21  ;;  %v9087_v24 = vunpack.i.l.bf16 %v9086_v21 }
 0x47e   : > { %v2504_v52 = vsel %vm2303_vm3, %v2202_v1, 0 }
 0x47f   : > { %v2200_v0 = vpack.c.bf16 %v9063_v22, %v9062_v57  ;;  %v2103_v2 = vpack.c.bf16 %v9088_v23, %v9087_v24  ;;  %v2102_v57 = vpack.c.bf16 %v9053_v5, %v9052_v6 }
 0x480   : > { %v9071_v16 = vpop.permute.xlu1 %9070  ;;  %v9096_v17 = vpop.permute.xlu0 %9095 }
 0x481   : > { %v9073_v18 = vunpack.i.h.bf16 %v9071_v16  ;;  %v9072_v46 = vunpack.i.l.bf16 %v9071_v16  ;;  %8970 = vmatprep.subr.msk.bf16.mxu0 %vm2303_vm3, %v2200_v0  ;;  %8433 = vmatprep.mubr.msk.bf16.mxu0 %vm2303_vm3, %v2103_v2  ;;  %v2498_v31 = vsel %vm2303_vm3, %v2200_v0, 0  ;;  %v9098_v45 = vunpack.i.h.bf16 %v9096_v17 }
 0x482   : > { %8416 = vmatpush3.bf16.xpose.msra.mxu1 %v2415_v20  ;;  %8428 = vmatpush3.bf16.xpose.msra.mxu0 %v2498_v31  ;;  %v9097_v21 = vunpack.i.l.bf16 %v9096_v17 }
 0x483   : > { %v2203_v34 = vpack.c.bf16 %v9073_v18, %v9072_v46  ;;  %8971 = vmatprep.subr.msk.bf16.mxu0 %vm2303_vm3, %v2201_v29 }
 0x484   : > { %v10470_v42 = vpop.permute.xlu0 %9100  ;;  %v2205_v24 = vpack.c.bf16 %v9098_v45, %v9097_v21 }
 0x485   : > { %v9081_v43 = vpop.permute.xlu1 %9080  ;;  %8973 = vmatprep.subr.msk.bf16.mxu1 %vm2303_vm3, %v2203_v34  ;;  %v2584_v63 = vsel %vm2303_vm3, %v2203_v34, 0  ;;  %v9102_v47 = vunpack.i.l.bf16 %v10470_v42 }
 0x486   : > { %v9083_v49 = vunpack.i.h.bf16 %v9081_v43  ;;  %v9082_v55 = vunpack.i.l.bf16 %v9081_v43  ;;  %v2590_v35 = vsel %vm2303_vm3, %v2205_v24, 0  ;;  %v9103_v43 = vunpack.i.h.bf16 %v10470_v42 }
 0x488   : > { %v2204_v59 = vpack.c.bf16 %v9083_v49, %v9082_v55  ;;  %v9116_v61 = vpop.permute.xlu0 %9115 }
 0x489   : > { %v9091_v60 = vpop.permute.xlu1 %9090  ;;  %8418 = vmatmul.mubr.msk.bf16.vlgmr.msra.gmra.mrb[24].mxu1 %vm2303_vm3, %v2100_v51  ;;  %v9118_v37 = vunpack.i.h.bf16 %v9116_v61  ;;  %v9117_v36 = vunpack.i.l.bf16 %v9116_v61 }
 0x48a   : > { %8421 = vmatprep.mubr.msk.bf16.mxu1 %vm2303_vm3, %v2101_v53  ;;  %8442 = vmatpush3.bf16.xpose.msra.mxu1 %v2584_v63  ;;  %v2587_v7 = vsel %vm2303_vm3, %v2204_v59, 0  ;;  %v9093_v2 = vunpack.i.h.bf16 %v9091_v60  ;;  %v9092_v16 = vunpack.i.l.bf16 %v9091_v60  ;;  %v2106_v53 = vpack.c.bf16 %v9103_v43, %v9102_v47 }
 0x48b   : > { %8430 = vmatpush3.bf16.xpose.msra.mxu0 %v2501_v4  ;;  %8974 = vmatprep.subr.msk.bf16.mxu1 %vm2303_vm3, %v2204_v59  ;;  %v2107_v23 = vpack.c.bf16 %v9118_v37, %v9117_v36 }
 0x48c   : > { %8972 = vmatprep.subr.msk.bf16.mxu0 %vm2303_vm3, %v2202_v1  ;;  %v9126_v0 = vpop.permute.xlu0 %9125  ;;  %v2104_v31 = vpack.c.bf16 %v9093_v2, %v9092_v16 }
 0x48d   : > { %v9106_v22 = vpop.permute.xlu1 %9105  ;;  %v9128_v1 = vunpack.i.h.bf16 %v9126_v0  ;;  %v9127_v4 = vunpack.i.l.bf16 %v9126_v0 }
 0x48e   : > { %v9108_v17 = vunpack.i.h.bf16 %v9106_v22  ;;  %v9107_v18 = vunpack.i.l.bf16 %v9106_v22 }
 0x48f   : > { %v2109_v21 = vpack.c.bf16 %v9128_v1, %v9127_v4 }
 0x490   : > { %v2105_v32 = vpack.c.bf16 %v9108_v17, %v9107_v18  ;;  %v9146_v33 = vpop.permute.xlu0 %9145 }
 0x491   : > { %v9111_v25 = vpop.permute.xlu1 %9110  ;;  %8422 = vmatmul.mubr.msk.bf16.gmra.mrb[28].mxu1 %vm2303_vm3, %v2102_v57  ;;  %v9148_v48 = vunpack.i.h.bf16 %v9146_v33  ;;  %v9147_v49 = vunpack.i.l.bf16 %v9146_v33 }
 0x492   : > { %8444 = vmatpush3.bf16.xpose.msra.mxu1 %v2587_v7  ;;  %8449 = vmatprep.mubr.msk.bf16.mxu1 %vm2303_vm3, %v2107_v23  ;;  %v9113_v20 = vunpack.i.h.bf16 %v9111_v25  ;;  %v9112_v29 = vunpack.i.l.bf16 %v9111_v25 }
 0x493   : > { %8432 = vmatpush3.bf16.xpose.msra.mxu0 %v2504_v52  ;;  %8975 = vmatprep.subr.msk.bf16.mxu1 %vm2303_vm3, %v2205_v24 }
 0x494   : > { %8457 = vmatprep.subr.bf16.mxu0 %v10393_v15  ;;  %v2206_v41 = vpack.c.bf16 %v9113_v20, %v9112_v29  ;;  %v9151_v51 = vpop.permute.xlu0 %9150 }
 0x495   : > { %v9121_v46 = vpop.permute.xlu1 %9120  ;;  %v9153_v60 = vunpack.i.h.bf16 %v9151_v51  ;;  %v9152_v61 = vunpack.i.l.bf16 %v9151_v51 }
 0x496   : > { %v2593_v59 = vsel %vm2303_vm3, %v2206_v41, 0  ;;  %v9123_v42 = vunpack.i.h.bf16 %v9121_v46  ;;  %v9122_v63 = vunpack.i.l.bf16 %v9121_v46 }
 0x497   : > { %v10503_v36 = vpack.c.bf16 %v9153_v60, %v9152_v61 }
 0x498   : > { %v9161_v37 = vpop.permute.xlu0 %9160  ;;  %v2108_v45 = vpack.c.bf16 %v9123_v42, %v9122_v63 }
 0x499   : > { %v9131_v34 = vpop.permute.xlu1 %9130  ;;  %v9163_v22 = vunpack.i.h.bf16 %v9161_v37 }
 0x49a   : > { %8434 = vmatmul.mubr.msk.bf16.vlgmr.msra.gmra.mrb[48].mxu0 %vm2303_vm3, %v2104_v31  ;;  %8446 = vmatpush3.bf16.xpose.msra.mxu1 %v2590_v35  ;;  %v9133_v24 = vunpack.i.h.bf16 %v9131_v34  ;;  %v9132_v25 = vunpack.i.l.bf16 %v9131_v34 }
 0x49b   : > { %8437 = vmatprep.mubr.msk.bf16.mxu0 %vm2303_vm3, %v2105_v32  ;;  %8458 = vmatpush3.bf16.msra.mxu0 %v10393_v15  ;;  %v2291_v15 = vpack.c.bf16 %v9148_v48, %v9147_v49 }
 0x49c   : > { %8976 = vmatprep.subr.msk.bf16.mxu1 %vm2303_vm3, %v2206_v41  ;;  %8459 = vmatprep.subr.bf16.mxu0 %v10389_v11 }
 0x49d   : > { %v9136_v55 = vpop.permute.xlu1 %9135 }
 0x49e   : > { %v9137_v6 = vunpack.i.l.bf16 %v9136_v55 }
 0x49f   : > { %8460 = vmatpush3.bf16.msra.mxu0 %v10389_v11  ;;  %v9138_v11 = vunpack.i.h.bf16 %v9136_v55 }
 0x4a0   : > { %8461 = vmatprep.subr.bf16.mxu0 %v10409_v28 }
 0x4a1   : > { %v10500_v5 = vpop.permute.xlu1 %9140  ;;  %v2292_v57 = vpack.c.bf16 %v9138_v11, %v9137_v6 }
 0x4a2   : > { %8438 = vmatmul.mubr.msk.bf16.gmra.mrb[52].mxu0 %vm2303_vm3, %v2106_v53  ;;  %8448 = vmatpush3.bf16.xpose.msra.mxu1 %v2593_v59 }
 0x4a3   : > { %8462 = vmatpush3.bf16.msra.mxu0 %v10409_v28  ;;  %8473 = vmatprep.subr.bf16.mxu1 %v2291_v15  ;;  %v9162_v28 = vunpack.i.l.bf16 %v9161_v37 }
 0x4a4   : > { %8463 = vmatprep.subr.bf16.mxu0 %v10405_v26 }
 0x4a5   : > { %v9156_v23 = vpop.permute.xlu1 %9155  ;;  %v2293_v0 = vpack.c.bf16 %v9163_v22, %v9162_v28 }
 0x4a6   : > { %v9158_v7 = vunpack.i.h.bf16 %v9156_v23  ;;  %v9157_v52 = vunpack.i.l.bf16 %v9156_v23 }
 0x4a7   : > { %8464 = vmatpush3.bf16.msra.mxu0 %v10405_v26  ;;  %v2110_v26 = vpack.c.bf16 %v9133_v24, %v9132_v25 }
 0x4a8   : > { %8489 = vmatprep.subr.bf16.mxu0 %v10503_v36  ;;  %v2294_v2 = vpack.c.bf16 %v9158_v7, %v9157_v52 }
 0x4a9   : > { %8450 = vmatmul.mubr.msk.bf16.vlgmr.msra.gmra.mrb[32].mxu1 %vm2303_vm3, %v2108_v45 }
 0x4aa   : > { %8453 = vmatprep.mubr.msk.bf16.mxu1 %vm2303_vm3, %v2109_v21  ;;  %8474 = vmatpush3.bf16.msra.mxu1 %v2291_v15 }
 0x4ab   : > { %8475 = vmatprep.subr.bf16.mxu1 %v2292_v57 }
 0x4ae   : > { %8476 = vmatpush3.bf16.msra.mxu1 %v2292_v57 }
 0x4af   : > { %8477 = vmatprep.subr.bf16.mxu1 %v2293_v0 }
 0x4b1   : > { %8454 = vmatmul.mubr.msk.bf16.gmra.mrb[36].mxu1 %vm2303_vm3, %v2110_v26 }
 0x4b2   : > { %8478 = vmatpush3.bf16.msra.mxu1 %v2293_v0 }
 0x4b3   : > { %8479 = vmatprep.subr.bf16.mxu1 %v2294_v2 }
 0x4b6   : > { %8480 = vmatpush3.bf16.msra.mxu1 %v2294_v2 }
 0x4e5   : > { %v8403_v16 = vpop.f32.mrb[40].mxu0 }
 0x4e6   : > { %v10510_v17 = vmul.f32 0.35355338, %v8403_v16  ;;  %v2362_v18 = vpop.f32.mrb[41].mxu0 }
 0x4e7   : > { %v8404_v46 = vpop.f32.mrb[42].mxu0  ;;  %v10512_v20 = vmul.f32 0.35355338, %v2362_v18 }
 0x4e8   : > { %v10514_v29 = vmul.f32 0.35355338, %v8404_v46  ;;  %v2365_v31 = vpop.f32.mrb[43].mxu0  ;;  %v2699_v32 = vsel %vm2692_vm4, %v10510_v17, -inf }
 0x4e9   : > { %2700 = vmax.xlane.f32.xlu0 %v2699_v32  ;;  %v10518_v33 = vmul.f32 0.35355338, %v2365_v31  ;;  %v2693_v35 = vsel %vm2692_vm4, %v10512_v20, -inf }
 0x4ea   : > { %v2702_v34 = vsel %vm2692_vm4, %v10514_v29, -inf }
 0x4eb   : > { %2703 = vmax.xlane.f32.xlu1 %v2702_v34  ;;  %v2696_v48 = vsel %vm2692_vm4, %v10518_v33, -inf }
 0x4ed   : > { %2694 = vmax.xlane.f32.xlu0 %v2693_v35  ;;  %v8407_v41 = vpop.f32.mrb[44].mxu0 }
 0x4ee   : > { %v10524_v43 = vmul.f32 0.35355338, %v8407_v41  ;;  %v2378_v47 = vpop.f32.mrb[45].mxu0 }
 0x4ef   : > { %2697 = vmax.xlane.f32.xlu1 %v2696_v48  ;;  %v8408_v49 = vpop.f32.mrb[46].mxu0  ;;  %v10528_v55 = vmul.f32 0.35355338, %v2378_v47 }
 0x4f0   : > { %v10530_v51 = vmul.f32 0.35355338, %v8408_v49  ;;  %v2381_v53 = vpop.f32.mrb[47].mxu0  ;;  %v2711_v59 = vsel %vm2692_vm4, %v10524_v43, -inf }
 0x4f1   : > { %2712 = vmax.xlane.f32.xlu0 %v2711_v59  ;;  %v10534_v15 = vmul.f32 0.35355338, %v2381_v53  ;;  %v2705_v61 = vsel %vm2692_vm4, %v10528_v55, -inf }
 0x4f2   : > { %v2714_v60 = vsel %vm2692_vm4, %v10530_v51, -inf }
 0x4f3   : > { %2715 = vmax.xlane.f32.xlu1 %v2714_v60  ;;  %v2708_v42 = vsel %vm2692_vm4, %v10534_v15, -inf }
 0x4f5   : > { %2706 = vmax.xlane.f32.xlu0 %v2705_v61 }
 0x4f7   : > { %2709 = vmax.xlane.f32.xlu1 %v2708_v42 }
 0x55c   : > { %v8419_v63 = vpop.f32.mrb[24].mxu1 }
 0x55d   : > { %v10542_v1 = vmul.f32 0.35355338, %v8419_v63  ;;  %v2451_v4 = vpop.f32.mrb[25].mxu1 }
 0x55e   : > { %v8420_v11 = vpop.f32.mrb[26].mxu1  ;;  %v10548_v7 = vmul.f32 0.35355338, %v2451_v4 }
 0x55f   : > { %v2454_v6 = vpop.f32.mrb[27].mxu1  ;;  %v2723_v37 = vsel %vm2692_vm4, %v10542_v1, -inf  ;;  %v10566_v47 = vmul.f32 0.35355338, %v8420_v11 }
 0x560   : > { %2724 = vmax.xlane.f32.xlu0 %v2723_v37  ;;  %v10554_v2 = vmul.f32 0.35355338, %v2454_v6  ;;  %v2717_v46 = vsel %vm2692_vm4, %v10548_v7, -inf }
 0x561   : > { %v2726_v42 = vsel %vm2692_vm4, %v10566_v47, -inf }
 0x562   : > { %v2720_v35 = vsel %vm2692_vm4, %v10554_v2, -inf }
 0x564   : > { %v8423_v45 = vpop.f32.mrb[28].mxu1 }
 0x565   : > { %v2467_v21 = vpop.f32.mrb[29].mxu1  ;;  %v10574_v60 = vmul.f32 0.35355338, %v8423_v45 }
 0x566   : > { %v8424_v22 = vpop.f32.mrb[30].mxu1 }
 0x567   : > { %v2470_v28 = vpop.f32.mrb[31].mxu1  ;;  %v10570_v53 = vmul.f32 0.35355338, %v8424_v22  ;;  %v2735_v45 = vsel %vm2692_vm4, %v10574_v60, -inf }
 0x569   : > { %v2738_v6 = vsel %vm2692_vm4, %v10570_v53, -inf }
 0x56d   : > { %v8435_v57 = vpop.f32.mrb[48].mxu0 }
 0x56e   : > { %v10546_v23 = vmul.f32 0.35355338, %v8435_v57  ;;  %v2540_v24 = vpop.f32.mrb[49].mxu0 }
 0x56f   : > { %v8436_v25 = vpop.f32.mrb[50].mxu0  ;;  %v10558_v18 = vmul.f32 0.35355338, %v2540_v24  ;;  %v10586_v24 = vmul.f32 0.35355338, %v2470_v28 }
 0x570   : > { %v10550_v52 = vmul.f32 0.35355338, %v8436_v25  ;;  %v2543_v0 = vpop.f32.mrb[51].mxu0  ;;  %v2747_v26 = vsel %vm2692_vm4, %v10546_v23, -inf }
 0x571   : > { %2748 = vmax.xlane.f32.xlu0 %v2747_v26  ;;  %v10562_v32 = vmul.f32 0.35355338, %v2543_v0  ;;  %v2741_v49 = vsel %vm2692_vm4, %v10558_v18, -inf  ;;  %v2732_v28 = vsel %vm2692_vm4, %v10586_v24, -inf }
 0x572   : > { %v2750_v16 = vsel %vm2692_vm4, %v10550_v52, -inf }
 0x573   : > { %2751 = vmax.xlane.f32.xlu1 %v2750_v16  ;;  %v2744_v59 = vsel %vm2692_vm4, %v10562_v32, -inf  ;;  %v10590_v16 = vmul.f32 0.35355338, %v2467_v21 }
 0x575   : > { %v8439_v31 = vpop.f32.mrb[52].mxu0  ;;  %2718 = vmax.xlane.f32.xlu0 %v2717_v46  ;;  %v2729_v21 = vsel %vm2692_vm4, %v10590_v16, -inf }
 0x576   : > { %v2556_v34 = vpop.f32.mrb[53].mxu0  ;;  %v2701_v61 = vpop.xlane.xlu0 %2700  ;;  %v10582_v57 = vmul.f32 0.35355338, %v8439_v31 }
 0x577   : > { %v8440_v41 = vpop.f32.mrb[54].mxu0  ;;  %2721 = vmax.xlane.f32.xlu1 %v2720_v35  ;;  %v2791_v39 = vsub.f32 %v10510_v17, %v2701_v61 }
 0x578   : > { %v2559_v48 = vpop.f32.mrb[55].mxu0  ;;  %v10578_v11 = vmul.f32 0.35355338, %v8440_v41  ;;  %v2704_v25 = vpop.xlane.xlu1 %2703  ;;  %v2759_v46 = vsel %vm2692_vm4, %v10582_v57, -inf }
 0x579   : > { %2742 = vmax.xlane.f32.xlu0 %v2741_v49  ;;  %v10594_v41 = vmul.f32 0.35355338, %v2559_v48  ;;  %v2792_v44 = vsub.f32 %v10514_v29, %v2704_v25 }
 0x57a   : > { %v2695_v0 = vpop.xlane.xlu0 %2694  ;;  %v2762_v26 = vsel %vm2692_vm4, %v10578_v11, -inf }
 0x57b   : > { %2745 = vmax.xlane.f32.xlu1 %v2744_v59  ;;  %v2756_v48 = vsel %vm2692_vm4, %v10594_v41, -inf }
 0x57c   : > { %v8451_v63 = vpop.f32.mrb[32].mxu1 }
 0x57d   : > { %2727 = vmax.xlane.f32.xlu0 %v2726_v42  ;;  %v2629_v4 = vpop.f32.mrb[33].mxu1  ;;  %v10598_v42 = vmul.f32 0.35355338, %v2556_v34 }
 0x57e   : > { %v8452_v37 = vpop.f32.mrb[34].mxu1  ;;  %v10618_v61 = vmul.f32 0.35355338, %v2629_v4 }
 0x57f   : > { %2739 = vmax.xlane.f32.xlu1 %v2738_v6  ;;  %v2632_v22 = vpop.f32.mrb[35].mxu1  ;;  %v2698_v6 = vpop.xlane.xlu1 %2697  ;;  %v2753_v34 = vsel %vm2692_vm4, %v10598_v42, -inf }
 0x580   : > { %v10613_v27 = vmul.f32 0.35355338, %v2632_v22  ;;  %v2790_v17 = vsub.f32 %v10518_v33, %v2698_v6 }
 0x581   : > { %2736 = vmax.xlane.f32.xlu0 %v2735_v45  ;;  %v2713_v45 = vpop.xlane.xlu0 %2712 }
 0x582   : > { %v2768_v25 = vsel %vm2692_vm4, %v10613_v27, -inf  ;;  %v2795_v33 = vsub.f32 %v10524_v43, %v2713_v45 }
 0x583   : > { %2763 = vmax.xlane.f32.xlu1 %v2762_v26  ;;  %v2789_v26 = vsub.f32 %v10512_v20, %v2695_v0  ;;  %v2716_v20 = vpop.xlane.xlu1 %2715 }
 0x584   : > { %v8455_v35 = vpop.f32.mrb[36].mxu1 }
 0x585   : > { %2760 = vmax.xlane.f32.xlu0 %v2759_v46  ;;  %v2645_v31 = vpop.f32.mrb[37].mxu1  ;;  %v10603_v46 = vmul.f32 0.35355338, %v8452_v37  ;;  %v2821_v40 = vmul.f32 1.442695, %v2789_v26  ;;  %v2707_v37 = vpop.xlane.xlu0 %2706 }
 0x586   : > { %v8456_v49 = vpop.f32.mrb[38].mxu1  ;;  %v2793_v29 = vsub.f32 %v10528_v55, %v2707_v37  ;;  %v10628_v6 = vmul.f32 0.35355338, %v8455_v35  ;;  %v10638_v35 = vmul.f32 0.35355338, %v2645_v31 }
 0x587   : > { %2733 = vmax.xlane.f32.xlu1 %v2732_v28  ;;  %v2648_v59 = vpop.f32.mrb[39].mxu1  ;;  %v10608_v28 = vmul.f32 0.35355338, %v8451_v63  ;;  %v2774_v0 = vsel %vm2692_vm4, %v10603_v46, -inf  ;;  %9479 = vpow2.f32 %v2821_v40  ;;  %v10623_v22 = vmul.f32 0.35355338, %v8456_v49  ;;  %v2710_v4 = vpop.xlane.xlu1 %2709 }
 0x588   : > { %v2796_v40 = vsub.f32 %v10530_v51, %v2716_v20  ;;  %v2829_v55 = vmul.f32 1.442695, %v2793_v29  ;;  %v10633_v49 = vmul.f32 0.35355338, %v2648_v59  ;;  %v2794_v43 = vsub.f32 %v10534_v15, %v2710_v4 }
 0x589   : > { %2730 = vmax.xlane.f32.xlu0 %v2729_v21  ;;  %v2825_v21 = vmul.f32 1.442695, %v2791_v39  ;;  %v2771_v63 = vsel %vm2692_vm4, %v10608_v28, -inf  ;;  %v2823_v39 = vmul.f32 1.442695, %v2790_v17  ;;  %v2786_v26 = vsel %vm2692_vm4, %v10623_v22, -inf }
 0x58a   : > { %v2783_v45 = vsel %vm2692_vm4, %v10628_v6, -inf  ;;  %v2835_v37 = vmul.f32 1.442695, %v2796_v40  ;;  %v2780_v51 = vsel %vm2692_vm4, %v10633_v49, -inf  ;;  %v2831_v20 = vmul.f32 1.442695, %v2794_v43 }
 0x58b   : > { %2757 = vmax.xlane.f32.xlu1 %v2756_v48  ;;  %v2827_v48 = vmul.f32 1.442695, %v2792_v44  ;;  %9481 = vpow2.f32 %v2825_v21  ;;  %v2765_v44 = vsel %vm2692_vm4, %v10618_v61, -inf  ;;  %v2777_v15 = vsel %vm2692_vm4, %v10638_v35, -inf }
 0x58d   : > { %2754 = vmax.xlane.f32.xlu0 %v2753_v34  ;;  %9483 = vpow2.f32 %v2827_v48  ;;  %v2833_v34 = vmul.f32 1.442695, %v2795_v33 }
 0x58e   : > { %9485 = vpow2.f32 %v2823_v39 }
 0x58f   : > { %2775 = vmax.xlane.f32.xlu1 %v2774_v0  ;;  %9487 = vpow2.f32 %v2829_v55 }
 0x590   : > { %9489 = vpow2.f32 %v2833_v34 }
 0x591   : > { %2772 = vmax.xlane.f32.xlu0 %v2771_v63  ;;  %v10644_v59 = vpop.eup %9479  ;;  %9491 = vpow2.f32 %v2835_v37 }
 0x592   : > { %v2885_v31 = vsel %vm2692_vm4, %v10644_v59, 0.0  ;;  %9493 = vpow2.f32 %v2831_v20 }
 0x593   : > { %2769 = vmax.xlane.f32.xlu1 %v2768_v25 }
 0x595   : > { %2766 = vmax.xlane.f32.xlu0 %v2765_v44  ;;  %v10648_v0 = vpop.eup %9481 }
 0x596   : > { %v2891_v17 = vsel %vm2692_vm4, %v10648_v0, 0.0 }
 0x597   : > { %2787 = vmax.xlane.f32.xlu1 %v2786_v26  ;;  %v10652_v21 = vpop.eup %9483 }
 0x598   : > { %v10656_v63 = vpop.eup %9485  ;;  %v2894_v48 = vsel %vm2692_vm4, %v10652_v21, 0.0 }
 0x599   : > { %2784 = vmax.xlane.f32.xlu0 %v2783_v45  ;;  %v10660_v29 = vpop.eup %9487  ;;  %v2888_v25 = vsel %vm2692_vm4, %v10656_v63, 0.0 }
 0x59a   : > { %v10664_v39 = vpop.eup %9489  ;;  %v2897_v33 = vsel %vm2692_vm4, %v10660_v29, 0.0 }
 0x59b   : > { %2781 = vmax.xlane.f32.xlu1 %v2780_v51  ;;  %v10668_v4 = vpop.eup %9491  ;;  %v2903_v44 = vsel %vm2692_vm4, %v10664_v39, 0.0 }
 0x59c   : > { %v10672_v40 = vpop.eup %9493  ;;  %v2906_v55 = vsel %vm2692_vm4, %v10668_v4, 0.0 }
 0x59d   : > { %2778 = vmax.xlane.f32.xlu0 %v2777_v15  ;;  %v2900_v26 = vsel %vm2692_vm4, %v10672_v40, 0.0 }
 0x59f   : > { %2886 = vadd.xlane.f32.xlu1 %v2885_v31 }
 0x5a1   : > { %2892 = vadd.xlane.f32.xlu0 %v2891_v17 }
 0x5a3   : > { %2895 = vadd.xlane.f32.xlu1 %v2894_v48 }
 0x5a5   : > { %2889 = vadd.xlane.f32.xlu0 %v2888_v25 }
 0x5a7   : > { %2898 = vadd.xlane.f32.xlu1 %v2897_v33 }
 0x5a9   : > { %2904 = vadd.xlane.f32.xlu0 %v2903_v44 }
 0x5ab   : > { %2907 = vadd.xlane.f32.xlu1 %v2906_v55 }
 0x5ad   : > { %2901 = vadd.xlane.f32.xlu0 %v2900_v26 }
 0x5ed   : > { %v2725_v34 = vpop.xlane.xlu0 %2724 }
 0x5ee   : > { %v2799_v43 = vsub.f32 %v10542_v1, %v2725_v34 }
 0x5f0   : > { %v2841_v45 = vmul.f32 1.442695, %v2799_v43 }
 0x5f2   : > { %9495 = vpow2.f32 %v2841_v45 }
 0x5fc   : > { %v10679_v37 = vpop.eup %9495 }
 0x5fd   : > { %v2915_v51 = vsel %vm2692_vm4, %v10679_v37, 0.0 }
 0x5fe   : > { %v2749_v20 = vpop.xlane.xlu0 %2748  ;;  %2916 = vadd.xlane.f32.xlu0 %v2915_v51 }
 0x5ff   : > { %v2807_v15 = vsub.f32 %v10546_v23, %v2749_v20 }
 0x600   : > { %v2752_v31 = vpop.xlane.xlu1 %2751 }
 0x601   : > { %v2857_v17 = vmul.f32 1.442695, %v2807_v15  ;;  %v2808_v34 = vsub.f32 %v10550_v52, %v2752_v31 }
 0x602   : > { %v2719_v48 = vpop.xlane.xlu0 %2718 }
 0x603   : > { %9497 = vpow2.f32 %v2857_v17  ;;  %v2797_v25 = vsub.f32 %v10548_v7, %v2719_v48  ;;  %v2859_v15 = vmul.f32 1.442695, %v2808_v34 }
 0x604   : > { %v2722_v33 = vpop.xlane.xlu1 %2721 }
 0x605   : > { %v2837_v44 = vmul.f32 1.442695, %v2797_v25  ;;  %v2798_v7 = vsub.f32 %v10554_v2, %v2722_v33 }
 0x606   : > { %v2743_v1 = vpop.xlane.xlu0 %2742 }
 0x607   : > { %9499 = vpow2.f32 %v2837_v44  ;;  %v2805_v55 = vsub.f32 %v10558_v18, %v2743_v1 }
 0x608   : > { %v2746_v26 = vpop.xlane.xlu1 %2745 }
 0x609   : > { %v2853_v43 = vmul.f32 1.442695, %v2805_v55  ;;  %v2806_v44 = vsub.f32 %v10562_v32, %v2746_v26 }
 0x60a   : > { %v2728_v45 = vpop.xlane.xlu0 %2727 }
 0x60b   : > { %9501 = vpow2.f32 %v2853_v43  ;;  %v2800_v23 = vsub.f32 %v10566_v47, %v2728_v45  ;;  %v2839_v47 = vmul.f32 1.442695, %v2798_v7  ;;  %v2855_v43 = vmul.f32 1.442695, %v2806_v44 }
 0x60c   : > { %v10688_v51 = vpop.xlane.xlu1 %2739 }
 0x60d   : > { %v10690_v20 = vpop.eup %9497  ;;  %v2843_v17 = vmul.f32 1.442695, %v2800_v23 }
 0x60e   : > { %v2737_v48 = vpop.xlane.xlu0 %2736  ;;  %v2939_v18 = vsel %vm2692_vm4, %v10690_v20, 0.0 }
 0x60f   : > { %9503 = vpow2.f32 %v2843_v17  ;;  %v2803_v52 = vsub.f32 %v10574_v60, %v2737_v48  ;;  %2940 = vadd.xlane.f32.xlu0 %v2939_v18 }
 0x610   : > { %v10696_v31 = vpop.xlane.xlu1 %2763  ;;  %9505 = vpow2.f32 %v2859_v15 }
 0x611   : > { %v10698_v25 = vpop.eup %9499  ;;  %v2849_v1 = vmul.f32 1.442695, %v2803_v52 }
 0x612   : > { %v2761_v55 = vpop.xlane.xlu0 %2760  ;;  %v2909_v2 = vsel %vm2692_vm4, %v10698_v25, 0.0 }
 0x613   : > { %9507 = vpow2.f32 %v2849_v1  ;;  %v2811_v33 = vsub.f32 %v10582_v57, %v2761_v55  ;;  %2910 = vadd.xlane.f32.xlu0 %v2909_v2 }
 0x614   : > { %v10704_v34 = vpop.xlane.xlu1 %2733  ;;  %9509 = vpow2.f32 %v2839_v47 }
 0x615   : > { %v10706_v60 = vpop.eup %9501  ;;  %v2865_v45 = vmul.f32 1.442695, %v2811_v33 }
 0x616   : > { %v2731_v23 = vpop.xlane.xlu0 %2730  ;;  %v2933_v32 = vsel %vm2692_vm4, %v10706_v60, 0.0 }
 0x617   : > { %9511 = vpow2.f32 %v2865_v45  ;;  %v2801_v26 = vsub.f32 %v10590_v16, %v2731_v23  ;;  %2934 = vadd.xlane.f32.xlu0 %v2933_v32 }
 0x618   : > { %v10711_v15 = vpop.xlane.xlu1 %2757  ;;  %9513 = vpow2.f32 %v2855_v43 }
 0x619   : > { %v10713_v7 = vpop.eup %9503  ;;  %v2845_v57 = vmul.f32 1.442695, %v2801_v26 }
 0x61a   : > { %v10715_v17 = vpop.xlane.xlu0 %2754  ;;  %v2918_v48 = vsel %vm2692_vm4, %v10713_v7, 0.0  ;;  %v10719_v18 = vpop.eup %9505 }
 0x61b   : > { %9515 = vpow2.f32 %v2845_v57  ;;  %2919 = vadd.xlane.f32.xlu1 %v2918_v48  ;;  %v2942_v1 = vsel %vm2692_vm4, %v10719_v18, 0.0 }
 0x61c   : > { %v10721_v52 = vpop.xlane.xlu1 %2775 }
 0x61d   : > { %v10723_v47 = vpop.eup %9507 }
 0x61e   : > { %v10725_v16 = vpop.xlane.xlu0 %2772  ;;  %v2927_v44 = vsel %vm2692_vm4, %v10723_v47, 0.0  ;;  %v10731_v55 = vpop.eup %9509 }
 0x61f   : > { %2928 = vadd.xlane.f32.xlu0 %v2927_v44  ;;  %2943 = vadd.xlane.f32.xlu1 %v2942_v1  ;;  %v2912_v23 = vsel %vm2692_vm4, %v10731_v55, 0.0 }
 0x620   : > { %v10733_v2 = vpop.xlane.xlu1 %2769 }
 0x621   : > { %v10735_v33 = vpop.eup %9511 }
 0x622   : > { %v10737_v43 = vpop.xlane.xlu0 %2766  ;;  %v2951_v45 = vsel %vm2692_vm4, %v10735_v33, 0.0  ;;  %v10743_v32 = vpop.eup %9513 }
 0x623   : > { %2952 = vadd.xlane.f32.xlu0 %v2951_v45  ;;  %2913 = vadd.xlane.f32.xlu1 %v2912_v23  ;;  %v2936_v1 = vsel %vm2692_vm4, %v10743_v32, 0.0 }
 0x624   : > { %v10745_v26 = vpop.xlane.xlu1 %2787 }
 0x625   : > { %v10747_v57 = vpop.eup %9515 }
 0x626   : > { %v10749_v48 = vpop.xlane.xlu0 %2784  ;;  %v2921_v44 = vsel %vm2692_vm4, %v10747_v57, 0.0 }
 0x627   : > { %2922 = vadd.xlane.f32.xlu0 %v2921_v44  ;;  %2937 = vadd.xlane.f32.xlu1 %v2936_v1 }
 0x628   : > { %v10755_v12 = vpop.xlane.xlu1 %2781 }
 0x62a   : > { %v10757_v9 = vpop.xlane.xlu0 %2778 }
 0x62c   : > { %v2887_v45 = vpop.xlane.xlu1 %2886 }
 0x62d   : > { %9517 = vrcp.f32 %v2887_v45 }
 0x62e   : > { %v2893_v23 = vpop.xlane.xlu0 %2892 }
 0x630   : > { %v2896_v13 = vpop.xlane.xlu1 %2895 }
 0x631   : > { %9519 = vrcp.f32 %v2896_v13 }
 0x632   : > { %9521 = vrcp.f32 %v2893_v23  ;;  %v2890_v10 = vpop.xlane.xlu0 %2889  ;;  %v9143_v23 = vunpack.i.h.bf16 %v10500_v5 }
 0x633   : > { %9523 = vrcp.f32 %v2890_v10 }
 0x634   : > { %v2899_v50 = vpop.xlane.xlu1 %2898 }
 0x635   : > { %9525 = vrcp.f32 %v2899_v50 }
 0x636   : > { %v2905_v58 = vpop.xlane.xlu0 %2904 }
 0x637   : > { %v9518_v1 = vpop.eup %9517 }
 0x638   : > { %9170 = vrot.lane.b32.xlu1 %v10403_v62, %s12395_s4  ;;  %v2908_v44 = vpop.xlane.xlu1 %2907  ;;  %v3013_v50 = vmul.f32 %v9518_v1, %v10644_v59 }
 0x639   : > { %9527 = vrcp.f32 %v2908_v44 }
 0x63a   : > { %9529 = vrcp.f32 %v2905_v58  ;;  %v2902_v56 = vpop.xlane.xlu0 %2901  ;;  %v9142_v58 = vunpack.i.l.bf16 %v10500_v5  ;;  %v2809_v5 = vsub.f32 %v10598_v42, %v10715_v17 }
 0x63b   : > { %v9520_v54 = vpop.eup %9519  ;;  %9531 = vrcp.f32 %v2902_v56 }
 0x63c   : > { %v9522_v30 = vpop.eup %9521  ;;  %9175 = vrot.lane.b32.xlu1 %v10391_v14, %s12393_s30  ;;  %v3016_v10 = vmul.f32 %v9520_v54, %v10652_v21  ;;  %v2296_v54 = vpack.c.bf16 %v9143_v23, %v9142_v58 }
 0x63d   : > { %v9524_v13 = vpop.eup %9523  ;;  %9165 = vrot.lane.b32.xlu0 %v10407_v3, %s12395_s4  ;;  %v3015_v56 = vmul.f32 %v9522_v30, %v10648_v0  ;;  %s12476_s4 = smov 112  }
 0x63e   : > { %v3014_v45 = vmul.f32 %v9524_v13, %v10656_v63 }
 0x63f   : > { %v3046_v19 = vpack.c.bf16 %v3016_v10, %v3015_v56  ;;  %v9526_v38 = vpop.eup %9525 }
 0x640   : > { %v3045_v44 = vpack.c.bf16 %v3014_v45, %v3013_v50  ;;  %v3017_v30 = vmul.f32 %v9526_v38, %v10660_v29  ;;  %v2815_v50 = vsub.f32 %v10608_v28, %v10725_v16  ;;  %v2812_v38 = vsub.f32 %v10578_v11, %v10696_v31 }
 0x641   : > { %v2817_v11 = vsub.f32 %v10638_v35, %v10757_v9 }
 0x642   : > { %8465 = vmatprep.mubr.msk.bf16.mxu0 %vm2692_vm4, %v3045_v44  ;;  %v2873_v29 = vmul.f32 1.442695, %v2815_v50 }
 0x643   : > { %v9528_v14 = vpop.eup %9527  ;;  %8466 = vmatmul.mubr.msk.bf16.vlgmr.msra.gmra.mrb[56].mxu0 %vm2692_vm4, %v3046_v19  ;;  %v2804_v19 = vsub.f32 %v10570_v53, %v10688_v51  ;;  %v2867_v53 = vmul.f32 1.442695, %v2812_v38 }
 0x644   : > { %v9530_v21 = vpop.eup %9529  ;;  %8490 = vmatpush3.bf16.msra.mxu0 %v10503_v36  ;;  %v3020_v63 = vmul.f32 %v9528_v14, %v10668_v4  ;;  %v2861_v36 = vmul.f32 1.442695, %v2809_v5  ;;  %v2802_v4 = vsub.f32 %v10586_v24, %v10704_v34  ;;  %v2877_v24 = vmul.f32 1.442695, %v2817_v11 }
 0x645   : > { %v9532_v59 = vpop.eup %9531  ;;  %8491 = vmatprep.subr.bf16.mxu0 %v2296_v54  ;;  %v3019_v1 = vmul.f32 %v9530_v21, %v10664_v39  ;;  %v2851_v42 = vmul.f32 1.442695, %v2804_v19  ;;  %v2814_v39 = vsub.f32 %v10613_v27, %v10733_v2  ;;  %v2820_v27 = vsub.f32 %v10623_v22, %v10745_v26 }
 0x646   : > { %v3018_v0 = vmul.f32 %v9532_v59, %v10672_v40  ;;  %9533 = vpow2.f32 %v2861_v36  ;;  %v2819_v40 = vsub.f32 %v10628_v6, %v10749_v48  ;;  %v2847_v51 = vmul.f32 1.442695, %v2802_v4 }
 0x647   : > { %v3048_v10 = vpack.c.bf16 %v3020_v63, %v3019_v1  ;;  %9535 = vpow2.f32 %v2851_v42  ;;  %v2871_v28 = vmul.f32 1.442695, %v2814_v39  ;;  %v2883_v2 = vmul.f32 1.442695, %v2820_v27 }
 0x648   : > { %8492 = vmatpush3.bf16.msra.mxu0 %v2296_v54  ;;  %v3047_v13 = vpack.c.bf16 %v3018_v0, %v3017_v30  ;;  %9537 = vpow2.f32 %v2873_v29  ;;  %v2881_v17 = vmul.f32 1.442695, %v2819_v40  ;;  %v2810_v63 = vsub.f32 %v10594_v41, %v10711_v15 }
 0x649   : > { %9539 = vpow2.f32 %v2867_v53  ;;  %v2813_v30 = vsub.f32 %v10618_v61, %v10737_v43  ;;  %v2816_v0 = vsub.f32 %v10603_v46, %v10721_v52 }
 0x64a   : > { %8469 = vmatprep.mubr.msk.bf16.mxu0 %vm2692_vm4, %v3047_v13  ;;  %9541 = vpow2.f32 %v2871_v28  ;;  %v2863_v5 = vmul.f32 1.442695, %v2810_v63 }
 0x64b   : > { %8470 = vmatmul.mubr.msk.bf16.gmra.mrb[60].mxu0 %vm2692_vm4, %v3048_v10  ;;  %9543 = vpow2.f32 %v2847_v51  ;;  %v2869_v1 = vmul.f32 1.442695, %v2813_v30  ;;  %v2875_v13 = vmul.f32 1.442695, %v2816_v0 }
 0x64c   : > { %9545 = vpow2.f32 %v2881_v17 }
 0x64d   : > { %9547 = vpow2.f32 %v2877_v24 }
 0x64e   : > { %9549 = vpow2.f32 %v2883_v2 }
 0x64f   : > { %9551 = vpow2.f32 %v2863_v5 }
 0x650   : > { %v10796_v31 = vpop.eup %9533  ;;  %9553 = vpow2.f32 %v2869_v1 }
 0x651   : > { %v10800_v34 = vpop.eup %9535  ;;  %v2945_v6 = vsel %vm2692_vm4, %v10796_v31, 0.0  ;;  %9555 = vpow2.f32 %v2875_v13 }
 0x652   : > { %v10804_v16 = vpop.eup %9537  ;;  %v2930_v22 = vsel %vm2692_vm4, %v10800_v34, 0.0 }
 0x653   : > { %v10806_v48 = vpop.eup %9539  ;;  %v2963_v9 = vsel %vm2692_vm4, %v10804_v16, 0.0 }
 0x654   : > { %v10812_v35 = vpop.eup %9541  ;;  %v2954_v23 = vsel %vm2692_vm4, %v10806_v48, 0.0 }
 0x655   : > { %v10814_v26 = vpop.eup %9543  ;;  %v2960_v45 = vsel %vm2692_vm4, %v10812_v35, 0.0 }
 0x656   : > { %v10820_v58 = vpop.eup %9545  ;;  %v2924_v44 = vsel %vm2692_vm4, %v10814_v26, 0.0 }
 0x657   : > { %v2975_v56 = vsel %vm2692_vm4, %v10820_v58, 0.0  ;;  %v10826_v14 = vpop.eup %9547 }
 0x658   : > { %v2969_v54 = vsel %vm2692_vm4, %v10826_v14, 0.0  ;;  %v10830_v21 = vpop.eup %9549 }
 0x659   : > { %v2978_v59 = vsel %vm2692_vm4, %v10830_v21, 0.0  ;;  %v10846_v10 = vpop.eup %9551 }
 0x65a   : > { %v2948_v61 = vsel %vm2692_vm4, %v10846_v10, 0.0  ;;  %v10850_v15 = vpop.eup %9553 }
 0x65b   : > { %v2957_v46 = vsel %vm2692_vm4, %v10850_v15, 0.0  ;;  %v10854_v52 = vpop.eup %9555 }
 0x65c   : > { %2946 = vadd.xlane.f32.xlu0 %v2945_v6 }
 0x660   : > { %2964 = vadd.xlane.f32.xlu0 %v2963_v9  ;;  %2931 = vadd.xlane.f32.xlu1 %v2930_v22 }
 0x664   : > { %2961 = vadd.xlane.f32.xlu0 %v2960_v45  ;;  %2955 = vadd.xlane.f32.xlu1 %v2954_v23 }
 0x668   : > { %2976 = vadd.xlane.f32.xlu0 %v2975_v56  ;;  %2925 = vadd.xlane.f32.xlu1 %v2924_v44 }
 0x66c   : > { %2970 = vadd.xlane.f32.xlu0 %v2969_v54 }
 0x670   : > { %2979 = vadd.xlane.f32.xlu0 %v2978_v59 }
 0x679   : > { %9180 = vrot.lane.b32.xlu1 %v10387_v8, %s12393_s30  ;;  %v2818_v8 = vsub.f32 %v10633_v49, %v10755_v12  ;;  %v2966_v49 = vsel %vm2692_vm4, %v10854_v52, 0.0 }
 0x67b   : > { %v2879_v19 = vmul.f32 1.442695, %v2818_v8 }
 0x67d   : > { %9557 = vpow2.f32 %v2879_v19 }
 0x686   : > { %9185 = vrot.lane.b32.xlu0 %v10407_v3, %s12393_s30 }
 0x687   : > { %v10858_v43 = vpop.eup %9557 }
 0x688   : > { %v2972_v42 = vsel %vm2692_vm4, %v10858_v43, 0.0 }
 0x68b   : > { %v2917_v3 = vpop.xlane.xlu0 %2916 }
 0x69c   : > { %v2941_v41 = vpop.xlane.xlu0 %2940 }
 0x69d   : > { %2949 = vadd.xlane.f32.xlu1 %v2948_v61 }
 0x6a0   : > { %v2911_v12 = vpop.xlane.xlu0 %2910 }
 0x6a1   : > { %2958 = vadd.xlane.f32.xlu1 %v2957_v46  ;;  %9559 = vrcp.f32 %v2911_v12 }
 0x6a4   : > { %v2935_v36 = vpop.xlane.xlu0 %2934 }
 0x6a5   : > { %2967 = vadd.xlane.f32.xlu1 %v2966_v49 }
 0x6a8   : > { %v2920_v50 = vpop.xlane.xlu1 %2919 }
 0x6a9   : > { %2973 = vadd.xlane.f32.xlu1 %v2972_v42  ;;  %9561 = vrcp.f32 %v2920_v50 }
 0x6aa   : > { %9563 = vrcp.f32 %v2917_v3 }
 0x6ab   : > { %v9560_v40 = vpop.eup %9559 }
 0x6ac   : > { %v10862_v38 = vpop.xlane.xlu0 %2928  ;;  %v2944_v29 = vpop.xlane.xlu1 %2943  ;;  %v3021_v44 = vmul.f32 %v9560_v40, %v10698_v25 }
 0x6b0   : > { %v10864_v39 = vpop.xlane.xlu0 %2952  ;;  %v2914_v53 = vpop.xlane.xlu1 %2913 }
 0x6b1   : > { %9565 = vrcp.f32 %v2914_v53 }
 0x6b2   : > { %9567 = vrcp.f32 %v2944_v29 }
 0x6b3   : > { %9569 = vrcp.f32 %v2935_v36  ;;  %v9562_v11 = vpop.eup %9561 }
 0x6b4   : > { %v2923_v4 = vpop.xlane.xlu0 %2922  ;;  %v2938_v28 = vpop.xlane.xlu1 %2937  ;;  %9571 = vrcp.f32 %v2941_v41  ;;  %v3024_v23 = vmul.f32 %v9562_v11, %v10713_v7 }
 0x6b5   : > { %9573 = vrcp.f32 %v2938_v28  ;;  %v9564_v9 = vpop.eup %9563 }
 0x6b6   : > { %v3023_v1 = vmul.f32 %v9564_v9, %v10679_v37 }
 0x6b8   : > { %v9166_v51 = vpop.permute.xlu0 %9165  ;;  %v9171_v17 = vpop.permute.xlu1 %9170  ;;  %v3050_v7 = vpack.c.bf16 %v3024_v23, %v3023_v1 }
 0x6b9   : > { %v9168_v27 = vunpack.i.h.bf16 %v9166_v51  ;;  %v9167_v24 = vunpack.i.l.bf16 %v9166_v51  ;;  %v9173_v6 = vunpack.i.h.bf16 %v9171_v17  ;;  %v9172_v2 = vunpack.i.l.bf16 %v9171_v17 }
 0x6ba   : > { %9190 = vrot.lane.b32.xlu1 %v10403_v62, %s12393_s30  ;;  %s12495_s30 = sshll.u32 %s12497_s5, 6 }
 0x6bb   : > { %v2297_v22 = vpack.c.bf16 %v9168_v27, %v9167_v24  ;;  %v9566_v45 = vpop.eup %9565  ;;  %v2298_v5 = vpack.c.bf16 %v9173_v6, %v9172_v2 }
 0x6bc   : > { %v9176_v56 = vpop.permute.xlu1 %9175  ;;  %v9568_v54 = vpop.eup %9567  ;;  %v3022_v30 = vmul.f32 %v9566_v45, %v10731_v55 }
 0x6bd   : > { %v9178_v59 = vunpack.i.h.bf16 %v9176_v56  ;;  %v9177_v63 = vunpack.i.l.bf16 %v9176_v56  ;;  %8493 = vmatprep.subr.bf16.mxu0 %v2297_v22  ;;  %v9570_v0 = vpop.eup %9569  ;;  %v3032_v3 = vmul.f32 %v9568_v54, %v10719_v18 }
 0x6be   : > { %8494 = vmatpush3.bf16.msra.mxu0 %v2297_v22  ;;  %v9572_v62 = vpop.eup %9571  ;;  %v3049_v13 = vpack.c.bf16 %v3022_v30, %v3021_v44  ;;  %v3029_v25 = vmul.f32 %v9570_v0, %v10706_v60 }
 0x6bf   : > { %8495 = vmatprep.subr.bf16.mxu0 %v2298_v5  ;;  %v2299_v8 = vpack.c.bf16 %v9178_v59, %v9177_v63  ;;  %v9574_v19 = vpop.eup %9573  ;;  %v3031_v55 = vmul.f32 %v9572_v62, %v10690_v20 }
 0x6c0   : > { %8481 = vmatprep.mubr.msk.bf16.mxu1 %vm2692_vm4, %v3049_v13  ;;  %v3030_v41 = vmul.f32 %v9574_v19, %v10743_v32 }
 0x6c1   : > { %8505 = vmatprep.subr.bf16.mxu1 %v2299_v8  ;;  %8482 = vmatmul.mubr.msk.bf16.vlgmr.msra.gmra.mrb[40].mxu1 %vm2692_vm4, %v3050_v7  ;;  %v3054_v61 = vpack.c.bf16 %v3032_v3, %v3031_v55 }
 0x6c2   : > { %8496 = vmatpush3.bf16.msra.mxu0 %v2298_v5  ;;  %8506 = vmatpush3.bf16.msra.mxu1 %v2299_v8  ;;  %v3053_v37 = vpack.c.bf16 %v3030_v41, %v3029_v25 }
 0x6c4   : > { %8497 = vmatprep.mubr.msk.bf16.mxu0 %vm2692_vm4, %v3053_v37 }
 0x6c5   : > { %8498 = vmatmul.mubr.msk.bf16.vlgmr.msra.gmra.mrb[64].mxu0 %vm2692_vm4, %v3054_v61 }
 0x6e9   : > { %v2947_v18 = vpop.xlane.xlu0 %2946 }
 0x6ed   : > { %v2965_v46 = vpop.xlane.xlu0 %2964  ;;  %v2932_v12 = vpop.xlane.xlu1 %2931 }
 0x6ee   : > { %9575 = vrcp.f32 %v2932_v12 }
 0x6ef   : > { %9577 = vrcp.f32 %v2923_v4 }
 0x6f0   : > { %9579 = vrcp.f32 %v10862_v38 }
 0x6f1   : > { %v2962_v49 = vpop.xlane.xlu0 %2961  ;;  %v2956_v36 = vpop.xlane.xlu1 %2955 }
 0x6f5   : > { %v10880_v60 = vpop.xlane.xlu0 %2976  ;;  %v2926_v20 = vpop.xlane.xlu1 %2925 }
 0x6f6   : > { %9581 = vrcp.f32 %v2926_v20 }
 0x6f7   : > { %9583 = vrcp.f32 %v2956_v36 }
 0x6f8   : > { %v9576_v40 = vpop.eup %9575  ;;  %9585 = vrcp.f32 %v2947_v18 }
 0x6f9   : > { %v2971_v32 = vpop.xlane.xlu0 %2970  ;;  %v9181_v50 = vpop.permute.xlu1 %9180  ;;  %v3028_v4 = vmul.f32 %v9576_v40, %v10800_v34  ;;  %9587 = vrcp.f32 %v10864_v39 }
 0x6fa   : > { %v9183_v42 = vunpack.i.h.bf16 %v9181_v50  ;;  %v9182_v29 = vunpack.i.l.bf16 %v9181_v50  ;;  %v9578_v51 = vpop.eup %9577 }
 0x6fb   : > { %v9580_v17 = vpop.eup %9579  ;;  %v3025_v38 = vmul.f32 %v9578_v51, %v10747_v57 }
 0x6fc   : > { %v2300_v53 = vpack.c.bf16 %v9183_v42, %v9182_v29  ;;  %v3027_v9 = vmul.f32 %v9580_v17, %v10723_v47  ;;  %v7746_v47 = vld [vmem:[%s12359_s18 + $0x4] sm:$0xf] }
 0x6fd   : > { %v2980_v28 = vpop.xlane.xlu0 %2979  ;;  %8977 = vmatprep.subr.msk.bf16.mxu0 %vm3392_vm5, %v7746_v47  ;;  %v3394_v59 = vsel %vm3392_vm5, %v7746_v47, 0 }
 0x6fe   : > { %8507 = vmatprep.subr.bf16.mxu1 %v2300_v53  ;;  %v3052_v23 = vpack.c.bf16 %v3028_v4, %v3027_v9  ;;  %8522 = vmatpush3.bf16.msra.mxu0 %v3394_v59 }
 0x6ff   : > { %8508 = vmatpush3.bf16.msra.mxu1 %v2300_v53 }
 0x700   : > { %v9582_v11 = vpop.eup %9581 }
 0x701   : > { %v9186_v27 = vpop.permute.xlu0 %9185  ;;  %v3026_v2 = vmul.f32 %v9582_v11, %v10814_v26  ;;  %v9584_v19 = vpop.eup %9583 }
 0x702   : > { %v9188_v24 = vunpack.i.h.bf16 %v9186_v27  ;;  %v9187_v6 = vunpack.i.l.bf16 %v9186_v27  ;;  %v9586_v3 = vpop.eup %9585  ;;  %v3036_v55 = vmul.f32 %v9584_v19, %v10806_v48 }
 0x703   : > { %v3051_v22 = vpack.c.bf16 %v3026_v2, %v3025_v38  ;;  %v9588_v25 = vpop.eup %9587  ;;  %v3033_v61 = vmul.f32 %v9586_v3, %v10796_v31 }
 0x704   : > { %v2301_v45 = vpack.c.bf16 %v9188_v24, %v9187_v6  ;;  %v3035_v12 = vmul.f32 %v9588_v25, %v10735_v33  ;;  %v3373_v24 = vld [vmem:[%s12359_s18] sm:$0xf] }
 0x705   : > { %8485 = vmatprep.mubr.msk.bf16.mxu1 %vm2692_vm4, %v3051_v22  ;;  %8978 = vmatprep.subr.msk.bf16.mxu0 %vm3392_vm5, %v3373_v24 }
 0x706   : > { %8509 = vmatprep.subr.bf16.mxu1 %v2301_v45  ;;  %8486 = vmatmul.mubr.msk.bf16.gmra.mrb[44].mxu1 %vm2692_vm4, %v3052_v23  ;;  %v3056_v36 = vpack.c.bf16 %v3036_v55, %v3035_v12  ;;  %v7755_v23 = vld [vmem:[%s12359_s18 + $0x8] sm:$0xf] }
 0x707   : > { %8510 = vmatpush3.bf16.msra.mxu1 %v2301_v45  ;;  %v3474_v45 = vsel %vm3392_vm5, %v3373_v24, 0  ;;  %v3560_v55 = vsel %vm3392_vm5, %v7755_v23, 0 }
 0x716   : > { %v10889_v56 = vpop.f32.mrb[56].mxu0 }
 0x717   : > { %v10891_v34 = vpop.f32.mrb[57].mxu0 }
 0x718   : > { %v10893_v44 = vpop.f32.mrb[58].mxu0 }
 0x719   : > { %v3370_v57 = vpack.c.bf16 %v10893_v44, %v10889_v56  ;;  %v10897_v26 = vpop.f32.mrb[59].mxu0  ;;  %v12449_v56 = vmov 0.0  }
 0x71a   : > { %v3369_v54 = vpack.c.bf16 %v10897_v26, %v10891_v34 }
 0x71e   : > { %v10906_v63 = vpop.f32.mrb[60].mxu0 }
 0x71f   : > { %v10908_v5 = vpop.f32.mrb[61].mxu0 }
 0x720   : > { %v10910_v30 = vpop.f32.mrb[62].mxu0 }
 0x721   : > { %v3372_v0 = vpack.c.bf16 %v10910_v30, %v10906_v63  ;;  %v10914_v1 = vpop.f32.mrb[63].mxu0 }
 0x722   : > { %v3371_v62 = vpack.c.bf16 %v10914_v1, %v10908_v5 }
 0x72a   : > { %v2950_v13 = vpop.xlane.xlu1 %2949 }
 0x72b   : > { %9589 = vrcp.f32 %v2950_v13 }
 0x72c   : > { %9591 = vrcp.f32 %v2962_v49 }
 0x72e   : > { %v2959_v8 = vpop.xlane.xlu1 %2958 }
 0x72f   : > { %9593 = vrcp.f32 %v2959_v8 }
 0x730   : > { %9595 = vrcp.f32 %v2965_v46 }
 0x732   : > { %v2968_v7 = vpop.xlane.xlu1 %2967 }
 0x733   : > { %9597 = vrcp.f32 %v2968_v7 }
 0x734   : > { %9599 = vrcp.f32 %v2971_v32 }
 0x735   : > { %v9590_v41 = vpop.eup %9589 }
 0x736   : > { %v2974_v37 = vpop.xlane.xlu1 %2973  ;;  %v3034_v39 = vmul.f32 %v9590_v41, %v10846_v10  ;;  %v9592_v18 = vpop.eup %9591 }
 0x737   : > { %9601 = vrcp.f32 %v2974_v37  ;;  %v3038_v32 = vmul.f32 %v9592_v18, %v10812_v35  ;;  %v7760_v37 = vld [vmem:[%s12359_s18 + $0xc] sm:$0xf]  ;;  %v9411_v18 = vld [vmem:[%s12439_s7 + $0x70] sm:$0xff]  }
 0x738   : > { %9603 = vrcp.f32 %v2980_v28  ;;  %v3055_v46 = vpack.c.bf16 %v3034_v39, %v3033_v61  ;;  %v3654_v34 = vsel %vm3392_vm5, %v7760_v37, 0 }
 0x739   : > { %v9594_v49 = vpop.eup %9593  ;;  %9605 = vrcp.f32 %v10880_v60 }
 0x73a   : > { %v9191_v20 = vpop.permute.xlu1 %9190  ;;  %8501 = vmatprep.mubr.msk.bf16.mxu0 %vm2692_vm4, %v3055_v46  ;;  %v3037_v48 = vmul.f32 %v9594_v49, %v10850_v15  ;;  %v9596_v31 = vpop.eup %9595  ;;  %v9412_v46 = vld [vmem:[%s12439_s7 + $0x78] sm:$0xff]  }
 0x73b   : > { %v9193_v50 = vunpack.i.h.bf16 %v9191_v20  ;;  %v9192_v10 = vunpack.i.l.bf16 %v9191_v20  ;;  %8502 = vmatmul.mubr.msk.bf16.gmra.mrb[68].mxu0 %vm2692_vm4, %v3056_v36  ;;  %v3039_v53 = vmul.f32 %v9596_v31, %v10804_v16  ;;  %v9413_v31 = vld [vmem:[%s12439_s7 + $0x90] sm:$0xff]  }
 0x73c   : > { %v3057_v42 = vpack.c.bf16 %v3038_v32, %v3037_v48 }
 0x73d   : > { %v9598_v33 = vpop.eup %9597  ;;  %v2302_v29 = vpack.c.bf16 %v9193_v50, %v9192_v10  ;;  %v12450_v50 = vld [vmem:[#allocation11_spill] sm:$0xff]  ;;  %v9414_v10 = vld [vmem:[%s12439_s7 + $0x98] sm:$0xff]  }
 0x73e   : > { %v3040_v28 = vmul.f32 %v9598_v33, %v10854_v52  ;;  %8513 = vmatprep.mubr.msk.bf16.mxu1 %vm2692_vm4, %v3057_v42  ;;  %v9600_v60 = vpop.eup %9599  ;;  %v9415_v42 = vld [vmem:[%s12439_s7 + $0xb0] sm:$0xff]   ;;  %v9416_v33 = vld [vmem:[%s12439_s7 + $0xb8] sm:$0xff]  }
 0x73f   : > { %8511 = vmatprep.subr.bf16.mxu1 %v2302_v29  ;;  %v3041_v51 = vmul.f32 %v9600_v60, %v10826_v14  ;;  %v7765_v60 = vld [vmem:[%s12360_s19] ss:$0 sm:$0xff] }
 0x740   : > { %v3058_v40 = vpack.c.bf16 %v3040_v28, %v3039_v53  ;;  %8512 = vmatpush3.bf16.msra.mxu1 %v2302_v29  ;;  %v1384_v29 = vld [vmem:[%s12445_s0 + $0x2] sm:$0x1]  ;;  %v12451_v53 = vld [vmem:[#allocation13_spill] sm:$0xff] }
 0x741   : > { %v9602_v15 = vpop.eup %9601  ;;  %v1432_v28 = vadd.f32 %v12451_v53, %v1384_v29 }
 0x742   : > { %v9604_v35 = vpop.eup %9603  ;;  %v3042_v17 = vmul.f32 %v9602_v15, %v10858_v43  ;;  %v12452_v15 = vld [vmem:[#allocation2_spill] sm:$0xff] }
 0x743   : > { %8514 = vmatmul.mubr.msk.bf16.vlgmr.msra.gmra.mrb[48].mxu1 %vm2692_vm4, %v3058_v40  ;;  %v9606_v11 = vpop.eup %9605  ;;  %v3044_v16 = vmul.f32 %v9604_v35, %v10830_v21  ;;  %v3745_v35 = vrot.slane %v1432_v28, %v12452_v15 }
 0x744   : > { %v3059_v27 = vpack.c.bf16 %v3042_v17, %v3041_v51  ;;  %v3043_v52 = vmul.f32 %v9606_v11, %v10820_v58 }
 0x746   : > { %8517 = vmatprep.mubr.msk.bf16.mxu1 %vm2692_vm4, %v3059_v27  ;;  %v3060_v4 = vpack.c.bf16 %v3044_v16, %v3043_v52 }
 0x74b   : > { %8518 = vmatmul.mubr.msk.bf16.gmra.mrb[52].mxu1 %vm2692_vm4, %v3060_v4 }
 0x794   : > { %v8483_v14 = vpop.f32.mrb[40].mxu1 }
 0x795   : > { %v3184_v43 = vpop.f32.mrb[41].mxu1 }
 0x796   : > { %v8484_v6 = vpop.f32.mrb[42].mxu1 }
 0x797   : > { %v3375_v38 = vpack.c.bf16 %v8484_v6, %v8483_v14  ;;  %v3187_v2 = vpop.f32.mrb[43].mxu1  ;;  %v12453_v6 = vld [vmem:[#allocation4_spill] sm:$0xff] }
 0x798   : > { %v3374_v9 = vpack.c.bf16 %v3187_v2, %v3184_v43  ;;  %v8499_v21 = vpop.f32.mrb[64].mxu0 }
 0x799   : > { %v3261_v22 = vpop.f32.mrb[65].mxu0 }
 0x79a   : > { %v8500_v58 = vpop.f32.mrb[66].mxu0  ;;  %8523 = vmatprep.mubr.msk.bf16.mxu0 %vm2303_vm3, %v3374_v9  ;;  %v12454_v9 = vld [vmem:[#allocation5_spill] sm:$0xff] }
 0x79b   : > { %v3542_v47 = vpack.c.bf16 %v8500_v58, %v8499_v21  ;;  %v3264_v59 = vpop.f32.mrb[67].mxu0  ;;  %8524 = vmatmul.mubr.msk.bf16.vlgmr.msra.gmra.mrb[72].mxu0 %vm2303_vm3, %v3375_v38 }
 0x79c   : > { %v3541_v13 = vpack.c.bf16 %v3264_v59, %v3261_v22  ;;  %8532 = vmatpush3.bf16.msra.mxu0 %v3474_v45  ;;  %v12455_v22 = vld [vmem:[#allocation6_spill] sm:$0xff] }
 0x79d   : > { %8979 = vmatprep.subr.msk.bf16.mxu0 %vm3392_vm5, %v7755_v23 }
 0x7d9   : > { %v8487_v8 = vpop.f32.mrb[44].mxu1 }
 0x7da   : > { %v3200_v19 = vpop.f32.mrb[45].mxu1 }
 0x7db   : > { %v8488_v7 = vpop.f32.mrb[46].mxu1 }
 0x7dc   : > { %v3377_v3 = vpack.c.bf16 %v8488_v7, %v8487_v8  ;;  %v3203_v25 = vpop.f32.mrb[47].mxu1 }
 0x7dd   : > { %v3376_v41 = vpack.c.bf16 %v3203_v25, %v3200_v19 }
 0x7df   : > { %8527 = vmatprep.mubr.msk.bf16.mxu0 %vm2303_vm3, %v3376_v41 }
 0x7e0   : > { %8528 = vmatmul.mubr.msk.bf16.gmra.mrb[76].mxu0 %vm2303_vm3, %v3377_v3 }
 0x7e1   : > { %8533 = vmatprep.mubr.msk.bf16.mxu0 %vm2303_vm3, %v3369_v54 }
 0x7e8   : > { %8534 = vmatmul.mubr.msk.bf16.vlgmr.msra.gmra.mrb[72].mxu0 %vm2303_vm3, %v3370_v57 }
 0x7e9   : > { %8537 = vmatprep.mubr.msk.bf16.mxu0 %vm2303_vm3, %v3371_v62  ;;  %8542 = vmatpush3.bf16.msra.mxu0 %v3560_v55 }
 0x7ea   : > { %8980 = vmatprep.subr.msk.bf16.mxu0 %vm3392_vm5, %v7760_v37 }
 0x7f0   : > { %8538 = vmatmul.mubr.msk.bf16.gmra.mrb[76].mxu0 %vm2303_vm3, %v3372_v0 }
 0x7f1   : > { %8543 = vmatprep.mubr.msk.bf16.mxu0 %vm2303_vm3, %v3541_v13  ;;  %v12456_v13 = vld [vmem:[#allocation3_spill] sm:$0xff] }
 0x7f8   : > { %8544 = vmatmul.mubr.msk.bf16.vlgmr.msra.gmra.mrb[72].mxu0 %vm2303_vm3, %v3542_v47 }
 0x7f9   : > { %8552 = vmatpush3.bf16.msra.mxu0 %v3654_v34 }
 0x7fa   : > { %8605 = vmatprep.subr.bf16.mxu0 %v12449_v56 }
 0x80e   : > { %v8503_v44 = vpop.f32.mrb[68].mxu0 }
 0x80f   : > { %v3277_v57 = vpop.f32.mrb[69].mxu0 }
 0x810   : > { %v8504_v26 = vpop.f32.mrb[70].mxu0 }
 0x811   : > { %v3544_v54 = vpack.c.bf16 %v8504_v26, %v8503_v44  ;;  %v3280_v5 = vpop.f32.mrb[71].mxu0  ;;  %v12457_v26 = vld [vmem:[#allocation8_spill] sm:$0xff] }
 0x812   : > { %v3543_v1 = vpack.c.bf16 %v3280_v5, %v3277_v57 }
 0x814   : > { %8547 = vmatprep.mubr.msk.bf16.mxu0 %vm2303_vm3, %v3543_v1 }
 0x815   : > { %8548 = vmatmul.mubr.msk.bf16.gmra.mrb[76].mxu0 %vm2303_vm3, %v3544_v54 }
 0x816   : > { %v8515_v63 = vpop.f32.mrb[48].mxu1 }
 0x817   : > { %v3338_v30 = vpop.f32.mrb[49].mxu1 }
 0x818   : > { %v8516_v0 = vpop.f32.mrb[50].mxu1 }
 0x819   : > { %v3636_v62 = vpack.c.bf16 %v8516_v0, %v8515_v63  ;;  %v3341_v61 = vpop.f32.mrb[51].mxu1  ;;  %v12458_v63 = vld [vmem:[#allocation10_spill] sm:$0xff] }
 0x81a   : > { %v3635_v39 = vpack.c.bf16 %v3341_v61, %v3338_v30  ;;  %v12459_v61 = vld [vmem:[#allocation7_spill] sm:$0xff] }
 0x81c   : > { %8553 = vmatprep.mubr.msk.bf16.mxu0 %vm2303_vm3, %v3635_v39 }
 0x81d   : > { %8554 = vmatmul.mubr.msk.bf16.vlgmr.msra.gmra.mrb[72].mxu0 %vm2303_vm3, %v3636_v62 }
 0x81e   : > { %v8519_v12 = vpop.f32.mrb[52].mxu1  ;;  %8606 = vmatpush3.bf16.msra.mxu0 %v9411_v18  ;;  %v12460_v18 = vld [vmem:[#allocation9_spill] sm:$0xff] }
 0x81f   : > { %v3354_v49 = vpop.f32.mrb[53].mxu1  ;;  %8607 = vmatprep.subr.bf16.mxu0 %v12449_v56 }
 0x820   : > { %v8520_v36 = vpop.f32.mrb[54].mxu1 }
 0x821   : > { %v3638_v20 = vpack.c.bf16 %v8520_v36, %v8519_v12  ;;  %v3357_v48 = vpop.f32.mrb[55].mxu1 }
 0x822   : > { %v3637_v32 = vpack.c.bf16 %v3357_v48, %v3354_v49  ;;  %8608 = vmatpush3.bf16.msra.mxu0 %v9412_v46 }
 0x823   : > { %8621 = vmatprep.subr.bf16.mxu0 %v12449_v56 }
 0x824   : > { %8557 = vmatprep.mubr.msk.bf16.mxu0 %vm2303_vm3, %v3637_v32 }
 0x825   : > { %8558 = vmatmul.mubr.msk.bf16.gmra.mrb[76].mxu0 %vm2303_vm3, %v3638_v20 }
 0x826   : > { %8609 = vmatprep.mubr.msk.bf16.mxu0 %vm9840_vm1, %v12449_v56 }
 0x82d   : > { %8610 = vmatmul.mubr.msk.bf16.vlgmr.msra.gmra.mrb[80].mxu0 %vm1207_vm2, %v12450_v50 }
 0x82e   : > { %8622 = vmatpush3.bf16.msra.mxu0 %v9413_v31  ;;  %8625 = vmatprep.mubr.msk.bf16.mxu0 %vm9840_vm1, %v12449_v56 }
 0x82f   : > { %8623 = vmatprep.subr.bf16.mxu0 %v12449_v56 }
 0x832   : > { %8624 = vmatpush3.bf16.msra.mxu0 %v9414_v10 }
 0x833   : > { %8637 = vmatprep.subr.bf16.mxu0 %v12449_v56 }
 0x835   : > { %8626 = vmatmul.mubr.msk.bf16.vlgmr.msra.gmra.mrb[84].mxu0 %vm1207_vm2, %v12450_v50 }
 0x836   : > { %8638 = vmatpush3.bf16.msra.mxu0 %v9415_v42  ;;  %8641 = vmatprep.mubr.msk.bf16.mxu0 %vm9840_vm1, %v12449_v56 }
 0x837   : > { %8639 = vmatprep.subr.bf16.mxu0 %v12449_v56 }
 0x83a   : > { %8640 = vmatpush3.bf16.msra.mxu0 %v9416_v33 }
 0x83d   : > { %8642 = vmatmul.mubr.msk.bf16.vlgmr.msra.gmra.mrb[88].mxu0 %vm1207_vm2, %v12450_v50 }
 0x8f0   : > { %v8555_v40 = vpop.f32.mrb[72].mxu0 }
 0x8f1   : > { %v3736_v51 = vadd.f32 %v8555_v40, %v7765_v60  ;;  %v3690_v17 = vpop.f32.mrb[73].mxu0 }
 0x8f2   : > { %v3734_v11 = vadd.f32 %v7765_v60, %v3690_v17  ;;  %v8556_v27 = vpop.f32.mrb[74].mxu0 }
 0x8f3   : > { %v3748_v16 = vmul.f32 %v3745_v35, %v3736_v51  ;;  %v3737_v52 = vadd.f32 %v8556_v27, %v7765_v60  ;;  %v3693_v4 = vpop.f32.mrb[75].mxu0 }
 0x8f4   : > { %v3746_v24 = vmul.f32 %v3745_v35, %v3734_v11  ;;  %v3735_v14 = vadd.f32 %v7765_v60, %v3693_v4 }
 0x8f5   : > { %v3749_v43 = vmul.f32 %v3745_v35, %v3737_v52  ;;  %v11037_v8 = vadd.f32 %v3748_v16, %v12456_v13 }
 0x8f6   : > { %v11026_v38 = vadd.f32 %v3746_v24, %v12453_v6  ;;  %v3747_v2 = vmul.f32 %v3745_v35, %v3735_v14 }
 0x8f7   : > { %v11029_v21 = vadd.f32 %v3749_v43, %v12454_v9  ;;  %v3768_v1 = vsel %vm1207_vm2, %v11037_v8, 0.0 }
 0x8f8   : > { %v11032_v45 = vadd.f32 %v3747_v2, %v12455_v22  ;;  %v8559_v58 = vpop.f32.mrb[76].mxu0  ;;  %v3762_v23 = vsel %vm1207_vm2, %v11026_v38, 0.0 }
 0x8f9   : > { %v3740_v47 = vadd.f32 %v8559_v58, %v7765_v60  ;;  %3763 = vadd.xlane.f32.xlu1 %v3762_v23  ;;  %v3706_v59 = vpop.f32.mrb[77].mxu0  ;;  %v3771_v44 = vsel %vm1207_vm2, %v11029_v21, 0.0 }
 0x8fa   : > { %v3738_v19 = vadd.f32 %v7765_v60, %v3706_v59  ;;  %v8560_v7 = vpop.f32.mrb[78].mxu0  ;;  %v3765_v3 = vsel %vm1207_vm2, %v11032_v45, 0.0 }
 0x8fb   : > { %v3752_v25 = vmul.f32 %v3745_v35, %v3740_v47  ;;  %v3741_v41 = vadd.f32 %v8560_v7, %v7765_v60  ;;  %3766 = vadd.xlane.f32.xlu0 %v3765_v3  ;;  %v3709_v55 = vpop.f32.mrb[79].mxu0 }
 0x8fc   : > { %v3750_v37 = vmul.f32 %v3745_v35, %v3738_v19  ;;  %v3739_v34 = vadd.f32 %v7765_v60, %v3709_v55 }
 0x8fd   : > { %v3753_v57 = vmul.f32 %v3745_v35, %v3741_v41  ;;  %3772 = vadd.xlane.f32.xlu1 %v3771_v44  ;;  %v11054_v39 = vadd.f32 %v3752_v25, %v12459_v61 }
 0x8fe   : > { %v11044_v54 = vadd.f32 %v3750_v37, %v12457_v26  ;;  %v3751_v5 = vmul.f32 %v3745_v35, %v3739_v34 }
 0x8ff   : > { %3769 = vadd.xlane.f32.xlu0 %v3768_v1  ;;  %v11057_v12 = vadd.f32 %v3753_v57, %v12460_v18  ;;  %v3780_v48 = vsel %vm1207_vm2, %v11054_v39, 0.0 }
 0x900   : > { %v11049_v30 = vadd.f32 %v3751_v5, %v12458_v63  ;;  %v11051_v0 = vpop.f32.mrb[80].mxu0  ;;  %v3774_v49 = vsel %vm1207_vm2, %v11044_v54, 0.0 }
 0x901   : > { %v8611_v62 = vpop.f32.mrb[81].mxu0  ;;  %v3783_v32 = vsel %vm1207_vm2, %v11057_v12, 0.0 }
 0x902   : > { %v4337_v46 = vpop.f32.mrb[82].mxu0  ;;  %v3777_v36 = vsel %vm1207_vm2, %v11049_v30, 0.0 }
 0x903   : > { %3775 = vadd.xlane.f32.xlu0 %v3774_v49  ;;  %v8612_v20 = vpop.f32.mrb[83].mxu0  ;;  %3778 = vadd.xlane.f32.xlu1 %v3777_v36  ;;  %v9417_v36 = vld [vmem:[%s12361_s20] sm:$0xff]  }
 0x904   : > { %8561 = vmatprep.subr.bf16.mxu1 %v9417_v36  ;;  %v9418_v20 = vld [vmem:[%s12361_s20 + $0x8] sm:$0xff]  }
 0x905   : > { %8562 = vmatpush3.bf16.msra.mxu1 %v9417_v36 }
 0x906   : > { %8563 = vmatprep.subr.bf16.mxu1 %v9418_v20 }
 0x907   : > { %3781 = vadd.xlane.f32.xlu0 %v3780_v48  ;;  %3784 = vadd.xlane.f32.xlu1 %v3783_v32 }
 0x908   : > { %v11067_v31 = vpop.f32.mrb[84].mxu0 }
 0x909   : > { %12461 = vst [vmem:[#allocation13_spill] sm:$0xff] %v11067_v31  ;;  %v8627_v10 = vpop.f32.mrb[85].mxu0  ;;  %8564 = vmatpush3.bf16.msra.mxu1 %v9418_v20 }
 0x90a   : > { %v4453_v42 = vpop.f32.mrb[86].mxu0 }
 0x90b   : > { %v8628_v33 = vpop.f32.mrb[87].mxu0 }
 0x910   : > { %v11069_v29 = vpop.f32.mrb[88].mxu0 }
 0x911   : > { %12462 = vst [vmem:[#allocation4_spill] sm:$0xff] %v11069_v29  ;;  %v8643_v53 = vpop.f32.mrb[89].mxu0 }
 0x912   : > { %v4569_v28 = vpop.f32.mrb[90].mxu0  ;;  %v1500_v53 = vld [vmem:[%s12445_s0 + $0x4] sm:$0x1] }
 0x913   : > { %v8644_v60 = vpop.f32.mrb[91].mxu0 }
 0x986   : > { %v3764_v40 = vpop.xlane.xlu1 %3763 }
 0x987   : > { %v3786_v35 = vmul.f32 0.03125, %v3764_v40 }
 0x988   : > { %v3767_v51 = vpop.xlane.xlu0 %3766 }
 0x989   : > { %v11072_v17 = vsub.f32 %v11026_v38, %v3786_v35  ;;  %v3787_v11 = vmul.f32 0.03125, %v3767_v51 }
 0x98a   : > { %v3773_v27 = vpop.xlane.xlu1 %3772 }
 0x98b   : > { %v11075_v16 = vsub.f32 %v11032_v45, %v3787_v11  ;;  %v3789_v52 = vmul.f32 0.03125, %v3773_v27  ;;  %v3802_v4 = vmul.f32 %v11072_v17, %v11072_v17  ;;  %v12463_v11 = vld [vmem:[#allocation12_spill] sm:$0xff] }
 0x98c   : > { %v3770_v24 = vpop.xlane.xlu0 %3769  ;;  %v1548_v27 = vadd.f32 %v12463_v11, %v1500_v53 }
 0x98d   : > { %v11080_v14 = vsub.f32 %v11029_v21, %v3789_v52  ;;  %v3788_v43 = vmul.f32 0.03125, %v3770_v24  ;;  %v3810_v6 = vsel %vm1207_vm2, %v3802_v4, 0.0  ;;  %v3803_v2 = vmul.f32 %v11075_v16, %v11075_v16 }
 0x98e   : > { %3811 = vadd.xlane.f32.xlu0 %v3810_v6  ;;  %v1442_v6 = vld [vmem:[%s12445_s0 + $0x3] sm:$0x1] }
 0x98f   : > { %v11086_v9 = vsub.f32 %v11037_v8, %v3788_v43  ;;  %v3813_v22 = vsel %vm1207_vm2, %v3803_v2, 0.0  ;;  %v3805_v58 = vmul.f32 %v11080_v14, %v11080_v14 }
 0x990   : > { %v3776_v23 = vpop.xlane.xlu0 %3775  ;;  %3814 = vadd.xlane.f32.xlu1 %v3813_v22  ;;  %v3779_v47 = vpop.xlane.xlu1 %3778 }
 0x991   : > { %v3790_v59 = vmul.f32 0.03125, %v3776_v23  ;;  %v3791_v13 = vmul.f32 0.03125, %v3779_v47  ;;  %v3804_v19 = vmul.f32 %v11086_v9, %v11086_v9  ;;  %v3819_v41 = vsel %vm1207_vm2, %v3805_v58, 0.0 }
 0x992   : > { %v3866_v58 = vadd.f32 1.0, %v1548_v27 }
 0x993   : > { %v11094_v7 = vsub.f32 %v11044_v54, %v3790_v59  ;;  %v11097_v3 = vsub.f32 %v11049_v30, %v3791_v13  ;;  %v3816_v25 = vsel %vm1207_vm2, %v3804_v19, 0.0  ;;  %v12464_v59 = vld [vmem:[#allocation14_spill] sm:$0xff] }
 0x994   : > { %3817 = vadd.xlane.f32.xlu0 %v3816_v25  ;;  %v3782_v55 = vpop.xlane.xlu0 %3781  ;;  %3820 = vadd.xlane.f32.xlu1 %v3819_v41  ;;  %v3785_v37 = vpop.xlane.xlu1 %3784  ;;  %v1490_v13 = vadd.f32 %v12464_v59, %v1442_v6  ;;  %v9423_v59 = vld [vmem:[%s12363_s22 + $0x20] sm:$0xff]  }
 0x995   : > { %v3792_v34 = vmul.f32 0.03125, %v3782_v55  ;;  %v3793_v44 = vmul.f32 0.03125, %v3785_v37  ;;  %v3806_v57 = vmul.f32 %v11094_v7, %v11094_v7  ;;  %v3807_v26 = vmul.f32 %v11097_v3, %v11097_v3 }
 0x997   : > { %v11106_v5 = vsub.f32 %v11054_v39, %v3792_v34  ;;  %v11109_v1 = vsub.f32 %v11057_v12, %v3793_v44  ;;  %v3822_v63 = vsel %vm1207_vm2, %v3806_v57, 0.0  ;;  %v3825_v62 = vsel %vm1207_vm2, %v3807_v26, 0.0 }
 0x998   : > { %3823 = vadd.xlane.f32.xlu0 %v3822_v63  ;;  %3826 = vadd.xlane.f32.xlu1 %v3825_v62  ;;  %v3870_v34 = vrot.slane %v3866_v58, %v12452_v15  ;;  %v3882_v62 = vrot.slane %v1490_v13, %v12452_v15  ;;  %v9424_v13 = vld [vmem:[%s12363_s22 + $0x28] sm:$0xff]  }
 0x999   : > { %v3808_v61 = vmul.f32 %v11106_v5, %v11106_v5  ;;  %v3809_v18 = vmul.f32 %v11109_v1, %v11109_v1 }
 0x99b   : > { %v3828_v46 = vsel %vm1207_vm2, %v3808_v61, 0.0  ;;  %v3831_v49 = vsel %vm1207_vm2, %v3809_v18, 0.0 }
 0x99c   : > { %3829 = vadd.xlane.f32.xlu0 %v3828_v46  ;;  %3832 = vadd.xlane.f32.xlu1 %v3831_v49 }
 0xa1b   : > { %v3812_v48 = vpop.xlane.xlu0 %3811 }
 0xa1c   : > { %v3834_v32 = vmul.f32 0.03125, %v3812_v48 }
 0xa1d   : > { %v3815_v10 = vpop.xlane.xlu1 %3814 }
 0xa1e   : > { %v3842_v42 = vadd.f32 1e-06, %v3834_v32  ;;  %v3835_v33 = vmul.f32 0.03125, %v3815_v10 }
 0xa20   : > { %9607 = vrsqrt.f32 %v3842_v42  ;;  %v3843_v28 = vadd.f32 1e-06, %v3835_v33 }
 0xa21   : > { %v3818_v60 = vpop.xlane.xlu0 %3817  ;;  %v3821_v40 = vpop.xlane.xlu1 %3820 }
 0xa22   : > { %9609 = vrsqrt.f32 %v3843_v28  ;;  %v3836_v35 = vmul.f32 0.03125, %v3818_v60  ;;  %v3837_v51 = vmul.f32 0.03125, %v3821_v40 }
 0xa24   : > { %v3844_v52 = vadd.f32 1e-06, %v3836_v35  ;;  %v3845_v4 = vadd.f32 1e-06, %v3837_v51 }
 0xa25   : > { %v3824_v24 = vpop.xlane.xlu0 %3823  ;;  %v3827_v43 = vpop.xlane.xlu1 %3826 }
 0xa26   : > { %9611 = vrsqrt.f32 %v3844_v52  ;;  %v3838_v2 = vmul.f32 0.03125, %v3824_v24  ;;  %v3839_v22 = vmul.f32 0.03125, %v3827_v43 }
 0xa27   : > { %9613 = vrsqrt.f32 %v3845_v4 }
 0xa28   : > { %v3846_v23 = vadd.f32 1e-06, %v3838_v2  ;;  %v3847_v47 = vadd.f32 1e-06, %v3839_v22 }
 0xa29   : > { %v3830_v19 = vpop.xlane.xlu0 %3829  ;;  %v3833_v25 = vpop.xlane.xlu1 %3832 }
 0xa2a   : > { %v9608_v41 = vpop.eup %9607  ;;  %9615 = vrsqrt.f32 %v3846_v23  ;;  %v3840_v55 = vmul.f32 0.03125, %v3830_v19  ;;  %v3841_v37 = vmul.f32 0.03125, %v3833_v25  ;;  %v9419_v23 = vld [vmem:[%s12363_s22] sm:$0xff]   ;;  %v9425_v19 = vld [vmem:[%s12363_s22 + $0x30] sm:$0xff]   ;;  %v9426_v25 = vld [vmem:[%s12363_s22 + $0x38] sm:$0xff]  }
 0xa2b   : > { %9617 = vrsqrt.f32 %v3847_v47  ;;  %v3858_v44 = vmul.f32 %v9608_v41, %v11072_v17  ;;  %8573 = vmatprep.subr.bf16.mxu1 %v9419_v23  ;;  %v9422_v47 = vld [vmem:[%s12363_s22 + $0x18] sm:$0xff]   ;;  %v7766_v41 = vld [vmem:[%s12362_s21] ss:$0 sm:$0xff] }
 0xa2c   : > { %v9610_v57 = vpop.eup %9609  ;;  %v3848_v26 = vadd.f32 1e-06, %v3840_v55  ;;  %v3849_v63 = vadd.f32 1e-06, %v3841_v37 }
 0xa2d   : > { %v3859_v61 = vmul.f32 %v9610_v57, %v11075_v16  ;;  %v3871_v18 = vmul.f32 %v3870_v34, %v3858_v44 }
 0xa2e   : > { %9619 = vrsqrt.f32 %v3848_v26 }
 0xa2f   : > { %9621 = vrsqrt.f32 %v3849_v63  ;;  %v3872_v46 = vmul.f32 %v3870_v34, %v3859_v61  ;;  %v3883_v49 = vadd.f32 %v3882_v62, %v3871_v18 }
 0xa30   : > { %v9612_v36 = vpop.eup %9611 }
 0xa31   : > { %v9614_v20 = vpop.eup %9613  ;;  %v3860_v48 = vmul.f32 %v9612_v36, %v11086_v9  ;;  %v3884_v32 = vadd.f32 %v3882_v62, %v3872_v46 }
 0xa32   : > { %v3861_v10 = vmul.f32 %v9614_v20, %v11080_v14 }
 0xa33   : > { %v3873_v17 = vmul.f32 %v3870_v34, %v3860_v48  ;;  %v3891_v42 = vpack.c.bf16 %v3884_v32, %v3883_v49 }
 0xa34   : > { %v9616_v33 = vpop.eup %9615  ;;  %v3874_v53 = vmul.f32 %v3870_v34, %v3861_v10 }
 0xa35   : > { %v9618_v28 = vpop.eup %9617  ;;  %v3885_v60 = vadd.f32 %v3882_v62, %v3873_v17  ;;  %8565 = vmatprep.mubr.msk.bf16.mxu1 %vm1207_vm2, %v3891_v42  ;;  %v3862_v16 = vmul.f32 %v9616_v33, %v11094_v7 }
 0xa36   : > { %v3886_v40 = vadd.f32 %v3882_v62, %v3874_v53  ;;  %v3863_v35 = vmul.f32 %v9618_v28, %v11097_v3 }
 0xa37   : > { %v3875_v51 = vmul.f32 %v3870_v34, %v3862_v16 }
 0xa38   : > { %v9620_v11 = vpop.eup %9619  ;;  %v3892_v27 = vpack.c.bf16 %v3886_v40, %v3885_v60  ;;  %v3876_v9 = vmul.f32 %v3870_v34, %v3863_v35 }
 0xa39   : > { %v9622_v52 = vpop.eup %9621  ;;  %v3887_v4 = vadd.f32 %v3882_v62, %v3875_v51  ;;  %v3864_v14 = vmul.f32 %v9620_v11, %v11106_v5  ;;  %v9420_v5 = vld [vmem:[%s12363_s22 + $0x8] sm:$0xff]  }
 0xa3a   : > { %8566 = vmatmul.mubr.msk.bf16.vlgmr.msra.gmra.mrb[56].mxu1 %vm1207_vm2, %v3892_v27  ;;  %v3888_v24 = vadd.f32 %v3882_v62, %v3876_v9  ;;  %v3865_v43 = vmul.f32 %v9622_v52, %v11109_v1  ;;  %v9421_v1 = vld [vmem:[%s12363_s22 + $0x10] sm:$0xff]  }
 0xa3b   : > { %v3877_v6 = vmul.f32 %v3870_v34, %v3864_v14  ;;  %8574 = vmatpush3.bf16.msra.mxu1 %v9419_v23 }
 0xa3c   : > { %v3893_v2 = vpack.c.bf16 %v3888_v24, %v3887_v4  ;;  %v3878_v22 = vmul.f32 %v3870_v34, %v3865_v43  ;;  %8575 = vmatprep.subr.bf16.mxu1 %v9420_v5 }
 0xa3d   : > { %v3889_v7 = vadd.f32 %v3882_v62, %v3877_v6 }
 0xa3e   : > { %8569 = vmatprep.mubr.msk.bf16.mxu1 %vm1207_vm2, %v3893_v2  ;;  %v3890_v3 = vadd.f32 %v3882_v62, %v3878_v22 }
 0xa3f   : > { %8576 = vmatpush3.bf16.msra.mxu1 %v9420_v5 }
 0xa40   : > { %v3894_v58 = vpack.c.bf16 %v3890_v3, %v3889_v7  ;;  %8577 = vmatprep.subr.bf16.mxu1 %v9421_v1 }
 0xa42   : > { %8570 = vmatmul.mubr.msk.bf16.gmra.mrb[60].mxu1 %vm1207_vm2, %v3894_v58 }
 0xa43   : > { %8578 = vmatpush3.bf16.msra.mxu1 %v9421_v1 }
 0xa44   : > { %8579 = vmatprep.subr.bf16.mxu1 %v9422_v47 }
 0xa47   : > { %8580 = vmatpush3.bf16.msra.mxu1 %v9422_v47 }
 0xa48   : > { %8581 = vmatprep.subr.bf16.mxu1 %v9423_v59 }
 0xa4b   : > { %8582 = vmatpush3.bf16.msra.mxu1 %v9423_v59 }
 0xa4c   : > { %8583 = vmatprep.subr.bf16.mxu1 %v9424_v13 }
 0xa4f   : > { %8584 = vmatpush3.bf16.msra.mxu1 %v9424_v13 }
 0xa50   : > { %8585 = vmatprep.subr.bf16.mxu1 %v9425_v19 }
 0xa53   : > { %8586 = vmatpush3.bf16.msra.mxu1 %v9425_v19 }
 0xa54   : > { %8587 = vmatprep.subr.bf16.mxu1 %v9426_v25 }
 0xa57   : > { %8588 = vmatpush3.bf16.msra.mxu1 %v9426_v25 }
 0xa58   : > { %8597 = vmatprep.subr.bf16.mxu1 %v12449_v56 }
 0xb0d   : > { %v8567_v55 = vpop.f32.mrb[56].mxu1 }
 0xb0e   : > { %v11175_v37 = vadd.f32 %v8567_v55, %v7766_v41  ;;  %v3962_v34 = vpop.f32.mrb[57].mxu1 }
 0xb0f   : > { %v11177_v44 = vadd.f32 %v7766_v41, %v3962_v34  ;;  %v8568_v57 = vpop.f32.mrb[58].mxu1 }
 0xb10   : > { %v4003_v26 = vmul.f32 0.044715, %v11175_v37  ;;  %v11180_v63 = vadd.f32 %v8568_v57, %v7766_v41  ;;  %v3965_v62 = vpop.f32.mrb[59].mxu1 }
 0xb11   : > { %v4001_v61 = vmul.f32 0.044715, %v11177_v44  ;;  %v11183_v18 = vadd.f32 %v7766_v41, %v3965_v62 }
 0xb12   : > { %v4011_v46 = vmul.f32 %v4003_v26, %v11175_v37  ;;  %v4004_v49 = vmul.f32 0.044715, %v11180_v63 }
 0xb13   : > { %v4009_v36 = vmul.f32 %v4001_v61, %v11177_v44  ;;  %v4002_v20 = vmul.f32 0.044715, %v11183_v18 }
 0xb14   : > { %v4019_v48 = vmul.f32 %v4011_v46, %v11175_v37  ;;  %v4012_v32 = vmul.f32 %v4004_v49, %v11180_v63 }
 0xb15   : > { %v4017_v10 = vmul.f32 %v4009_v36, %v11177_v44  ;;  %v4010_v17 = vmul.f32 %v4002_v20, %v11183_v18  ;;  %v8571_v42 = vpop.f32.mrb[60].mxu1 }
 0xb16   : > { %v4027_v33 = vadd.f32 %v4019_v48, %v11175_v37  ;;  %v4020_v53 = vmul.f32 %v4012_v32, %v11180_v63  ;;  %v11195_v28 = vadd.f32 %v8571_v42, %v7766_v41  ;;  %v3978_v60 = vpop.f32.mrb[61].mxu1 }
 0xb17   : > { %v4018_v16 = vmul.f32 %v4010_v17, %v11183_v18  ;;  %v11198_v40 = vadd.f32 %v7766_v41, %v3978_v60  ;;  %v8572_v35 = vpop.f32.mrb[62].mxu1  ;;  %v4025_v51 = vadd.f32 %v4017_v10, %v11177_v44  ;;  %v3995_v10 = vmul.f32 0.5, %v11175_v37 }
 0xb18   : > { %v4035_v11 = vmul.f32 0.7978846, %v4027_v33  ;;  %v4028_v27 = vadd.f32 %v4020_v53, %v11180_v63  ;;  %v4007_v9 = vmul.f32 0.044715, %v11195_v28  ;;  %v3990_v52 = vadd.f32 %v8572_v35, %v7766_v41  ;;  %v3981_v4 = vpop.f32.mrb[63].mxu1 }
 0xb19   : > { %v4005_v14 = vmul.f32 0.044715, %v11198_v40  ;;  %v3982_v24 = vadd.f32 %v7766_v41, %v3981_v4  ;;  %v4026_v43 = vadd.f32 %v4018_v16, %v11183_v18  ;;  %v4033_v6 = vmul.f32 0.7978846, %v4025_v51 }
 0xb1a   : > { %9623 = vtanh.f32 %v4035_v11  ;;  %v4036_v2 = vmul.f32 0.7978846, %v4028_v27  ;;  %v4015_v22 = vmul.f32 %v4007_v9, %v11195_v28  ;;  %v4008_v7 = vmul.f32 0.044715, %v3990_v52 }
 0xb1b   : > { %v4013_v3 = vmul.f32 %v4005_v14, %v11198_v40  ;;  %v4006_v58 = vmul.f32 0.044715, %v3982_v24  ;;  %v4034_v23 = vmul.f32 0.7978846, %v4026_v43  ;;  %9625 = vtanh.f32 %v4033_v6  ;;  %v9427_v14 = vld [vmem:[%s12439_s7 + $0x60] sm:$0xff]  }
 0xb1c   : > { %9627 = vtanh.f32 %v4036_v2  ;;  %v4023_v5 = vmul.f32 %v4015_v22, %v11195_v28  ;;  %v4016_v1 = vmul.f32 %v4008_v7, %v3990_v52  ;;  %v3996_v17 = vmul.f32 0.5, %v11180_v63 }
 0xb1d   : > { %v4021_v47 = vmul.f32 %v4013_v3, %v11198_v40  ;;  %v4014_v59 = vmul.f32 %v4006_v58, %v3982_v24  ;;  %9629 = vtanh.f32 %v4034_v23  ;;  %v3993_v33 = vmul.f32 0.5, %v11177_v44  ;;  %v9428_v23 = vld [vmem:[%s12439_s7 + $0x68] sm:$0xff]  }
 0xb1e   : > { %v4024_v13 = vmul.f32 %v4016_v1, %v3990_v52  ;;  %v4031_v19 = vadd.f32 %v4023_v5, %v11195_v28  ;;  %v3994_v53 = vmul.f32 0.5, %v11183_v18  ;;  %v3999_v18 = vmul.f32 0.5, %v11195_v28  ;;  %v9429_v28 = vld [vmem:[%s12439_s7 + $0x80] sm:$0xff]  }
 0xb1f   : > { %v4022_v25 = vmul.f32 %v4014_v59, %v3982_v24  ;;  %v4029_v41 = vadd.f32 %v4021_v47, %v11198_v40  ;;  %v4000_v2 = vmul.f32 0.5, %v3990_v52  ;;  %v3997_v7 = vmul.f32 0.5, %v11198_v40  ;;  %v9430_v40 = vld [vmem:[%s12439_s7 + $0x88] sm:$0xff]  }
 0xb20   : > { %v4032_v55 = vadd.f32 %v4024_v13, %v3990_v52  ;;  %v4039_v34 = vmul.f32 0.7978846, %v4031_v19  ;;  %v3998_v3 = vmul.f32 0.5, %v3982_v24  ;;  %v9431_v52 = vld [vmem:[%s12439_s7 + $0xa0] sm:$0xff]  }
 0xb21   : > { %v4030_v57 = vadd.f32 %v4022_v25, %v3982_v24  ;;  %v4037_v26 = vmul.f32 0.7978846, %v4029_v41  ;;  %v9432_v24 = vld [vmem:[%s12439_s7 + $0xa8] sm:$0xff]   ;;  %v1558_v25 = vld [vmem:[%s12445_s0 + $0x5] sm:$0x1] }
 0xb22   : > { %v4040_v62 = vmul.f32 0.7978846, %v4032_v55  ;;  %9631 = vtanh.f32 %v4039_v34  ;;  %v12465_v41 = vld [vmem:[#allocation15_spill] sm:$0xff]  ;;  %v7773_v34 = vld [vmem:[%s12364_s23] ss:$0 sm:$0xff] }
 0xb23   : > { %v4038_v61 = vmul.f32 0.7978846, %v4030_v57  ;;  %9633 = vtanh.f32 %v4037_v26  ;;  %v1606_v55 = vadd.f32 %v12465_v41, %v1558_v25 }
 0xb24   : > { %v9624_v46 = vpop.eup %9623  ;;  %9635 = vtanh.f32 %v4040_v62 }
 0xb25   : > { %v9626_v49 = vpop.eup %9625  ;;  %v4051_v36 = vadd.f32 1.0, %v9624_v46  ;;  %9637 = vtanh.f32 %v4038_v61  ;;  %v4206_v26 = vrot.slane %v1606_v55, %v12452_v15 }
 0xb26   : > { %v9628_v20 = vpop.eup %9627  ;;  %v4049_v48 = vadd.f32 1.0, %v9626_v49 }
 0xb27   : > { %v9630_v32 = vpop.eup %9629  ;;  %v4052_v42 = vadd.f32 1.0, %v9628_v20  ;;  %v4059_v16 = vmul.f32 %v4051_v36, %v3995_v10 }
 0xb28   : > { %v4050_v60 = vadd.f32 1.0, %v9630_v32  ;;  %v4057_v51 = vmul.f32 %v4049_v48, %v3993_v33 }
 0xb29   : > { %v4060_v35 = vmul.f32 %v4052_v42, %v3996_v17 }
 0xb2a   : > { %v4058_v11 = vmul.f32 %v4050_v60, %v3994_v53 }
 0xb2b   : > { %v4066_v27 = vpack.c.bf16 %v4060_v35, %v4059_v16 }
 0xb2c   : > { %v9632_v9 = vpop.eup %9631  ;;  %v4065_v4 = vpack.c.bf16 %v4058_v11, %v4057_v51 }
 0xb2d   : > { %v9634_v37 = vpop.eup %9633  ;;  %v4055_v43 = vadd.f32 1.0, %v9632_v9 }
 0xb2e   : > { %v9636_v63 = vpop.eup %9635  ;;  %8589 = vmatprep.mubr.bf16.mxu1 %v4065_v4  ;;  %v4053_v6 = vadd.f32 1.0, %v9634_v37 }
 0xb2f   : > { %v9638_v44 = vpop.eup %9637  ;;  %8590 = vmatmul.mubr.bf16.vlgmr.msra.gmra.mrb[64].mxu1 %v4066_v27  ;;  %v4056_v22 = vadd.f32 1.0, %v9636_v63  ;;  %v4063_v5 = vmul.f32 %v4055_v43, %v3999_v18 }
 0xb30   : > { %v4054_v58 = vadd.f32 1.0, %v9638_v44  ;;  %8598 = vmatpush3.bf16.msra.mxu1 %v9427_v14  ;;  %v4061_v47 = vmul.f32 %v4053_v6, %v3997_v7 }
 0xb31   : > { %v4064_v1 = vmul.f32 %v4056_v22, %v4000_v2  ;;  %8599 = vmatprep.subr.bf16.mxu1 %v12449_v56 }
 0xb32   : > { %v4062_v59 = vmul.f32 %v4054_v58, %v3998_v3 }
 0xb33   : > { %v4068_v13 = vpack.c.bf16 %v4064_v1, %v4063_v5 }
 0xb34   : > { %v4067_v19 = vpack.c.bf16 %v4062_v59, %v4061_v47  ;;  %8600 = vmatpush3.bf16.msra.mxu1 %v9428_v23 }
 0xb35   : > { %8613 = vmatprep.subr.bf16.mxu1 %v12449_v56 }
 0xb36   : > { %8593 = vmatprep.mubr.bf16.mxu1 %v4067_v19 }
 0xb37   : > { %8594 = vmatmul.mubr.bf16.gmra.mrb[68].mxu1 %v4068_v13 }
 0xb38   : > { %8601 = vmatprep.mubr.msk.bf16.mxu1 %vm9840_vm1, %v12449_v56 }
 0xb3f   : > { %8602 = vmatmul.mubr.msk.bf16.vlgmr.msra.gmra.mrb[72].mxu1 %vm1207_vm2, %v12450_v50 }
 0xb40   : > { %8614 = vmatpush3.bf16.msra.mxu1 %v9429_v28  ;;  %8617 = vmatprep.mubr.msk.bf16.mxu1 %vm9840_vm1, %v12449_v56 }
 0xb41   : > { %8615 = vmatprep.subr.bf16.mxu1 %v12449_v56 }
 0xb44   : > { %8616 = vmatpush3.bf16.msra.mxu1 %v9430_v40 }
 0xb45   : > { %8629 = vmatprep.subr.bf16.mxu1 %v12449_v56 }
 0xb47   : > { %8618 = vmatmul.mubr.msk.bf16.vlgmr.msra.gmra.mrb[76].mxu1 %vm1207_vm2, %v12450_v50 }
 0xb48   : > { %8630 = vmatpush3.bf16.msra.mxu1 %v9431_v52  ;;  %8633 = vmatprep.mubr.msk.bf16.mxu1 %vm9840_vm1, %v12449_v56 }
 0xb49   : > { %8631 = vmatprep.subr.bf16.mxu1 %v12449_v56 }
 0xb4c   : > { %8632 = vmatpush3.bf16.msra.mxu1 %v9432_v24 }
 0xb4f   : > { %8634 = vmatmul.mubr.msk.bf16.vlgmr.msra.gmra.mrb[80].mxu1 %vm1207_vm2, %v12450_v50 }
 0xc02   : > { %v8591_v57 = vpop.f32.mrb[64].mxu1 }
 0xc03   : > { %v4181_v62 = vadd.f32 %v8591_v57, %v7773_v34  ;;  %v4172_v61 = vpop.f32.mrb[65].mxu1 }
 0xc04   : > { %v4173_v46 = vadd.f32 %v7773_v34, %v4172_v61  ;;  %v8592_v49 = vpop.f32.mrb[66].mxu1 }
 0xc05   : > { %v4209_v36 = vmul.f32 %v4206_v26, %v4181_v62  ;;  %v4184_v20 = vadd.f32 %v8592_v49, %v7773_v34  ;;  %v4175_v48 = vpop.f32.mrb[67].mxu1 }
 0xc06   : > { %v4207_v32 = vmul.f32 %v4206_v26, %v4173_v46  ;;  %v4176_v10 = vadd.f32 %v7773_v34, %v4175_v48 }
 0xc07   : > { %v4210_v17 = vmul.f32 %v4206_v26, %v4184_v20  ;;  %v11264_v53 = vadd.f32 %v4209_v36, %v11037_v8 }
 0xc08   : > { %v11261_v42 = vadd.f32 %v4207_v32, %v11026_v38  ;;  %v4208_v33 = vmul.f32 %v4206_v26, %v4176_v10 }
 0xc09   : > { %12467 = vst [vmem:[#allocation6_spill] sm:$0xff] %v11264_v53  ;;  %v11272_v27 = vadd.f32 %v4210_v17, %v11029_v21  ;;  %v4578_v63 = vsel %vm1207_vm2, %v11264_v53, 0.0 }
 0xc0a   : > { %12466 = vst [vmem:[#allocation5_spill] sm:$0xff] %v11261_v42  ;;  %v11267_v60 = vadd.f32 %v4208_v33, %v11032_v45  ;;  %v8595_v16 = vpop.f32.mrb[68].mxu1  ;;  %v4572_v35 = vsel %vm1207_vm2, %v11261_v42, 0.0 }
 0xc0b   : > { %v4197_v51 = vadd.f32 %v8595_v16, %v7773_v34  ;;  %4573 = vadd.xlane.f32.xlu0 %v4572_v35  ;;  %v4188_v11 = vpop.f32.mrb[69].mxu1  ;;  %12469 = vst [vmem:[#allocation8_spill] sm:$0xff] %v11272_v27  ;;  %v4581_v18 = vsel %vm1207_vm2, %v11272_v27, 0.0 }
 0xc0c   : > { %12468 = vst [vmem:[#allocation3_spill] sm:$0xff] %v11267_v60  ;;  %v4189_v9 = vadd.f32 %v7773_v34, %v4188_v11  ;;  %v8596_v38 = vpop.f32.mrb[70].mxu1  ;;  %v4575_v4 = vsel %vm1207_vm2, %v11267_v60, 0.0 }
 0xc0d   : > { %v4213_v8 = vmul.f32 %v4206_v26, %v4197_v51  ;;  %v4200_v14 = vadd.f32 %v8596_v38, %v7773_v34  ;;  %4576 = vadd.xlane.f32.xlu1 %v4575_v4  ;;  %v4191_v45 = vpop.f32.mrb[71].mxu1 }
 0xc0e   : > { %v4211_v37 = vmul.f32 %v4206_v26, %v4189_v9  ;;  %v4192_v43 = vadd.f32 %v7773_v34, %v4191_v45 }
 0xc0f   : > { %v4214_v6 = vmul.f32 %v4206_v26, %v4200_v14  ;;  %4579 = vadd.xlane.f32.xlu0 %v4578_v63  ;;  %v11284_v2 = vadd.f32 %v4213_v8, %v11054_v39 }
 0xc10   : > { %v11279_v44 = vadd.f32 %v4211_v37, %v11044_v54  ;;  %v4212_v21 = vmul.f32 %v4206_v26, %v4192_v43 }
 0xc11   : > { %4582 = vadd.xlane.f32.xlu1 %v4581_v18  ;;  %12471 = vst [vmem:[#allocation7_spill] sm:$0xff] %v11284_v2  ;;  %v11294_v54 = vadd.f32 %v4214_v6, %v11057_v12 }
 0xc12   : > { %12470 = vst [vmem:[#allocation10_spill] sm:$0xff] %v11279_v44  ;;  %v11287_v22 = vadd.f32 %v4212_v21, %v11049_v30  ;;  %v11289_v7 = vpop.f32.mrb[72].mxu1  ;;  %v4584_v3 = vsel %vm1207_vm2, %v11279_v44, 0.0  ;;  %v4590_v30 = vsel %vm1207_vm2, %v11284_v2, 0.0 }
 0xc13   : > { %v8603_v58 = vpop.f32.mrb[73].mxu1  ;;  %4585 = vadd.xlane.f32.xlu0 %v4584_v3  ;;  %12473 = vst [vmem:[#allocation12_spill] sm:$0xff] %v11294_v54  ;;  %v4593_v39 = vsel %vm1207_vm2, %v11294_v54, 0.0 }
 0xc14   : > { %12472 = vst [vmem:[#allocation9_spill] sm:$0xff] %v11287_v22  ;;  %v4279_v23 = vpop.f32.mrb[74].mxu1  ;;  %v4587_v5 = vsel %vm1207_vm2, %v11287_v22, 0.0 }
 0xc15   : > { %v8604_v1 = vpop.f32.mrb[75].mxu1  ;;  %4588 = vadd.xlane.f32.xlu1 %v4587_v5 }
 0xc17   : > { %4591 = vadd.xlane.f32.xlu0 %v4590_v30 }
 0xc19   : > { %4594 = vadd.xlane.f32.xlu1 %v4593_v39  ;;  %v9433_v39 = vld [vmem:[%s12443_s2 + $0x10] sm:$0xff]  }
 0xc1a   : > { %v11302_v47 = vpop.f32.mrb[76].mxu1  ;;  %8645 = vmatprep.subr.bf16.mxu1 %v9433_v39 }
 0xc1b   : > { %12474 = vst [vmem:[#allocation14_spill] sm:$0xff] %v11302_v47  ;;  %v8619_v59 = vpop.f32.mrb[77].mxu1  ;;  %8646 = vmatpush3.bf16.msra.mxu1 %v9433_v39 }
 0xc1c   : > { %v4395_v13 = vpop.f32.mrb[78].mxu1  ;;  %v9434_v59 = vld [vmem:[%s12355_s14 + $0x10] sm:$0xff]  }
 0xc1d   : > { %v8620_v12 = vpop.f32.mrb[79].mxu1  ;;  %v9435_v13 = vld [vmem:[%s12443_s2 + $0x18] sm:$0xff]   ;;  %8657 = vmatprep.subr.bf16.mxu0 %v9434_v59 }
 0xc1e   : > { %v9436_v12 = vld [vmem:[%s12355_s14 + $0x18] sm:$0xff]   ;;  %8658 = vmatpush3.bf16.msra.mxu0 %v9434_v59  ;;  %8647 = vmatprep.subr.bf16.mxu1 %v9435_v13 }
 0xc1f   : > { %8659 = vmatprep.subr.bf16.mxu0 %v9436_v12  ;;  %8648 = vmatpush3.bf16.msra.mxu1 %v9435_v13 }
 0xc22   : > { %v11304_v19 = vpop.f32.mrb[80].mxu1  ;;  %8660 = vmatpush3.bf16.msra.mxu0 %v9436_v12 }
 0xc23   : > { %12475 = vst [vmem:[#allocation15_spill] sm:$0xff] %v11304_v19  ;;  %v8635_v28 = vpop.f32.mrb[81].mxu1 }
 0xc24   : > { %v4511_v40 = vpop.f32.mrb[82].mxu1  ;;  %v11369_v28 = vld [vmem:[%s12357_s16 + $0x10] sm:$0xff]  }
 0xc25   : > { %v8636_v52 = vpop.f32.mrb[83].mxu1  ;;  %8669 = vmatprep.subr.bf16.mxu1 %v11369_v28 }
 0xc98   : > { %v4574_v24 = vpop.xlane.xlu0 %4573 }
 0xc99   : > { %v4596_v25 = vmul.f32 0.03125, %v4574_v24 }
 0xc9a   : > { %v4577_v41 = vpop.xlane.xlu1 %4576 }
 0xc9b   : > { %v11307_v55 = vsub.f32 %v11261_v42, %v4596_v25  ;;  %v4597_v34 = vmul.f32 0.03125, %v4577_v41 }
 0xc9c   : > { %v4580_v57 = vpop.xlane.xlu0 %4579 }
 0xc9d   : > { %v11310_v26 = vsub.f32 %v11267_v60, %v4597_v34  ;;  %v4598_v62 = vmul.f32 0.03125, %v4580_v57  ;;  %v4612_v61 = vmul.f32 %v11307_v55, %v11307_v55  ;;  %v7794_v57 = vld [vmem:[%s12445_s0 + $0x9] sm:$0x1] }
 0xc9e   : > { %v4583_v46 = vpop.xlane.xlu1 %4582 }
 0xc9f   : > { %v11315_v49 = vsub.f32 %v11264_v53, %v4598_v62  ;;  %v4599_v36 = vmul.f32 0.03125, %v4583_v46  ;;  %v4620_v20 = vsel %vm1207_vm2, %v4612_v61, 0.0  ;;  %v4613_v48 = vmul.f32 %v11310_v26, %v11310_v26 }
 0xca0   : > { %4621 = vadd.xlane.f32.xlu0 %v4620_v20  ;;  %v4586_v32 = vpop.xlane.xlu0 %4585 }
 0xca1   : > { %v11321_v10 = vsub.f32 %v11272_v27, %v4599_v36  ;;  %v4600_v17 = vmul.f32 0.03125, %v4586_v32  ;;  %v4623_v33 = vsel %vm1207_vm2, %v4613_v48, 0.0  ;;  %v4614_v16 = vmul.f32 %v11315_v49, %v11315_v49 }
 0xca2   : > { %4624 = vadd.xlane.f32.xlu1 %v4623_v33  ;;  %v4589_v35 = vpop.xlane.xlu1 %4588  ;;  %v4335_v48 = vadd.f32 %v7794_v57, %v11051_v0 }
 0xca3   : > { %v11327_v51 = vsub.f32 %v11279_v44, %v4600_v17  ;;  %v4601_v11 = vmul.f32 0.03125, %v4589_v35  ;;  %v4626_v9 = vsel %vm1207_vm2, %v4614_v16, 0.0  ;;  %v4615_v38 = vmul.f32 %v11321_v10, %v11321_v10  ;;  %v7786_v35 = vld [vmem:[%s12445_s0 + $0x8] sm:$0x1] }
 0xca4   : > { %4627 = vadd.xlane.f32.xlu0 %v4626_v9  ;;  %v4592_v4 = vpop.xlane.xlu0 %4591 }
 0xca5   : > { %v11333_v8 = vsub.f32 %v11287_v22, %v4601_v11  ;;  %v4602_v14 = vmul.f32 0.03125, %v4592_v4  ;;  %v4629_v45 = vsel %vm1207_vm2, %v4615_v38, 0.0  ;;  %v4616_v37 = vmul.f32 %v11327_v51, %v11327_v51 }
 0xca6   : > { %4630 = vadd.xlane.f32.xlu1 %v4629_v45  ;;  %v4595_v43 = vpop.xlane.xlu1 %4594  ;;  %v4676_v38 = vadd.f32 1.0, %v4335_v48 }
 0xca7   : > { %v11339_v63 = vsub.f32 %v11284_v2, %v4602_v14  ;;  %v4603_v6 = vmul.f32 0.03125, %v4595_v43  ;;  %v4632_v21 = vsel %vm1207_vm2, %v4616_v37, 0.0  ;;  %v4617_v18 = vmul.f32 %v11333_v8, %v11333_v8 }
 0xca8   : > { %4633 = vadd.xlane.f32.xlu0 %v4632_v21  ;;  %v4277_v37 = vadd.f32 %v7786_v35, %v11289_v7 }
 0xca9   : > { %v11345_v3 = vsub.f32 %v11294_v54, %v4603_v6  ;;  %v4635_v58 = vsel %vm1207_vm2, %v4617_v18, 0.0  ;;  %v4618_v23 = vmul.f32 %v11339_v63, %v11339_v63  ;;  %v4680_v18 = vrot.slane %v4676_v38, %v12452_v15 }
 0xcaa   : > { %4636 = vadd.xlane.f32.xlu1 %v4635_v58 }
 0xcab   : > { %v4638_v5 = vsel %vm1207_vm2, %v4618_v23, 0.0  ;;  %v4619_v1 = vmul.f32 %v11345_v3, %v11345_v3 }
 0xcac   : > { %4639 = vadd.xlane.f32.xlu0 %v4638_v5 }
 0xcad   : > { %v4641_v30 = vsel %vm1207_vm2, %v4619_v1, 0.0  ;;  %v4692_v1 = vrot.slane %v4277_v37, %v12452_v15 }
 0xcae   : > { %4642 = vadd.xlane.f32.xlu1 %v4641_v30 }
 0xd2d   : > { %v4622_v40 = vpop.xlane.xlu0 %4621 }
 0xd2e   : > { %v4644_v52 = vmul.f32 0.03125, %v4622_v40 }
 0xd2f   : > { %v4625_v24 = vpop.xlane.xlu1 %4624 }
 0xd30   : > { %v4652_v25 = vadd.f32 1e-06, %v4644_v52  ;;  %v4645_v41 = vmul.f32 0.03125, %v4625_v24 }
 0xd31   : > { %v4628_v34 = vpop.xlane.xlu0 %4627 }
 0xd32   : > { %9639 = vrsqrt.f32 %v4652_v25  ;;  %v4653_v62 = vadd.f32 1e-06, %v4645_v41  ;;  %v4646_v61 = vmul.f32 0.03125, %v4628_v34 }
 0xd33   : > { %v4631_v46 = vpop.xlane.xlu1 %4630 }
 0xd34   : > { %9641 = vrsqrt.f32 %v4653_v62  ;;  %v4654_v36 = vadd.f32 1e-06, %v4646_v61  ;;  %v4647_v20 = vmul.f32 0.03125, %v4631_v46 }
 0xd35   : > { %v4634_v32 = vpop.xlane.xlu0 %4633 }
 0xd36   : > { %9643 = vrsqrt.f32 %v4654_v36  ;;  %v4655_v17 = vadd.f32 1e-06, %v4647_v20  ;;  %v4648_v33 = vmul.f32 0.03125, %v4634_v32 }
 0xd37   : > { %v4637_v16 = vpop.xlane.xlu1 %4636 }
 0xd38   : > { %9645 = vrsqrt.f32 %v4655_v17  ;;  %v4656_v11 = vadd.f32 1e-06, %v4648_v33  ;;  %v4649_v9 = vmul.f32 0.03125, %v4637_v16  ;;  %v9438_v17 = vld [vmem:[%s12357_s16 + $0x18] sm:$0xff]  }
 0xd39   : > { %v4640_v4 = vpop.xlane.xlu0 %4639 }
 0xd3a   : > { %9647 = vrsqrt.f32 %v4656_v11  ;;  %v4657_v14 = vadd.f32 1e-06, %v4649_v9  ;;  %v4650_v45 = vmul.f32 0.03125, %v4640_v4 }
 0xd3b   : > { %v4643_v0 = vpop.xlane.xlu1 %4642 }
 0xd3c   : > { %v9640_v43 = vpop.eup %9639  ;;  %9649 = vrsqrt.f32 %v4657_v14  ;;  %v4658_v6 = vadd.f32 1e-06, %v4650_v45  ;;  %v4651_v21 = vmul.f32 0.03125, %v4643_v0  ;;  %v7845_v14 = vld [vmem:[%s12356_s15 + $0x1] ss:$0 sm:$0xff] }
 0xd3d   : > { %v4668_v58 = vmul.f32 %v9640_v43, %v11307_v55 }
 0xd3e   : > { %v9642_v23 = vpop.eup %9641  ;;  %9651 = vrsqrt.f32 %v4658_v6  ;;  %v4659_v5 = vadd.f32 1e-06, %v4651_v21 }
 0xd3f   : > { %v4669_v30 = vmul.f32 %v9642_v23, %v11310_v26  ;;  %v4681_v39 = vmul.f32 %v4680_v18, %v4668_v58 }
 0xd40   : > { %v9644_v59 = vpop.eup %9643  ;;  %9653 = vrsqrt.f32 %v4659_v5 }
 0xd41   : > { %v4670_v7 = vmul.f32 %v9644_v59, %v11315_v49  ;;  %v4682_v13 = vmul.f32 %v4680_v18, %v4669_v30  ;;  %v4693_v12 = vadd.f32 %v4692_v1, %v4681_v39 }
 0xd42   : > { %v9646_v40 = vpop.eup %9645 }
 0xd43   : > { %v4683_v52 = vmul.f32 %v4680_v18, %v4670_v7  ;;  %v4671_v24 = vmul.f32 %v9646_v40, %v11321_v10  ;;  %v4694_v25 = vadd.f32 %v4692_v1, %v4682_v13 }
 0xd44   : > { %v9648_v55 = vpop.eup %9647 }
 0xd45   : > { %v4684_v41 = vmul.f32 %v4680_v18, %v4671_v24  ;;  %v4701_v34 = vpack.c.bf16 %v4694_v25, %v4693_v12  ;;  %v4695_v57 = vadd.f32 %v4692_v1, %v4683_v52  ;;  %v4672_v62 = vmul.f32 %v9648_v55, %v11327_v51 }
 0xd46   : > { %v9650_v61 = vpop.eup %9649 }
 0xd47   : > { %8649 = vmatprep.mubr.msk.bf16.mxu1 %vm1207_vm2, %v4701_v34  ;;  %8661 = vmatprep.mubr.msk.bf16.mxu0 %vm1207_vm2, %v4701_v34  ;;  %v4696_v26 = vadd.f32 %v4692_v1, %v4684_v41  ;;  %v4673_v49 = vmul.f32 %v9650_v61, %v11333_v8  ;;  %v4685_v46 = vmul.f32 %v4680_v18, %v4672_v62 }
 0xd48   : > { %v9652_v36 = vpop.eup %9651 }
 0xd49   : > { %v4702_v20 = vpack.c.bf16 %v4696_v26, %v4695_v57  ;;  %v4686_v48 = vmul.f32 %v4680_v18, %v4673_v49  ;;  %v4697_v10 = vadd.f32 %v4692_v1, %v4685_v46  ;;  %v4674_v32 = vmul.f32 %v9652_v36, %v11339_v63 }
 0xd4a   : > { %v9654_v51 = vpop.eup %9653 }
 0xd4b   : > { %8650 = vmatmul.mubr.msk.bf16.vlgmr.msra.gmra.mrb[84].mxu1 %vm1207_vm2, %v4702_v20  ;;  %8662 = vmatmul.mubr.msk.bf16.vlgmr.msra.gmra.mrb[92].mxu0 %vm1207_vm2, %v4702_v20  ;;  %v4698_v33 = vadd.f32 %v4692_v1, %v4686_v48  ;;  %v4675_v16 = vmul.f32 %v9654_v51, %v11345_v3  ;;  %v4687_v8 = vmul.f32 %v4680_v18, %v4674_v32 }
 0xd4c   : > { %8670 = vmatpush3.bf16.msra.mxu1 %v11369_v28  ;;  %v7834_v28 = vld [vmem:[%s12354_s13 + $0x1] ss:$0 sm:$0xff] }
 0xd4d   : > { %v4703_v35 = vpack.c.bf16 %v4698_v33, %v4697_v10  ;;  %v4688_v11 = vmul.f32 %v4680_v18, %v4675_v16  ;;  %v4699_v9 = vadd.f32 %v4692_v1, %v4687_v8  ;;  %8671 = vmatprep.subr.bf16.mxu1 %v9438_v17 }
 0xd4f   : > { %8653 = vmatprep.mubr.msk.bf16.mxu1 %vm1207_vm2, %v4703_v35  ;;  %8665 = vmatprep.mubr.msk.bf16.mxu0 %vm1207_vm2, %v4703_v35  ;;  %v4700_v63 = vadd.f32 %v4692_v1, %v4688_v11 }
 0xd50   : > { %8672 = vmatpush3.bf16.msra.mxu1 %v9438_v17 }
 0xd51   : > { %v4704_v38 = vpack.c.bf16 %v4700_v63, %v4699_v9 }
 0xd53   : > { %8654 = vmatmul.mubr.msk.bf16.gmra.mrb[88].mxu1 %vm1207_vm2, %v4704_v38  ;;  %8666 = vmatmul.mubr.msk.bf16.gmra.mrb[96].mxu0 %vm1207_vm2, %v4704_v38 }
 0xd54   : > { %8673 = vmatprep.mubr.msk.bf16.mxu1 %vm1207_vm2, %v4701_v34 }
 0xd5b   : > { %8674 = vmatmul.mubr.msk.bf16.vlgmr.msra.gmra.mrb[92].mxu1 %vm1207_vm2, %v4702_v20 }
 0xd5c   : > { %8677 = vmatprep.mubr.msk.bf16.mxu1 %vm1207_vm2, %v4703_v35 }
 0xd63   : > { %8678 = vmatmul.mubr.msk.bf16.gmra.mrb[96].mxu1 %vm1207_vm2, %v4704_v38 }
 0xe1e   : > { %v8651_v3 = vpop.f32.mrb[84].mxu1  ;;  %v8663_v4 = vpop.f32.mrb[92].mxu0 }
 0xe1f   : > { %v4773_v45 = vpop.f32.mrb[85].mxu1  ;;  %v4860_v37 = vpop.f32.mrb[93].mxu0  ;;  %v11412_v6 = vadd.f32 %v8651_v3, %v7834_v28  ;;  %v4869_v21 = vadd.f32 %v8663_v4, %v7845_v14  ;;  %v7856_v4 = vld [vmem:[%s12358_s17 + $0x1] ss:$0 sm:$0xff] }
 0xe20   : > { %v8652_v0 = vpop.f32.mrb[86].mxu1  ;;  %v8664_v43 = vpop.f32.mrb[94].mxu0  ;;  %v4774_v1 = vadd.f32 %v7834_v28, %v4773_v45  ;;  %v4861_v30 = vadd.f32 %v7845_v14, %v4860_v37 }
 0xe21   : > { %v11414_v18 = vadd.f32 %v8652_v0, %v7834_v28  ;;  %v4872_v58 = vadd.f32 %v8664_v43, %v7845_v14  ;;  %v4776_v23 = vpop.f32.mrb[87].mxu1  ;;  %v4863_v5 = vpop.f32.mrb[95].mxu0 }
 0xe22   : > { %v4777_v39 = vadd.f32 %v7834_v28, %v4776_v23  ;;  %v4864_v59 = vadd.f32 %v7845_v14, %v4863_v5 }
 0xe23   : > { %v5059_v7 = vpack.c.bf16 %v11414_v18, %v11412_v6  ;;  %v11418_v13 = vpack.i.bf16 %v4872_v58, %v4869_v21  ;;  %v5155_v12 = vpack.c.bf16 %v4872_v58, %v4869_v21  ;;  %v11422_v40 = vpack.i.bf16 %v11414_v18, %v11412_v6 }
 0xe24   : > { %v11424_v52 = vpack.i.bf16 %v4864_v59, %v4861_v30  ;;  %v5154_v24 = vpack.c.bf16 %v4864_v59, %v4861_v30  ;;  %v5058_v25 = vpack.c.bf16 %v4777_v39, %v4774_v1  ;;  %v11426_v55 = vpack.i.bf16 %v4777_v39, %v4774_v1 }
 0xe25   : > { %9200 = vrot.lane.b32.xlu1 %v11418_v13, %s9841_s29 }
 0xe26   : > { %9195 = vrot.lane.b32.xlu0 %v11424_v52, %s9841_s29  ;;  %v8655_v41 = vpop.f32.mrb[88].mxu1  ;;  %v8667_v34 = vpop.f32.mrb[96].mxu0  ;;  %8981 = vmatprep.subr.msk.bf16.mxu0 %vm2303_vm3, %v5154_v24  ;;  %v5279_v57 = vsel %vm2303_vm3, %v5154_v24, 0 }
 0xe27   : > { %8689 = vmatprep.mubr.msk.bf16.mxu0 %vm2303_vm3, %v5058_v25  ;;  %v4789_v62 = vpop.f32.mrb[89].mxu1  ;;  %v4876_v61 = vpop.f32.mrb[97].mxu0  ;;  %8682 = vmatpush3.bf16.xpose.msra.mxu0 %v5279_v57  ;;  %v11436_v46 = vadd.f32 %v8655_v41, %v7834_v28  ;;  %v4885_v36 = vadd.f32 %v8667_v34, %v7845_v14 }
 0xe28   : > { %v8656_v26 = vpop.f32.mrb[90].mxu1  ;;  %v8668_v49 = vpop.f32.mrb[98].mxu0  ;;  %8982 = vmatprep.subr.msk.bf16.mxu0 %vm2303_vm3, %v5155_v12  ;;  %v4790_v17 = vadd.f32 %v7834_v28, %v4789_v62  ;;  %v4877_v51 = vadd.f32 %v7845_v14, %v4876_v61 }
 0xe29   : > { %v11438_v20 = vadd.f32 %v8656_v26, %v7834_v28  ;;  %v4888_v48 = vadd.f32 %v8668_v49, %v7845_v14  ;;  %v4792_v10 = vpop.f32.mrb[91].mxu1  ;;  %v4879_v32 = vpop.f32.mrb[99].mxu0 }
 0xe2a   : > { %v4793_v33 = vadd.f32 %v7834_v28, %v4792_v10  ;;  %v4880_v16 = vadd.f32 %v7845_v14, %v4879_v32  ;;  %9215 = vrot.lane.b32.xlu0 %v11426_v55, %s9841_s29  ;;  %v5282_v14 = vsel %vm2303_vm3, %v5155_v12, 0 }
 0xe2b   : > { %v9209_v8 = vpack.i.bf16 %v4888_v48, %v4885_v36  ;;  %v11444_v35 = vpack.i.bf16 %v11438_v20, %v11436_v46  ;;  %v5157_v11 = vpack.c.bf16 %v4888_v48, %v4885_v36  ;;  %v5061_v45 = vpack.c.bf16 %v11438_v20, %v11436_v46 }
 0xe2c   : > { %v9204_v9 = vpack.i.bf16 %v4880_v16, %v4877_v51  ;;  %v5156_v63 = vpack.c.bf16 %v4880_v16, %v4877_v51  ;;  %v9234_v38 = vpack.i.bf16 %v4793_v33, %v4790_v17  ;;  %v5060_v3 = vpack.c.bf16 %v4793_v33, %v4790_v17 }
 0xe2d   : > { %v5288_v48 = vsel %vm2303_vm3, %v5157_v11, 0 }
 0xe2e   : > { %9225 = vrot.lane.b32.xlu0 %v11424_v52, %s12476_s4  ;;  %9205 = vrot.lane.b32.xlu1 %v9204_v9, %s9841_s29  ;;  %v8675_v28 = vpop.f32.mrb[92].mxu1  ;;  %v5285_v24 = vsel %vm2303_vm3, %v5156_v63, 0 }
 0xe2f   : > { %v4947_v37 = vpop.f32.mrb[93].mxu1  ;;  %8684 = vmatpush3.bf16.xpose.msra.mxu0 %v5282_v14  ;;  %v4956_v43 = vadd.f32 %v8675_v28, %v7856_v4 }
 0xe30   : > { %v8676_v0 = vpop.f32.mrb[94].mxu1  ;;  %8983 = vmatprep.subr.msk.bf16.mxu0 %vm2303_vm3, %v5156_v63  ;;  %v4948_v23 = vadd.f32 %v7856_v4, %v4947_v37 }
 0xe31   : > { %v4959_v21 = vadd.f32 %v8676_v0, %v7856_v4  ;;  %v4950_v58 = vpop.f32.mrb[95].mxu1 }
 0xe32   : > { %v4951_v5 = vadd.f32 %v7856_v4, %v4950_v58  ;;  %9210 = vrot.lane.b32.xlu1 %v9209_v8, %s9841_s29  ;;  %9230 = vrot.lane.b32.xlu0 %v11444_v35, %s9841_s29 }
 0xe33   : > { %v11459_v1 = vpack.i.bf16 %v4959_v21, %v4956_v43  ;;  %v11461_v30 = vpack.c.bf16 %v4959_v21, %v4956_v43 }
 0xe34   : > { %v11463_v39 = vpack.i.bf16 %v4951_v5, %v4948_v23  ;;  %v11465_v59 = vpack.c.bf16 %v4951_v5, %v4948_v23 }
 0xe36   : > { %9220 = vrot.lane.b32.xlu1 %v11422_v40, %s9841_s29  ;;  %9245 = vrot.lane.b32.xlu0 %v9204_v9, %s12476_s4  ;;  %v8679_v12 = vpop.f32.mrb[96].mxu1 }
 0xe37   : > { %v4963_v25 = vpop.f32.mrb[97].mxu1  ;;  %8686 = vmatpush3.bf16.xpose.msra.mxu0 %v5285_v24  ;;  %v4972_v34 = vadd.f32 %v8679_v12, %v7856_v4 }
 0xe38   : > { %v8680_v41 = vpop.f32.mrb[98].mxu1  ;;  %8984 = vmatprep.subr.msk.bf16.mxu0 %vm2303_vm3, %v5157_v11  ;;  %v4964_v61 = vadd.f32 %v7856_v4, %v4963_v25 }
 0xe39   : > { %v4975_v57 = vadd.f32 %v8680_v41, %v7856_v4  ;;  %v4966_v62 = vpop.f32.mrb[99].mxu1 }
 0xe3a   : > { %v4967_v26 = vadd.f32 %v7856_v4, %v4966_v62  ;;  %9255 = vrot.lane.b32.xlu0 %v9209_v8, %s12476_s4  ;;  %9235 = vrot.lane.b32.xlu1 %v9234_v38, %s9841_s29 }
 0xe3b   : > { %v11474_v49 = vpack.i.bf16 %v4975_v57, %v4972_v34  ;;  %v11476_v46 = vpack.c.bf16 %v4975_v57, %v4972_v34 }
 0xe3c   : > { %v11478_v36 = vpack.i.bf16 %v4967_v26, %v4964_v61  ;;  %v11480_v20 = vpack.c.bf16 %v4967_v26, %v4964_v61 }
 0xe3e   : > { %9265 = vrot.lane.b32.xlu0 %v11426_v55, %s12476_s4  ;;  %9240 = vrot.lane.b32.xlu1 %v11418_v13, %s12476_s4 }
 0xe3f   : > { %8688 = vmatpush3.bf16.xpose.msra.mxu0 %v5288_v48 }
 0xe42   : > { %9275 = vrot.lane.b32.xlu0 %v9204_v9, %s12477_s11  ;;  %9250 = vrot.lane.b32.xlu1 %v11424_v52, %s12477_s11 }
 0xe46   : > { %8690 = vmatmul.mubr.msk.bf16.vlgmr.msra.gmra.mrb[100].mxu0 %vm2303_vm3, %v5059_v7  ;;  %9280 = vrot.lane.b32.xlu0 %v11444_v35, %s12476_s4 }
 0xe47   : > { %9260 = vrot.lane.b32.xlu1 %v11418_v13, %s12477_s11  ;;  %8693 = vmatprep.mubr.msk.bf16.mxu0 %vm2303_vm3, %v5060_v3 }
 0xe4a   : > { %9295 = vrot.lane.b32.xlu0 %v11426_v55, %s12477_s11 }
 0xe4b   : > { %9270 = vrot.lane.b32.xlu1 %v11422_v40, %s12476_s4 }
 0xe4e   : > { %9305 = vrot.lane.b32.xlu0 %v9234_v38, %s12477_s11  ;;  %8694 = vmatmul.mubr.msk.bf16.gmra.mrb[104].mxu0 %vm2303_vm3, %v5061_v45 }
 0xe4f   : > { %9285 = vrot.lane.b32.xlu1 %v9234_v38, %s12476_s4 }
 0xe52   : > { %9325 = vrot.lane.b32.xlu0 %v11463_v39, %s9841_s29 }
 0xe53   : > { %9290 = vrot.lane.b32.xlu1 %v9209_v8, %s12477_s11 }
 0xe56   : > { %9330 = vrot.lane.b32.xlu0 %v11463_v39, %s12476_s4 }
 0xe57   : > { %9300 = vrot.lane.b32.xlu1 %v11422_v40, %s12477_s11 }
 0xe5a   : > { %9340 = vrot.lane.b32.xlu0 %v11478_v36, %s9841_s29 }
 0xe5b   : > { %9310 = vrot.lane.b32.xlu1 %v11444_v35, %s12477_s11 }
 0xe5f   : > { %9315 = vrot.lane.b32.xlu1 %v11459_v1, %s9841_s29 }
 0xe63   : > { %9320 = vrot.lane.b32.xlu1 %v11459_v1, %s12476_s4 }
 0xe67   : > { %9335 = vrot.lane.b32.xlu1 %v11474_v49, %s9841_s29  ;;  %s876_s29 = scalar_lea.vmem %s12369_s28, %s12495_s30 }
 0xe97   : > { %v9201_v6 = vpop.permute.xlu1 %9200 }
 0xe98   : > { %v9196_v18 = vpop.permute.xlu0 %9195  ;;  %v9203_v7 = vunpack.i.h.bf16 %v9201_v6  ;;  %v9202_v13 = vunpack.i.l.bf16 %v9201_v6 }
 0xe99   : > { %v9198_v40 = vunpack.i.h.bf16 %v9196_v18  ;;  %v9197_v52 = vunpack.i.l.bf16 %v9196_v18 }
 0xe9a   : > { %v5159_v32 = vpack.c.bf16 %v9203_v7, %v9202_v13 }
 0xe9b   : > { %v5158_v55 = vpack.c.bf16 %v9198_v40, %v9197_v52 }
 0xe9c   : > { %v9216_v10 = vpop.permute.xlu0 %9215  ;;  %v5371_v45 = vsel %vm2303_vm3, %v5159_v32, 0 }
 0xe9d   : > { %v9218_v17 = vunpack.i.h.bf16 %v9216_v10  ;;  %v9217_v51 = vunpack.i.l.bf16 %v9216_v10  ;;  %8985 = vmatprep.subr.msk.bf16.mxu1 %vm2303_vm3, %v5158_v55  ;;  %v5368_v33 = vsel %vm2303_vm3, %v5158_v55, 0 }
 0xe9e   : > { %8698 = vmatpush3.bf16.xpose.msra.mxu1 %v5368_v33 }
 0xe9f   : > { %v5062_v16 = vpack.c.bf16 %v9218_v17, %v9217_v51  ;;  %8986 = vmatprep.subr.msk.bf16.mxu1 %vm2303_vm3, %v5159_v32 }
 0xea0   : > { %v9206_v8 = vpop.permute.xlu1 %9205  ;;  %v9226_v35 = vpop.permute.xlu0 %9225 }
 0xea1   : > { %v9208_v11 = vunpack.i.h.bf16 %v9206_v8  ;;  %v9207_v9 = vunpack.i.l.bf16 %v9206_v8  ;;  %v9228_v63 = vunpack.i.h.bf16 %v9226_v35  ;;  %v9227_v38 = vunpack.i.l.bf16 %v9226_v35  ;;  %8705 = vmatprep.mubr.msk.bf16.mxu1 %vm2303_vm3, %v5062_v16 }
 0xea3   : > { %v5162_v3 = vpack.c.bf16 %v9228_v63, %v9227_v38  ;;  %v5160_v14 = vpack.c.bf16 %v9208_v11, %v9207_v9 }
 0xea4   : > { %v9211_v28 = vpop.permute.xlu1 %9210  ;;  %v11527_v4 = vpop.permute.xlu0 %9230 }
 0xea5   : > { %8989 = vmatprep.subr.msk.bf16.mxu0 %vm2303_vm3, %v5162_v3  ;;  %v5457_v37 = vsel %vm2303_vm3, %v5162_v3, 0  ;;  %v9213_v21 = vunpack.i.h.bf16 %v9211_v28  ;;  %v9212_v58 = vunpack.i.l.bf16 %v9211_v28  ;;  %v5374_v24 = vsel %vm2303_vm3, %v5160_v14, 0 }
 0xea6   : > { %8700 = vmatpush3.bf16.xpose.msra.mxu1 %v5371_v45  ;;  %8714 = vmatpush3.bf16.xpose.msra.mxu0 %v5457_v37 }
 0xea7   : > { %8987 = vmatprep.subr.msk.bf16.mxu1 %vm2303_vm3, %v5160_v14  ;;  %v5161_v12 = vpack.c.bf16 %v9213_v21, %v9212_v58 }
 0xea8   : > { %v9221_v0 = vpop.permute.xlu1 %9220  ;;  %v9246_v43 = vpop.permute.xlu0 %9245 }
 0xea9   : > { %v9248_v26 = vunpack.i.h.bf16 %v9246_v43  ;;  %v9247_v48 = vunpack.i.l.bf16 %v9246_v43  ;;  %v5377_v55 = vsel %vm2303_vm3, %v5161_v12, 0  ;;  %v9223_v17 = vunpack.i.h.bf16 %v9221_v0 }
 0xeaa   : > { %v9222_v51 = vunpack.i.l.bf16 %v9221_v0 }
 0xeab   : > { %v5164_v10 = vpack.c.bf16 %v9248_v26, %v9247_v48 }
 0xeac   : > { %v9236_v23 = vpop.permute.xlu1 %9235  ;;  %v9256_v5 = vpop.permute.xlu0 %9255  ;;  %v5063_v28 = vpack.c.bf16 %v9223_v17, %v9222_v51 }
 0xead   : > { %v9238_v16 = vunpack.i.h.bf16 %v9236_v23  ;;  %v9237_v8 = vunpack.i.l.bf16 %v9236_v23  ;;  %v9258_v9 = vunpack.i.h.bf16 %v9256_v5  ;;  %v9257_v63 = vunpack.i.l.bf16 %v9256_v5 }
 0xeae   : > { %8702 = vmatpush3.bf16.xpose.msra.mxu1 %v5374_v24  ;;  %v5463_v58 = vsel %vm2303_vm3, %v5164_v10, 0  ;;  %v9233_v23 = vunpack.i.h.bf16 %v11527_v4  ;;  %v9232_v5 = vunpack.i.l.bf16 %v11527_v4 }
 0xeaf   : > { %8988 = vmatprep.subr.msk.bf16.mxu1 %vm2303_vm3, %v5161_v12  ;;  %v5064_v14 = vpack.c.bf16 %v9238_v16, %v9237_v8  ;;  %v5165_v21 = vpack.c.bf16 %v9258_v9, %v9257_v63 }
 0xeb0   : > { %v9241_v25 = vpop.permute.xlu1 %9240  ;;  %v9266_v41 = vpop.permute.xlu0 %9265 }
 0xeb1   : > { %v9243_v34 = vunpack.i.h.bf16 %v9241_v25  ;;  %v9242_v57 = vunpack.i.l.bf16 %v9241_v25  ;;  %v9268_v62 = vunpack.i.h.bf16 %v9266_v41  ;;  %v9267_v61 = vunpack.i.l.bf16 %v9266_v41 }
 0xeb2   : > { %v5466_v4 = vsel %vm2303_vm3, %v5165_v21, 0 }
 0xeb3   : > { %v5163_v6 = vpack.c.bf16 %v9243_v34, %v9242_v57  ;;  %v5066_v18 = vpack.c.bf16 %v9268_v62, %v9267_v61  ;;  %v5065_v57 = vpack.c.bf16 %v9233_v23, %v9232_v5 }
 0xeb4   : > { %v9251_v7 = vpop.permute.xlu1 %9250  ;;  %v9276_v13 = vpop.permute.xlu0 %9275 }
 0xeb5   : > { %v9253_v40 = vunpack.i.h.bf16 %v9251_v7  ;;  %v9252_v52 = vunpack.i.l.bf16 %v9251_v7  ;;  %8990 = vmatprep.subr.msk.bf16.mxu0 %vm2303_vm3, %v5163_v6  ;;  %8721 = vmatprep.mubr.msk.bf16.mxu0 %vm2303_vm3, %v5066_v18  ;;  %v5460_v32 = vsel %vm2303_vm3, %v5163_v6, 0  ;;  %v9278_v25 = vunpack.i.h.bf16 %v9276_v13 }
 0xeb6   : > { %8704 = vmatpush3.bf16.xpose.msra.mxu1 %v5377_v55  ;;  %8716 = vmatpush3.bf16.xpose.msra.mxu0 %v5460_v32  ;;  %v9277_v41 = vunpack.i.l.bf16 %v9276_v13 }
 0xeb7   : > { %v5166_v33 = vpack.c.bf16 %v9253_v40, %v9252_v52  ;;  %8991 = vmatprep.subr.msk.bf16.mxu0 %vm2303_vm3, %v5164_v10 }
 0xeb8   : > { %v11540_v35 = vpop.permute.xlu0 %9280  ;;  %v5168_v61 = vpack.c.bf16 %v9278_v25, %v9277_v41 }
 0xeb9   : > { %v9261_v11 = vpop.permute.xlu1 %9260  ;;  %8993 = vmatprep.subr.msk.bf16.mxu1 %vm2303_vm3, %v5166_v33  ;;  %v5546_v43 = vsel %vm2303_vm3, %v5166_v33, 0  ;;  %v9282_v9 = vunpack.i.l.bf16 %v11540_v35 }
 0xeba   : > { %v9263_v38 = vunpack.i.h.bf16 %v9261_v11  ;;  %v9262_v3 = vunpack.i.l.bf16 %v9261_v11  ;;  %v5552_v16 = vsel %vm2303_vm3, %v5168_v61, 0  ;;  %v9283_v11 = vunpack.i.h.bf16 %v11540_v35 }
 0xebc   : > { %v5167_v45 = vpack.c.bf16 %v9263_v38, %v9262_v3  ;;  %v9296_v0 = vpop.permute.xlu0 %9295 }
 0xebd   : > { %v9271_v37 = vpop.permute.xlu1 %9270  ;;  %8706 = vmatmul.mubr.msk.bf16.vlgmr.msra.gmra.mrb[100].mxu1 %vm2303_vm3, %v5063_v28  ;;  %v9298_v12 = vunpack.i.h.bf16 %v9296_v0  ;;  %v9297_v24 = vunpack.i.l.bf16 %v9296_v0 }
 0xebe   : > { %8709 = vmatprep.mubr.msk.bf16.mxu1 %vm2303_vm3, %v5064_v14  ;;  %8730 = vmatpush3.bf16.xpose.msra.mxu1 %v5546_v43  ;;  %v5549_v48 = vsel %vm2303_vm3, %v5167_v45, 0  ;;  %v9273_v18 = vunpack.i.h.bf16 %v9271_v37  ;;  %v9272_v7 = vunpack.i.l.bf16 %v9271_v37  ;;  %v5069_v14 = vpack.c.bf16 %v9283_v11, %v9282_v9 }
 0xebf   : > { %8718 = vmatpush3.bf16.xpose.msra.mxu0 %v5463_v58  ;;  %8994 = vmatprep.subr.msk.bf16.mxu1 %vm2303_vm3, %v5167_v45  ;;  %v5070_v62 = vpack.c.bf16 %v9298_v12, %v9297_v24 }
 0xec0   : > { %8992 = vmatprep.subr.msk.bf16.mxu0 %vm2303_vm3, %v5165_v21  ;;  %v9306_v6 = vpop.permute.xlu0 %9305  ;;  %v5067_v32 = vpack.c.bf16 %v9273_v18, %v9272_v7 }
 0xec1   : > { %v9286_v34 = vpop.permute.xlu1 %9285  ;;  %v9308_v21 = vunpack.i.h.bf16 %v9306_v6  ;;  %v9307_v58 = vunpack.i.l.bf16 %v9306_v6 }
 0xec2   : > { %v9288_v13 = vunpack.i.h.bf16 %v9286_v34  ;;  %v9287_v40 = vunpack.i.l.bf16 %v9286_v34 }
 0xec3   : > { %v5072_v41 = vpack.c.bf16 %v9308_v21, %v9307_v58 }
 0xec4   : > { %v5068_v17 = vpack.c.bf16 %v9288_v13, %v9287_v40  ;;  %v9326_v51 = vpop.permute.xlu0 %9325 }
 0xec5   : > { %v9291_v26 = vpop.permute.xlu1 %9290  ;;  %8710 = vmatmul.mubr.msk.bf16.gmra.mrb[104].mxu1 %vm2303_vm3, %v5065_v57  ;;  %v9328_v63 = vunpack.i.h.bf16 %v9326_v51  ;;  %v9327_v38 = vunpack.i.l.bf16 %v9326_v51 }
 0xec6   : > { %8732 = vmatpush3.bf16.xpose.msra.mxu1 %v5549_v48  ;;  %8737 = vmatprep.mubr.msk.bf16.mxu1 %vm2303_vm3, %v5070_v62  ;;  %v9293_v55 = vunpack.i.h.bf16 %v9291_v26  ;;  %v9292_v10 = vunpack.i.l.bf16 %v9291_v26 }
 0xec7   : > { %8720 = vmatpush3.bf16.xpose.msra.mxu0 %v5466_v4  ;;  %8995 = vmatprep.subr.msk.bf16.mxu1 %vm2303_vm3, %v5168_v61 }
 0xec8   : > { %8745 = vmatprep.subr.bf16.mxu0 %v11465_v59  ;;  %v5169_v8 = vpack.c.bf16 %v9293_v55, %v9292_v10  ;;  %v9331_v28 = vpop.permute.xlu0 %9330 }
 0xec9   : > { %v9301_v52 = vpop.permute.xlu1 %9300  ;;  %v9333_v37 = vunpack.i.h.bf16 %v9331_v28  ;;  %v9332_v0 = vunpack.i.l.bf16 %v9331_v28 }
 0xeca   : > { %v5555_v45 = vsel %vm2303_vm3, %v5169_v8, 0  ;;  %v9303_v35 = vunpack.i.h.bf16 %v9301_v52  ;;  %v9302_v43 = vunpack.i.l.bf16 %v9301_v52 }
 0xecb   : > { %v11573_v24 = vpack.c.bf16 %v9333_v37, %v9332_v0 }
 0xecc   : > { %v9341_v12 = vpop.permute.xlu0 %9340  ;;  %v5071_v25 = vpack.c.bf16 %v9303_v35, %v9302_v43 }
 0xecd   : > { %v9311_v33 = vpop.permute.xlu1 %9310  ;;  %v9343_v34 = vunpack.i.h.bf16 %v9341_v12 }
 0xece   : > { %8722 = vmatmul.mubr.msk.bf16.vlgmr.msra.gmra.mrb[108].mxu0 %vm2303_vm3, %v5067_v32  ;;  %8734 = vmatpush3.bf16.xpose.msra.mxu1 %v5552_v16  ;;  %v9313_v61 = vunpack.i.h.bf16 %v9311_v33  ;;  %v9312_v26 = vunpack.i.l.bf16 %v9311_v33 }
 0xecf   : > { %8725 = vmatprep.mubr.msk.bf16.mxu0 %vm2303_vm3, %v5068_v17  ;;  %8746 = vmatpush3.bf16.msra.mxu0 %v11465_v59  ;;  %v5254_v59 = vpack.c.bf16 %v9328_v63, %v9327_v38 }
 0xed0   : > { %8996 = vmatprep.subr.msk.bf16.mxu1 %vm2303_vm3, %v5169_v8  ;;  %8747 = vmatprep.subr.bf16.mxu0 %v11461_v30 }
 0xed1   : > { %v9316_v3 = vpop.permute.xlu1 %9315 }
 0xed2   : > { %v9317_v5 = vunpack.i.l.bf16 %v9316_v3 }
 0xed3   : > { %8748 = vmatpush3.bf16.msra.mxu0 %v11461_v30  ;;  %v9318_v30 = vunpack.i.h.bf16 %v9316_v3 }
 0xed4   : > { %8749 = vmatprep.subr.bf16.mxu0 %v11480_v20 }
 0xed5   : > { %v11570_v23 = vpop.permute.xlu1 %9320  ;;  %v5255_v57 = vpack.c.bf16 %v9318_v30, %v9317_v5 }
 0xed6   : > { %8726 = vmatmul.mubr.msk.bf16.gmra.mrb[112].mxu0 %vm2303_vm3, %v5069_v14  ;;  %8736 = vmatpush3.bf16.xpose.msra.mxu1 %v5555_v45 }
 0xed7   : > { %8750 = vmatpush3.bf16.msra.mxu0 %v11480_v20  ;;  %8761 = vmatprep.subr.bf16.mxu1 %v5254_v59  ;;  %v9342_v20 = vunpack.i.l.bf16 %v9341_v12 }
 0xed8   : > { %8751 = vmatprep.subr.bf16.mxu0 %v11476_v46 }
 0xed9   : > { %v9336_v62 = vpop.permute.xlu1 %9335  ;;  %v5256_v6 = vpack.c.bf16 %v9343_v34, %v9342_v20 }
 0xeda   : > { %v9338_v48 = vunpack.i.h.bf16 %v9336_v62  ;;  %v9337_v4 = vunpack.i.l.bf16 %v9336_v62 }
 0xedb   : > { %8752 = vmatpush3.bf16.msra.mxu0 %v11476_v46  ;;  %v5073_v46 = vpack.c.bf16 %v9313_v61, %v9312_v26 }
 0xedc   : > { %8777 = vmatprep.subr.bf16.mxu0 %v11573_v24  ;;  %v5257_v18 = vpack.c.bf16 %v9338_v48, %v9337_v4 }
 0xedd   : > { %8738 = vmatmul.mubr.msk.bf16.vlgmr.msra.gmra.mrb[108].mxu1 %vm2303_vm3, %v5071_v25 }
 0xede   : > { %8741 = vmatprep.mubr.msk.bf16.mxu1 %vm2303_vm3, %v5072_v41  ;;  %8762 = vmatpush3.bf16.msra.mxu1 %v5254_v59 }
 0xedf   : > { %8763 = vmatprep.subr.bf16.mxu1 %v5255_v57 }
 0xee2   : > { %8764 = vmatpush3.bf16.msra.mxu1 %v5255_v57 }
 0xee3   : > { %8765 = vmatprep.subr.bf16.mxu1 %v5256_v6 }
 0xee5   : > { %8742 = vmatmul.mubr.msk.bf16.gmra.mrb[112].mxu1 %vm2303_vm3, %v5073_v46 }
 0xee6   : > { %8766 = vmatpush3.bf16.msra.mxu1 %v5256_v6 }
 0xee7   : > { %8767 = vmatprep.subr.bf16.mxu1 %v5257_v18 }
 0xeea   : > { %8768 = vmatpush3.bf16.msra.mxu1 %v5257_v18 }
 0xf19   : > { %v8691_v7 = vpop.f32.mrb[100].mxu0 }
 0xf1a   : > { %v11580_v13 = vmul.f32 0.35355338, %v8691_v7  ;;  %v5324_v40 = vpop.f32.mrb[101].mxu0 }
 0xf1b   : > { %v8692_v52 = vpop.f32.mrb[102].mxu0  ;;  %v11582_v55 = vmul.f32 0.35355338, %v5324_v40 }
 0xf1c   : > { %v11584_v10 = vmul.f32 0.35355338, %v8692_v52  ;;  %v5327_v32 = vpop.f32.mrb[103].mxu0  ;;  %v5660_v17 = vsel %vm2692_vm4, %v11580_v13, -inf }
 0xf1d   : > { %5661 = vmax.xlane.f32.xlu0 %v5660_v17  ;;  %v11588_v51 = vmul.f32 0.35355338, %v5327_v32  ;;  %v5654_v16 = vsel %vm2692_vm4, %v11582_v55, -inf }
 0xf1e   : > { %v5663_v33 = vsel %vm2692_vm4, %v11584_v10, -inf }
 0xf1f   : > { %5664 = vmax.xlane.f32.xlu1 %v5663_v33  ;;  %v5657_v63 = vsel %vm2692_vm4, %v11588_v51, -inf }
 0xf21   : > { %5655 = vmax.xlane.f32.xlu0 %v5654_v16  ;;  %v8695_v8 = vpop.f32.mrb[104].mxu0 }
 0xf22   : > { %v11594_v11 = vmul.f32 0.35355338, %v8695_v8  ;;  %v5340_v9 = vpop.f32.mrb[105].mxu0 }
 0xf23   : > { %5658 = vmax.xlane.f32.xlu1 %v5657_v63  ;;  %v8696_v38 = vpop.f32.mrb[106].mxu0  ;;  %v11598_v3 = vmul.f32 0.35355338, %v5340_v9 }
 0xf24   : > { %v11600_v28 = vmul.f32 0.35355338, %v8696_v38  ;;  %v5343_v14 = vpop.f32.mrb[107].mxu0  ;;  %v5672_v45 = vsel %vm2692_vm4, %v11594_v11, -inf }
 0xf25   : > { %5673 = vmax.xlane.f32.xlu0 %v5672_v45  ;;  %v11604_v59 = vmul.f32 0.35355338, %v5343_v14  ;;  %v5666_v0 = vsel %vm2692_vm4, %v11598_v3, -inf }
 0xf26   : > { %v5675_v37 = vsel %vm2692_vm4, %v11600_v28, -inf }
 0xf27   : > { %5676 = vmax.xlane.f32.xlu1 %v5675_v37  ;;  %v5669_v35 = vsel %vm2692_vm4, %v11604_v59, -inf }
 0xf29   : > { %5667 = vmax.xlane.f32.xlu0 %v5666_v0 }
 0xf2b   : > { %5670 = vmax.xlane.f32.xlu1 %v5669_v35 }
 0xf90   : > { %v8707_v43 = vpop.f32.mrb[100].mxu1 }
 0xf91   : > { %v11612_v21 = vmul.f32 0.35355338, %v8707_v43  ;;  %v5413_v58 = vpop.f32.mrb[101].mxu1 }
 0xf92   : > { %v8708_v30 = vpop.f32.mrb[102].mxu1  ;;  %v11618_v48 = vmul.f32 0.35355338, %v5413_v58 }
 0xf93   : > { %v5416_v5 = vpop.f32.mrb[103].mxu1  ;;  %v5684_v12 = vsel %vm2692_vm4, %v11612_v21, -inf  ;;  %v11636_v9 = vmul.f32 0.35355338, %v8708_v30 }
 0xf94   : > { %5685 = vmax.xlane.f32.xlu0 %v5684_v12  ;;  %v11624_v18 = vmul.f32 0.35355338, %v5416_v5  ;;  %v5678_v52 = vsel %vm2692_vm4, %v11618_v48, -inf }
 0xf95   : > { %v5687_v35 = vsel %vm2692_vm4, %v11636_v9, -inf }
 0xf96   : > { %v5681_v16 = vsel %vm2692_vm4, %v11624_v18, -inf }
 0xf98   : > { %v8711_v25 = vpop.f32.mrb[104].mxu1 }
 0xf99   : > { %v5429_v41 = vpop.f32.mrb[105].mxu1  ;;  %v11644_v37 = vmul.f32 0.35355338, %v8711_v25 }
 0xf9a   : > { %v8712_v34 = vpop.f32.mrb[106].mxu1 }
 0xf9b   : > { %v5432_v20 = vpop.f32.mrb[107].mxu1  ;;  %v11640_v14 = vmul.f32 0.35355338, %v8712_v34  ;;  %v5696_v25 = vsel %vm2692_vm4, %v11644_v37, -inf }
 0xf9d   : > { %v5699_v5 = vsel %vm2692_vm4, %v11640_v14, -inf }
 0xfa1   : > { %v8723_v57 = vpop.f32.mrb[108].mxu0 }
 0xfa2   : > { %v11616_v62 = vmul.f32 0.35355338, %v8723_v57  ;;  %v5502_v61 = vpop.f32.mrb[109].mxu0 }
 0xfa3   : > { %v8724_v26 = vpop.f32.mrb[110].mxu0  ;;  %v11628_v40 = vmul.f32 0.35355338, %v5502_v61  ;;  %v11656_v61 = vmul.f32 0.35355338, %v5432_v20 }
 0xfa4   : > { %v11620_v4 = vmul.f32 0.35355338, %v8724_v26  ;;  %v5505_v6 = vpop.f32.mrb[111].mxu0  ;;  %v5708_v46 = vsel %vm2692_vm4, %v11616_v62, -inf }
 0xfa5   : > { %5709 = vmax.xlane.f32.xlu0 %v5708_v46  ;;  %v11632_v17 = vmul.f32 0.35355338, %v5505_v6  ;;  %v5702_v38 = vsel %vm2692_vm4, %v11628_v40, -inf  ;;  %v5693_v20 = vsel %vm2692_vm4, %v11656_v61, -inf }
 0xfa6   : > { %v5711_v7 = vsel %vm2692_vm4, %v11620_v4, -inf }
 0xfa7   : > { %5712 = vmax.xlane.f32.xlu1 %v5711_v7  ;;  %v5705_v45 = vsel %vm2692_vm4, %v11632_v17, -inf  ;;  %v11660_v7 = vmul.f32 0.35355338, %v5429_v41 }
 0xfa9   : > { %v8727_v32 = vpop.f32.mrb[112].mxu0  ;;  %5679 = vmax.xlane.f32.xlu0 %v5678_v52  ;;  %v5690_v41 = vsel %vm2692_vm4, %v11660_v7, -inf }
 0xfaa   : > { %v5518_v33 = vpop.f32.mrb[113].mxu0  ;;  %v5662_v0 = vpop.xlane.xlu0 %5661  ;;  %v11652_v57 = vmul.f32 0.35355338, %v8727_v32 }
 0xfab   : > { %v8728_v8 = vpop.f32.mrb[114].mxu0  ;;  %5682 = vmax.xlane.f32.xlu1 %v5681_v16  ;;  %v5752_v29 = vsub.f32 %v11580_v13, %v5662_v0 }
 0xfac   : > { %v5521_v63 = vpop.f32.mrb[115].mxu0  ;;  %v11648_v30 = vmul.f32 0.35355338, %v8728_v8  ;;  %v5665_v26 = vpop.xlane.xlu1 %5664  ;;  %v5720_v52 = vsel %vm2692_vm4, %v11652_v57, -inf }
 0xfad   : > { %5703 = vmax.xlane.f32.xlu0 %v5702_v38  ;;  %v11664_v8 = vmul.f32 0.35355338, %v5521_v63  ;;  %v5753_v31 = vsub.f32 %v11584_v10, %v5665_v26 }
 0xfae   : > { %v5656_v6 = vpop.xlane.xlu0 %5655  ;;  %v5723_v46 = vsel %vm2692_vm4, %v11648_v30, -inf }
 0xfaf   : > { %5706 = vmax.xlane.f32.xlu1 %v5705_v45  ;;  %v5717_v63 = vsel %vm2692_vm4, %v11664_v8, -inf }
 0xfb0   : > { %v8739_v43 = vpop.f32.mrb[108].mxu1 }
 0xfb1   : > { %5688 = vmax.xlane.f32.xlu0 %v5687_v35  ;;  %v5591_v58 = vpop.f32.mrb[109].mxu1  ;;  %v11668_v35 = vmul.f32 0.35355338, %v5518_v33 }
 0xfb2   : > { %v8740_v12 = vpop.f32.mrb[110].mxu1  ;;  %v11688_v0 = vmul.f32 0.35355338, %v5591_v58 }
 0xfb3   : > { %5700 = vmax.xlane.f32.xlu1 %v5699_v5  ;;  %v5594_v34 = vpop.f32.mrb[111].mxu1  ;;  %v5659_v5 = vpop.xlane.xlu1 %5658  ;;  %v5714_v33 = vsel %vm2692_vm4, %v11668_v35, -inf }
 0xfb4   : > { %v11683_v2 = vmul.f32 0.35355338, %v5594_v34  ;;  %v5751_v13 = vsub.f32 %v11588_v51, %v5659_v5 }
 0xfb5   : > { %5697 = vmax.xlane.f32.xlu0 %v5696_v25  ;;  %v5674_v25 = vpop.xlane.xlu0 %5673 }
 0xfb6   : > { %v5729_v26 = vsel %vm2692_vm4, %v11683_v2, -inf  ;;  %v5756_v51 = vsub.f32 %v11594_v11, %v5674_v25 }
 0xfb7   : > { %5724 = vmax.xlane.f32.xlu1 %v5723_v46  ;;  %v5750_v46 = vsub.f32 %v11582_v55, %v5656_v6  ;;  %v5677_v55 = vpop.xlane.xlu1 %5676 }
 0xfb8   : > { %v8743_v16 = vpop.f32.mrb[112].mxu1 }
 0xfb9   : > { %5721 = vmax.xlane.f32.xlu0 %v5720_v52  ;;  %v5607_v32 = vpop.f32.mrb[113].mxu1  ;;  %v11673_v52 = vmul.f32 0.35355338, %v8740_v12  ;;  %v5782_v19 = vmul.f32 1.442695, %v5750_v46  ;;  %v5668_v12 = vpop.xlane.xlu0 %5667 }
 0xfba   : > { %v8744_v38 = vpop.f32.mrb[114].mxu1  ;;  %v5754_v10 = vsub.f32 %v11598_v3, %v5668_v12  ;;  %v11698_v5 = vmul.f32 0.35355338, %v8743_v16  ;;  %v11708_v16 = vmul.f32 0.35355338, %v5607_v32 }
 0xfbb   : > { %5694 = vmax.xlane.f32.xlu1 %v5693_v20  ;;  %v5610_v45 = vpop.f32.mrb[115].mxu1  ;;  %v11678_v20 = vmul.f32 0.35355338, %v8739_v43  ;;  %v5735_v6 = vsel %vm2692_vm4, %v11673_v52, -inf  ;;  %9655 = vpow2.f32 %v5782_v19  ;;  %v11693_v34 = vmul.f32 0.35355338, %v8744_v38  ;;  %v5671_v58 = vpop.xlane.xlu1 %5670 }
 0xfbc   : > { %v5757_v19 = vsub.f32 %v11600_v28, %v5677_v55  ;;  %v5790_v3 = vmul.f32 1.442695, %v5754_v10  ;;  %v11703_v38 = vmul.f32 0.35355338, %v5610_v45  ;;  %v5755_v11 = vsub.f32 %v11604_v59, %v5671_v58 }
 0xfbd   : > { %5691 = vmax.xlane.f32.xlu0 %v5690_v41  ;;  %v5786_v41 = vmul.f32 1.442695, %v5752_v29  ;;  %v5732_v43 = vsel %vm2692_vm4, %v11678_v20, -inf  ;;  %v5784_v29 = vmul.f32 1.442695, %v5751_v13  ;;  %v5747_v46 = vsel %vm2692_vm4, %v11693_v34, -inf }
 0xfbe   : > { %v5744_v25 = vsel %vm2692_vm4, %v11698_v5, -inf  ;;  %v5796_v12 = vmul.f32 1.442695, %v5757_v19  ;;  %v5741_v28 = vsel %vm2692_vm4, %v11703_v38, -inf  ;;  %v5792_v55 = vmul.f32 1.442695, %v5755_v11 }
 0xfbf   : > { %5718 = vmax.xlane.f32.xlu1 %v5717_v63  ;;  %v5788_v63 = vmul.f32 1.442695, %v5753_v31  ;;  %9657 = vpow2.f32 %v5786_v41  ;;  %v5726_v31 = vsel %vm2692_vm4, %v11688_v0, -inf  ;;  %v5738_v59 = vsel %vm2692_vm4, %v11708_v16, -inf }
 0xfc1   : > { %5715 = vmax.xlane.f32.xlu0 %v5714_v33  ;;  %9659 = vpow2.f32 %v5788_v63  ;;  %v5794_v33 = vmul.f32 1.442695, %v5756_v51 }
 0xfc2   : > { %9661 = vpow2.f32 %v5784_v29 }
 0xfc3   : > { %5736 = vmax.xlane.f32.xlu1 %v5735_v6  ;;  %9663 = vpow2.f32 %v5790_v3 }
 0xfc4   : > { %9665 = vpow2.f32 %v5794_v33 }
 0xfc5   : > { %5733 = vmax.xlane.f32.xlu0 %v5732_v43  ;;  %v11714_v45 = vpop.eup %9655  ;;  %9667 = vpow2.f32 %v5796_v12 }
 0xfc6   : > { %v5846_v32 = vsel %vm2692_vm4, %v11714_v45, 0.0  ;;  %9669 = vpow2.f32 %v5792_v55 }
 0xfc7   : > { %5730 = vmax.xlane.f32.xlu1 %v5729_v26 }
 0xfc9   : > { %5727 = vmax.xlane.f32.xlu0 %v5726_v31  ;;  %v11718_v6 = vpop.eup %9657 }
 0xfca   : > { %v5852_v13 = vsel %vm2692_vm4, %v11718_v6, 0.0 }
 0xfcb   : > { %5748 = vmax.xlane.f32.xlu1 %v5747_v46  ;;  %v11722_v41 = vpop.eup %9659 }
 0xfcc   : > { %v11726_v43 = vpop.eup %9661  ;;  %v5855_v63 = vsel %vm2692_vm4, %v11722_v41, 0.0 }
 0xfcd   : > { %5745 = vmax.xlane.f32.xlu0 %v5744_v25  ;;  %v11730_v10 = vpop.eup %9663  ;;  %v5849_v26 = vsel %vm2692_vm4, %v11726_v43, 0.0 }
 0xfce   : > { %v11734_v29 = vpop.eup %9665  ;;  %v5858_v51 = vsel %vm2692_vm4, %v11730_v10, 0.0 }
 0xfcf   : > { %5742 = vmax.xlane.f32.xlu1 %v5741_v28  ;;  %v11738_v58 = vpop.eup %9667  ;;  %v5864_v31 = vsel %vm2692_vm4, %v11734_v29, 0.0 }
 0xfd0   : > { %v11742_v19 = vpop.eup %9669  ;;  %v5867_v3 = vsel %vm2692_vm4, %v11738_v58, 0.0 }
 0xfd1   : > { %5739 = vmax.xlane.f32.xlu0 %v5738_v59  ;;  %v5861_v46 = vsel %vm2692_vm4, %v11742_v19, 0.0 }
 0xfd3   : > { %5847 = vadd.xlane.f32.xlu1 %v5846_v32 }
 0xfd5   : > { %5853 = vadd.xlane.f32.xlu0 %v5852_v13 }
 0xfd7   : > { %5856 = vadd.xlane.f32.xlu1 %v5855_v63 }
 0xfd9   : > { %5850 = vadd.xlane.f32.xlu0 %v5849_v26 }
 0xfdb   : > { %5859 = vadd.xlane.f32.xlu1 %v5858_v51 }
 0xfdd   : > { %5865 = vadd.xlane.f32.xlu0 %v5864_v31 }
 0xfdf   : > { %5868 = vadd.xlane.f32.xlu1 %v5867_v3 }
 0xfe1   : > { %5862 = vadd.xlane.f32.xlu0 %v5861_v46 }
0x1021   : > { %v5686_v33 = vpop.xlane.xlu0 %5685 }
0x1022   : > { %v5760_v11 = vsub.f32 %v11612_v21, %v5686_v33 }
0x1024   : > { %v5802_v25 = vmul.f32 1.442695, %v5760_v11 }
0x1026   : > { %9671 = vpow2.f32 %v5802_v25 }
0x1030   : > { %v11749_v12 = vpop.eup %9671 }
0x1031   : > { %v5876_v28 = vsel %vm2692_vm4, %v11749_v12, 0.0 }
0x1032   : > { %v5710_v55 = vpop.xlane.xlu0 %5709  ;;  %5877 = vadd.xlane.f32.xlu0 %v5876_v28 }
0x1033   : > { %v5768_v59 = vsub.f32 %v11616_v62, %v5710_v55 }
0x1034   : > { %v5713_v32 = vpop.xlane.xlu1 %5712 }
0x1035   : > { %v5818_v13 = vmul.f32 1.442695, %v5768_v59  ;;  %v5769_v33 = vsub.f32 %v11620_v4, %v5713_v32 }
0x1036   : > { %v5680_v63 = vpop.xlane.xlu0 %5679 }
0x1037   : > { %9673 = vpow2.f32 %v5818_v13  ;;  %v5758_v26 = vsub.f32 %v11618_v48, %v5680_v63  ;;  %v5820_v59 = vmul.f32 1.442695, %v5769_v33 }
0x1038   : > { %v5683_v51 = vpop.xlane.xlu1 %5682 }
0x1039   : > { %v5798_v31 = vmul.f32 1.442695, %v5758_v26  ;;  %v5759_v48 = vsub.f32 %v11624_v18, %v5683_v51 }
0x103a   : > { %v5704_v21 = vpop.xlane.xlu0 %5703 }
0x103b   : > { %9675 = vpow2.f32 %v5798_v31  ;;  %v5766_v3 = vsub.f32 %v11628_v40, %v5704_v21 }
0x103c   : > { %v5707_v46 = vpop.xlane.xlu1 %5706 }
0x103d   : > { %v5814_v11 = vmul.f32 1.442695, %v5766_v3  ;;  %v5767_v31 = vsub.f32 %v11632_v17, %v5707_v46 }
0x103e   : > { %v5689_v25 = vpop.xlane.xlu0 %5688 }
0x103f   : > { %9677 = vpow2.f32 %v5814_v11  ;;  %v5761_v62 = vsub.f32 %v11636_v9, %v5689_v25  ;;  %v5800_v9 = vmul.f32 1.442695, %v5759_v48  ;;  %v5816_v11 = vmul.f32 1.442695, %v5767_v31 }
0x1040   : > { %v11758_v28 = vpop.xlane.xlu1 %5700 }
0x1041   : > { %v11760_v55 = vpop.eup %9673  ;;  %v5804_v13 = vmul.f32 1.442695, %v5761_v62 }
0x1042   : > { %v5698_v63 = vpop.xlane.xlu0 %5697  ;;  %v5900_v40 = vsel %vm2692_vm4, %v11760_v55, 0.0 }
0x1043   : > { %9679 = vpow2.f32 %v5804_v13  ;;  %v5764_v4 = vsub.f32 %v11644_v37, %v5698_v63  ;;  %5901 = vadd.xlane.f32.xlu0 %v5900_v40 }
0x1044   : > { %v11766_v32 = vpop.xlane.xlu1 %5724  ;;  %9681 = vpow2.f32 %v5820_v59 }
0x1045   : > { %v11768_v26 = vpop.eup %9675  ;;  %v5810_v21 = vmul.f32 1.442695, %v5764_v4 }
0x1046   : > { %v5722_v3 = vpop.xlane.xlu0 %5721  ;;  %v5870_v18 = vsel %vm2692_vm4, %v11768_v26, 0.0 }
0x1047   : > { %9683 = vpow2.f32 %v5810_v21  ;;  %v5772_v51 = vsub.f32 %v11652_v57, %v5722_v3  ;;  %5871 = vadd.xlane.f32.xlu0 %v5870_v18 }
0x1048   : > { %v11774_v33 = vpop.xlane.xlu1 %5694  ;;  %9685 = vpow2.f32 %v5800_v9 }
0x1049   : > { %v11776_v37 = vpop.eup %9677  ;;  %v5826_v25 = vmul.f32 1.442695, %v5772_v51 }
0x104a   : > { %v5692_v62 = vpop.xlane.xlu0 %5691  ;;  %v5894_v17 = vsel %vm2692_vm4, %v11776_v37, 0.0 }
0x104b   : > { %9687 = vpow2.f32 %v5826_v25  ;;  %v5762_v46 = vsub.f32 %v11660_v7, %v5692_v62  ;;  %5895 = vadd.xlane.f32.xlu0 %v5894_v17 }
0x104c   : > { %v11781_v59 = vpop.xlane.xlu1 %5718  ;;  %9689 = vpow2.f32 %v5816_v11 }
0x104d   : > { %v11783_v48 = vpop.eup %9679  ;;  %v5806_v57 = vmul.f32 1.442695, %v5762_v46 }
0x104e   : > { %v11785_v13 = vpop.xlane.xlu0 %5715  ;;  %v5879_v63 = vsel %vm2692_vm4, %v11783_v48, 0.0  ;;  %v11789_v40 = vpop.eup %9681 }
0x104f   : > { %9691 = vpow2.f32 %v5806_v57  ;;  %5880 = vadd.xlane.f32.xlu1 %v5879_v63  ;;  %v5903_v21 = vsel %vm2692_vm4, %v11789_v40, 0.0 }
0x1050   : > { %v11791_v4 = vpop.xlane.xlu1 %5736 }
0x1051   : > { %v11793_v9 = vpop.eup %9683 }
0x1052   : > { %v11795_v7 = vpop.xlane.xlu0 %5733  ;;  %v5888_v31 = vsel %vm2692_vm4, %v11793_v9, 0.0  ;;  %v11801_v3 = vpop.eup %9685 }
0x1053   : > { %5889 = vadd.xlane.f32.xlu0 %v5888_v31  ;;  %5904 = vadd.xlane.f32.xlu1 %v5903_v21  ;;  %v5873_v62 = vsel %vm2692_vm4, %v11801_v3, 0.0 }
0x1054   : > { %v11803_v18 = vpop.xlane.xlu1 %5730 }
0x1055   : > { %v11805_v51 = vpop.eup %9687 }
0x1056   : > { %12478 = vst [vmem:[#allocation16_spill] sm:$0xff] %v11805_v51  ;;  %v11807_v11 = vpop.xlane.xlu0 %5727  ;;  %v5912_v25 = vsel %vm2692_vm4, %v11805_v51, 0.0  ;;  %v11813_v17 = vpop.eup %9689 }
0x1057   : > { %5913 = vadd.xlane.f32.xlu0 %v5912_v25  ;;  %5874 = vadd.xlane.f32.xlu1 %v5873_v62  ;;  %v5897_v21 = vsel %vm2692_vm4, %v11813_v17, 0.0 }
0x1058   : > { %v11815_v46 = vpop.xlane.xlu1 %5748 }
0x1059   : > { %v11817_v57 = vpop.eup %9691 }
0x105a   : > { %v11819_v63 = vpop.xlane.xlu0 %5745  ;;  %v5882_v31 = vsel %vm2692_vm4, %v11817_v57, 0.0 }
0x105b   : > { %5883 = vadd.xlane.f32.xlu0 %v5882_v31  ;;  %5898 = vadd.xlane.f32.xlu1 %v5897_v21 }
0x105c   : > { %v11825_v54 = vpop.xlane.xlu1 %5742 }
0x105e   : > { %v11827_v22 = vpop.xlane.xlu0 %5739 }
0x1060   : > { %v5848_v25 = vpop.xlane.xlu1 %5847 }
0x1061   : > { %9693 = vrcp.f32 %v5848_v25 }
0x1062   : > { %v5854_v62 = vpop.xlane.xlu0 %5853 }
0x1064   : > { %v5857_v44 = vpop.xlane.xlu1 %5856 }
0x1065   : > { %9695 = vrcp.f32 %v5857_v44 }
0x1066   : > { %9697 = vrcp.f32 %v5854_v62  ;;  %v5851_v27 = vpop.xlane.xlu0 %5850  ;;  %v9323_v62 = vunpack.i.h.bf16 %v11570_v23 }
0x1067   : > { %9699 = vrcp.f32 %v5851_v27 }
0x1068   : > { %v5860_v60 = vpop.xlane.xlu1 %5859 }
0x1069   : > { %9701 = vrcp.f32 %v5860_v60 }
0x106a   : > { %v5866_v53 = vpop.xlane.xlu0 %5865 }
0x106b   : > { %v9694_v21 = vpop.eup %9693 }
0x106c   : > { %9350 = vrot.lane.b32.xlu1 %v11474_v49, %s12476_s4  ;;  %v5869_v31 = vpop.xlane.xlu1 %5868  ;;  %v5974_v27 = vmul.f32 %v9694_v21, %v11714_v45 }
0x106d   : > { %9703 = vrcp.f32 %v5869_v31  ;;  %v9322_v31 = vunpack.i.l.bf16 %v11570_v23 }
0x106e   : > { %9705 = vrcp.f32 %v5866_v53  ;;  %v5863_v42 = vpop.xlane.xlu0 %5862 }
0x106f   : > { %v9696_v15 = vpop.eup %9695  ;;  %9707 = vrcp.f32 %v5863_v42 }
0x1070   : > { %v9698_v47 = vpop.eup %9697  ;;  %v5977_v44 = vmul.f32 %v9696_v15, %v11722_v41  ;;  %v5259_v15 = vpack.c.bf16 %v9323_v62, %v9322_v31  ;;  %v5781_v62 = vsub.f32 %v11693_v34, %v11815_v46 }
0x1071   : > { %v9700_v25 = vpop.eup %9699  ;;  %9345 = vrot.lane.b32.xlu0 %v11478_v36, %s12476_s4  ;;  %v5976_v53 = vmul.f32 %v9698_v47, %v11718_v6  ;;  %v5770_v47 = vsub.f32 %v11668_v35, %v11785_v13 }
0x1072   : > { %v5975_v60 = vmul.f32 %v9700_v25, %v11726_v43  ;;  %v5765_v43 = vsub.f32 %v11640_v14, %v11758_v28  ;;  %v5771_v28 = vsub.f32 %v11664_v8, %v11781_v59  ;;  %v5777_v59 = vsub.f32 %v11673_v52, %v11791_v4 }
0x1073   : > { %v6007_v56 = vpack.c.bf16 %v5977_v44, %v5976_v53  ;;  %v9702_v42 = vpop.eup %9701  ;;  %v5822_v14 = vmul.f32 1.442695, %v5770_v47  ;;  %v5778_v52 = vsub.f32 %v11708_v16, %v11827_v22 }
0x1074   : > { %v6006_v50 = vpack.c.bf16 %v5975_v60, %v5974_v27  ;;  %v5978_v6 = vmul.f32 %v9702_v42, %v11730_v10  ;;  %v5812_v25 = vmul.f32 1.442695, %v5765_v43  ;;  %v5763_v10 = vsub.f32 %v11656_v61, %v11774_v33 }
0x1075   : > { %v5824_v13 = vmul.f32 1.442695, %v5771_v28  ;;  %v5774_v61 = vsub.f32 %v11688_v0, %v11807_v11  ;;  %v5838_v31 = vmul.f32 1.442695, %v5778_v52 }
0x1076   : > { %8753 = vmatprep.mubr.msk.bf16.mxu0 %vm2692_vm4, %v6006_v50  ;;  %9709 = vpow2.f32 %v5812_v25 }
0x1077   : > { %v9704_v51 = vpop.eup %9703  ;;  %8754 = vmatmul.mubr.msk.bf16.vlgmr.msra.gmra.mrb[116].mxu0 %vm2692_vm4, %v6007_v56  ;;  %9711 = vpow2.f32 %v5822_v14  ;;  %v5830_v8 = vmul.f32 1.442695, %v5774_v61 }
0x1078   : > { %v9706_v41 = vpop.eup %9705  ;;  %8778 = vmatpush3.bf16.msra.mxu0 %v11573_v24  ;;  %v5981_v23 = vmul.f32 %v9704_v51, %v11738_v58  ;;  %v5773_v24 = vsub.f32 %v11648_v30, %v11766_v32  ;;  %v5776_v58 = vsub.f32 %v11678_v20, %v11795_v7  ;;  %v5808_v30 = vmul.f32 1.442695, %v5763_v10 }
0x1079   : > { %v9708_v45 = vpop.eup %9707  ;;  %8779 = vmatprep.subr.bf16.mxu0 %v5259_v15  ;;  %v5980_v56 = vmul.f32 %v9706_v41, %v11734_v29  ;;  %v5780_v32 = vsub.f32 %v11698_v5, %v11819_v63 }
0x107a   : > { %v5979_v50 = vmul.f32 %v9708_v45, %v11742_v19  ;;  %v5828_v35 = vmul.f32 1.442695, %v5773_v24  ;;  %v5834_v29 = vmul.f32 1.442695, %v5776_v58  ;;  %v5775_v19 = vsub.f32 %v11683_v2, %v11803_v18 }
0x107b   : > { %v6009_v44 = vpack.c.bf16 %v5981_v23, %v5980_v56  ;;  %v5842_v33 = vmul.f32 1.442695, %v5780_v32  ;;  %v5779_v2 = vsub.f32 %v11703_v38, %v11825_v54  ;;  %v5836_v38 = vmul.f32 1.442695, %v5777_v59 }
0x107c   : > { %8780 = vmatpush3.bf16.msra.mxu0 %v5259_v15  ;;  %v6008_v21 = vpack.c.bf16 %v5979_v50, %v5978_v6  ;;  %9713 = vpow2.f32 %v5828_v35  ;;  %v5832_v20 = vmul.f32 1.442695, %v5775_v19  ;;  %v5844_v15 = vmul.f32 1.442695, %v5781_v62 }
0x107d   : > { %9715 = vpow2.f32 %v5834_v29  ;;  %v5840_v5 = vmul.f32 1.442695, %v5779_v2 }
0x107e   : > { %8757 = vmatprep.mubr.msk.bf16.mxu0 %vm2692_vm4, %v6008_v21  ;;  %9717 = vpow2.f32 %v5808_v30 }
0x107f   : > { %8758 = vmatmul.mubr.msk.bf16.gmra.mrb[120].mxu0 %vm2692_vm4, %v6009_v44  ;;  %9719 = vpow2.f32 %v5832_v20 }
0x1080   : > { %v11868_v7 = vpop.eup %9709  ;;  %9721 = vpow2.f32 %v5824_v13 }
0x1081   : > { %v11870_v18 = vpop.eup %9711  ;;  %9723 = vpow2.f32 %v5842_v33  ;;  %v5891_v11 = vsel %vm2692_vm4, %v11868_v7, 0.0 }
0x1082   : > { %v5906_v0 = vsel %vm2692_vm4, %v11870_v18, 0.0  ;;  %9725 = vpow2.f32 %v5830_v8 }
0x1083   : > { %9727 = vpow2.f32 %v5840_v5 }
0x1084   : > { %9729 = vpow2.f32 %v5836_v38 }
0x1085   : > { %9731 = vpow2.f32 %v5838_v31 }
0x1086   : > { %v11874_v51 = vpop.eup %9713  ;;  %9733 = vpow2.f32 %v5844_v15 }
0x1087   : > { %v11880_v54 = vpop.eup %9715  ;;  %v5915_v27 = vsel %vm2692_vm4, %v11874_v51, 0.0 }
0x1088   : > { %v11884_v4 = vpop.eup %9717  ;;  %v5924_v63 = vsel %vm2692_vm4, %v11880_v54, 0.0 }
0x1089   : > { %v11890_v60 = vpop.eup %9719  ;;  %v5885_v16 = vsel %vm2692_vm4, %v11884_v4, 0.0 }
0x108a   : > { %v11894_v53 = vpop.eup %9721  ;;  %v5921_v22 = vsel %vm2692_vm4, %v11890_v60, 0.0 }
0x108b   : > { %v11900_v42 = vpop.eup %9723  ;;  %v5909_v46 = vsel %vm2692_vm4, %v11894_v53, 0.0 }
0x108c   : > { %v11902_v41 = vpop.eup %9725  ;;  %v5936_v34 = vsel %vm2692_vm4, %v11900_v42, 0.0 }
0x108d   : > { %v11908_v45 = vpop.eup %9727  ;;  %v5918_v43 = vsel %vm2692_vm4, %v11902_v41, 0.0 }
0x108e   : > { %v5933_v23 = vsel %vm2692_vm4, %v11908_v45, 0.0  ;;  %v11914_v47 = vpop.eup %9729 }
0x108f   : > { %v5927_v6 = vsel %vm2692_vm4, %v11914_v47, 0.0  ;;  %v11918_v50 = vpop.eup %9731 }
0x1090   : > { %5907 = vadd.xlane.f32.xlu0 %v5906_v0  ;;  %5892 = vadd.xlane.f32.xlu1 %v5891_v11  ;;  %v5930_v56 = vsel %vm2692_vm4, %v11918_v50, 0.0  ;;  %v11922_v21 = vpop.eup %9733 }
0x1091   : > { %v5939_v25 = vsel %vm2692_vm4, %v11922_v21, 0.0 }
0x1094   : > { %5925 = vadd.xlane.f32.xlu0 %v5924_v63  ;;  %5916 = vadd.xlane.f32.xlu1 %v5915_v27 }
0x1098   : > { %5922 = vadd.xlane.f32.xlu0 %v5921_v22  ;;  %5886 = vadd.xlane.f32.xlu1 %v5885_v16 }
0x109c   : > { %5937 = vadd.xlane.f32.xlu0 %v5936_v34  ;;  %5910 = vadd.xlane.f32.xlu1 %v5909_v46 }
0x10a0   : > { %5919 = vadd.xlane.f32.xlu1 %v5918_v43  ;;  %5934 = vadd.xlane.f32.xlu0 %v5933_v23 }
0x10a4   : > { %5928 = vadd.xlane.f32.xlu1 %v5927_v6 }
0x10a8   : > { %5931 = vadd.xlane.f32.xlu1 %v5930_v56 }
0x10ac   : > { %5940 = vadd.xlane.f32.xlu1 %v5939_v25 }
0x10b6   : > { %9355 = vrot.lane.b32.xlu0 %v11463_v39, %s12477_s11 }
0x10bd   : > { %9360 = vrot.lane.b32.xlu1 %v11459_v1, %s12477_s11 }
0x10bf   : > { %v5878_v24 = vpop.xlane.xlu0 %5877 }
0x10c1   : > { %9365 = vrot.lane.b32.xlu1 %v11478_v36, %s12477_s11 }
0x10c5   : > { %9370 = vrot.lane.b32.xlu1 %v11474_v49, %s12477_s11 }
0x10d0   : > { %v5902_v44 = vpop.xlane.xlu0 %5901 }
0x10d4   : > { %v5872_v14 = vpop.xlane.xlu0 %5871 }
0x10d8   : > { %v5896_v58 = vpop.xlane.xlu0 %5895 }
0x10dc   : > { %v5881_v35 = vpop.xlane.xlu1 %5880 }
0x10dd   : > { %9735 = vrcp.f32 %v5881_v35 }
0x10de   : > { %9737 = vrcp.f32 %v5872_v14 }
0x10df   : > { %9739 = vrcp.f32 %v5878_v24 }
0x10e0   : > { %v5890_v10 = vpop.xlane.xlu0 %5889  ;;  %v5905_v29 = vpop.xlane.xlu1 %5904 }
0x10e4   : > { %v5914_v19 = vpop.xlane.xlu0 %5913  ;;  %v5875_v39 = vpop.xlane.xlu1 %5874 }
0x10e5   : > { %9741 = vrcp.f32 %v5875_v39 }
0x10e6   : > { %9743 = vrcp.f32 %v5905_v29 }
0x10e7   : > { %9745 = vrcp.f32 %v5896_v58  ;;  %v9736_v28 = vpop.eup %9735 }
0x10e8   : > { %v5884_v1 = vpop.xlane.xlu0 %5883  ;;  %v5899_v36 = vpop.xlane.xlu1 %5898  ;;  %9747 = vrcp.f32 %v5902_v44  ;;  %v5985_v5 = vmul.f32 %v9736_v28, %v11783_v48 }
0x10e9   : > { %9749 = vrcp.f32 %v5899_v36  ;;  %v9738_v61 = vpop.eup %9737 }
0x10ea   : > { %v9740_v2 = vpop.eup %9739  ;;  %v5982_v38 = vmul.f32 %v9738_v61, %v11768_v26 }
0x10eb   : > { %v5984_v27 = vmul.f32 %v9740_v2, %v11749_v12 }
0x10ec   : > { %v9346_v49 = vpop.permute.xlu0 %9345  ;;  %v9351_v30 = vpop.permute.xlu1 %9350 }
0x10ed   : > { %v9348_v20 = vunpack.i.h.bf16 %v9346_v49  ;;  %v9347_v32 = vunpack.i.l.bf16 %v9346_v49  ;;  %v9353_v13 = vunpack.i.h.bf16 %v9351_v30  ;;  %v9352_v33 = vunpack.i.l.bf16 %v9351_v30 }
0x10ee   : > { %v6011_v16 = vpack.c.bf16 %v5985_v5, %v5984_v27 }
0x10ef   : > { %v5260_v8 = vpack.c.bf16 %v9348_v20, %v9347_v32  ;;  %v9742_v59 = vpop.eup %9741  ;;  %v5261_v11 = vpack.c.bf16 %v9353_v13, %v9352_v33 }
0x10f0   : > { %v9744_v0 = vpop.eup %9743  ;;  %v5983_v52 = vmul.f32 %v9742_v59, %v11801_v3 }
0x10f1   : > { %8781 = vmatprep.subr.bf16.mxu0 %v5260_v8  ;;  %v9746_v63 = vpop.eup %9745  ;;  %v5993_v15 = vmul.f32 %v9744_v0, %v11789_v40 }
0x10f2   : > { %8782 = vmatpush3.bf16.msra.mxu0 %v5260_v8  ;;  %v9748_v62 = vpop.eup %9747  ;;  %v6010_v31 = vpack.c.bf16 %v5983_v52, %v5982_v38  ;;  %v5990_v48 = vmul.f32 %v9746_v63, %v11776_v37 }
0x10f3   : > { %8783 = vmatprep.subr.bf16.mxu0 %v5261_v11  ;;  %v9750_v22 = vpop.eup %9749  ;;  %v5992_v26 = vmul.f32 %v9748_v62, %v11760_v55 }
0x10f4   : > { %8769 = vmatprep.mubr.msk.bf16.mxu1 %vm2692_vm4, %v6010_v31  ;;  %v5991_v34 = vmul.f32 %v9750_v22, %v11813_v17 }
0x10f5   : > { %8770 = vmatmul.mubr.msk.bf16.vlgmr.msra.gmra.mrb[116].mxu1 %vm2692_vm4, %v6011_v16  ;;  %v6015_v3 = vpack.c.bf16 %v5993_v15, %v5992_v26 }
0x10f6   : > { %8784 = vmatpush3.bf16.msra.mxu0 %v5261_v11  ;;  %v6014_v12 = vpack.c.bf16 %v5991_v34, %v5990_v48 }
0x10f8   : > { %8785 = vmatprep.mubr.msk.bf16.mxu0 %vm2692_vm4, %v6014_v12 }
0x10f9   : > { %8786 = vmatmul.mubr.msk.bf16.vlgmr.msra.gmra.mrb[124].mxu0 %vm2692_vm4, %v6015_v3 }
0x111d   : > { %v5908_v46 = vpop.xlane.xlu0 %5907  ;;  %v5893_v43 = vpop.xlane.xlu1 %5892 }
0x111e   : > { %9751 = vrcp.f32 %v5893_v43 }
0x111f   : > { %9753 = vrcp.f32 %v5884_v1 }
0x1120   : > { %9755 = vrcp.f32 %v5890_v10 }
0x1121   : > { %v5926_v40 = vpop.xlane.xlu0 %5925  ;;  %v5917_v23 = vpop.xlane.xlu1 %5916 }
0x1125   : > { %v5923_v37 = vpop.xlane.xlu0 %5922  ;;  %v5887_v6 = vpop.xlane.xlu1 %5886 }
0x1126   : > { %9757 = vrcp.f32 %v5887_v6 }
0x1127   : > { %9759 = vrcp.f32 %v5917_v23 }
0x1128   : > { %9761 = vrcp.f32 %v5908_v46  ;;  %v9752_v24 = vpop.eup %9751 }
0x1129   : > { %v5938_v55 = vpop.xlane.xlu0 %5937  ;;  %v5911_v17 = vpop.xlane.xlu1 %5910  ;;  %9763 = vrcp.f32 %v5914_v19  ;;  %v5989_v39 = vmul.f32 %v9752_v24, %v11868_v7 }
0x112a   : > { %9765 = vrcp.f32 %v5911_v17  ;;  %v9754_v44 = vpop.eup %9753 }
0x112b   : > { %9767 = vrcp.f32 %v5923_v37  ;;  %v9756_v14 = vpop.eup %9755  ;;  %v5986_v49 = vmul.f32 %v9754_v44, %v11817_v57 }
0x112c   : > { %v5988_v28 = vmul.f32 %v9756_v14, %v11793_v9 }
0x112d   : > { %v5935_v56 = vpop.xlane.xlu0 %5934  ;;  %v5920_v25 = vpop.xlane.xlu1 %5919 }
0x112e   : > { %9769 = vrcp.f32 %v5920_v25  ;;  %v6013_v2 = vpack.c.bf16 %v5989_v39, %v5988_v28 }
0x1130   : > { %v9758_v58 = vpop.eup %9757 }
0x1131   : > { %v9356_v35 = vpop.permute.xlu0 %9355  ;;  %v5929_v29 = vpop.xlane.xlu1 %5928  ;;  %v5987_v19 = vmul.f32 %v9758_v58, %v11884_v4  ;;  %v12479_v4 = vld [vmem:[#allocation16_spill] sm:$0xff] }
0x1132   : > { %v9760_v10 = vpop.eup %9759  ;;  %v9358_v1 = vunpack.i.h.bf16 %v9356_v35  ;;  %v9357_v36 = vunpack.i.l.bf16 %v9356_v35  ;;  %9771 = vrcp.f32 %v5929_v29  ;;  %v7895_v35 = vld [vmem:[%s12359_s18 + $0x10] sm:$0xf] }
0x1133   : > { %v9762_v30 = vpop.eup %9761  ;;  %v6012_v13 = vpack.c.bf16 %v5987_v19, %v5986_v49  ;;  %v5997_v8 = vmul.f32 %v9760_v10, %v11874_v51 }
0x1134   : > { %v9764_v20 = vpop.eup %9763  ;;  %v5262_v32 = vpack.c.bf16 %v9358_v1, %v9357_v36  ;;  %v5994_v7 = vmul.f32 %v9762_v30, %v11870_v18 }
0x1135   : > { %v9766_v61 = vpop.eup %9765  ;;  %v5932_v33 = vpop.xlane.xlu1 %5931  ;;  %8773 = vmatprep.mubr.msk.bf16.mxu1 %vm2692_vm4, %v6012_v13  ;;  %v5996_v9 = vmul.f32 %v9764_v20, %v12479_v4 }
0x1136   : > { %8793 = vmatprep.subr.bf16.mxu1 %v5262_v32  ;;  %v5995_v57 = vmul.f32 %v9766_v61, %v11894_v53  ;;  %v9768_v59 = vpop.eup %9767  ;;  %8774 = vmatmul.mubr.msk.bf16.gmra.mrb[120].mxu1 %vm2692_vm4, %v6013_v2  ;;  %9773 = vrcp.f32 %v5932_v33 }
0x1137   : > { %8794 = vmatpush3.bf16.msra.mxu1 %v5262_v32  ;;  %v6017_v38 = vpack.c.bf16 %v5997_v8, %v5996_v9  ;;  %v5999_v52 = vmul.f32 %v9768_v59, %v11890_v60  ;;  %9775 = vrcp.f32 %v5926_v40 }
0x1138   : > { %v6016_v5 = vpack.c.bf16 %v5995_v57, %v5994_v7  ;;  %v9770_v0 = vpop.eup %9769  ;;  %9777 = vrcp.f32 %v5935_v56  ;;  %v7905_v7 = vld [vmem:[%s12359_s18 + $0x18] sm:$0xf] }
0x1139   : > { %v5941_v11 = vpop.xlane.xlu1 %5940  ;;  %v5998_v51 = vmul.f32 %v9770_v0, %v11902_v41 }
0x113a   : > { %8789 = vmatprep.mubr.msk.bf16.mxu0 %vm2692_vm4, %v6016_v5  ;;  %9779 = vrcp.f32 %v5941_v11 }
0x113b   : > { %8790 = vmatmul.mubr.msk.bf16.gmra.mrb[128].mxu0 %vm2692_vm4, %v6017_v38  ;;  %v6018_v18 = vpack.c.bf16 %v5999_v52, %v5998_v51  ;;  %9781 = vrcp.f32 %v5938_v55 }
0x113c   : > { %v9772_v41 = vpop.eup %9771 }
0x113d   : > { %v9361_v53 = vpop.permute.xlu1 %9360  ;;  %8801 = vmatprep.mubr.msk.bf16.mxu1 %vm2692_vm4, %v6018_v18  ;;  %v6001_v46 = vmul.f32 %v9772_v41, %v11914_v47  ;;  %v7896_v47 = vld [vmem:[%s12359_s18 + $0x14] sm:$0xf] }
0x113e   : > { %v9363_v63 = vunpack.i.h.bf16 %v9361_v53  ;;  %v9362_v27 = vunpack.i.l.bf16 %v9361_v53  ;;  %8997 = vmatprep.subr.msk.bf16.mxu0 %vm3392_vm5, %v7896_v47 }
0x1140   : > { %v5263_v62 = vpack.c.bf16 %v9363_v63, %v9362_v27  ;;  %v9774_v48 = vpop.eup %9773 }
0x1141   : > { %v9366_v31 = vpop.permute.xlu1 %9365  ;;  %v9776_v12 = vpop.eup %9775  ;;  %v6002_v40 = vmul.f32 %v9774_v48, %v11918_v50 }
0x1142   : > { %v9368_v22 = vunpack.i.h.bf16 %v9366_v31  ;;  %v9367_v16 = vunpack.i.l.bf16 %v9366_v31  ;;  %8795 = vmatprep.subr.bf16.mxu1 %v5263_v62  ;;  %v9778_v3 = vpop.eup %9777  ;;  %v6000_v23 = vmul.f32 %v9776_v12, %v11880_v54  ;;  %v6355_v54 = vsel %vm3392_vm5, %v7896_v47, 0  ;;  %v12483_v47 = vld [vmem:[#allocation2_spill] sm:$0xff] }
0x1143   : > { %8796 = vmatpush3.bf16.msra.mxu1 %v5263_v62  ;;  %v6003_v55 = vmul.f32 %v9778_v3, %v11908_v45  ;;  %8810 = vmatpush3.bf16.msra.mxu0 %v6355_v54  ;;  %v6521_v31 = vsel %vm3392_vm5, %v7905_v7, 0 }
0x1144   : > { %v5264_v60 = vpack.c.bf16 %v9368_v22, %v9367_v16  ;;  %v6019_v17 = vpack.c.bf16 %v6001_v46, %v6000_v23  ;;  %v9780_v25 = vpop.eup %9779  ;;  %8998 = vmatprep.subr.msk.bf16.mxu0 %vm3392_vm5, %v7895_v35  ;;  %v7910_v22 = vld [vmem:[%s12359_s18 + $0x1c] sm:$0xf] }
0x1145   : > { %v9371_v15 = vpop.permute.xlu1 %9370  ;;  %v6020_v14 = vpack.c.bf16 %v6003_v55, %v6002_v40  ;;  %v9782_v58 = vpop.eup %9781  ;;  %v6005_v45 = vmul.f32 %v9780_v25, %v11922_v21  ;;  %v9440_v55 = vld [vmem:[%s12365_s24 + $0x18] sm:$0xff]   ;;  %v12482_v25 = vld [vmem:[#allocation14_spill] sm:$0xff] }
0x1146   : > { %v9373_v34 = vunpack.i.h.bf16 %v9371_v15  ;;  %v9372_v26 = vunpack.i.l.bf16 %v9371_v15  ;;  %8797 = vmatprep.subr.bf16.mxu1 %v5264_v60  ;;  %v6004_v39 = vmul.f32 %v9782_v58, %v11900_v42  ;;  %v6435_v42 = vsel %vm3392_vm5, %v7895_v35, 0 }
0x1147   : > { %8798 = vmatpush3.bf16.msra.mxu1 %v5264_v60 }
0x1148   : > { %v5265_v43 = vpack.c.bf16 %v9373_v34, %v9372_v26  ;;  %v6021_v36 = vpack.c.bf16 %v6005_v45, %v6004_v39  ;;  %v6615_v26 = vsel %vm3392_vm5, %v7910_v22, 0 }
0x114a   : > { %v11964_v37 = vpop.f32.mrb[116].mxu0  ;;  %8799 = vmatprep.subr.bf16.mxu1 %v5265_v43 }
0x114b   : > { %v6068_v6 = vpop.f32.mrb[117].mxu0  ;;  %8800 = vmatpush3.bf16.msra.mxu1 %v5265_v43  ;;  %v12480_v43 = vmov 0.0  }
0x114c   : > { %v8756_v56 = vpop.f32.mrb[118].mxu0 }
0x114d   : > { %v6331_v24 = vpack.c.bf16 %v8756_v56, %v11964_v37  ;;  %v6071_v44 = vpop.f32.mrb[119].mxu0  ;;  %v7802_v56 = vld [vmem:[%s12445_s0 + $0xa] sm:$0x1] }
0x114e   : > { %v6330_v50 = vpack.c.bf16 %v6071_v44, %v6068_v6  ;;  %8802 = vmatmul.mubr.msk.bf16.vlgmr.msra.gmra.mrb[124].mxu1 %vm2692_vm4, %v6019_v17  ;;  %v9439_v6 = vld [vmem:[%s12365_s24 + $0x10] sm:$0xff]   ;;  %v12481_v17 = vld [vmem:[#allocation11_spill] sm:$0xff]  ;;  %v7915_v44 = vld [vmem:[%s12360_s19 + $0x1] ss:$0 sm:$0xff] }
0x114f   : > { %8805 = vmatprep.mubr.msk.bf16.mxu1 %vm2692_vm4, %v6020_v14 }
0x1152   : > { %v8759_v29 = vpop.f32.mrb[120].mxu0 }
0x1153   : > { %v6084_v10 = vpop.f32.mrb[121].mxu0 }
0x1154   : > { %v8760_v1 = vpop.f32.mrb[122].mxu0 }
0x1155   : > { %v6333_v49 = vpack.c.bf16 %v8760_v1, %v8759_v29  ;;  %v6087_v19 = vpop.f32.mrb[123].mxu0 }
0x1156   : > { %v6332_v30 = vpack.c.bf16 %v6087_v19, %v6084_v10  ;;  %8806 = vmatmul.mubr.msk.bf16.gmra.mrb[128].mxu1 %vm2692_vm4, %v6021_v36  ;;  %v12484_v19 = vld [vmem:[#allocation5_spill] sm:$0xff] }
0x11c8   : > { %v8771_v28 = vpop.f32.mrb[116].mxu1 }
0x11c9   : > { %v6145_v20 = vpop.f32.mrb[117].mxu1 }
0x11ca   : > { %v8772_v21 = vpop.f32.mrb[118].mxu1 }
0x11cb   : > { %v6337_v32 = vpack.c.bf16 %v8772_v21, %v8771_v28  ;;  %v6148_v13 = vpop.f32.mrb[119].mxu1 }
0x11cc   : > { %v6336_v61 = vpack.c.bf16 %v6148_v13, %v6145_v20  ;;  %v8787_v33 = vpop.f32.mrb[124].mxu0  ;;  %v12485_v20 = vld [vmem:[#allocation6_spill] sm:$0xff] }
0x11cd   : > { %v6222_v2 = vpop.f32.mrb[125].mxu0 }
0x11ce   : > { %v8788_v8 = vpop.f32.mrb[126].mxu0  ;;  %8811 = vmatprep.mubr.msk.bf16.mxu0 %vm2303_vm3, %v6336_v61 }
0x11cf   : > { %v6503_v57 = vpack.c.bf16 %v8788_v8, %v8787_v33  ;;  %v6225_v59 = vpop.f32.mrb[127].mxu0  ;;  %8812 = vmatmul.mubr.msk.bf16.vlgmr.msra.gmra.mrb[132].mxu0 %vm2303_vm3, %v6337_v32  ;;  %v12486_v32 = vld [vmem:[#allocation3_spill] sm:$0xff] }
0x11d0   : > { %v6502_v4 = vpack.c.bf16 %v6225_v59, %v6222_v2  ;;  %8820 = vmatpush3.bf16.msra.mxu0 %v6435_v42 }
0x11d1   : > { %8999 = vmatprep.subr.msk.bf16.mxu0 %vm3392_vm5, %v7905_v7 }
0x1209   : > { %v8775_v9 = vpop.f32.mrb[120].mxu1 }
0x120a   : > { %v6161_v5 = vpop.f32.mrb[121].mxu1 }
0x120b   : > { %v8776_v0 = vpop.f32.mrb[122].mxu1 }
0x120c   : > { %v6339_v11 = vpack.c.bf16 %v8776_v0, %v8775_v9  ;;  %v6164_v38 = vpop.f32.mrb[123].mxu1 }
0x120d   : > { %v6338_v51 = vpack.c.bf16 %v6164_v38, %v6161_v5  ;;  %v12487_v5 = vld [vmem:[#allocation8_spill] sm:$0xff] }
0x120e   : > { %v8791_v52 = vpop.f32.mrb[128].mxu0 }
0x120f   : > { %v6238_v18 = vpop.f32.mrb[129].mxu0  ;;  %8815 = vmatprep.mubr.msk.bf16.mxu0 %vm2303_vm3, %v6338_v51 }
0x1210   : > { %v8792_v53 = vpop.f32.mrb[130].mxu0  ;;  %8816 = vmatmul.mubr.msk.bf16.gmra.mrb[136].mxu0 %vm2303_vm3, %v6339_v11 }
0x1211   : > { %v6505_v63 = vpack.c.bf16 %v8792_v53, %v8791_v52  ;;  %v6241_v27 = vpop.f32.mrb[131].mxu0  ;;  %8821 = vmatprep.mubr.msk.bf16.mxu0 %vm2303_vm3, %v6330_v50  ;;  %v12488_v53 = vld [vmem:[#allocation10_spill] sm:$0xff] }
0x1212   : > { %v6504_v62 = vpack.c.bf16 %v6241_v27, %v6238_v18  ;;  %v12489_v27 = vld [vmem:[#allocation9_spill] sm:$0xff] }
0x1218   : > { %8822 = vmatmul.mubr.msk.bf16.vlgmr.msra.gmra.mrb[132].mxu0 %vm2303_vm3, %v6331_v24  ;;  %v4393_v24 = vadd.f32 %v7802_v56, %v12482_v25 }
0x1219   : > { %8825 = vmatprep.mubr.msk.bf16.mxu0 %vm2303_vm3, %v6332_v30  ;;  %8830 = vmatpush3.bf16.msra.mxu0 %v6521_v31 }
0x121a   : > { %9000 = vmatprep.subr.msk.bf16.mxu0 %vm3392_vm5, %v7910_v22  ;;  %v6706_v50 = vrot.slane %v4393_v24, %v12483_v47 }
0x1220   : > { %8826 = vmatmul.mubr.msk.bf16.gmra.mrb[136].mxu0 %vm2303_vm3, %v6333_v49 }
0x1221   : > { %v8803_v16 = vpop.f32.mrb[124].mxu1  ;;  %8831 = vmatprep.mubr.msk.bf16.mxu0 %vm2303_vm3, %v6502_v4 }
0x1222   : > { %v6299_v60 = vpop.f32.mrb[125].mxu1 }
0x1223   : > { %v8804_v41 = vpop.f32.mrb[126].mxu1 }
0x1224   : > { %v6597_v15 = vpack.c.bf16 %v8804_v41, %v8803_v16  ;;  %v6302_v48 = vpop.f32.mrb[127].mxu1 }
0x1225   : > { %v6596_v34 = vpack.c.bf16 %v6302_v48, %v6299_v60  ;;  %v12490_v60 = vld [vmem:[#allocation12_spill] sm:$0xff] }
0x1228   : > { %8832 = vmatmul.mubr.msk.bf16.vlgmr.msra.gmra.mrb[132].mxu0 %vm2303_vm3, %v6503_v57 }
0x1229   : > { %v8807_v12 = vpop.f32.mrb[128].mxu1  ;;  %8835 = vmatprep.mubr.msk.bf16.mxu0 %vm2303_vm3, %v6504_v62  ;;  %8840 = vmatpush3.bf16.msra.mxu0 %v6615_v26  ;;  %v12491_v26 = vld [vmem:[#allocation7_spill] sm:$0xff] }
0x122a   : > { %v6315_v3 = vpop.f32.mrb[129].mxu1  ;;  %8893 = vmatprep.subr.bf16.mxu0 %v12480_v43 }
0x122b   : > { %v8808_v46 = vpop.f32.mrb[130].mxu1 }
0x122c   : > { %v6599_v40 = vpack.c.bf16 %v8808_v46, %v8807_v12  ;;  %v6318_v23 = vpop.f32.mrb[131].mxu1 }
0x122d   : > { %v6598_v37 = vpack.c.bf16 %v6318_v23, %v6315_v3 }
0x1230   : > { %8836 = vmatmul.mubr.msk.bf16.gmra.mrb[136].mxu0 %vm2303_vm3, %v6505_v63 }
0x1231   : > { %8841 = vmatprep.mubr.msk.bf16.mxu0 %vm2303_vm3, %v6596_v34 }
0x1238   : > { %8842 = vmatmul.mubr.msk.bf16.vlgmr.msra.gmra.mrb[132].mxu0 %vm2303_vm3, %v6597_v15 }
0x1239   : > { %8845 = vmatprep.mubr.msk.bf16.mxu0 %vm2303_vm3, %v6598_v37  ;;  %8894 = vmatpush3.bf16.msra.mxu0 %v9439_v6 }
0x123a   : > { %8895 = vmatprep.subr.bf16.mxu0 %v12480_v43 }
0x123d   : > { %8896 = vmatpush3.bf16.msra.mxu0 %v9440_v55 }
0x1240   : > { %8846 = vmatmul.mubr.msk.bf16.gmra.mrb[136].mxu0 %vm2303_vm3, %v6599_v40 }
0x1241   : > { %8897 = vmatprep.mubr.msk.bf16.mxu0 %vm9840_vm1, %v12480_v43 }
0x1248   : > { %8898 = vmatmul.mubr.msk.bf16.vlgmr.msra.gmra.mrb[140].mxu0 %vm1207_vm2, %v12481_v17 }
0x130b   : > { %v8843_v14 = vpop.f32.mrb[132].mxu0 }
0x130c   : > { %v6697_v54 = vadd.f32 %v8843_v14, %v7915_v44  ;;  %v6651_v58 = vpop.f32.mrb[133].mxu0 }
0x130d   : > { %v6695_v45 = vadd.f32 %v7915_v44, %v6651_v58  ;;  %v8844_v35 = vpop.f32.mrb[134].mxu0 }
0x130e   : > { %v6709_v29 = vmul.f32 %v6706_v50, %v6697_v54  ;;  %v6698_v39 = vadd.f32 %v8844_v35, %v7915_v44  ;;  %v6654_v10 = vpop.f32.mrb[135].mxu0 }
0x130f   : > { %v6707_v1 = vmul.f32 %v6706_v50, %v6695_v45  ;;  %v6696_v36 = vadd.f32 %v7915_v44, %v6654_v10 }
0x1310   : > { %v6710_v49 = vmul.f32 %v6706_v50, %v6698_v39  ;;  %v12033_v21 = vadd.f32 %v6709_v29, %v12485_v20 }
0x1311   : > { %v12030_v30 = vadd.f32 %v6707_v1, %v12484_v19  ;;  %v6708_v28 = vmul.f32 %v6706_v50, %v6696_v36 }
0x1312   : > { %v12043_v0 = vadd.f32 %v6710_v49, %v12487_v5  ;;  %v6729_v51 = vsel %vm1207_vm2, %v12033_v21, 0.0 }
0x1313   : > { %v12036_v13 = vadd.f32 %v6708_v28, %v12486_v32  ;;  %v8847_v61 = vpop.f32.mrb[136].mxu0  ;;  %v6723_v33 = vsel %vm1207_vm2, %v12030_v30, 0.0 }
0x1314   : > { %v6701_v2 = vadd.f32 %v8847_v61, %v7915_v44  ;;  %6724 = vadd.xlane.f32.xlu0 %v6723_v33  ;;  %v6667_v42 = vpop.f32.mrb[137].mxu0  ;;  %v6732_v22 = vsel %vm1207_vm2, %v12043_v0, 0.0 }
0x1315   : > { %v6699_v8 = vadd.f32 %v7915_v44, %v6667_v42  ;;  %v8848_v7 = vpop.f32.mrb[138].mxu0  ;;  %v6726_v57 = vsel %vm1207_vm2, %v12036_v13, 0.0 }
0x1316   : > { %v6713_v59 = vmul.f32 %v6706_v50, %v6701_v2  ;;  %v6702_v4 = vadd.f32 %v8848_v7, %v7915_v44  ;;  %6727 = vadd.xlane.f32.xlu1 %v6726_v57  ;;  %v6670_v9 = vpop.f32.mrb[139].mxu0 }
0x1317   : > { %v6711_v11 = vmul.f32 %v6706_v50, %v6699_v8  ;;  %v6700_v38 = vadd.f32 %v7915_v44, %v6670_v9 }
0x1318   : > { %v6714_v52 = vmul.f32 %v6706_v50, %v6702_v4  ;;  %6730 = vadd.xlane.f32.xlu0 %v6729_v51  ;;  %v12063_v12 = vadd.f32 %v6713_v59, %v12491_v26  ;;  %v7818_v26 = vld [vmem:[%s12445_s0 + $0xc] sm:$0x1] }
0x1319   : > { %v6712_v18 = vmul.f32 %v6706_v50, %v6700_v38  ;;  %v12048_v63 = vadd.f32 %v6711_v11, %v12488_v53  ;;  %v9441_v53 = vld [vmem:[%s12361_s20 + $0x10] sm:$0xff]  }
0x131a   : > { %v12058_v41 = vadd.f32 %v6714_v52, %v12490_v60  ;;  %v6741_v40 = vsel %vm1207_vm2, %v12063_v12, 0.0  ;;  %8849 = vmatprep.subr.bf16.mxu1 %v9441_v53 }
0x131b   : > { %v12051_v62 = vadd.f32 %v6712_v18, %v12489_v27  ;;  %v12053_v31 = vpop.f32.mrb[140].mxu0  ;;  %v6735_v3 = vsel %vm1207_vm2, %v12048_v63, 0.0  ;;  %8850 = vmatpush3.bf16.msra.mxu1 %v9441_v53  ;;  %v9442_v27 = vld [vmem:[%s12361_s20 + $0x18] sm:$0xff]  }
0x131c   : > { %6733 = vadd.xlane.f32.xlu0 %v6732_v22  ;;  %v8899_v16 = vpop.f32.mrb[141].mxu0  ;;  %v6744_v46 = vsel %vm1207_vm2, %v12058_v41, 0.0  ;;  %8851 = vmatprep.subr.bf16.mxu1 %v9442_v27 }
0x131d   : > { %v7298_v15 = vpop.f32.mrb[142].mxu0  ;;  %v6738_v48 = vsel %vm1207_vm2, %v12051_v62, 0.0 }
0x131e   : > { %v8900_v34 = vpop.f32.mrb[143].mxu0  ;;  %6739 = vadd.xlane.f32.xlu1 %v6738_v48 }
0x131f   : > { %8852 = vmatpush3.bf16.msra.mxu1 %v9442_v27 }
0x1320   : > { %6736 = vadd.xlane.f32.xlu0 %v6735_v3 }
0x1322   : > { %6745 = vadd.xlane.f32.xlu1 %v6744_v46 }
0x1324   : > { %6742 = vadd.xlane.f32.xlu0 %v6741_v40 }
0x13a1   : > { %v6725_v23 = vpop.xlane.xlu0 %6724 }
0x13a2   : > { %v6747_v37 = vmul.f32 0.03125, %v6725_v23  ;;  %v12492_v23 = vld [vmem:[#allocation15_spill] sm:$0xff] }
0x13a3   : > { %v6728_v6 = vpop.xlane.xlu1 %6727 }
0x13a4   : > { %v12072_v55 = vsub.f32 %v12030_v30, %v6747_v37  ;;  %v6748_v56 = vmul.f32 0.03125, %v6728_v6  ;;  %v4509_v37 = vadd.f32 %v7818_v26, %v12492_v23 }
0x13a5   : > { %v6731_v25 = vpop.xlane.xlu0 %6730 }
0x13a6   : > { %v12075_v24 = vsub.f32 %v12036_v13, %v6748_v56  ;;  %v6749_v44 = vmul.f32 0.03125, %v6731_v25  ;;  %v6763_v14 = vmul.f32 %v12072_v55, %v12072_v55  ;;  %v7810_v25 = vld [vmem:[%s12445_s0 + $0xb] sm:$0x1] }
0x13a8   : > { %v12080_v50 = vsub.f32 %v12033_v21, %v6749_v44  ;;  %v6771_v54 = vsel %vm1207_vm2, %v6763_v14, 0.0  ;;  %v6764_v58 = vmul.f32 %v12075_v24, %v12075_v24  ;;  %v6827_v14 = vadd.f32 1.0, %v4509_v37 }
0x13a9   : > { %v6734_v45 = vpop.xlane.xlu0 %6733  ;;  %6772 = vadd.xlane.f32.xlu0 %v6771_v54 }
0x13aa   : > { %v6750_v35 = vmul.f32 0.03125, %v6734_v45  ;;  %v6774_v29 = vsel %vm1207_vm2, %v6764_v58, 0.0  ;;  %v6765_v39 = vmul.f32 %v12080_v50, %v12080_v50 }
0x13ab   : > { %6775 = vadd.xlane.f32.xlu1 %v6774_v29  ;;  %v6740_v10 = vpop.xlane.xlu1 %6739  ;;  %v12493_v29 = vld [vmem:[#allocation13_spill] sm:$0xff] }
0x13ac   : > { %v12089_v1 = vsub.f32 %v12043_v0, %v6750_v35  ;;  %v6752_v36 = vmul.f32 0.03125, %v6740_v10  ;;  %v6777_v49 = vsel %vm1207_vm2, %v6765_v39, 0.0  ;;  %v4451_v39 = vadd.f32 %v7810_v25, %v12493_v29  ;;  %v9447_v29 = vld [vmem:[%s12363_s22 + $0x60] sm:$0xff]  }
0x13ad   : > { %6778 = vadd.xlane.f32.xlu0 %v6777_v49  ;;  %v6737_v19 = vpop.xlane.xlu0 %6736 }
0x13ae   : > { %v12093_v28 = vsub.f32 %v12051_v62, %v6752_v36  ;;  %v6751_v20 = vmul.f32 0.03125, %v6737_v19  ;;  %v6766_v32 = vmul.f32 %v12089_v1, %v12089_v1  ;;  %v6831_v19 = vrot.slane %v6827_v14, %v12483_v47 }
0x13af   : > { %v6746_v61 = vpop.xlane.xlu1 %6745 }
0x13b0   : > { %v12098_v33 = vsub.f32 %v12048_v63, %v6751_v20  ;;  %v6754_v2 = vmul.f32 0.03125, %v6746_v61  ;;  %v6780_v42 = vsel %vm1207_vm2, %v6766_v32, 0.0  ;;  %v6768_v8 = vmul.f32 %v12093_v28, %v12093_v28 }
0x13b1   : > { %v6743_v7 = vpop.xlane.xlu0 %6742  ;;  %6781 = vadd.xlane.f32.xlu1 %v6780_v42 }
0x13b2   : > { %v12104_v57 = vsub.f32 %v12058_v41, %v6754_v2  ;;  %v6753_v59 = vmul.f32 0.03125, %v6743_v7  ;;  %v6767_v4 = vmul.f32 %v12098_v33, %v12098_v33  ;;  %v6786_v11 = vsel %vm1207_vm2, %v6768_v8, 0.0 }
0x13b3   : > { %v6843_v7 = vrot.slane %v4451_v39, %v12483_v47  ;;  %v9448_v39 = vld [vmem:[%s12363_s22 + $0x68] sm:$0xff]  }
0x13b4   : > { %v12109_v9 = vsub.f32 %v12063_v12, %v6753_v59  ;;  %v6783_v5 = vsel %vm1207_vm2, %v6767_v4, 0.0  ;;  %v6770_v38 = vmul.f32 %v12104_v57, %v12104_v57 }
0x13b5   : > { %6784 = vadd.xlane.f32.xlu0 %v6783_v5  ;;  %6787 = vadd.xlane.f32.xlu1 %v6786_v11 }
0x13b6   : > { %v6769_v51 = vmul.f32 %v12109_v9, %v12109_v9  ;;  %v6792_v18 = vsel %vm1207_vm2, %v6770_v38, 0.0 }
0x13b8   : > { %v6789_v52 = vsel %vm1207_vm2, %v6769_v51, 0.0 }
0x13b9   : > { %6790 = vadd.xlane.f32.xlu0 %v6789_v52  ;;  %6793 = vadd.xlane.f32.xlu1 %v6792_v18 }
0x1436   : > { %v6773_v22 = vpop.xlane.xlu0 %6772 }
0x1437   : > { %v6795_v16 = vmul.f32 0.03125, %v6773_v22 }
0x1438   : > { %v6776_v60 = vpop.xlane.xlu1 %6775 }
0x1439   : > { %v6803_v15 = vadd.f32 1e-06, %v6795_v16  ;;  %v6796_v48 = vmul.f32 0.03125, %v6776_v60 }
0x143a   : > { %v6779_v34 = vpop.xlane.xlu0 %6778 }
0x143b   : > { %9783 = vrsqrt.f32 %v6803_v15  ;;  %v6804_v3 = vadd.f32 1e-06, %v6796_v48  ;;  %v6797_v46 = vmul.f32 0.03125, %v6779_v34 }
0x143d   : > { %9785 = vrsqrt.f32 %v6804_v3  ;;  %v6805_v40 = vadd.f32 1e-06, %v6797_v46 }
0x143e   : > { %v6782_v6 = vpop.xlane.xlu1 %6781 }
0x143f   : > { %9787 = vrsqrt.f32 %v6805_v40  ;;  %v6798_v56 = vmul.f32 0.03125, %v6782_v6 }
0x1441   : > { %v6806_v44 = vadd.f32 1e-06, %v6798_v56 }
0x1442   : > { %v6785_v54 = vpop.xlane.xlu0 %6784  ;;  %v6788_v58 = vpop.xlane.xlu1 %6787 }
0x1443   : > { %9789 = vrsqrt.f32 %v6806_v44  ;;  %v6799_v45 = vmul.f32 0.03125, %v6785_v54  ;;  %v6800_v35 = vmul.f32 0.03125, %v6788_v58 }
0x1445   : > { %v9784_v10 = vpop.eup %9783  ;;  %v6807_v36 = vadd.f32 1e-06, %v6799_v45  ;;  %v6808_v49 = vadd.f32 1e-06, %v6800_v35  ;;  %v9445_v45 = vld [vmem:[%s12363_s22 + $0x50] sm:$0xff]   ;;  %v9446_v35 = vld [vmem:[%s12363_s22 + $0x58] sm:$0xff]  }
0x1446   : > { %v6819_v20 = vmul.f32 %v9784_v10, %v12072_v55  ;;  %v6791_v32 = vpop.xlane.xlu0 %6790  ;;  %v6794_v61 = vpop.xlane.xlu1 %6793  ;;  %v9449_v10 = vld [vmem:[%s12363_s22 + $0x70] sm:$0xff]  }
0x1447   : > { %v9786_v2 = vpop.eup %9785  ;;  %9791 = vrsqrt.f32 %v6807_v36  ;;  %v6801_v42 = vmul.f32 0.03125, %v6791_v32  ;;  %v6802_v8 = vmul.f32 0.03125, %v6794_v61  ;;  %v9450_v36 = vld [vmem:[%s12363_s22 + $0x78] sm:$0xff]  }
0x1448   : > { %v6820_v59 = vmul.f32 %v9786_v2, %v12075_v24  ;;  %9793 = vrsqrt.f32 %v6808_v49  ;;  %v6832_v4 = vmul.f32 %v6831_v19, %v6819_v20  ;;  %v7920_v49 = vld [vmem:[%s12362_s21 + $0x1] ss:$0 sm:$0xff] }
0x1449   : > { %v9788_v5 = vpop.eup %9787  ;;  %v6809_v11 = vadd.f32 1e-06, %v6801_v42  ;;  %v6810_v38 = vadd.f32 1e-06, %v6802_v8 }
0x144a   : > { %v6821_v51 = vmul.f32 %v9788_v5, %v12080_v50  ;;  %v6833_v52 = vmul.f32 %v6831_v19, %v6820_v59  ;;  %v6844_v18 = vadd.f32 %v6843_v7, %v6832_v4 }
0x144b   : > { %9795 = vrsqrt.f32 %v6809_v11 }
0x144c   : > { %v6834_v55 = vmul.f32 %v6831_v19, %v6821_v51  ;;  %9797 = vrsqrt.f32 %v6810_v38  ;;  %v6845_v53 = vadd.f32 %v6843_v7, %v6833_v52 }
0x144d   : > { %v9790_v27 = vpop.eup %9789 }
0x144e   : > { %v6846_v22 = vadd.f32 %v6843_v7, %v6834_v55  ;;  %v6822_v16 = vmul.f32 %v9790_v27, %v12089_v1  ;;  %v6852_v60 = vpack.c.bf16 %v6845_v53, %v6844_v18 }
0x1450   : > { %v6835_v15 = vmul.f32 %v6831_v19, %v6822_v16  ;;  %8853 = vmatprep.mubr.msk.bf16.mxu1 %vm1207_vm2, %v6852_v60 }
0x1451   : > { %v9792_v24 = vpop.eup %9791 }
0x1452   : > { %v9794_v48 = vpop.eup %9793  ;;  %v6847_v34 = vadd.f32 %v6843_v7, %v6835_v15  ;;  %v6823_v26 = vmul.f32 %v9792_v24, %v12098_v33 }
0x1453   : > { %v6824_v50 = vmul.f32 %v9794_v48, %v12093_v28 }
0x1454   : > { %v6853_v3 = vpack.c.bf16 %v6847_v34, %v6846_v22  ;;  %v6836_v46 = vmul.f32 %v6831_v19, %v6823_v26 }
0x1455   : > { %v9796_v40 = vpop.eup %9795  ;;  %v6837_v23 = vmul.f32 %v6831_v19, %v6824_v50 }
0x1456   : > { %v9798_v37 = vpop.eup %9797  ;;  %v6825_v6 = vmul.f32 %v9796_v40, %v12109_v9  ;;  %8854 = vmatmul.mubr.msk.bf16.vlgmr.msra.gmra.mrb[132].mxu1 %vm1207_vm2, %v6853_v3  ;;  %v6848_v1 = vadd.f32 %v6843_v7, %v6836_v46  ;;  %v9443_v9 = vld [vmem:[%s12363_s22 + $0x40] sm:$0xff]  }
0x1457   : > { %v6826_v56 = vmul.f32 %v9798_v37, %v12104_v57  ;;  %v6849_v25 = vadd.f32 %v6843_v7, %v6837_v23  ;;  %8861 = vmatprep.subr.bf16.mxu1 %v9443_v9  ;;  %v9444_v57 = vld [vmem:[%s12363_s22 + $0x48] sm:$0xff]  }
0x1458   : > { %v6838_v44 = vmul.f32 %v6831_v19, %v6825_v6  ;;  %8862 = vmatpush3.bf16.msra.mxu1 %v9443_v9 }
0x1459   : > { %v6854_v14 = vpack.c.bf16 %v6849_v25, %v6848_v1  ;;  %v6839_v54 = vmul.f32 %v6831_v19, %v6826_v56  ;;  %8863 = vmatprep.subr.bf16.mxu1 %v9444_v57 }
0x145a   : > { %v6850_v58 = vadd.f32 %v6843_v7, %v6838_v44 }
0x145b   : > { %8857 = vmatprep.mubr.msk.bf16.mxu1 %vm1207_vm2, %v6854_v14  ;;  %v6851_v28 = vadd.f32 %v6843_v7, %v6839_v54 }
0x145c   : > { %8864 = vmatpush3.bf16.msra.mxu1 %v9444_v57 }
0x145d   : > { %v6855_v33 = vpack.c.bf16 %v6851_v28, %v6850_v58  ;;  %8865 = vmatprep.subr.bf16.mxu1 %v9445_v45 }
0x145f   : > { %8858 = vmatmul.mubr.msk.bf16.gmra.mrb[136].mxu1 %vm1207_vm2, %v6855_v33 }
0x1460   : > { %8866 = vmatpush3.bf16.msra.mxu1 %v9445_v45 }
0x1461   : > { %8867 = vmatprep.subr.bf16.mxu1 %v9446_v35 }
0x1464   : > { %8868 = vmatpush3.bf16.msra.mxu1 %v9446_v35 }
0x1465   : > { %8869 = vmatprep.subr.bf16.mxu1 %v9447_v29 }
0x1468   : > { %8870 = vmatpush3.bf16.msra.mxu1 %v9447_v29 }
0x1469   : > { %8871 = vmatprep.subr.bf16.mxu1 %v9448_v39 }
0x146c   : > { %8872 = vmatpush3.bf16.msra.mxu1 %v9448_v39 }
0x146d   : > { %8873 = vmatprep.subr.bf16.mxu1 %v9449_v10 }
0x1470   : > { %8874 = vmatpush3.bf16.msra.mxu1 %v9449_v10 }
0x1471   : > { %8875 = vmatprep.subr.bf16.mxu1 %v9450_v36 }
0x1474   : > { %8876 = vmatpush3.bf16.msra.mxu1 %v9450_v36 }
0x1475   : > { %8885 = vmatprep.subr.bf16.mxu1 %v12480_v43 }
0x1529   : > { %v8855_v19 = vpop.f32.mrb[132].mxu1 }
0x152a   : > { %v12175_v20 = vadd.f32 %v8855_v19, %v7920_v49  ;;  %v6924_v32 = vpop.f32.mrb[133].mxu1 }
0x152b   : > { %v12177_v61 = vadd.f32 %v7920_v49, %v6924_v32  ;;  %v8856_v2 = vpop.f32.mrb[134].mxu1 }
0x152c   : > { %v6965_v42 = vmul.f32 0.044715, %v12175_v20  ;;  %v12180_v8 = vadd.f32 %v8856_v2, %v7920_v49  ;;  %v6927_v7 = vpop.f32.mrb[135].mxu1 }
0x152d   : > { %v6963_v59 = vmul.f32 0.044715, %v12177_v61  ;;  %v12183_v4 = vadd.f32 %v7920_v49, %v6927_v7 }
0x152e   : > { %v6973_v5 = vmul.f32 %v6965_v42, %v12175_v20  ;;  %v6966_v11 = vmul.f32 0.044715, %v12180_v8 }
0x152f   : > { %v6971_v38 = vmul.f32 %v6963_v59, %v12177_v61  ;;  %v6964_v51 = vmul.f32 0.044715, %v12183_v4 }
0x1530   : > { %v6981_v52 = vmul.f32 %v6973_v5, %v12175_v20  ;;  %v6974_v18 = vmul.f32 %v6966_v11, %v12180_v8 }
0x1531   : > { %v6979_v55 = vmul.f32 %v6971_v38, %v12177_v61  ;;  %v6972_v53 = vmul.f32 %v6964_v51, %v12183_v4 }
0x1532   : > { %v6989_v27 = vadd.f32 %v6981_v52, %v12175_v20  ;;  %v6982_v22 = vmul.f32 %v6974_v18, %v12180_v8  ;;  %v8859_v16 = vpop.f32.mrb[136].mxu1  ;;  %v6957_v52 = vmul.f32 0.5, %v12175_v20  ;;  %v6958_v18 = vmul.f32 0.5, %v12180_v8 }
0x1533   : > { %v6980_v60 = vmul.f32 %v6972_v53, %v12183_v4  ;;  %v12196_v15 = vadd.f32 %v8859_v16, %v7920_v49  ;;  %v6940_v24 = vpop.f32.mrb[137].mxu1  ;;  %v6987_v48 = vadd.f32 %v6979_v55, %v12177_v61  ;;  %v6955_v53 = vmul.f32 0.5, %v12177_v61 }
0x1534   : > { %v6997_v34 = vmul.f32 0.7978846, %v6989_v27  ;;  %v6990_v26 = vadd.f32 %v6982_v22, %v12180_v8  ;;  %v12200_v50 = vadd.f32 %v7920_v49, %v6940_v24  ;;  %v8860_v3 = vpop.f32.mrb[138].mxu1  ;;  %v6956_v27 = vmul.f32 0.5, %v12183_v4 }
0x1535   : > { %v6969_v46 = vmul.f32 0.044715, %v12196_v15  ;;  %v6952_v40 = vadd.f32 %v8860_v3, %v7920_v49  ;;  %v6943_v23 = vpop.f32.mrb[139].mxu1  ;;  %v6988_v37 = vadd.f32 %v6980_v60, %v12183_v4  ;;  %v6995_v6 = vmul.f32 0.7978846, %v6987_v48  ;;  %v9451_v3 = vld [vmem:[%s12365_s24] sm:$0xff]  }
0x1536   : > { %9799 = vtanh.f32 %v6997_v34  ;;  %v6998_v1 = vmul.f32 0.7978846, %v6990_v26  ;;  %v6967_v56 = vmul.f32 0.044715, %v12200_v50  ;;  %v6944_v25 = vadd.f32 %v7920_v49, %v6943_v23 }
0x1537   : > { %v6977_v44 = vmul.f32 %v6969_v46, %v12196_v15  ;;  %v6970_v14 = vmul.f32 0.044715, %v6952_v40  ;;  %v6996_v54 = vmul.f32 0.7978846, %v6988_v37  ;;  %9801 = vtanh.f32 %v6995_v6 }
0x1538   : > { %9803 = vtanh.f32 %v6998_v1  ;;  %v6975_v58 = vmul.f32 %v6967_v56, %v12200_v50  ;;  %v6968_v28 = vmul.f32 0.044715, %v6944_v25  ;;  %v6961_v4 = vmul.f32 0.5, %v12196_v15  ;;  %v9452_v56 = vld [vmem:[%s12365_s24 + $0x8] sm:$0xff]  }
0x1539   : > { %v6985_v33 = vmul.f32 %v6977_v44, %v12196_v15  ;;  %v6978_v9 = vmul.f32 %v6970_v14, %v6952_v40  ;;  %9805 = vtanh.f32 %v6996_v54  ;;  %v6962_v6 = vmul.f32 0.5, %v6952_v40 }
0x153a   : > { %v6983_v57 = vmul.f32 %v6975_v58, %v12200_v50  ;;  %v6976_v45 = vmul.f32 %v6968_v28, %v6944_v25  ;;  %v6959_v44 = vmul.f32 0.5, %v12200_v50  ;;  %v6960_v14 = vmul.f32 0.5, %v6944_v25 }
0x153b   : > { %v6986_v35 = vmul.f32 %v6978_v9, %v6952_v40  ;;  %v6993_v29 = vadd.f32 %v6985_v33, %v12196_v15 }
0x153c   : > { %v6984_v39 = vmul.f32 %v6976_v45, %v6944_v25  ;;  %v6991_v10 = vadd.f32 %v6983_v57, %v12200_v50  ;;  %v7826_v50 = vld [vmem:[%s12445_s0 + $0xd] sm:$0x1]  ;;  %v7943_v45 = vld [vmem:[%s12364_s23 + $0x1] ss:$0 sm:$0xff] }
0x153d   : > { %v6994_v36 = vadd.f32 %v6986_v35, %v6952_v40  ;;  %v7001_v49 = vmul.f32 0.7978846, %v6993_v29  ;;  %v12494_v40 = vld [vmem:[#allocation4_spill] sm:$0xff] }
0x153e   : > { %v6992_v19 = vadd.f32 %v6984_v39, %v6944_v25  ;;  %v6999_v32 = vmul.f32 0.7978846, %v6991_v10  ;;  %v4567_v25 = vadd.f32 %v7826_v50, %v12494_v40 }
0x153f   : > { %v7002_v2 = vmul.f32 0.7978846, %v6994_v36  ;;  %9807 = vtanh.f32 %v7001_v49 }
0x1540   : > { %v9800_v42 = vpop.eup %9799  ;;  %v7000_v7 = vmul.f32 0.7978846, %v6992_v19  ;;  %9809 = vtanh.f32 %v6999_v32  ;;  %v7169_v29 = vrot.slane %v4567_v25, %v12483_v47 }
0x1541   : > { %v9802_v59 = vpop.eup %9801  ;;  %v7013_v5 = vadd.f32 1.0, %v9800_v42  ;;  %9811 = vtanh.f32 %v7002_v2 }
0x1542   : > { %v9804_v11 = vpop.eup %9803  ;;  %v7011_v38 = vadd.f32 1.0, %v9802_v59  ;;  %9813 = vtanh.f32 %v7000_v7 }
0x1543   : > { %v9806_v51 = vpop.eup %9805  ;;  %v7014_v55 = vadd.f32 1.0, %v9804_v11  ;;  %v7021_v16 = vmul.f32 %v7013_v5, %v6957_v52 }
0x1544   : > { %v7012_v22 = vadd.f32 1.0, %v9806_v51  ;;  %v7019_v24 = vmul.f32 %v7011_v38, %v6955_v53 }
0x1545   : > { %v7022_v60 = vmul.f32 %v7014_v55, %v6958_v18 }
0x1546   : > { %v7020_v48 = vmul.f32 %v7012_v22, %v6956_v27 }
0x1547   : > { %v7028_v34 = vpack.c.bf16 %v7022_v60, %v7021_v16 }
0x1548   : > { %v7027_v26 = vpack.c.bf16 %v7020_v48, %v7019_v24 }
0x1549   : > { %v9808_v46 = vpop.eup %9807 }
0x154a   : > { %v9810_v20 = vpop.eup %9809  ;;  %8877 = vmatprep.mubr.bf16.mxu1 %v7027_v26  ;;  %v7017_v8 = vadd.f32 1.0, %v9808_v46 }
0x154b   : > { %v9812_v23 = vpop.eup %9811  ;;  %8878 = vmatmul.mubr.bf16.vlgmr.msra.gmra.mrb[140].mxu1 %v7028_v34  ;;  %v7015_v61 = vadd.f32 1.0, %v9810_v20 }
0x154c   : > { %v9814_v37 = vpop.eup %9813  ;;  %v7018_v1 = vadd.f32 1.0, %v9812_v23  ;;  %8886 = vmatpush3.bf16.msra.mxu1 %v9451_v3  ;;  %v7025_v58 = vmul.f32 %v7017_v8, %v6961_v4 }
0x154d   : > { %v7016_v54 = vadd.f32 1.0, %v9814_v37  ;;  %8887 = vmatprep.subr.bf16.mxu1 %v12480_v43  ;;  %v7023_v33 = vmul.f32 %v7015_v61, %v6959_v44 }
0x154e   : > { %v7026_v28 = vmul.f32 %v7018_v1, %v6962_v6 }
0x154f   : > { %v7024_v9 = vmul.f32 %v7016_v54, %v6960_v14 }
0x1550   : > { %v7030_v57 = vpack.c.bf16 %v7026_v28, %v7025_v58  ;;  %8888 = vmatpush3.bf16.msra.mxu1 %v9452_v56 }
0x1551   : > { %v7029_v15 = vpack.c.bf16 %v7024_v9, %v7023_v33 }
0x1553   : > { %8881 = vmatprep.mubr.bf16.mxu1 %v7029_v15 }
0x1554   : > { %8882 = vmatmul.mubr.bf16.gmra.mrb[144].mxu1 %v7030_v57 }
0x1555   : > { %8889 = vmatprep.mubr.msk.bf16.mxu1 %vm9840_vm1, %v12480_v43 }
0x155c   : > { %8890 = vmatmul.mubr.msk.bf16.vlgmr.msra.gmra.mrb[148].mxu1 %vm1207_vm2, %v12481_v17 }
0x161e   : > { %v8879_v35 = vpop.f32.mrb[140].mxu1 }
0x161f   : > { %v7144_v39 = vadd.f32 %v8879_v35, %v7943_v45  ;;  %v7135_v10 = vpop.f32.mrb[141].mxu1 }
0x1620   : > { %v7136_v36 = vadd.f32 %v7943_v45, %v7135_v10  ;;  %v8880_v43 = vpop.f32.mrb[142].mxu1 }
0x1621   : > { %v7172_v49 = vmul.f32 %v7169_v29, %v7144_v39  ;;  %v7147_v19 = vadd.f32 %v8880_v43, %v7943_v45  ;;  %v7138_v17 = vpop.f32.mrb[143].mxu1 }
0x1622   : > { %v7170_v32 = vmul.f32 %v7169_v29, %v7136_v36  ;;  %v7139_v2 = vadd.f32 %v7943_v45, %v7138_v17 }
0x1623   : > { %v7173_v42 = vmul.f32 %v7169_v29, %v7147_v19  ;;  %v7180_v38 = vadd.f32 %v7172_v49, %v12033_v21 }
0x1624   : > { %v7171_v7 = vmul.f32 %v7169_v29, %v7139_v2  ;;  %v7178_v59 = vadd.f32 %v7170_v32, %v12030_v30 }
0x1625   : > { %v7181_v53 = vadd.f32 %v7173_v42, %v12043_v0  ;;  %v7307_v24 = vsel %vm1207_vm2, %v7180_v38, 0.0 }
0x1626   : > { %v7301_v5 = vsel %vm1207_vm2, %v7178_v59, 0.0  ;;  %v7179_v11 = vadd.f32 %v7171_v7, %v12036_v13 }
0x1627   : > { %v8883_v51 = vpop.f32.mrb[144].mxu1  ;;  %7302 = vadd.xlane.f32.xlu0 %v7301_v5  ;;  %v7310_v34 = vsel %vm1207_vm2, %v7181_v53, 0.0 }
0x1628   : > { %v7160_v52 = vadd.f32 %v8883_v51, %v7943_v45  ;;  %v7151_v18 = vpop.f32.mrb[145].mxu1  ;;  %v7304_v55 = vsel %vm1207_vm2, %v7179_v11, 0.0 }
0x1629   : > { %v7152_v27 = vadd.f32 %v7943_v45, %v7151_v18  ;;  %v8884_v22 = vpop.f32.mrb[146].mxu1  ;;  %7305 = vadd.xlane.f32.xlu1 %v7304_v55 }
0x162a   : > { %v7176_v16 = vmul.f32 %v7169_v29, %v7160_v52  ;;  %v7163_v60 = vadd.f32 %v8884_v22, %v7943_v45  ;;  %v7154_v30 = vpop.f32.mrb[147].mxu1  ;;  %v9453_v22 = vld [vmem:[%s12367_s26] sm:$0xff]  }
0x162b   : > { %v7174_v48 = vmul.f32 %v7169_v29, %v7152_v27  ;;  %v7155_v13 = vadd.f32 %v7943_v45, %v7154_v30  ;;  %7308 = vadd.xlane.f32.xlu0 %v7307_v24  ;;  %8901 = vmatprep.subr.bf16.mxu1 %v9453_v22 }
0x162c   : > { %v7177_v21 = vmul.f32 %v7169_v29, %v7163_v60  ;;  %v7184_v8 = vadd.f32 %v7176_v16, %v12063_v12  ;;  %8902 = vmatpush3.bf16.msra.mxu1 %v9453_v22  ;;  %v9454_v16 = vld [vmem:[%s12367_s26 + $0x8] sm:$0xff]  }
0x162d   : > { %v7175_v26 = vmul.f32 %v7169_v29, %v7155_v13  ;;  %7311 = vadd.xlane.f32.xlu1 %v7310_v34  ;;  %v7182_v3 = vadd.f32 %v7174_v48, %v12048_v63  ;;  %8903 = vmatprep.subr.bf16.mxu1 %v9454_v16 }
0x162e   : > { %v7185_v4 = vadd.f32 %v7177_v21, %v12058_v41  ;;  %v7319_v1 = vsel %vm1207_vm2, %v7184_v8, 0.0  ;;  %v7248_v21 = vld [vmem:[%s12366_s25 + $0x1] sm:$0x1] }
0x162f   : > { %v12245_v46 = vpop.f32.mrb[148].mxu1  ;;  %v7313_v0 = vsel %vm1207_vm2, %v7182_v3, 0.0  ;;  %v7183_v20 = vadd.f32 %v7175_v26, %v12051_v62 }
0x1630   : > { %v8891_v23 = vpop.f32.mrb[149].mxu1  ;;  %7314 = vadd.xlane.f32.xlu0 %v7313_v0  ;;  %v7322_v63 = vsel %vm1207_vm2, %v7185_v4, 0.0  ;;  %8904 = vmatpush3.bf16.msra.mxu1 %v9454_v16 }
0x1631   : > { %v7240_v61 = vpop.f32.mrb[150].mxu1  ;;  %v7316_v37 = vsel %vm1207_vm2, %v7183_v20, 0.0 }
0x1632   : > { %v8892_v6 = vpop.f32.mrb[151].mxu1  ;;  %7317 = vadd.xlane.f32.xlu1 %v7316_v37 }
0x1634   : > { %7320 = vadd.xlane.f32.xlu0 %v7319_v1 }
0x1636   : > { %7323 = vadd.xlane.f32.xlu1 %v7322_v63 }
0x16b4   : > { %v7303_v56 = vpop.xlane.xlu0 %7302 }
0x16b5   : > { %v7325_v44 = vmul.f32 0.03125, %v7303_v56 }
0x16b6   : > { %v7306_v62 = vpop.xlane.xlu1 %7305 }
0x16b7   : > { %v12254_v14 = vsub.f32 %v7178_v59, %v7325_v44  ;;  %v7326_v12 = vmul.f32 0.03125, %v7306_v62 }
0x16b8   : > { %v7309_v54 = vpop.xlane.xlu0 %7308 }
0x16b9   : > { %v12256_v58 = vsub.f32 %v7179_v11, %v7326_v12  ;;  %v7327_v28 = vmul.f32 0.03125, %v7309_v54  ;;  %v7341_v41 = vmul.f32 %v12254_v14, %v12254_v14 }
0x16ba   : > { %v7312_v33 = vpop.xlane.xlu1 %7311 }
0x16bb   : > { %v12260_v9 = vsub.f32 %v7180_v38, %v7327_v28  ;;  %v7328_v57 = vmul.f32 0.03125, %v7312_v33  ;;  %v7349_v15 = vsel %vm1207_vm2, %v7341_v41, 0.0  ;;  %v7342_v50 = vmul.f32 %v12256_v58, %v12256_v58 }
0x16bc   : > { %7350 = vadd.xlane.f32.xlu0 %v7349_v15 }
0x16bd   : > { %v12265_v40 = vsub.f32 %v7181_v53, %v7328_v57  ;;  %v7315_v25 = vpop.xlane.xlu0 %7314  ;;  %v7352_v45 = vsel %vm1207_vm2, %v7342_v50, 0.0  ;;  %v7343_v35 = vmul.f32 %v12260_v9, %v12260_v9 }
0x16be   : > { %v7329_v29 = vmul.f32 0.03125, %v7315_v25  ;;  %7353 = vadd.xlane.f32.xlu1 %v7352_v45 }
0x16bf   : > { %v7318_v39 = vpop.xlane.xlu1 %7317  ;;  %v7355_v10 = vsel %vm1207_vm2, %v7343_v35, 0.0  ;;  %v7344_v36 = vmul.f32 %v12265_v40, %v12265_v40 }
0x16c0   : > { %v12273_v43 = vsub.f32 %v7182_v3, %v7329_v29  ;;  %v7330_v49 = vmul.f32 0.03125, %v7318_v39  ;;  %7356 = vadd.xlane.f32.xlu0 %v7355_v10 }
0x16c1   : > { %v7321_v19 = vpop.xlane.xlu0 %7320  ;;  %v7358_v17 = vsel %vm1207_vm2, %v7344_v36, 0.0 }
0x16c2   : > { %v12276_v32 = vsub.f32 %v7183_v20, %v7330_v49  ;;  %v7331_v2 = vmul.f32 0.03125, %v7321_v19  ;;  %7359 = vadd.xlane.f32.xlu1 %v7358_v17  ;;  %v7345_v42 = vmul.f32 %v12273_v43, %v12273_v43  ;;  %v7296_v20 = vadd.f32 %v12053_v31, %v7248_v21 }
0x16c3   : > { %v7324_v7 = vpop.xlane.xlu1 %7323 }
0x16c4   : > { %v12280_v59 = vsub.f32 %v7184_v8, %v7331_v2  ;;  %v7332_v5 = vmul.f32 0.03125, %v7324_v7  ;;  %v7361_v11 = vsel %vm1207_vm2, %v7345_v42, 0.0  ;;  %v7346_v38 = vmul.f32 %v12276_v32, %v12276_v32 }
0x16c5   : > { %7362 = vadd.xlane.f32.xlu0 %v7361_v11  ;;  %v7405_v1 = vadd.f32 1.0, %v7296_v20 }
0x16c6   : > { %v12285_v51 = vsub.f32 %v7185_v4, %v7332_v5  ;;  %v7364_v52 = vsel %vm1207_vm2, %v7346_v38, 0.0  ;;  %v7347_v18 = vmul.f32 %v12280_v59, %v12280_v59  ;;  %v7190_v4 = vld [vmem:[%s12366_s25] sm:$0x1] }
0x16c7   : > { %7365 = vadd.xlane.f32.xlu1 %v7364_v52  ;;  %v7238_v62 = vadd.f32 %v12245_v46, %v7190_v4  ;;  %v7409_v41 = vrot.slane %v7405_v1, %v12483_v47 }
0x16c8   : > { %v7367_v55 = vsel %vm1207_vm2, %v7347_v18, 0.0  ;;  %v7348_v53 = vmul.f32 %v12285_v51, %v12285_v51 }
0x16c9   : > { %7368 = vadd.xlane.f32.xlu0 %v7367_v55  ;;  %v7421_v45 = vrot.slane %v7238_v62, %v12483_v47 }
0x16ca   : > { %v7370_v27 = vsel %vm1207_vm2, %v7348_v53, 0.0 }
0x16cb   : > { %7371 = vadd.xlane.f32.xlu1 %v7370_v27 }
0x1749   : > { %v7351_v60 = vpop.xlane.xlu0 %7350 }
0x174a   : > { %v7373_v30 = vmul.f32 0.03125, %v7351_v60 }
0x174b   : > { %v7354_v24 = vpop.xlane.xlu1 %7353 }
0x174c   : > { %v7381_v48 = vadd.f32 1e-06, %v7373_v30  ;;  %v7374_v13 = vmul.f32 0.03125, %v7354_v24 }
0x174d   : > { %v7357_v34 = vpop.xlane.xlu0 %7356 }
0x174e   : > { %9815 = vrsqrt.f32 %v7381_v48  ;;  %v7382_v26 = vadd.f32 1e-06, %v7374_v13  ;;  %v7375_v3 = vmul.f32 0.03125, %v7357_v34 }
0x174f   : > { %v7360_v0 = vpop.xlane.xlu1 %7359 }
0x1750   : > { %9817 = vrsqrt.f32 %v7382_v26  ;;  %v7383_v8 = vadd.f32 1e-06, %v7375_v3  ;;  %v7376_v23 = vmul.f32 0.03125, %v7360_v0 }
0x1752   : > { %9819 = vrsqrt.f32 %v7383_v8  ;;  %v7384_v61 = vadd.f32 1e-06, %v7376_v23  ;;  %v7363_v37 = vpop.xlane.xlu0 %7362 }
0x1753   : > { %v7377_v6 = vmul.f32 0.03125, %v7363_v37 }
0x1754   : > { %9821 = vrsqrt.f32 %v7384_v61  ;;  %v7366_v63 = vpop.xlane.xlu1 %7365 }
0x1755   : > { %v7385_v56 = vadd.f32 1e-06, %v7377_v6  ;;  %v7378_v44 = vmul.f32 0.03125, %v7366_v63 }
0x1756   : > { %v7369_v12 = vpop.xlane.xlu0 %7368 }
0x1757   : > { %9823 = vrsqrt.f32 %v7385_v56  ;;  %v7386_v31 = vadd.f32 1e-06, %v7378_v44  ;;  %v7379_v54 = vmul.f32 0.03125, %v7369_v12 }
0x1758   : > { %v9816_v28 = vpop.eup %9815  ;;  %v7372_v33 = vpop.xlane.xlu1 %7371 }
0x1759   : > { %v7397_v57 = vmul.f32 %v9816_v28, %v12254_v14  ;;  %9825 = vrsqrt.f32 %v7386_v31  ;;  %v7387_v15 = vadd.f32 1e-06, %v7379_v54  ;;  %v7380_v50 = vmul.f32 0.03125, %v7372_v33 }
0x175a   : > { %v9818_v25 = vpop.eup %9817 }
0x175b   : > { %v7398_v35 = vmul.f32 %v9818_v25, %v12256_v58  ;;  %9827 = vrsqrt.f32 %v7387_v15  ;;  %v7388_v46 = vadd.f32 1e-06, %v7380_v50  ;;  %v7410_v29 = vmul.f32 %v7409_v41, %v7397_v57 }
0x175c   : > { %v9820_v39 = vpop.eup %9819 }
0x175d   : > { %v7399_v10 = vmul.f32 %v9820_v39, %v12260_v9  ;;  %9829 = vrsqrt.f32 %v7388_v46  ;;  %v7411_v36 = vmul.f32 %v7409_v41, %v7398_v35  ;;  %v7422_v49 = vadd.f32 %v7421_v45, %v7410_v29 }
0x175e   : > { %v9822_v19 = vpop.eup %9821 }
0x175f   : > { %v7412_v17 = vmul.f32 %v7409_v41, %v7399_v10  ;;  %v7400_v14 = vmul.f32 %v9822_v19, %v12265_v40  ;;  %v7423_v2 = vadd.f32 %v7421_v45, %v7411_v36 }
0x1761   : > { %v9824_v42 = vpop.eup %9823  ;;  %v7413_v7 = vmul.f32 %v7409_v41, %v7400_v14  ;;  %v7430_v5 = vpack.c.bf16 %v7423_v2, %v7422_v49  ;;  %v7424_v47 = vadd.f32 %v7421_v45, %v7412_v17 }
0x1762   : > { %v7401_v58 = vmul.f32 %v9824_v42, %v12273_v43 }
0x1763   : > { %v9826_v11 = vpop.eup %9825  ;;  %8905 = vmatprep.mubr.msk.bf16.mxu1 %vm1207_vm2, %v7430_v5  ;;  %v7425_v38 = vadd.f32 %v7421_v45, %v7413_v7 }
0x1764   : > { %v7402_v9 = vmul.f32 %v9826_v11, %v12276_v32  ;;  %v7414_v52 = vmul.f32 %v7409_v41, %v7401_v58 }
0x1765   : > { %v9828_v18 = vpop.eup %9827  ;;  %v7431_v55 = vpack.c.bf16 %v7425_v38, %v7424_v47 }
0x1766   : > { %v7403_v53 = vmul.f32 %v9828_v18, %v12280_v59  ;;  %v7415_v40 = vmul.f32 %v7409_v41, %v7402_v9  ;;  %v7426_v27 = vadd.f32 %v7421_v45, %v7414_v52  ;;  %v7962_v59 = vld [vmem:[%s12368_s27] ss:$0 sm:$0xff] }
0x1767   : > { %v9830_v22 = vpop.eup %9829  ;;  %8906 = vmatmul.mubr.msk.bf16.vlgmr.msra.gmra.mrb[152].mxu1 %vm1207_vm2, %v7431_v55 }
0x1768   : > { %v7404_v16 = vmul.f32 %v9830_v22, %v12285_v51  ;;  %v7427_v43 = vadd.f32 %v7421_v45, %v7415_v40  ;;  %v7416_v60 = vmul.f32 %v7409_v41, %v7403_v53 }
0x176a   : > { %v7432_v30 = vpack.c.bf16 %v7427_v43, %v7426_v27  ;;  %v7417_v24 = vmul.f32 %v7409_v41, %v7404_v16  ;;  %v7428_v48 = vadd.f32 %v7421_v45, %v7416_v60 }
0x176c   : > { %8909 = vmatprep.mubr.msk.bf16.mxu1 %vm1207_vm2, %v7432_v30  ;;  %v7429_v32 = vadd.f32 %v7421_v45, %v7417_v24 }
0x176e   : > { %v7433_v13 = vpack.c.bf16 %v7429_v32, %v7428_v48 }
0x1770   : > { %8910 = vmatmul.mubr.msk.bf16.gmra.mrb[156].mxu1 %vm1207_vm2, %v7433_v13 }
0x183a   : > { %v8907_v51 = vpop.f32.mrb[152].mxu1 }
0x183b   : > { %v7512_v21 = vadd.f32 %v8907_v51, %v7962_v59  ;;  %v7503_v34 = vpop.f32.mrb[153].mxu1 }
0x183c   : > { %v7504_v26 = vadd.f32 %v7962_v59, %v7503_v34  ;;  %v8908_v3 = vpop.f32.mrb[154].mxu1 }
0x183d   : > { %7536 = vst.msk [vmem:[%s876_s29 + $0x10] sm:$0xff] %vm1207_vm2, %v7512_v21  ;;  %v7515_v0 = vadd.f32 %v8908_v3, %v7962_v59  ;;  %v7506_v20 = vpop.f32.mrb[155].mxu1 }
0x183e   : > { %7534 = vst.msk [vmem:[%s876_s29] sm:$0xff] %vm1207_vm2, %v7504_v26  ;;  %v7507_v8 = vadd.f32 %v7962_v59, %v7506_v20 }
0x183f   : > { %7537 = vst.msk [vmem:[%s876_s29 + $0x18] sm:$0xff] %vm1207_vm2, %v7515_v0 }
0x1840   : > { %7535 = vst.msk [vmem:[%s876_s29 + $0x8] sm:$0xff] %vm1207_vm2, %v7507_v8 }
0x1843   : > { %v8911_v23 = vpop.f32.mrb[156].mxu1 }
0x1844   : > { %v7528_v61 = vadd.f32 %v8911_v23, %v7962_v59  ;;  %v7519_v37 = vpop.f32.mrb[157].mxu1 }
0x1845   : > { %v7520_v4 = vadd.f32 %v7962_v59, %v7519_v37  ;;  %v8912_v6 = vpop.f32.mrb[158].mxu1 }
0x1846   : > { %7540 = vst.msk [vmem:[%s876_s29 + $0x30] sm:$0xff] %vm1207_vm2, %v7528_v61  ;;  %v7531_v1 = vadd.f32 %v8912_v6, %v7962_v59  ;;  %v7522_v63 = vpop.f32.mrb[159].mxu1 }
0x1847   : > { %7538 = vst.msk [vmem:[%s876_s29 + $0x20] sm:$0xff] %vm1207_vm2, %v7520_v4  ;;  %v7523_v56 = vadd.f32 %v7962_v59, %v7522_v63 }
0x1848   : > { %7541 = vst.msk [vmem:[%s876_s29 + $0x38] sm:$0xff] %vm1207_vm2, %v7531_v1 }
0x1849   : > { %7539 = vst.msk [vmem:[%s876_s29 + $0x28] sm:$0xff] %vm1207_vm2, %v7523_v56 }
0x184a PF: > { %s38_s8 = sadd.s32 1, %s9837_s8  }
0x184b   : > { %p35_p4 = scmp.ge.s32.totalorder %s38_s8, 4  }
0x184d   :  { %37 = sbr.rel (!%p35_p4) target bundleno = 14 (0xe), region = 193 }

</bundles_post_ra>
